<compile_context>
chip_gen: v5e
topology: v5e:2x2
jax: 0.10.0
libtpu: 0.0.40
codegen_flags: <defaults>
</compile_context>

<pallas_src>
import functools

import jax
import jax.numpy as jnp
from jax.experimental import pallas as pl
from jax.experimental.pallas import tpu as pltpu

# ---- module constants (from the reference script) ----------------------------
n_azimuth = 16
n_color = 3
n_sublevel = n_eccentricity = 4
n_levels = 7
n_phase = 1
n_theta = 8

C_IN = n_color * n_theta * n_phase        # 24
C_PAD = 32                                # conv1 channels padded for alignment
H_IN = n_levels * n_eccentricity          # 28
W_IN = n_azimuth                          # 16
C1, C2 = 64, 128
OH1, OW1 = H_IN // 2, W_IN // 2           # 14, 8   (conv1 output grid)
OH2, OW2 = OH1 // 2, OW1 // 2             # 7, 4    (conv2 output grid)
P1, P2 = OH1 * OW1, OH2 * OW2             # 112, 28 (rows per image)
K1P, K2 = 9 * C_PAD, 9 * C1               # 288, 576


# ---- fused kernel: conv1 + ReLU + conv2 + ReLU for a tile of images ----------
def _encoder_fused_kernel(x_ref, w1_ref, b1_ref, w2_ref, b2_ref, o_ref, xp_ref):
    # x_ref : (Bt, 28, 16, 32) NHWC input tile (channels zero-padded 24->32)
    # w1_ref: (288, 64)   w2_ref: (576, 128)   b1/b2: (1, 64)/(1, 128) f32
    # o_ref : (Bt*28, 128) rows ordered (image, oh2, ow2)
    # xp_ref: (Bt, 30, 18, 32) persistent VMEM scratch = zero-padded input
    bt = x_ref.shape[0]
    cdt = x_ref.dtype

    # ---- zero-padded input via scratch (no zeros+concatenate copies) --------
    # Re-zero the 1-wide borders every step: tiny traffic, and correct no
    # matter how the "parallel" grid axis is sharded across TensorCores
    # (a program_id()==0 one-shot init would be wrong on megacore parts).
    zrow = jnp.zeros((bt, 1, W_IN + 2, C_PAD), cdt)
    xp_ref[:, 0:1, :, :] = zrow
    xp_ref[:, H_IN + 1:H_IN + 2, :, :] = zrow
    zcol = jnp.zeros((bt, H_IN + 2, 1, C_PAD), cdt)
    xp_ref[:, :, 0:1, :] = zcol
    xp_ref[:, :, W_IN + 1:W_IN + 2, :] = zcol
    xp_ref[:, 1:H_IN + 1, 1:W_IN + 1, :] = x_ref[...]
    xp = xp_ref[...]                                           # (Bt, 30, 18, 32)

    # ---- conv1 im2col ---------------------------------------------------------
    # padded row = 2*pair + parity; stride-2 windows become unit-stride slices
    # of the (pair, parity)-split tensor.  Each tap is 32-lane aligned.
    xp_rows = xp.reshape(bt, (H_IN + 2) // 2, 2, W_IN + 2, C_PAD)  # (Bt,15,2,18,32)
    row_slabs = (
        xp_rows[:, 0:OH1, 0],          # ki = 0 : padded rows 2*oh
        xp_rows[:, 0:OH1, 1],          # ki = 1 : padded rows 2*oh + 1
        xp_rows[:, 1:OH1 + 1, 0],      # ki = 2 : padded rows 2*oh + 2
    )
    taps1 = []
    for slab in row_slabs:                                         # (Bt,14,18,32)
        cols = slab.reshape(bt, OH1, (W_IN + 2) // 2, 2, C_PAD)    # (Bt,14,9,2,32)
        taps1.append(cols[:, :, 0:OW1, 0])        # kj = 0 : padded cols 2*ow
        taps1.append(cols[:, :, 0:OW1, 1])        # kj = 1 : padded cols 2*ow + 1
        taps1.append(cols[:, :, 1:OW1 + 1, 0])    # kj = 2 : padded cols 2*ow + 2
    patches1 = jnp.concatenate(taps1, axis=-1)                     # (Bt,14,8,288)
    patches1 = patches1.reshape(bt * P1, K1P)                      # rows (img,oh,ow)

    # ---- conv1 GEMM + bias + ReLU (f32 accumulation on the MXU) --------------
    h1 = jnp.dot(patches1, w1_ref[...], preferred_element_type=jnp.float32)
    h1 = jnp.maximum(h1 + b1_ref[...], 0.0)                        # (Bt*112, 64)
    h1 = h1.astype(cdt)

    # ---- conv2 im2col from the VMEM-resident h1 -------------------------------
    # Split the 14x8 h1 grid into the four (row-parity, col-parity) sub-grids.
    h1_rows = h1.reshape(bt, OH2, 2, OW1, C1)                      # (Bt,7,2,8,64)
    even_r = h1_rows[:, :, 0].reshape(bt, OH2, OW2, 2, C1)         # h1 rows 2a
    odd_r = h1_rows[:, :, 1].reshape(bt, OH2, OW2, 2, C1)          # h1 rows 2a+1
    a_ee = even_r[:, :, :, 0]                                      # (Bt,7,4,64)
    a_eo = even_r[:, :, :, 1]
    a_oe = odd_r[:, :, :, 0]
    a_oo = odd_r[:, :, :, 1]

    # conv2's pad=1 only touches the top row / left column (14 and 8 are even),
    # so front-pad the odd-row / odd-col sub-grids with explicit zeros.
    zr = jnp.zeros((bt, 1, OW2, C1), cdt)
    a_oe_p = jnp.concatenate([zr, a_oe], axis=1)                   # (Bt,8,4,64)
    a_oo_p = jnp.concatenate([zr, a_oo], axis=1)                   # (Bt,8,4,64)
    a_eo_p = jnp.concatenate([jnp.zeros((bt, OH2, 1, C1), cdt), a_eo], axis=2)
    a_oo_p = jnp.concatenate([jnp.zeros((bt, OH2 + 1, 1, C1), cdt), a_oo_p], axis=2)

    # tap(ki,kj)[oh,ow] = h1pad[2*oh+ki, 2*ow+kj]  (ki,kj row-major order)
    taps2 = (
        a_oo_p[:, 0:OH2, 0:OW2], a_oe_p[:, 0:OH2, :], a_oo_p[:, 0:OH2, 1:OW2 + 1],
        a_eo_p[:, :, 0:OW2],     a_ee,                a_eo_p[:, :, 1:OW2 + 1],
        a_oo_p[:, 1:OH2 + 1, 0:OW2], a_oe_p[:, 1:OH2 + 1, :],
        a_oo_p[:, 1:OH2 + 1, 1:OW2 + 1],
    )
    patches2 = jnp.concatenate(taps2, axis=-1)                     # (Bt,7,4,576)
    patches2 = patches2.reshape(bt * P2, K2)

    # ---- conv2 GEMM + bias + ReLU, lane-dense (rows, 128) store ---------------
    h2 = jnp.dot(patches2, w2_ref[...], preferred_element_type=jnp.float32)
    h2 = jnp.maximum(h2 + b2_ref[...], 0.0)                        # (Bt*28, 128)
    o_ref[...] = h2.astype(o_ref.dtype)


# ---- wrapper ------------------------------------------------------------------
def _conv_w_to_gemm(w_oihw, c_pad=None):
    co, ci, kh, kw = w_oihw.shape
    # (Cout, Cin, kh, kw) -> (kh, kw, Cin, Cout) -> (kh*kw*Cin_pad, Cout)
    w = jnp.transpose(w_oihw, (2, 3, 1, 0))
    if c_pad is not None and c_pad > ci:
        w = jnp.pad(w, ((0, 0), (0, 0), (0, c_pad - ci), (0, 0)))
        ci = c_pad
    return w.reshape(kh * kw * ci, co)


def _vmem_estimate_bytes(bt, in_item, out_item):
    # Rough peak VMEM footprint (lane-padded layouts), used to pick a safe tile
    # and a matching vmem_limit_bytes (v5e default scoped limit is only 16 MiB;
    # v7x physical VMEM is 64 MiB per TensorCore).
    blk_in = 2 * bt * H_IN * W_IN * 128 * in_item          # double-buffered input
    scr = bt * (H_IN + 2) * 24 * 128 * in_item             # xp scratch (18->24,32->128)
    patches = 2 * bt * P1 * 384 * in_item                  # taps + patches1 (288->384)
    h1 = bt * P1 * 128 * 4                                 # f32 conv1 activations
    blk_out = 2 * bt * P2 * C2 * out_item                  # double-buffered output
    return blk_in + scr + patches + h1 + blk_out + (8 << 20)


_VMEM_CAP_BYTES = 56 * 1024 * 1024   # below v7x's 64 MiB/TC physical VMEM


@functools.partial(jax.jit, static_argnames=("use_bf16", "block_images", "nchw_output"))
def encoder_forward(x, params, use_bf16=True, block_images=32, nchw_output=True):
    # x: (B, n_levels, n_color, n_eccentricity, n_azimuth, n_theta, n_phase)
    B = x.shape[0]
    # torch: x.permute(0,2,5,6,1,3,4).view(-1, 24, 28, 16)  == NCHW with
    # C=(color,theta,phase), H=(levels,ecc), W=azimuth.  Fold the whole chain
    # into a single transpose straight to NHWC (per review: one input copy).
    xt = jnp.transpose(x, (0, 1, 3, 4, 2, 5, 6))
    x_nhwc = xt.reshape(B, H_IN, W_IN, C_IN)                       # (B, 28, 16, 24)

    cdt = jnp.bfloat16 if use_bf16 else jnp.float32
    odt = jnp.bfloat16 if use_bf16 else jnp.float32                # bf16 writeback on fast path
    # Pad channels 24 -> 32 so every conv1 tap is a 32-lane-aligned piece and
    # the w1 GEMM rows line up (K1 = 288).
    x_in = jnp.pad(x_nhwc, ((0, 0), (0, 0), (0, 0), (0, C_PAD - C_IN))).astype(cdt)

    w1 = _conv_w_to_gemm(params["w1"], C_PAD).astype(cdt)          # (288, 64)
    w2 = _conv_w_to_gemm(params["w2"]).astype(cdt)                 # (576, 128)
    b1 = params["b1"].reshape(1, C1).astype(jnp.float32)
    b2 = params["b2"].reshape(1, C2).astype(jnp.float32)

    # Tile many images per grid step: large GEMM M (Bt*112 / Bt*28 rows),
    # big DMAs, per-step overhead amortized.  Keep bt even (bt*28 % 8 == 0)
    # and auto-shrink it until the VMEM footprint fits the budget.
    in_item = jnp.dtype(cdt).itemsize
    out_item = jnp.dtype(odt).itemsize
    bt = max(1, min(block_images, B))
    if bt > 1:
        bt -= bt % 2
    while bt > 2 and _vmem_estimate_bytes(bt, in_item, out_item) > _VMEM_CAP_BYTES:
        bt = max(2, bt // 2)
        bt -= bt % 2
    bp = ((B + bt - 1) // bt) * bt
    if bp != B:
        pad = jnp.zeros((bp - B,) + x_in.shape[1:], cdt)
        x_in = jnp.concatenate([x_in, pad], axis=0)

    vmem_limit = int(min(_VMEM_CAP_BYTES,
                         max(_vmem_estimate_bytes(bt, in_item, out_item),
                             32 * 1024 * 1024)))

    flops = 2 * bp * (P1 * K1P * C1 + P2 * K2 * C2)
    bytes_accessed = (x_in.size * in_item
                      + w1.size * in_item + w2.size * in_item
                      + bp * P2 * C2 * out_item)

    out = pl.pallas_call(
        _encoder_fused_kernel,
        out_shape=jax.ShapeDtypeStruct((bp * P2, C2), odt),
        grid=(bp // bt,),
        in_specs=[
            # NOTE(perf review): a fully lane-dense (B, 28, 512) presentation
            # would further speed the input DMA, but needs an in-kernel
            # lane-splitting reshape; the sanctioned minimum (channel pad to
            # 32) is used instead to keep Mosaic lowering safe.
            # (optional sweep: pipeline_mode=pl.Buffered(3) on this spec)
            pl.BlockSpec((bt, H_IN, W_IN, C_PAD), lambda i: (i, 0, 0, 0)),
            pl.BlockSpec((K1P, C1), lambda i: (0, 0)),
            pl.BlockSpec((1, C1), lambda i: (0, 0)),
            pl.BlockSpec((K2, C2), lambda i: (0, 0)),
            pl.BlockSpec((1, C2), lambda i: (0, 0)),
        ],
        out_specs=pl.BlockSpec((bt * P2, C2), lambda i: (i, 0)),
        scratch_shapes=[pltpu.VMEM((bt, H_IN + 2, W_IN + 2, C_PAD), cdt)],
        compiler_params=pltpu.CompilerParams(
            dimension_semantics=("parallel",),
            vmem_limit_bytes=vmem_limit),
        cost_estimate=pl.CostEstimate(
            flops=flops, transcendentals=0, bytes_accessed=bytes_accessed),
    )(x_in, w1, b1, w2, b2)

    out = out[: B * P2].reshape(B, OH2, OW2, C2)
    if nchw_output:
        # Match the PyTorch module's NCHW output layout.  Per the review this
        # transpose adds an extra HBM round trip; pass nchw_output=False if the
        # consumer accepts NHWC.
        out = jnp.transpose(out, (0, 3, 1, 2))
    return out.astype(jnp.float32)


# ---- parameter init & pure-JAX reference --------------------------------------
def init_encoder_params(key):
    k1, k2, k3, k4 = jax.random.split(key, 4)
    scale1 = 1.0 / (C_IN * 9.0) ** 0.5
    scale2 = 1.0 / (C1 * 9.0) ** 0.5
    return {
        "w1": jax.random.uniform(k1, (C1, C_IN, 3, 3), jnp.float32, -scale1, scale1),
        "b1": jax.random.uniform(k2, (C1,), jnp.float32, -scale1, scale1),
        "w2": jax.random.uniform(k3, (C2, C1, 3, 3), jnp.float32, -scale2, scale2),
        "b2": jax.random.uniform(k4, (C2,), jnp.float32, -scale2, scale2),
    }


def encoder_forward_ref(x, params):
    B = x.shape[0]
    xt = jnp.transpose(x, (0, 2, 5, 6, 1, 3, 4)).reshape(B, C_IN, H_IN, W_IN)
    h = jax.lax.conv_general_dilated(
        xt, params["w1"], (2, 2), ((1, 1), (1, 1)),
        dimension_numbers=("NCHW", "OIHW", "NCHW"))
    h = jnp.maximum(h + params["b1"][None, :, None, None], 0.0)
    h = jax.lax.conv_general_dilated(
        h, params["w2"], (2, 2), ((1, 1), (1, 1)),
        dimension_numbers=("NCHW", "OIHW", "NCHW"))
    h = jnp.maximum(h + params["b2"][None, :, None, None], 0.0)
    return h


if __name__ == "__main__":
    key = jax.random.PRNGKey(0)
    k_x, k_p = jax.random.split(key)

    batch = 2
    x = jax.random.normal(
        k_x, (batch, n_levels, n_color, n_eccentricity, n_azimuth, n_theta, n_phase),
        dtype=jnp.float32)
    params = init_encoder_params(k_p)

    ref = jax.block_until_ready(encoder_forward_ref(x, params))

    # exact f32-MXU path
    out_f32 = jax.block_until_ready(encoder_forward(x, params, use_bf16=False))
    assert out_f32.shape == (batch, C2, n_levels, n_eccentricity), out_f32.shape
    err_f32 = float(jnp.max(jnp.abs(out_f32 - ref)))
    assert jnp.allclose(out_f32, ref, atol=1e-3, rtol=1e-3), err_f32

    # default fast path: bf16 MXU inputs + bf16 kernel output, f32 accumulation
    out_bf16 = jax.block_until_ready(encoder_forward(x, params))
    assert out_bf16.shape == (batch, C2, n_levels, n_eccentricity), out_bf16.shape
    err_bf16 = float(jnp.max(jnp.abs(out_bf16 - ref)))
    assert jnp.allclose(out_bf16, ref, atol=1e-1, rtol=1e-1), err_bf16

    print("KERNEL_OK")
</pallas_src>

<mosaic_0001>
module attributes {stable_mosaic.version = 11 : i64} {
  func.func @_encoder_fused_kernel(%arg0: i32, %arg1: memref<2x28x16x32xf32, #tpu.memory_space<vmem>>, %arg2: memref<288x64xf32, #tpu.memory_space<vmem>>, %arg3: memref<1x64xf32, #tpu.memory_space<vmem>>, %arg4: memref<576x128xf32, #tpu.memory_space<vmem>>, %arg5: memref<1x128xf32, #tpu.memory_space<vmem>>, %arg6: memref<56x128xf32, #tpu.memory_space<vmem>>, %arg7: memref<2x30x18x32xf32, #tpu.memory_space<vmem>>) attributes {dimension_semantics = [#tpu.dimension_semantics<parallel>], iteration_bounds = array<i64: 1>, scalar_prefetch = 0 : i64, scratch_operands = 1 : i64, tpu.core_type = #tpu.core_type<tc>, window_params = [{transform_indices = @transform_0, window_bounds = array<i64: 2, 28, 16, 32>}, {pipeline_mode = #tpu.pipeline_mode<synchronous>, transform_indices = @transform_1, window_bounds = array<i64: 288, 64>}, {pipeline_mode = #tpu.pipeline_mode<synchronous>, transform_indices = @transform_2, window_bounds = array<i64: 1, 64>}, {pipeline_mode = #tpu.pipeline_mode<synchronous>, transform_indices = @transform_3, window_bounds = array<i64: 576, 128>}, {pipeline_mode = #tpu.pipeline_mode<synchronous>, transform_indices = @transform_4, window_bounds = array<i64: 1, 128>}, {transform_indices = @transform_5, window_bounds = array<i64: 56, 128>}]} {
    %cst = arith.constant 0.000000e+00 : f32
    %0 = vector.broadcast %cst : f32 to vector<2x1x18x32xf32>
    %c0 = arith.constant 0 : index
    %c0_0 = arith.constant 0 : index
    %c0_1 = arith.constant 0 : index
    %c0_2 = arith.constant 0 : index
    %1 = vector.load %arg7[%c0, %c0_0, %c0_1, %c0_2] : memref<2x30x18x32xf32, #tpu.memory_space<vmem>>, vector<2x1x18x32xf32>
    tpu.vector_store %arg7[%c0, %c0_0, %c0_1, %c0_2], %0 {strides = array<i32>} : memref<2x30x18x32xf32, #tpu.memory_space<vmem>>, vector<2x1x18x32xf32>,
    %c0_3 = arith.constant 0 : index
    %c29 = arith.constant 29 : index
    %c0_4 = arith.constant 0 : index
    %c0_5 = arith.constant 0 : index
    %2 = vector.load %arg7[%c0_3, %c29, %c0_4, %c0_5] : memref<2x30x18x32xf32, #tpu.memory_space<vmem>>, vector<2x1x18x32xf32>
    tpu.vector_store %arg7[%c0_3, %c29, %c0_4, %c0_5], %0 {strides = array<i32>} : memref<2x30x18x32xf32, #tpu.memory_space<vmem>>, vector<2x1x18x32xf32>,
    %cst_6 = arith.constant 0.000000e+00 : f32
    %3 = vector.broadcast %cst_6 : f32 to vector<2x30x1x32xf32>
    %c0_7 = arith.constant 0 : index
    %c0_8 = arith.constant 0 : index
    %c0_9 = arith.constant 0 : index
    %c0_10 = arith.constant 0 : index
    %4 = vector.load %arg7[%c0_7, %c0_8, %c0_9, %c0_10] : memref<2x30x18x32xf32, #tpu.memory_space<vmem>>, vector<2x30x1x32xf32>
    tpu.vector_store %arg7[%c0_7, %c0_8, %c0_9, %c0_10], %3 {strides = array<i32>} : memref<2x30x18x32xf32, #tpu.memory_space<vmem>>, vector<2x30x1x32xf32>,
    %c0_11 = arith.constant 0 : index
    %c0_12 = arith.constant 0 : index
    %c17 = arith.constant 17 : index
    %c0_13 = arith.constant 0 : index
    %5 = vector.load %arg7[%c0_11, %c0_12, %c17, %c0_13] : memref<2x30x18x32xf32, #tpu.memory_space<vmem>>, vector<2x30x1x32xf32>
    tpu.vector_store %arg7[%c0_11, %c0_12, %c17, %c0_13], %3 {strides = array<i32>} : memref<2x30x18x32xf32, #tpu.memory_space<vmem>>, vector<2x30x1x32xf32>,
    %c0_14 = arith.constant 0 : index
    %c0_15 = arith.constant 0 : index
    %c0_16 = arith.constant 0 : index
    %c0_17 = arith.constant 0 : index
    %6 = vector.load %arg1[%c0_14, %c0_15, %c0_16, %c0_17] : memref<2x28x16x32xf32, #tpu.memory_space<vmem>>, vector<2x28x16x32xf32>
    %c0_18 = arith.constant 0 : index
    %c1 = arith.constant 1 : index
    %c1_19 = arith.constant 1 : index
    %c0_20 = arith.constant 0 : index
    %7 = vector.load %arg7[%c0_18, %c1, %c1_19, %c0_20] : memref<2x30x18x32xf32, #tpu.memory_space<vmem>>, vector<2x28x16x32xf32>
    tpu.vector_store %arg7[%c0_18, %c1, %c1_19, %c0_20], %6 {strides = array<i32>} : memref<2x30x18x32xf32, #tpu.memory_space<vmem>>, vector<2x28x16x32xf32>,
    %c0_21 = arith.constant 0 : index
    %c0_22 = arith.constant 0 : index
    %c0_23 = arith.constant 0 : index
    %c0_24 = arith.constant 0 : index
    %8 = vector.load %arg7[%c0_21, %c0_22, %c0_23, %c0_24] : memref<2x30x18x32xf32, #tpu.memory_space<vmem>>, vector<2x30x18x32xf32>
    %9 = vector.shape_cast %8 : vector<2x30x18x32xf32> to vector<2x15x2x18x32xf32>
    %10 = vector.extract_strided_slice %9 {offsets = [0, 0, 0, 0, 0], sizes = [2, 14, 1, 18, 32], strides = [1, 1, 1, 1, 1]} : vector<2x15x2x18x32xf32> to vector<2x14x1x18x32xf32>
    %11 = vector.shape_cast %10 : vector<2x14x1x18x32xf32> to vector<2x14x18x32xf32>
    %12 = vector.extract_strided_slice %9 {offsets = [0, 0, 1, 0, 0], sizes = [2, 14, 1, 18, 32], strides = [1, 1, 1, 1, 1]} : vector<2x15x2x18x32xf32> to vector<2x14x1x18x32xf32>
    %13 = vector.shape_cast %12 : vector<2x14x1x18x32xf32> to vector<2x14x18x32xf32>
    %14 = vector.extract_strided_slice %9 {offsets = [0, 1, 0, 0, 0], sizes = [2, 14, 1, 18, 32], strides = [1, 1, 1, 1, 1]} : vector<2x15x2x18x32xf32> to vector<2x14x1x18x32xf32>
    %15 = vector.shape_cast %14 : vector<2x14x1x18x32xf32> to vector<2x14x18x32xf32>
    %16 = vector.shape_cast %11 : vector<2x14x18x32xf32> to vector<2x14x9x2x32xf32>
    %17 = vector.extract_strided_slice %16 {offsets = [0, 0, 0, 0, 0], sizes = [2, 14, 8, 1, 32], strides = [1, 1, 1, 1, 1]} : vector<2x14x9x2x32xf32> to vector<2x14x8x1x32xf32>
    %18 = vector.shape_cast %17 : vector<2x14x8x1x32xf32> to vector<2x14x8x32xf32>
    %19 = vector.extract_strided_slice %16 {offsets = [0, 0, 0, 1, 0], sizes = [2, 14, 8, 1, 32], strides = [1, 1, 1, 1, 1]} : vector<2x14x9x2x32xf32> to vector<2x14x8x1x32xf32>
    %20 = vector.shape_cast %19 : vector<2x14x8x1x32xf32> to vector<2x14x8x32xf32>
    %21 = vector.extract_strided_slice %16 {offsets = [0, 0, 1, 0, 0], sizes = [2, 14, 8, 1, 32], strides = [1, 1, 1, 1, 1]} : vector<2x14x9x2x32xf32> to vector<2x14x8x1x32xf32>
    %22 = vector.shape_cast %21 : vector<2x14x8x1x32xf32> to vector<2x14x8x32xf32>
    %23 = vector.shape_cast %13 : vector<2x14x18x32xf32> to vector<2x14x9x2x32xf32>
    %24 = vector.extract_strided_slice %23 {offsets = [0, 0, 0, 0, 0], sizes = [2, 14, 8, 1, 32], strides = [1, 1, 1, 1, 1]} : vector<2x14x9x2x32xf32> to vector<2x14x8x1x32xf32>
    %25 = vector.shape_cast %24 : vector<2x14x8x1x32xf32> to vector<2x14x8x32xf32>
    %26 = vector.extract_strided_slice %23 {offsets = [0, 0, 0, 1, 0], sizes = [2, 14, 8, 1, 32], strides = [1, 1, 1, 1, 1]} : vector<2x14x9x2x32xf32> to vector<2x14x8x1x32xf32>
    %27 = vector.shape_cast %26 : vector<2x14x8x1x32xf32> to vector<2x14x8x32xf32>
    %28 = vector.extract_strided_slice %23 {offsets = [0, 0, 1, 0, 0], sizes = [2, 14, 8, 1, 32], strides = [1, 1, 1, 1, 1]} : vector<2x14x9x2x32xf32> to vector<2x14x8x1x32xf32>
    %29 = vector.shape_cast %28 : vector<2x14x8x1x32xf32> to vector<2x14x8x32xf32>
    %30 = vector.shape_cast %15 : vector<2x14x18x32xf32> to vector<2x14x9x2x32xf32>
    %31 = vector.extract_strided_slice %30 {offsets = [0, 0, 0, 0, 0], sizes = [2, 14, 8, 1, 32], strides = [1, 1, 1, 1, 1]} : vector<2x14x9x2x32xf32> to vector<2x14x8x1x32xf32>
    %32 = vector.shape_cast %31 : vector<2x14x8x1x32xf32> to vector<2x14x8x32xf32>
    %33 = vector.extract_strided_slice %30 {offsets = [0, 0, 0, 1, 0], sizes = [2, 14, 8, 1, 32], strides = [1, 1, 1, 1, 1]} : vector<2x14x9x2x32xf32> to vector<2x14x8x1x32xf32>
    %34 = vector.shape_cast %33 : vector<2x14x8x1x32xf32> to vector<2x14x8x32xf32>
    %35 = vector.extract_strided_slice %30 {offsets = [0, 0, 1, 0, 0], sizes = [2, 14, 8, 1, 32], strides = [1, 1, 1, 1, 1]} : vector<2x14x9x2x32xf32> to vector<2x14x8x1x32xf32>
    %36 = vector.shape_cast %35 : vector<2x14x8x1x32xf32> to vector<2x14x8x32xf32>
    %37 = tpu.concatenate %18, %20, %22, %25, %27, %29, %32, %34, %36 in 3 : vector<2x14x8x32xf32>, vector<2x14x8x32xf32>, vector<2x14x8x32xf32>, vector<2x14x8x32xf32>, vector<2x14x8x32xf32>, vector<2x14x8x32xf32>, vector<2x14x8x32xf32>, vector<2x14x8x32xf32>, vector<2x14x8x32xf32> -> vector<2x14x8x288xf32>
    %38 = vector.shape_cast %37 : vector<2x14x8x288xf32> to vector<224x288xf32>
    %c0_25 = arith.constant 0 : index
    %c0_26 = arith.constant 0 : index
    %39 = vector.load %arg2[%c0_25, %c0_26] : memref<288x64xf32, #tpu.memory_space<vmem>>, vector<288x64xf32>
    %cst_27 = arith.constant dense<0.000000e+00> : vector<224x64xf32>
    %40 = tpu.matmul %38, %39, %cst_27 {dimension_numbers = #tpu.dot_dimension_numbers<[1], [0], [0], [1], [0, 0, 1, 1], [], []>} : vector<224x288xf32>, vector<288x64xf32>, vector<224x64xf32> -> vector<224x64xf32>
    %c0_28 = arith.constant 0 : index
    %c0_29 = arith.constant 0 : index
    %41 = vector.load %arg3[%c0_28, %c0_29] : memref<1x64xf32, #tpu.memory_space<vmem>>, vector<1x64xf32>
    %42 = vector.broadcast %41 : vector<1x64xf32> to vector<224x64xf32>
    %43 = arith.addf %40, %42 : vector<224x64xf32>
    %cst_30 = arith.constant 0.000000e+00 : f32
    %44 = vector.broadcast %cst_30 : f32 to vector<224x64xf32>
    %45 = arith.maximumf %43, %44 : vector<224x64xf32>
    %46 = vector.shape_cast %45 : vector<224x64xf32> to vector<2x7x2x8x64xf32>
    %47 = vector.extract_strided_slice %46 {offsets = [0, 0, 0, 0, 0], sizes = [2, 7, 1, 8, 64], strides = [1, 1, 1, 1, 1]} : vector<2x7x2x8x64xf32> to vector<2x7x1x8x64xf32>
    %48 = vector.shape_cast %47 : vector<2x7x1x8x64xf32> to vector<2x7x8x64xf32>
    %49 = vector.shape_cast %48 : vector<2x7x8x64xf32> to vector<2x7x4x2x64xf32>
    %50 = vector.extract_strided_slice %46 {offsets = [0, 0, 1, 0, 0], sizes = [2, 7, 1, 8, 64], strides = [1, 1, 1, 1, 1]} : vector<2x7x2x8x64xf32> to vector<2x7x1x8x64xf32>
    %51 = vector.shape_cast %50 : vector<2x7x1x8x64xf32> to vector<2x7x8x64xf32>
    %52 = vector.shape_cast %51 : vector<2x7x8x64xf32> to vector<2x7x4x2x64xf32>
    %53 = vector.extract_strided_slice %49 {offsets = [0, 0, 0, 0, 0], sizes = [2, 7, 4, 1, 64], strides = [1, 1, 1, 1, 1]} : vector<2x7x4x2x64xf32> to vector<2x7x4x1x64xf32>
    %54 = vector.shape_cast %53 : vector<2x7x4x1x64xf32> to vector<2x7x4x64xf32>
    %55 = vector.extract_strided_slice %49 {offsets = [0, 0, 0, 1, 0], sizes = [2, 7, 4, 1, 64], strides = [1, 1, 1, 1, 1]} : vector<2x7x4x2x64xf32> to vector<2x7x4x1x64xf32>
    %56 = vector.shape_cast %55 : vector<2x7x4x1x64xf32> to vector<2x7x4x64xf32>
    %57 = vector.extract_strided_slice %52 {offsets = [0, 0, 0, 0, 0], sizes = [2, 7, 4, 1, 64], strides = [1, 1, 1, 1, 1]} : vector<2x7x4x2x64xf32> to vector<2x7x4x1x64xf32>
    %58 = vector.shape_cast %57 : vector<2x7x4x1x64xf32> to vector<2x7x4x64xf32>
    %59 = vector.extract_strided_slice %52 {offsets = [0, 0, 0, 1, 0], sizes = [2, 7, 4, 1, 64], strides = [1, 1, 1, 1, 1]} : vector<2x7x4x2x64xf32> to vector<2x7x4x1x64xf32>
    %60 = vector.shape_cast %59 : vector<2x7x4x1x64xf32> to vector<2x7x4x64xf32>
    %cst_31 = arith.constant 0.000000e+00 : f32
    %61 = vector.broadcast %cst_31 : f32 to vector<2x1x4x64xf32>
    %62 = tpu.concatenate %61, %58 in 1 : vector<2x1x4x64xf32>, vector<2x7x4x64xf32> -> vector<2x8x4x64xf32>
    %63 = tpu.concatenate %61, %60 in 1 : vector<2x1x4x64xf32>, vector<2x7x4x64xf32> -> vector<2x8x4x64xf32>
    %cst_32 = arith.constant 0.000000e+00 : f32
    %64 = vector.broadcast %cst_32 : f32 to vector<2x7x1x64xf32>
    %65 = tpu.concatenate %64, %56 in 2 : vector<2x7x1x64xf32>, vector<2x7x4x64xf32> -> vector<2x7x5x64xf32>
    %cst_33 = arith.constant 0.000000e+00 : f32
    %66 = vector.broadcast %cst_33 : f32 to vector<2x8x1x64xf32>
    %67 = tpu.concatenate %66, %63 in 2 : vector<2x8x1x64xf32>, vector<2x8x4x64xf32> -> vector<2x8x5x64xf32>
    %68 = vector.extract_strided_slice %67 {offsets = [0, 0, 0, 0], sizes = [2, 7, 4, 64], strides = [1, 1, 1, 1]} : vector<2x8x5x64xf32> to vector<2x7x4x64xf32>
    %69 = vector.extract_strided_slice %62 {offsets = [0, 0, 0, 0], sizes = [2, 7, 4, 64], strides = [1, 1, 1, 1]} : vector<2x8x4x64xf32> to vector<2x7x4x64xf32>
    %70 = vector.extract_strided_slice %67 {offsets = [0, 0, 1, 0], sizes = [2, 7, 4, 64], strides = [1, 1, 1, 1]} : vector<2x8x5x64xf32> to vector<2x7x4x64xf32>
    %71 = vector.extract_strided_slice %65 {offsets = [0, 0, 0, 0], sizes = [2, 7, 4, 64], strides = [1, 1, 1, 1]} : vector<2x7x5x64xf32> to vector<2x7x4x64xf32>
    %72 = vector.extract_strided_slice %65 {offsets = [0, 0, 1, 0], sizes = [2, 7, 4, 64], strides = [1, 1, 1, 1]} : vector<2x7x5x64xf32> to vector<2x7x4x64xf32>
    %73 = vector.extract_strided_slice %67 {offsets = [0, 1, 0, 0], sizes = [2, 7, 4, 64], strides = [1, 1, 1, 1]} : vector<2x8x5x64xf32> to vector<2x7x4x64xf32>
    %74 = vector.extract_strided_slice %62 {offsets = [0, 1, 0, 0], sizes = [2, 7, 4, 64], strides = [1, 1, 1, 1]} : vector<2x8x4x64xf32> to vector<2x7x4x64xf32>
    %75 = vector.extract_strided_slice %67 {offsets = [0, 1, 1, 0], sizes = [2, 7, 4, 64], strides = [1, 1, 1, 1]} : vector<2x8x5x64xf32> to vector<2x7x4x64xf32>
    %76 = tpu.concatenate %68, %69, %70, %71, %54, %72, %73, %74, %75 in 3 : vector<2x7x4x64xf32>, vector<2x7x4x64xf32>, vector<2x7x4x64xf32>, vector<2x7x4x64xf32>, vector<2x7x4x64xf32>, vector<2x7x4x64xf32>, vector<2x7x4x64xf32>, vector<2x7x4x64xf32>, vector<2x7x4x64xf32> -> vector<2x7x4x576xf32>
    %77 = vector.shape_cast %76 : vector<2x7x4x576xf32> to vector<56x576xf32>
    %c0_34 = arith.constant 0 : index
    %c0_35 = arith.constant 0 : index
    %78 = vector.load %arg4[%c0_34, %c0_35] : memref<576x128xf32, #tpu.memory_space<vmem>>, vector<576x128xf32>
    %cst_36 = arith.constant dense<0.000000e+00> : vector<56x128xf32>
    %79 = tpu.matmul %77, %78, %cst_36 {dimension_numbers = #tpu.dot_dimension_numbers<[1], [0], [0], [1], [0, 0, 1, 1], [], []>} : vector<56x576xf32>, vector<576x128xf32>, vector<56x128xf32> -> vector<56x128xf32>
    %c0_37 = arith.constant 0 : index
    %c0_38 = arith.constant 0 : index
    %80 = vector.load %arg5[%c0_37, %c0_38] : memref<1x128xf32, #tpu.memory_space<vmem>>, vector<1x128xf32>
    %81 = vector.broadcast %80 : vector<1x128xf32> to vector<56x128xf32>
    %82 = arith.addf %79, %81 : vector<56x128xf32>
    %cst_39 = arith.constant 0.000000e+00 : f32
    %83 = vector.broadcast %cst_39 : f32 to vector<56x128xf32>
    %84 = arith.maximumf %82, %83 : vector<56x128xf32>
    %c0_40 = arith.constant 0 : index
    %c0_41 = arith.constant 0 : index
    %85 = vector.load %arg6[%c0_40, %c0_41] : memref<56x128xf32, #tpu.memory_space<vmem>>, vector<56x128xf32>
    tpu.vector_store %arg6[%c0_40, %c0_41], %84 {strides = array<i32>} : memref<56x128xf32, #tpu.memory_space<vmem>>, vector<56x128xf32>,
    return
  }
  func.func @transform_0(%arg0: i32) -> (i32, i32, i32, i32) {
    %c0_i32 = arith.constant 0 : i32
    %c0_i32_0 = arith.constant 0 : i32
    %c0_i32_1 = arith.constant 0 : i32
    %c0_i32_2 = arith.constant 0 : i32
    return %arg0, %c0_i32, %c0_i32_0, %c0_i32_1 : i32, i32, i32, i32
  }
  func.func @transform_1(%arg0: i32) -> (i32, i32) {
    %c0_i32 = arith.constant 0 : i32
    %c0_i32_0 = arith.constant 0 : i32
    %c0_i32_1 = arith.constant 0 : i32
    return %c0_i32, %c0_i32_0 : i32, i32
  }
  func.func @transform_2(%arg0: i32) -> (i32, i32) {
    %c0_i32 = arith.constant 0 : i32
    %c0_i32_0 = arith.constant 0 : i32
    %c0_i32_1 = arith.constant 0 : i32
    return %c0_i32, %c0_i32_0 : i32, i32
  }
  func.func @transform_3(%arg0: i32) -> (i32, i32) {
    %c0_i32 = arith.constant 0 : i32
    %c0_i32_0 = arith.constant 0 : i32
    %c0_i32_1 = arith.constant 0 : i32
    return %c0_i32, %c0_i32_0 : i32, i32
  }
  func.func @transform_4(%arg0: i32) -> (i32, i32) {
    %c0_i32 = arith.constant 0 : i32
    %c0_i32_0 = arith.constant 0 : i32
    %c0_i32_1 = arith.constant 0 : i32
    return %c0_i32, %c0_i32_0 : i32, i32
  }
  func.func @transform_5(%arg0: i32) -> (i32, i32) {
    %c0_i32 = arith.constant 0 : i32
    %c0_i32_0 = arith.constant 0 : i32
    return %arg0, %c0_i32 : i32, i32
  }
}

</mosaic_0001>

<bundles_post_ra>
// kernel: encoder_forward.1
= control target key start
LH: loop header
LB: loop body
LE: loop exit
PB: predicated region body
PF: predicated region fallthrough
CT: control target
= control target key end

     0   :  { %vm21_vm0 = vcmask 261120   ;;  %vm36_vm1 = vcmask 253952   ;;  %v14215_v1 = vmov 0.0   ;;  %s14194_s0 = inlined_call_operand.vmem [shape: f32[2,28,16,32], index: 0, kind: input, shape index: {}]   ;;  %s14195_s1 = inlined_call_operand.vmem [shape: f32[288,64], index: 1, kind: input, shape index: {}]   ;;  %s14196_s2 = inlined_call_operand.vmem [shape: f32[1,64], index: 2, kind: input, shape index: {}]   ;;  %s14197_s3 = inlined_call_operand.vmem [shape: f32[576,128], index: 3, kind: input, shape index: {}]   ;;  %s14198_s4 = inlined_call_operand.vmem [shape: f32[1,128], index: 4, kind: input, shape index: {}]   ;;  %s14199_s5 = inlined_call_operand.hbm [shape: f32[56,128], index: 5, kind: output, shape index: {}]  }
   0x1   :  { %v159_v0 = vld [vmem:[%s14194_s0 + $0x10] sm:$0xff]  ;;  %39 = vst.msk [vmem:[#allocation2 + $0x30] sm:$0x1] %vm36_vm1, %v14215_v1  ;;  %v160_v2 = vld [vmem:[%s14194_s0 + $0x18] sm:$0xff]  ;;  %v189_v3 = vld [vmem:[%s14194_s0 + $0x100] sm:$0xff] }
   0x2   :  { %54 = vst.msk [vmem:[#allocation2 + $0x198] sm:$0x1] %vm36_vm1, %v14215_v1  ;;  %v190_v4 = vld [vmem:[%s14194_s0 + $0x108] sm:$0xff] }
   0x3   :  { %272 = vst.msk [vmem:[#allocation2 + $0x31] sm:$0xff] %vm21_vm0, %v159_v0 }
   0x4   :  { %273 = vst.msk [vmem:[#allocation2 + $0x39] sm:$0xff] %vm21_vm0, %v160_v2 }
   0x5   :  { %10 = vsyncpa [#allocation4], 0  ;;  %302 = vst.msk [vmem:[#allocation2 + $0x199] sm:$0xff] %vm21_vm0, %v189_v3  ;;  %vm1302_vm2 = vcmask 1041409   ;;  %vm1304_vm3 = vcmask 1042434   ;;  %vm1306_vm4 = vcmask 1043459  }
   0x6   :  { %303 = vst.msk [vmem:[#allocation2 + $0x1a1] sm:$0xff] %vm21_vm0, %v190_v4  ;;  %vm1308_vm5 = vcmask 1044484   ;;  %vm1310_vm6 = vcmask 1045509   ;;  %vm1312_vm7 = vcmask 1046534   ;;  %vm1314_vm8 = vcmask 1047559   ;;  %s6350_s26 = smov 32  }
   0x7   :  { %22 = vst.msk [vmem:[#allocation2] sm:$0xff] %vm21_vm0, %v14215_v1  ;;  %vm24_vm9 = vcmask 254976   ;;  %s6351_s10 = smov 96   ;;  %s6352_s11 = smov 64   ;;  %vm3877_vm10 = vcmask 523264   ;;  %vm3906_vm11 = vcmask 785408  }
   0x8   :  { %23 = vst.msk [vmem:[#allocation2 + $0x8] sm:$0xff] %vm21_vm0, %v14215_v1  ;;  %vm4866_vm12 = vcmask 1040384   ;;  %vm5353_vm13 = vcmask 1043456   ;;  %s5794_s12 = sshll.u32 %s14199_s5, 4  ;;  %s6354_s13 = smov 128   ;;  %s5795_s12 = int_to_ptr.hbm [resolvable:$true] %s5794_s12 }
   0x9   :  { %37 = vst.msk [vmem:[#allocation2] sm:$0x1] %vm36_vm1, %v14215_v1  ;;  %s6355_s14 = smov 8  }
   0xa   :  { %v6412_v5 = vld [vmem:[#allocation2 + $0x30] sm:$0xff]  ;;  %26 = vst.msk [vmem:[#allocation2 + $0x2d0] sm:$0xff] %vm21_vm0, %v14215_v1 }
   0xb   :  { %v646_v6 = vrot.slane %v6412_v5, 2  ;;  %27 = vst.msk [vmem:[#allocation2 + $0x2d8] sm:$0xff] %vm21_vm0, %v14215_v1  ;;  %v647_v7 = vrot.slane %v6412_v5, 4  ;;  %v648_v8 = vrot.slane %v6412_v5, 6  ;;  %v6421_v9 = vld [vmem:[#allocation2 + $0x38] sm:$0xff]  ;;  %v1541_v10 = vperm.slane %v6412_v5, 1 }
   0xc   :  { %v649_v12 = vrot.slane %v6421_v9, 2  ;;  %v1545_v15 = vperm.slane %v6421_v9, 1  ;;  %38 = vst.msk [vmem:[#allocation2 + $0x18] sm:$0x1] %vm36_vm1, %v14215_v1  ;;  %v650_v20 = vrot.slane %v6421_v9, 4  ;;  %v651_v27 = vrot.slane %v6421_v9, 6 }
   0xd   :  { %v1542_v11 = vperm.slane %v646_v6, 1  ;;  %v1543_v13 = vperm.slane %v647_v7, 1  ;;  %v1544_v14 = vperm.slane %v648_v8, 1  ;;  %40 = vst.msk [vmem:[#allocation2 + $0x48] sm:$0x1] %vm36_vm1, %v14215_v1  ;;  %v6654_v52 = vld [vmem:[#allocation2 + $0x198] sm:$0xff] }
   0xe   :  { %41 = vst.msk [vmem:[#allocation2 + $0x60] sm:$0x1] %vm36_vm1, %v14215_v1  ;;  %v1546_v21 = vperm.slane %v649_v12, 1  ;;  %v1547_v29 = vperm.slane %v650_v20, 1  ;;  %v1548_v38 = vperm.slane %v651_v27, 1  ;;  %v14205_v53 = vrot.slane %v6654_v52, 2 }
   0xf   :  { %v1764_v16 = vsel %vm1302_vm2, %v1542_v11, %v1541_v10  ;;  %v6446_v22 = vld [vmem:[#allocation2 + $0x8] sm:$0xff]  ;;  %42 = vst.msk [vmem:[#allocation2 + $0x78] sm:$0x1] %vm36_vm1, %v14215_v1  ;;  %v14204_v54 = vrot.slane %v6654_v52, 4  ;;  %v2409_v55 = vperm.slane %v6654_v52, 0  ;;  %v14203_v57 = vrot.slane %v6654_v52, 6 }
  0x10   :  { %v1765_v17 = vsel %vm1304_vm3, %v1543_v13, %v1764_v16  ;;  %v6436_v18 = vld [vmem:[#allocation2] sm:$0xff]  ;;  %14840 = vst [vmem:[#allocation6_spill] sm:$0xff] %v6446_v22  ;;  %v643_v28 = vrot.slane %v6446_v22, 2  ;;  %v644_v31 = vrot.slane %v6446_v22, 4  ;;  %v645_v32 = vrot.slane %v6446_v22, 6  ;;  %v157_v5 = vld [vmem:[%s14194_s0] sm:$0xff] }
  0x11   :  { %v1766_v19 = vsel %vm1306_vm4, %v1544_v14, %v1765_v17  ;;  %v640_v24 = vrot.slane %v6436_v18, 2  ;;  %v641_v25 = vrot.slane %v6436_v18, 4  ;;  %43 = vst.msk [vmem:[#allocation2 + $0x90] sm:$0x1] %vm36_vm1, %v14215_v1  ;;  %v642_v26 = vrot.slane %v6436_v18, 6  ;;  %v6694_v60 = vld [vmem:[#allocation2 + $0x1a0] sm:$0xff] }
  0x12   :  { %v1767_v23 = vsel %vm1308_vm5, %v1545_v15, %v1766_v19  ;;  %44 = vst.msk [vmem:[#allocation2 + $0xa8] sm:$0x1] %vm36_vm1, %v14215_v1  ;;  %v1533_v33 = vperm.slane %v6436_v18, 1  ;;  %v1537_v37 = vperm.slane %v6446_v22, 1  ;;  %v1538_v39 = vperm.slane %v643_v28, 1  ;;  %v158_v17 = vld [vmem:[%s14194_s0 + $0x8] sm:$0xff] }
  0x13   :  { %45 = vst.msk [vmem:[#allocation2 + $0xc0] sm:$0x1] %vm36_vm1, %v14215_v1  ;;  %v1768_v30 = vsel %vm1310_vm6, %v1546_v21, %v1767_v23  ;;  %v1534_v34 = vperm.slane %v640_v24, 1  ;;  %v1535_v35 = vperm.slane %v641_v25, 1  ;;  %v1536_v36 = vperm.slane %v642_v26, 1  ;;  %v161_v23 = vld [vmem:[%s14194_s0 + $0x20] sm:$0xff] }
  0x14   :  { %46 = vst.msk [vmem:[#allocation2 + $0xd8] sm:$0x1] %vm36_vm1, %v14215_v1  ;;  %v1769_v41 = vsel %vm1312_vm7, %v1547_v29, %v1768_v30  ;;  %v1539_v42 = vperm.slane %v644_v31, 1  ;;  %v1540_v44 = vperm.slane %v645_v32, 1  ;;  %v6675_v56 = vperm.slane %v14205_v53, 0 }
  0x15   :  { %47 = vst.msk [vmem:[#allocation2 + $0xf0] sm:$0x1] %vm36_vm1, %v14215_v1  ;;  %v1757_v40 = vsel %vm1302_vm2, %v1534_v34, %v1533_v33  ;;  %v6503_v47 = vsel %vm1314_vm8, %v1548_v38, %v1769_v41  ;;  %v6686_v58 = vperm.slane %v14204_v54, 0  ;;  %v6700_v61 = vperm.slane %v14203_v57, 0 }
  0x16   :  { %48 = vst.msk [vmem:[#allocation2 + $0x108] sm:$0x1] %vm36_vm1, %v14215_v1  ;;  %v1758_v43 = vsel %vm1304_vm3, %v1535_v35, %v1757_v40  ;;  %v2625_v59 = vsel %vm1302_vm2, %v6675_v56, %v2409_v55  ;;  %v14202_v63 = vrot.slane %v6694_v60, 2  ;;  %v14216_v0 = vperm.slane %v6694_v60, 0 }
  0x17   :  { %49 = vst.msk [vmem:[#allocation2 + $0x120] sm:$0x1] %vm36_vm1, %v14215_v1  ;;  %v1759_v45 = vsel %vm1306_vm4, %v1536_v36, %v1758_v43  ;;  %v2626_v62 = vsel %vm1304_vm3, %v6686_v58, %v2625_v59  ;;  %v6716_v2 = vperm.slane %v647_v7, 0  ;;  %v6724_v4 = vperm.slane %v646_v6, 0 }
  0x18   :  { %50 = vst.msk [vmem:[#allocation2 + $0x138] sm:$0x1] %vm36_vm1, %v14215_v1  ;;  %v1760_v46 = vsel %vm1308_vm5, %v1537_v37, %v1759_v45  ;;  %v2627_v3 = vsel %vm1306_vm4, %v6700_v61, %v2626_v62  ;;  %v14201_v10 = vrot.slane %v6694_v60, 4  ;;  %v6731_v11 = vperm.slane %v14202_v63, 0  ;;  %v167_v45 = vld [vmem:[%s14194_s0 + $0x50] sm:$0xff]  ;;  %v168_v63 = vld [vmem:[%s14194_s0 + $0x58] sm:$0xff] }
  0x19   :  { %51 = vst.msk [vmem:[#allocation2 + $0x150] sm:$0x1] %vm36_vm1, %v14215_v1  ;;  %v1761_v48 = vsel %vm1310_vm6, %v1538_v39, %v1760_v46  ;;  %v6737_v7 = vperm.slane %v648_v8, 0  ;;  %v2628_v6 = vsel %vm1308_vm5, %v14216_v0, %v2627_v3  ;;  %v6744_v13 = vperm.slane %v641_v25, 0  ;;  %v162_v25 = vld [vmem:[%s14194_s0 + $0x28] sm:$0xff]  ;;  %v163_v39 = vld [vmem:[%s14194_s0 + $0x30] sm:$0xff] }
  0x1a   :  { %52 = vst.msk [vmem:[#allocation2 + $0x168] sm:$0x1] %vm36_vm1, %v14215_v1  ;;  %v1762_v49 = vsel %vm1312_vm7, %v1539_v42, %v1761_v48  ;;  %v6750_v14 = vperm.slane %v640_v24, 0  ;;  %v14200_v15 = vrot.slane %v6694_v60, 6  ;;  %v2072_v8 = vsel %vm1302_vm2, %v6716_v2, %v6724_v4  ;;  %v164_v42 = vld [vmem:[%s14194_s0 + $0x38] sm:$0xff] }
  0x1b   :  { %14841 = vst [vmem:[#allocation7_spill] sm:$0xff] %v6503_v47  ;;  %v1763_v50 = vsel %vm1314_vm8, %v1540_v44, %v1762_v49  ;;  %v6763_v16 = vperm.slane %v14201_v10, 0  ;;  %v2629_v19 = vsel %vm1310_vm6, %v6731_v11, %v2628_v6  ;;  %v6774_v21 = vperm.slane %v642_v26, 0 }
  0x1c   :  { %53 = vst.msk [vmem:[#allocation2 + $0x180] sm:$0x1] %vm36_vm1, %v14215_v1  ;;  %v5856_v51 = vpack.i.bf16 %v6503_v47, %v1763_v50  ;;  %v14218_v24 = vperm.slane %v6421_v9, 0  ;;  %v2065_v18 = vsel %vm1302_vm2, %v6744_v13, %v6750_v14  ;;  %v2073_v26 = vsel %vm1304_vm3, %v6737_v7, %v2072_v8 }
  0x1d   :  { %55 = vst.msk [vmem:[#allocation2 + $0x1b0] sm:$0x1] %vm36_vm1, %v14215_v1  ;;  %v6793_v29 = vperm.slane %v14200_v15, 0  ;;  %v6798_v30 = vperm.slane %v649_v12, 0  ;;  %v2630_v33 = vsel %vm1312_vm7, %v6763_v16, %v2629_v19  ;;  %v14206_v34 = vperm.slane %v6446_v22, 0 }
  0x1e   :  { %56 = vst.msk [vmem:[#allocation2 + $0x1c8] sm:$0x1] %vm36_vm1, %v14215_v1  ;;  %5857 = vrot.lane.b32.xlu0 %v5856_v51, %s6350_s26  ;;  %v2066_v35 = vsel %vm1304_vm3, %v6774_v21, %v2065_v18  ;;  %v2074_v36 = vsel %vm1306_vm4, %v14218_v24, %v2073_v26  ;;  %v6812_v12 = vperm.slane %v650_v20, 0  ;;  %v6820_v38 = vperm.slane %v643_v28, 0 }
  0x1f   :  { %57 = vst.msk [vmem:[#allocation2 + $0x1e0] sm:$0x1] %vm36_vm1, %v14215_v1  ;;  %v6816_v37 = vsel %vm1314_vm8, %v6793_v29, %v2630_v33  ;;  %v6829_v40 = vperm.slane %v651_v27, 0  ;;  %v2067_v41 = vsel %vm1306_vm4, %v14206_v34, %v2066_v35  ;;  %v2075_v28 = vsel %vm1308_vm5, %v6798_v30, %v2074_v36 }
  0x20   :  { %58 = vst.msk [vmem:[#allocation2 + $0x1f8] sm:$0x1] %vm36_vm1, %v14215_v1  ;;  %v6843_v43 = vperm.slane %v644_v31, 0  ;;  %v6847_v27 = vperm.slane %v645_v32, 0  ;;  %v2068_v59 = vsel %vm1308_vm5, %v6820_v38, %v2067_v41  ;;  %v2076_v62 = vsel %vm1310_vm6, %v6812_v12, %v2075_v28 }
  0x21   :  { %59 = vst.msk [vmem:[#allocation2 + $0x210] sm:$0x1] %vm36_vm1, %v14215_v1  ;;  %v2077_v10 = vsel %vm1312_vm7, %v6829_v40, %v2076_v62 }
  0x22   :  { %60 = vst.msk [vmem:[#allocation2 + $0x228] sm:$0x1] %vm36_vm1, %v14215_v1  ;;  %v2069_v15 = vsel %vm1310_vm6, %v6843_v43, %v2068_v59 }
  0x23   :  { %61 = vst.msk [vmem:[#allocation2 + $0x240] sm:$0x1] %vm36_vm1, %v14215_v1 }
  0x24   :  { %62 = vst.msk [vmem:[#allocation2 + $0x258] sm:$0x1] %vm36_vm1, %v14215_v1 }
  0x25   :  { %63 = vst.msk [vmem:[#allocation2 + $0x270] sm:$0x1] %vm36_vm1, %v14215_v1 }
  0x26   :  { %64 = vst.msk [vmem:[#allocation2 + $0x288] sm:$0x1] %vm36_vm1, %v14215_v1 }
  0x27   :  { %65 = vst.msk [vmem:[#allocation2 + $0x2a0] sm:$0x1] %vm36_vm1, %v14215_v1 }
  0x28   :  { %68 = vst.msk [vmem:[#allocation2 + $0x2e8] sm:$0x1] %vm36_vm1, %v14215_v1 }
  0x29   :  { %69 = vst.msk [vmem:[#allocation2 + $0x300] sm:$0x1] %vm36_vm1, %v14215_v1 }
  0x2a   :  { %70 = vst.msk [vmem:[#allocation2 + $0x318] sm:$0x1] %vm36_vm1, %v14215_v1 }
  0x2b   :  { %71 = vst.msk [vmem:[#allocation2 + $0x330] sm:$0x1] %vm36_vm1, %v14215_v1 }
  0x2c   :  { %72 = vst.msk [vmem:[#allocation2 + $0x348] sm:$0x1] %vm36_vm1, %v14215_v1 }
  0x2d   :  { %73 = vst.msk [vmem:[#allocation2 + $0x360] sm:$0x1] %vm36_vm1, %v14215_v1 }
  0x2e   :  { %74 = vst.msk [vmem:[#allocation2 + $0x378] sm:$0x1] %vm36_vm1, %v14215_v1 }
  0x2f   :  { %75 = vst.msk [vmem:[#allocation2 + $0x390] sm:$0x1] %vm36_vm1, %v14215_v1 }
  0x30   :  { %76 = vst.msk [vmem:[#allocation2 + $0x3a8] sm:$0x1] %vm36_vm1, %v14215_v1 }
  0x31   :  { %77 = vst.msk [vmem:[#allocation2 + $0x3c0] sm:$0x1] %vm36_vm1, %v14215_v1 }
  0x32   :  { %78 = vst.msk [vmem:[#allocation2 + $0x3d8] sm:$0x1] %vm36_vm1, %v14215_v1 }
  0x33   :  { %79 = vst.msk [vmem:[#allocation2 + $0x3f0] sm:$0x1] %vm36_vm1, %v14215_v1 }
  0x34   :  { %80 = vst.msk [vmem:[#allocation2 + $0x408] sm:$0x1] %vm36_vm1, %v14215_v1 }
  0x35   :  { %81 = vst.msk [vmem:[#allocation2 + $0x420] sm:$0x1] %vm36_vm1, %v14215_v1 }
  0x36   :  { %82 = vst.msk [vmem:[#allocation2 + $0x438] sm:$0x1] %vm36_vm1, %v14215_v1 }
  0x37   :  { %83 = vst.msk [vmem:[#allocation2 + $0x450] sm:$0x1] %vm36_vm1, %v14215_v1 }
  0x38   :  { %84 = vst.msk [vmem:[#allocation2 + $0x468] sm:$0x1] %vm36_vm1, %v14215_v1 }
  0x39   :  { %85 = vst.msk [vmem:[#allocation2 + $0x480] sm:$0x1] %vm36_vm1, %v14215_v1 }
  0x3a   :  { %86 = vst.msk [vmem:[#allocation2 + $0x498] sm:$0x1] %vm36_vm1, %v14215_v1 }
  0x3b   :  { %87 = vst.msk [vmem:[#allocation2 + $0x4b0] sm:$0x1] %vm36_vm1, %v14215_v1 }
  0x3c   :  { %88 = vst.msk [vmem:[#allocation2 + $0x4c8] sm:$0x1] %vm36_vm1, %v14215_v1 }
  0x3d   :  { %89 = vst.msk [vmem:[#allocation2 + $0x4e0] sm:$0x1] %vm36_vm1, %v14215_v1 }
  0x3e   :  { %90 = vst.msk [vmem:[#allocation2 + $0x4f8] sm:$0x1] %vm36_vm1, %v14215_v1 }
  0x3f   :  { %91 = vst.msk [vmem:[#allocation2 + $0x510] sm:$0x1] %vm36_vm1, %v14215_v1 }
  0x40   :  { %92 = vst.msk [vmem:[#allocation2 + $0x528] sm:$0x1] %vm36_vm1, %v14215_v1 }
  0x41   :  { %93 = vst.msk [vmem:[#allocation2 + $0x540] sm:$0x1] %vm36_vm1, %v14215_v1 }
  0x42   :  { %94 = vst.msk [vmem:[#allocation2 + $0x558] sm:$0x1] %vm36_vm1, %v14215_v1 }
  0x43   :  { %95 = vst.msk [vmem:[#allocation2 + $0x570] sm:$0x1] %vm36_vm1, %v14215_v1 }
  0x44   :  { %98 = vst.msk [vmem:[#allocation2 + $0x29] sm:$0x1] %vm36_vm1, %v14215_v1 }
  0x45   :  { %99 = vst.msk [vmem:[#allocation2 + $0x41] sm:$0x1] %vm36_vm1, %v14215_v1 }
  0x46   :  { %100 = vst.msk [vmem:[#allocation2 + $0x59] sm:$0x1] %vm36_vm1, %v14215_v1 }
  0x47   :  { %101 = vst.msk [vmem:[#allocation2 + $0x71] sm:$0x1] %vm36_vm1, %v14215_v1 }
  0x48   :  { %102 = vst.msk [vmem:[#allocation2 + $0x89] sm:$0x1] %vm36_vm1, %v14215_v1 }
  0x49   :  { %103 = vst.msk [vmem:[#allocation2 + $0xa1] sm:$0x1] %vm36_vm1, %v14215_v1 }
  0x4a   :  { %104 = vst.msk [vmem:[#allocation2 + $0xb9] sm:$0x1] %vm36_vm1, %v14215_v1 }
  0x4b   :  { %105 = vst.msk [vmem:[#allocation2 + $0xd1] sm:$0x1] %vm36_vm1, %v14215_v1 }
  0x4c   :  { %106 = vst.msk [vmem:[#allocation2 + $0xe9] sm:$0x1] %vm36_vm1, %v14215_v1  ;;  %v6831_v20 = vld [vmem:[#allocation2 + $0x40] sm:$0x3] }
  0x4d   :  { %107 = vst.msk [vmem:[#allocation2 + $0x101] sm:$0x1] %vm36_vm1, %v14215_v1  ;;  %v2038_v55 = vperm.slane %v6831_v20, 0 }
  0x4e   :  { %108 = vst.msk [vmem:[#allocation2 + $0x119] sm:$0x1] %vm36_vm1, %v14215_v1 }
  0x4f   :  { %109 = vst.msk [vmem:[#allocation2 + $0x131] sm:$0x1] %vm36_vm1, %v14215_v1 }
  0x50   :  { %110 = vst.msk [vmem:[#allocation2 + $0x149] sm:$0x1] %vm36_vm1, %v14215_v1 }
  0x51   :  { %111 = vst.msk [vmem:[#allocation2 + $0x161] sm:$0x1] %vm36_vm1, %v14215_v1 }
  0x52   :  { %112 = vst.msk [vmem:[#allocation2 + $0x179] sm:$0x1] %vm36_vm1, %v14215_v1 }
  0x53   :  { %113 = vst.msk [vmem:[#allocation2 + $0x191] sm:$0x1] %vm36_vm1, %v14215_v1 }
  0x54   :  { %114 = vst.msk [vmem:[#allocation2 + $0x1a9] sm:$0x1] %vm36_vm1, %v14215_v1 }
  0x55   :  { %115 = vst.msk [vmem:[#allocation2 + $0x1c1] sm:$0x1] %vm36_vm1, %v14215_v1 }
  0x56   :  { %116 = vst.msk [vmem:[#allocation2 + $0x1d9] sm:$0x1] %vm36_vm1, %v14215_v1 }
  0x57   :  { %117 = vst.msk [vmem:[#allocation2 + $0x1f1] sm:$0x1] %vm36_vm1, %v14215_v1 }
  0x58   :  { %118 = vst.msk [vmem:[#allocation2 + $0x209] sm:$0x1] %vm36_vm1, %v14215_v1 }
  0x59   :  { %119 = vst.msk [vmem:[#allocation2 + $0x221] sm:$0x1] %vm36_vm1, %v14215_v1 }
  0x5a   :  { %120 = vst.msk [vmem:[#allocation2 + $0x239] sm:$0x1] %vm36_vm1, %v14215_v1 }
  0x5b   :  { %121 = vst.msk [vmem:[#allocation2 + $0x251] sm:$0x1] %vm36_vm1, %v14215_v1 }
  0x5c   :  { %122 = vst.msk [vmem:[#allocation2 + $0x269] sm:$0x1] %vm36_vm1, %v14215_v1 }
  0x5d   :  { %123 = vst.msk [vmem:[#allocation2 + $0x281] sm:$0x1] %vm36_vm1, %v14215_v1 }
  0x5e   :  { %124 = vst.msk [vmem:[#allocation2 + $0x299] sm:$0x1] %vm36_vm1, %v14215_v1 }
  0x5f   :  { %125 = vst.msk [vmem:[#allocation2 + $0x2b1] sm:$0x1] %vm36_vm1, %v14215_v1 }
  0x60   :  { %128 = vst.msk [vmem:[#allocation2 + $0x2f9] sm:$0x1] %vm36_vm1, %v14215_v1 }
  0x61   :  { %129 = vst.msk [vmem:[#allocation2 + $0x311] sm:$0x1] %vm36_vm1, %v14215_v1 }
  0x62   :  { %130 = vst.msk [vmem:[#allocation2 + $0x329] sm:$0x1] %vm36_vm1, %v14215_v1 }
  0x63   :  { %131 = vst.msk [vmem:[#allocation2 + $0x341] sm:$0x1] %vm36_vm1, %v14215_v1 }
  0x64   :  { %14842 = vst [vmem:[#allocation8_spill] sm:$0xff] %v6654_v52 }
  0x65   :  { %132 = vst.msk [vmem:[#allocation2 + $0x359] sm:$0x1] %vm36_vm1, %v14215_v1 }
  0x66   :  { %133 = vst.msk [vmem:[#allocation2 + $0x371] sm:$0x1] %vm36_vm1, %v14215_v1 }
  0x67   :  { %134 = vst.msk [vmem:[#allocation2 + $0x389] sm:$0x1] %vm36_vm1, %v14215_v1 }
  0x68   :  { %135 = vst.msk [vmem:[#allocation2 + $0x3a1] sm:$0x1] %vm36_vm1, %v14215_v1 }
  0x69   :  { %136 = vst.msk [vmem:[#allocation2 + $0x3b9] sm:$0x1] %vm36_vm1, %v14215_v1 }
  0x6a   :  { %137 = vst.msk [vmem:[#allocation2 + $0x3d1] sm:$0x1] %vm36_vm1, %v14215_v1 }
  0x6b   :  { %138 = vst.msk [vmem:[#allocation2 + $0x3e9] sm:$0x1] %vm36_vm1, %v14215_v1 }
  0x6c   :  { %14843 = vst [vmem:[#allocation9_spill] sm:$0xff] %v6675_v56 }
  0x6d   :  { %139 = vst.msk [vmem:[#allocation2 + $0x401] sm:$0x1] %vm36_vm1, %v14215_v1 }
  0x6e   :  { %140 = vst.msk [vmem:[#allocation2 + $0x419] sm:$0x1] %vm36_vm1, %v14215_v1 }
  0x6f   :  { %141 = vst.msk [vmem:[#allocation2 + $0x431] sm:$0x1] %vm36_vm1, %v14215_v1 }
  0x70   :  { %14844 = vst [vmem:[#allocation10_spill] sm:$0xff] %v6686_v58 }
  0x71   :  { %142 = vst.msk [vmem:[#allocation2 + $0x449] sm:$0x1] %vm36_vm1, %v14215_v1 }
  0x72   :  { %143 = vst.msk [vmem:[#allocation2 + $0x461] sm:$0x1] %vm36_vm1, %v14215_v1 }
  0x73   :  { %14845 = vst [vmem:[#allocation11_spill] sm:$0xff] %v6694_v60 }
  0x74   :  { %144 = vst.msk [vmem:[#allocation2 + $0x479] sm:$0x1] %vm36_vm1, %v14215_v1 }
  0x75   :  { %14846 = vst [vmem:[#allocation12_spill] sm:$0xff] %v6700_v61 }
  0x76   :  { %145 = vst.msk [vmem:[#allocation2 + $0x491] sm:$0x1] %vm36_vm1, %v14215_v1 }
  0x77   :  { %146 = vst.msk [vmem:[#allocation2 + $0x4a9] sm:$0x1] %vm36_vm1, %v14215_v1 }
  0x78   :  { %147 = vst.msk [vmem:[#allocation2 + $0x4c1] sm:$0x1] %vm36_vm1, %v14215_v1 }
  0x79   :  { %148 = vst.msk [vmem:[#allocation2 + $0x4d9] sm:$0x1] %vm36_vm1, %v14215_v1 }
  0x7a   :  { %149 = vst.msk [vmem:[#allocation2 + $0x4f1] sm:$0x1] %vm36_vm1, %v14215_v1 }
  0x7b   :  { %150 = vst.msk [vmem:[#allocation2 + $0x509] sm:$0x1] %vm36_vm1, %v14215_v1 }
  0x7c   :  { %14847 = vst [vmem:[#allocation13_spill] sm:$0xff] %v6731_v11 }
  0x7d   :  { %151 = vst.msk [vmem:[#allocation2 + $0x521] sm:$0x1] %vm36_vm1, %v14215_v1 }
  0x7e   :  { %14848 = vst [vmem:[#allocation14_spill] sm:$0xff] %v6744_v13 }
  0x7f   :  { %152 = vst.msk [vmem:[#allocation2 + $0x539] sm:$0x1] %vm36_vm1, %v14215_v1 }
  0x80   :  { %14849 = vst [vmem:[#allocation15_spill] sm:$0xff] %v6750_v14 }
  0x81   :  { %153 = vst.msk [vmem:[#allocation2 + $0x551] sm:$0x1] %vm36_vm1, %v14215_v1 }
  0x82   :  { %14850 = vst [vmem:[#allocation16_spill] sm:$0xff] %v6763_v16 }
  0x83   :  { %154 = vst.msk [vmem:[#allocation2 + $0x569] sm:$0x1] %vm36_vm1, %v14215_v1 }
  0x84   :  { %14851 = vst [vmem:[#allocation17_spill] sm:$0xff] %v6774_v21 }
  0x85   :  { %155 = vst.msk [vmem:[#allocation2 + $0x581] sm:$0x1] %vm36_vm1, %v14215_v1 }
  0x86   :  { %270 = vst.msk [vmem:[#allocation2 + $0x19] sm:$0xff] %vm21_vm0, %v157_v5 }
  0x87   :  { %14852 = vst [vmem:[#allocation18_spill] sm:$0xff] %v6793_v29 }
  0x88   :  { %271 = vst.msk [vmem:[#allocation2 + $0x21] sm:$0xff] %vm21_vm0, %v158_v17 }
  0x89   :  { %274 = vst.msk [vmem:[#allocation2 + $0x49] sm:$0xff] %vm21_vm0, %v161_v23 }
  0x8a   :  { %275 = vst.msk [vmem:[#allocation2 + $0x51] sm:$0xff] %vm21_vm0, %v162_v25 }
  0x8b   :  { %14853 = vst [vmem:[#allocation19_spill] sm:$0xff] %v6816_v37 }
  0x8c   :  { %14854 = vst [vmem:[#allocation20_spill] sm:$0xff] %v6820_v38 }
  0x8d   :  { %67 = vst.msk [vmem:[#allocation2 + $0x2d0] sm:$0x1] %vm36_vm1, %v14215_v1  ;;  %v6849_v44 = vld [vmem:[#allocation2 + $0x18] sm:$0xff] }
  0x8e   :  { %14855 = vst [vmem:[#allocation21_spill] sm:$0xff] %v6843_v43  ;;  %v892_v31 = vrot.slane %v6849_v44, 2  ;;  %v893_v49 = vrot.slane %v6849_v44, 4  ;;  %v894_v32 = vrot.slane %v6849_v44, 6  ;;  %v2345_v51 = vperm.slane %v6849_v44, 0  ;;  %v180_v44 = vld [vmem:[%s14194_s0 + $0xb8] sm:$0xff] }
  0x8f   :  { %14856 = vst [vmem:[#allocation22_spill] sm:$0xff] %v6847_v27  ;;  %v6858_v48 = vld [vmem:[#allocation2 + $0x20] sm:$0xff] }
  0x90   :  { %25 = vst.msk [vmem:[#allocation2 + $0x10] sm:$0x3] %vm24_vm9, %v14215_v1  ;;  %v6864_v50 = vld [vmem:[#allocation2 + $0x48] sm:$0xff]  ;;  %v895_v6 = vrot.slane %v6858_v48, 2  ;;  %v14214_v19 = vrot.slane %v6858_v48, 4  ;;  %v14213_v23 = vrot.slane %v6858_v48, 6 }
  0x91   :  { %14857 = vst [vmem:[#allocation23_spill] sm:$0xff] %v6858_v48  ;;  %v6873_v3 = vld [vmem:[#allocation2 + $0x50] sm:$0xff]  ;;  %v14211_v5 = vrot.slane %v6864_v50, 2  ;;  %v14210_v8 = vrot.slane %v6864_v50, 4  ;;  %v14207_v17 = vrot.slane %v6864_v50, 6  ;;  %v6883_v18 = vperm.slane %v892_v31, 0 }
  0x92   :  { %276 = vst.msk [vmem:[#allocation2 + $0x61] sm:$0xff] %vm21_vm0, %v163_v39  ;;  %v14208_v25 = vrot.slane %v6873_v3, 2  ;;  %v14209_v26 = vrot.slane %v6873_v3, 4  ;;  %v14212_v33 = vrot.slane %v6873_v3, 6  ;;  %v6887_v35 = vperm.slane %v893_v49, 0 }
  0x93   :  { %14858 = vst [vmem:[#allocation24_spill] sm:$0xff] %v6864_v50  ;;  %v6891_v36 = vperm.slane %v894_v32, 0  ;;  %v2353_v39 = vperm.slane %v6864_v50, 0  ;;  %v6896_v20 = vperm.slane %v14211_v5, 0  ;;  %v6900_v41 = vperm.slane %v14210_v8, 0  ;;  %v172_v8 = vld [vmem:[%s14194_s0 + $0x78] sm:$0xff] }
  0x94   :  { %277 = vst.msk [vmem:[#allocation2 + $0x69] sm:$0xff] %vm21_vm0, %v164_v42  ;;  %v6904_v28 = vperm.slane %v14207_v17, 0  ;;  %v14219_v42 = vperm.slane %v6858_v48, 0  ;;  %v6917_v57 = vperm.slane %v895_v6, 0  ;;  %v6921_v54 = vperm.slane %v14208_v25, 0 }
  0x95   :  { %14859 = vst [vmem:[#allocation25_spill] sm:$0xff] %v6873_v3  ;;  %v2569_v53 = vsel %vm1302_vm2, %v6883_v18, %v2345_v51  ;;  %v2576_v34 = vsel %vm1302_vm2, %v6896_v20, %v2353_v39  ;;  %v6929_v59 = vperm.slane %v14214_v19, 0  ;;  %v6933_v62 = vperm.slane %v14209_v26, 0  ;;  %v171_v51 = vld [vmem:[%s14194_s0 + $0x70] sm:$0xff] }
  0x96   :  { %280 = vst.msk [vmem:[#allocation2 + $0x91] sm:$0xff] %vm21_vm0, %v167_v45  ;;  %v14217_v45 = vperm.slane %v6873_v3, 0  ;;  %v2570_v17 = vsel %vm1304_vm3, %v6887_v35, %v2569_v53  ;;  %v2577_v25 = vsel %vm1304_vm3, %v6900_v41, %v2576_v34  ;;  %v6946_v39 = vperm.slane %v14213_v23, 0 }
  0x97   :  { %97 = vst.msk [vmem:[#allocation2 + $0x11] sm:$0x1] %vm36_vm1, %v14215_v1  ;;  %v6950_v26 = vperm.slane %v14212_v33, 0  ;;  %v2571_v53 = vsel %vm1306_vm4, %v6891_v36, %v2570_v17  ;;  %v2578_v34 = vsel %vm1306_vm4, %v6904_v28, %v2577_v25  ;;  %v2070_v17 = vsel %vm1312_vm7, %v6847_v27, %v2069_v15 }
  0x98   :  { %28 = vst.msk [vmem:[#allocation2 + $0x2e0] sm:$0x3] %vm24_vm9, %v14215_v1  ;;  %v2572_v5 = vsel %vm1308_vm5, %v14219_v42, %v2571_v53  ;;  %v2579_v33 = vsel %vm1308_vm5, %v14217_v45, %v2578_v34  ;;  %v6969_v23 = vsel %vm1314_vm8, %v2038_v55, %v2077_v10  ;;  %v6982_v19 = vperm.slane %v892_v31, 1  ;;  %v176_v55 = vld [vmem:[%s14194_s0 + $0x98] sm:$0xff] }
  0x99   :  { %281 = vst.msk [vmem:[#allocation2 + $0x99] sm:$0xff] %vm21_vm0, %v168_v63  ;;  %v6971_v25 = vld [vmem:[#allocation2 + $0x60] sm:$0xff]  ;;  %v175_v63 = vld [vmem:[%s14194_s0 + $0x90] sm:$0xff]  ;;  %v2573_v53 = vsel %vm1310_vm6, %v6917_v57, %v2572_v5  ;;  %v2580_v34 = vsel %vm1310_vm6, %v6921_v54, %v2579_v33  ;;  %v6984_v15 = vperm.slane %v893_v49, 1  ;;  %v7001_v49 = vperm.slane %v894_v32, 1 }
  0x9a   :  { %14860 = vst [vmem:[#allocation26_spill] sm:$0xff] %v6969_v23  ;;  %v2574_v5 = vsel %vm1312_vm7, %v6929_v59, %v2573_v53  ;;  %v2581_v31 = vsel %vm1312_vm7, %v6933_v62, %v2580_v34  ;;  %v7003_v33 = vperm.slane %v895_v6, 1  ;;  %v14220_v34 = vrot.slane %v6971_v25, 2 }
  0x9b   :  { %127 = vst.msk [vmem:[#allocation2 + $0x2e1] sm:$0x1] %vm36_vm1, %v14215_v1  ;;  %v6986_v10 = vld [vmem:[#allocation2 + $0x68] sm:$0xff]  ;;  %v2582_v53 = vsel %vm1314_vm8, %v6950_v26, %v2581_v31  ;;  %v14221_v6 = vrot.slane %v6971_v25, 4  ;;  %v1549_v31 = vperm.slane %v6971_v25, 1 }
  0x9c   :  { %14861 = vst [vmem:[#allocation27_spill] sm:$0xff] %v6982_v19  ;;  %v179_v1 = vld [vmem:[%s14194_s0 + $0xb0] sm:$0xff]  ;;  %v14226_v24 = vrot.slane %v6986_v10, 2 }
  0x9d   :  { %14862 = vst [vmem:[#allocation28_spill] sm:$0xff] %v6984_v15  ;;  %v7005_v46 = vld [vmem:[#allocation2 + $0x90] sm:$0xff] }
  0x9e   :  { %284 = vst.msk [vmem:[#allocation2 + $0xc1] sm:$0xff] %vm21_vm0, %v171_v51  ;;  %v384_v0 = vld [vmem:[#allocation2 + $0x10] sm:$0x3]  ;;  %v2575_v51 = vsel %vm1314_vm8, %v6946_v39, %v2574_v5 }
  0x9f   :  { %14863 = vst [vmem:[#allocation29_spill] sm:$0xff] %v7001_v49  ;;  %v2037_v45 = vperm.slane %v384_v0, 0  ;;  %v5866_v32 = vpack.i.bf16 %v2582_v53, %v2575_v51  ;;  %v183_v0 = vld [vmem:[%s14194_s0 + $0xd0] sm:$0xff]  ;;  %v184_v53 = vld [vmem:[%s14194_s0 + $0xd8] sm:$0xff]  ;;  %v1553_v51 = vperm.slane %v6986_v10, 1 }
  0xa0   :  { %14864 = vst [vmem:[#allocation30_spill] sm:$0xff] %v7003_v33  ;;  %v7034_v42 = vld [vmem:[#allocation2 + $0x98] sm:$0xff] }
  0xa1   :  { %285 = vst.msk [vmem:[#allocation2 + $0xc9] sm:$0xff] %vm21_vm0, %v172_v8  ;;  %v14223_v8 = vrot.slane %v6971_v25, 6  ;;  %v2071_v5 = vsel %vm1314_vm8, %v2037_v45, %v2070_v17  ;;  %5867 = vrot.lane.b32.xlu1 %v5866_v32, %s6351_s10  ;;  %v1550_v32 = vperm.slane %v14220_v34, 1  ;;  %v14865_v34 = vrot.slane %v6986_v10, 4 }
  0xa2   :  { %288 = vst.msk [vmem:[#allocation2 + $0xf1] sm:$0xff] %vm21_vm0, %v175_v63  ;;  %v1554_v63 = vperm.slane %v14226_v24, 1  ;;  %v14869_v24 = vrot.slane %v7005_v46, 6 }
  0xa3   :  { %289 = vst.msk [vmem:[#allocation2 + $0xf9] sm:$0xff] %vm21_vm0, %v176_v55  ;;  %v5861_v55 = vpack.i.bf16 %v6969_v23, %v2071_v5  ;;  %v1551_v5 = vperm.slane %v14221_v6, 1  ;;  %v14867_v6 = vrot.slane %v7005_v46, 2  ;;  %v1771_v43 = vsel %vm1302_vm2, %v1550_v32, %v1549_v31 }
  0xa4   :  { %292 = vst.msk [vmem:[#allocation2 + $0x121] sm:$0xff] %vm21_vm0, %v179_v1  ;;  %v1555_v1 = vperm.slane %v14865_v34, 1  ;;  %v1560_v33 = vperm.slane %v14869_v24, 1  ;;  %v14870_v34 = vrot.slane %v7034_v42, 2 }
  0xa5   :  { %293 = vst.msk [vmem:[#allocation2 + $0x129] sm:$0xff] %vm21_vm0, %v180_v44  ;;  %5862 = vrot.lane.b32.xlu0 %v5861_v55, %s6352_s11  ;;  %v1552_v44 = vperm.slane %v14223_v8, 1  ;;  %v1557_v55 = vperm.slane %v7005_v46, 1  ;;  %v1558_v45 = vperm.slane %v14867_v6, 1  ;;  %v7062_v23 = vld [vmem:[#allocation2 + $0xc0] sm:$0xff]  ;;  %v14868_v8 = vrot.slane %v7005_v46, 4 }
  0xa6   :  { %296 = vst.msk [vmem:[#allocation2 + $0x151] sm:$0xff] %vm21_vm0, %v183_v0  ;;  %v14866_v0 = vrot.slane %v6986_v10, 6  ;;  %v1562_v49 = vperm.slane %v14870_v34, 1  ;;  %v14873_v6 = vrot.slane %v7034_v42, 6  ;;  %v1772_v38 = vsel %vm1304_vm3, %v1551_v5, %v1771_v43 }
  0xa7   :  { %297 = vst.msk [vmem:[#allocation2 + $0x159] sm:$0xff] %vm21_vm0, %v184_v53  ;;  %v1559_v52 = vperm.slane %v14868_v8, 1  ;;  %v1561_v53 = vperm.slane %v7034_v42, 1  ;;  %v1778_v8 = vsel %vm1302_vm2, %v1558_v45, %v1557_v55  ;;  %v664_v34 = vrot.slane %v7062_v23, 2 }
  0xa8   :  { %v1556_v17 = vperm.slane %v14866_v0, 1  ;;  %v7071_v15 = vld [vmem:[#allocation2 + $0xc8] sm:$0xff]  ;;  %v14872_v0 = vrot.slane %v7034_v42, 4  ;;  %v1564_v27 = vperm.slane %v14873_v6, 1  ;;  %v665_v21 = vrot.slane %v7062_v23, 4 }
  0xa9   :  { %14871 = vst [vmem:[#allocation31_spill] sm:$0xff] %v7071_v15  ;;  %v1779_v24 = vsel %vm1304_vm3, %v1559_v52, %v1778_v8  ;;  %v7081_v22 = vld [vmem:[#allocation2 + $0xf0] sm:$0xff]  ;;  %v1773_v13 = vsel %vm1306_vm4, %v1552_v44, %v1772_v38  ;;  %v666_v31 = vrot.slane %v7062_v23, 6  ;;  %v667_v45 = vrot.slane %v7071_v15, 2 }
  0xaa   :  { %v1563_v19 = vperm.slane %v14872_v0, 1  ;;  %v1780_v0 = vsel %vm1306_vm4, %v1560_v33, %v1779_v24  ;;  %v7087_v14 = vld [vmem:[#allocation2 + $0xf8] sm:$0xff]  ;;  %v1774_v43 = vsel %vm1308_vm5, %v1553_v51, %v1773_v13  ;;  %v668_v32 = vrot.slane %v7071_v15, 4 }
  0xab   :  { %14874 = vst [vmem:[#allocation32_spill] sm:$0xff] %v7087_v14  ;;  %v1781_v52 = vsel %vm1308_vm5, %v1561_v53, %v1780_v0  ;;  %v669_v5 = vrot.slane %v7071_v15, 6  ;;  %v1775_v55 = vsel %vm1310_vm6, %v1554_v63, %v1774_v43  ;;  %v670_v33 = vrot.slane %v7081_v22, 2 }
  0xac   :  { %v1782_v38 = vsel %vm1310_vm6, %v1562_v49, %v1781_v52  ;;  %v671_v44 = vrot.slane %v7081_v22, 4  ;;  %v1776_v6 = vsel %vm1312_vm7, %v1555_v1, %v1775_v55  ;;  %v672_v13 = vrot.slane %v7081_v22, 6  ;;  %v187_v1 = vld [vmem:[%s14194_s0 + $0xf0] sm:$0xff] }
  0xad   :  { %v1783_v8 = vsel %vm1312_vm7, %v1563_v19, %v1782_v38  ;;  %v673_v51 = vrot.slane %v7087_v14, 2  ;;  %v7104_v53 = vsel %vm1314_vm8, %v1556_v17, %v1776_v6  ;;  %v674_v49 = vrot.slane %v7087_v14, 4  ;;  %300 = vst.msk [vmem:[#allocation2 + $0x181] sm:$0xff] %vm21_vm0, %v187_v1 }
  0xae   :  { %14875 = vst [vmem:[#allocation33_spill] sm:$0xff] %v7104_v53  ;;  %v7107_v24 = vsel %vm1314_vm8, %v1564_v27, %v1783_v8  ;;  %v675_v63 = vrot.slane %v7087_v14, 6  ;;  %v1565_v0 = vperm.slane %v7062_v23, 1  ;;  %v1566_v43 = vperm.slane %v664_v34, 1 }
  0xaf   :  { %14876 = vst [vmem:[#allocation34_spill] sm:$0xff] %v7107_v24  ;;  %v5871_v19 = vpack.i.bf16 %v7107_v24, %v7104_v53  ;;  %v1567_v52 = vperm.slane %v665_v21, 1  ;;  %v1568_v17 = vperm.slane %v666_v31, 1  ;;  %v1569_v27 = vperm.slane %v7071_v15, 1 }
  0xb0   :  { %v1570_v55 = vperm.slane %v667_v45, 1  ;;  %v1571_v38 = vperm.slane %v668_v32, 1  ;;  %v1572_v6 = vperm.slane %v669_v5, 1  ;;  %v1573_v8 = vperm.slane %v7081_v22, 1 }
  0xb1   :  { %5872 = vrot.lane.b32.xlu1 %v5871_v19, %s6350_s26  ;;  %v1574_v50 = vperm.slane %v670_v33, 1  ;;  %v1575_v29 = vperm.slane %v671_v44, 1  ;;  %v1576_v16 = vperm.slane %v672_v13, 1  ;;  %v1577_v11 = vperm.slane %v7087_v14, 1  ;;  %v188_v19 = vld [vmem:[%s14194_s0 + $0xf8] sm:$0xff] }
  0xb2   :  { %v1578_v23 = vperm.slane %v673_v51, 1  ;;  %v1579_v60 = vperm.slane %v674_v49, 1  ;;  %v1580_v61 = vperm.slane %v675_v63, 1  ;;  %v1785_v1 = vsel %vm1302_vm2, %v1566_v43, %v1565_v0  ;;  %301 = vst.msk [vmem:[#allocation2 + $0x189] sm:$0xff] %vm21_vm0, %v188_v19 }
  0xb3   :  { %v1792_v58 = vsel %vm1302_vm2, %v1574_v50, %v1573_v8  ;;  %v7124_v56 = vperm.slane %v664_v34, 0  ;;  %v1786_v22 = vsel %vm1304_vm3, %v1567_v52, %v1785_v1  ;;  %v7131_v53 = vperm.slane %v665_v21, 0  ;;  %v408_v1 = vld [vmem:[#allocation2 + $0xd0] sm:$0x3] }
  0xb4   :  { %v1793_v24 = vsel %vm1304_vm3, %v1575_v29, %v1792_v58  ;;  %v7133_v47 = vperm.slane %v666_v31, 0  ;;  %v1787_v0 = vsel %vm1306_vm4, %v1568_v17, %v1786_v22  ;;  %v14248_v34 = vperm.slane %v7071_v15, 0  ;;  %v165_v29 = vld [vmem:[%s14194_s0 + $0x40] sm:$0xff]  ;;  %v7165_v22 = vld [vmem:[#allocation2 + $0x120] sm:$0xff] }
  0xb5   :  { %14877 = vst [vmem:[#allocation35_spill] sm:$0xff] %v7124_v56  ;;  %v1794_v50 = vsel %vm1306_vm4, %v1576_v16, %v1793_v24  ;;  %v7139_v43 = vperm.slane %v667_v45, 0  ;;  %v1788_v8 = vsel %vm1308_vm5, %v1569_v27, %v1787_v0  ;;  %v7143_v58 = vperm.slane %v668_v32, 0  ;;  %v169_v16 = vld [vmem:[%s14194_s0 + $0x60] sm:$0xff]  ;;  %v414_v24 = vld [vmem:[#allocation2 + $0x100] sm:$0x3] }
  0xb6   :  { %14878 = vst [vmem:[#allocation36_spill] sm:$0xff] %v7131_v53  ;;  %v1795_v52 = vsel %vm1308_vm5, %v1577_v11, %v1794_v50  ;;  %v7145_v21 = vperm.slane %v669_v5, 0  ;;  %v1789_v31 = vsel %vm1310_vm6, %v1570_v55, %v1788_v8  ;;  %v7155_v17 = vperm.slane %v670_v33, 0 }
  0xb7   :  { %14879 = vst [vmem:[#allocation37_spill] sm:$0xff] %v7133_v47  ;;  %v1796_v45 = vsel %vm1310_vm6, %v1578_v23, %v1795_v52  ;;  %v7157_v11 = vperm.slane %v671_v44, 0  ;;  %v1790_v32 = vsel %vm1312_vm7, %v1571_v38, %v1789_v31  ;;  %v7162_v27 = vperm.slane %v672_v13, 0  ;;  %v7178_v38 = vld [vmem:[#allocation2 + $0x128] sm:$0xff] }
  0xb8   :  { %14880 = vst [vmem:[#allocation38_spill] sm:$0xff] %v7139_v43  ;;  %v1797_v5 = vsel %vm1312_vm7, %v1579_v60, %v1796_v45  ;;  %v14247_v19 = vperm.slane %v7087_v14, 0  ;;  %v7169_v55 = vsel %vm1314_vm8, %v1572_v6, %v1790_v32  ;;  %v7174_v44 = vperm.slane %v673_v51, 0  ;;  %v166_v6 = vld [vmem:[%s14194_s0 + $0x48] sm:$0xff] }
  0xb9   :  { %14881 = vst [vmem:[#allocation39_spill] sm:$0xff] %v7143_v58  ;;  %v7172_v33 = vsel %vm1314_vm8, %v1580_v61, %v1797_v5  ;;  %v7176_v23 = vperm.slane %v674_v49, 0  ;;  %v7182_v13 = vperm.slane %v675_v63, 0  ;;  %v2041_v0 = vperm.slane %v408_v1, 0  ;;  %v170_v61 = vld [vmem:[%s14194_s0 + $0x68] sm:$0xff]  ;;  %v7196_v63 = vld [vmem:[#allocation2 + $0x150] sm:$0xff] }
  0xba   :  { %14882 = vst [vmem:[#allocation40_spill] sm:$0xff] %v7145_v21  ;;  %v5886_v60 = vpack.i.bf16 %v7172_v33, %v7169_v55  ;;  %v2042_v50 = vperm.slane %v414_v24, 0  ;;  %v2093_v51 = vsel %vm1302_vm2, %v7131_v53, %v7124_v56  ;;  %v2100_v49 = vsel %vm1302_vm2, %v7157_v11, %v7155_v17 }
  0xbb   :  { %14883 = vst [vmem:[#allocation41_spill] sm:$0xff] %v7155_v17  ;;  %v676_v8 = vrot.slane %v7165_v22, 2  ;;  %v677_v52 = vrot.slane %v7165_v22, 4  ;;  %v2094_v1 = vsel %vm1304_vm3, %v7133_v47, %v2093_v51  ;;  %v678_v31 = vrot.slane %v7165_v22, 6 }
  0xbc   :  { %14884 = vst [vmem:[#allocation42_spill] sm:$0xff] %v7157_v11  ;;  %5887 = vrot.lane.b32.xlu0 %v5886_v60, %s6350_s26  ;;  %v679_v45 = vrot.slane %v7178_v38, 2  ;;  %v2095_v24 = vsel %vm1306_vm4, %v14248_v34, %v2094_v1  ;;  %v680_v5 = vrot.slane %v7178_v38, 4  ;;  %v681_v60 = vrot.slane %v7178_v38, 6 }
  0xbd   :  { %278 = vst.msk [vmem:[#allocation2 + $0x79] sm:$0xff] %vm21_vm0, %v165_v29  ;;  %v2101_v29 = vsel %vm1304_vm3, %v7162_v27, %v2100_v49  ;;  %v683_v49 = vrot.slane %v7196_v63, 4  ;;  %v7253_v15 = vperm.slane %v676_v8, 0  ;;  %v7255_v47 = vperm.slane %v677_v52, 0 }
  0xbe   :  { %14885 = vst [vmem:[#allocation43_spill] sm:$0xff] %v7162_v27  ;;  %v2102_v32 = vsel %vm1306_vm4, %v14247_v19, %v2101_v29  ;;  %v684_v19 = vrot.slane %v7196_v63, 6  ;;  %v1584_v27 = vperm.slane %v678_v31, 1  ;;  %v1587_v11 = vperm.slane %v680_v5, 1 }
  0xbf   :  { %282 = vst.msk [vmem:[#allocation2 + $0xa9] sm:$0xff] %vm21_vm0, %v169_v16  ;;  %v7206_v16 = vld [vmem:[#allocation2 + $0x158] sm:$0xff]  ;;  %v2103_v51 = vsel %vm1308_vm5, %v7174_v44, %v2102_v32  ;;  %v1588_v17 = vperm.slane %v681_v60, 1  ;;  %v7262_v56 = vperm.slane %v678_v31, 0 }
  0xc0   :  { %14886 = vst [vmem:[#allocation44_spill] sm:$0xff] %v7169_v55  ;;  %v2104_v29 = vsel %vm1310_vm6, %v7176_v23, %v2103_v51  ;;  %v685_v34 = vrot.slane %v7206_v16, 2  ;;  %v687_v55 = vrot.slane %v7206_v16, 6  ;;  %v1581_v51 = vperm.slane %v7165_v22, 1 }
  0xc1   :  { %14887 = vst [vmem:[#allocation45_spill] sm:$0xff] %v7172_v33  ;;  %v2105_v32 = vsel %vm1312_vm7, %v7182_v13, %v2104_v29  ;;  %v686_v33 = vrot.slane %v7206_v16, 4  ;;  %v1585_v29 = vperm.slane %v7178_v38, 1  ;;  %v1593_v22 = vperm.slane %v7206_v16, 1 }
  0xc2   :  { %14888 = vst [vmem:[#allocation46_spill] sm:$0xff] %v7174_v44 }
  0xc3   :  { %14889 = vst [vmem:[#allocation47_spill] sm:$0xff] %v7176_v23  ;;  %v1582_v23 = vperm.slane %v676_v8, 1  ;;  %v1595_v37 = vperm.slane %v686_v33, 1 }
  0xc4   :  { %14890 = vst [vmem:[#allocation48_spill] sm:$0xff] %v7178_v38 }
  0xc5   :  { %14891 = vst [vmem:[#allocation49_spill] sm:$0xff] %v7182_v13  ;;  %v1586_v13 = vperm.slane %v679_v45, 1 }
  0xc6   :  { %279 = vst.msk [vmem:[#allocation2 + $0x81] sm:$0xff] %vm21_vm0, %v166_v6  ;;  %v2096_v6 = vsel %vm1308_vm5, %v7139_v43, %v2095_v24 }
  0xc7   :  { %14892 = vst [vmem:[#allocation50_spill] sm:$0xff] %v7206_v16  ;;  %v2097_v1 = vsel %vm1310_vm6, %v7143_v58, %v2096_v6  ;;  %v7241_v6 = vsel %vm1314_vm8, %v2042_v50, %v2105_v32  ;;  %v1591_v50 = vperm.slane %v683_v49, 1  ;;  %v1594_v32 = vperm.slane %v685_v34, 1 }
  0xc8   :  { %283 = vst.msk [vmem:[#allocation2 + $0xb1] sm:$0xff] %vm21_vm0, %v170_v61  ;;  %v682_v61 = vrot.slane %v7196_v63, 2  ;;  %v2098_v24 = vsel %vm1312_vm7, %v7145_v21, %v2097_v1  ;;  %v1583_v1 = vperm.slane %v677_v52, 1  ;;  %v1589_v21 = vperm.slane %v7196_v63, 1 }
  0xc9   :  { %v7238_v44 = vsel %vm1314_vm8, %v2041_v0, %v2098_v24  ;;  %14894 = vst [vmem:[#allocation52_spill] sm:$0xff] %v7241_v6  ;;  %v1592_v24 = vperm.slane %v684_v19, 1  ;;  %v1596_v58 = vperm.slane %v687_v55, 1  ;;  %v7268_v52 = vperm.slane %v679_v45, 0 }
  0xca   :  { %14893 = vst [vmem:[#allocation51_spill] sm:$0xff] %v7238_v44  ;;  %v5891_v14 = vpack.i.bf16 %v7241_v6, %v7238_v44  ;;  %v1590_v0 = vperm.slane %v682_v61, 1  ;;  %v1799_v6 = vsel %vm1302_vm2, %v1582_v23, %v1581_v51  ;;  %v14269_v23 = vperm.slane %v7178_v38, 0 }
  0xcb   :  { %v1800_v44 = vsel %vm1304_vm3, %v1583_v1, %v1799_v6  ;;  %14895 = vst [vmem:[#allocation53_spill] sm:$0xff] %v7253_v15  ;;  %v7270_v6 = vperm.slane %v680_v5, 0  ;;  %v7276_v31 = vperm.slane %v682_v61, 0  ;;  %v7292_v61 = vperm.slane %v685_v34, 0 }
  0xcc   :  { %5892 = vrot.lane.b32.xlu1 %v5891_v14, %s6352_s11  ;;  %v1806_v43 = vsel %vm1302_vm2, %v1590_v0, %v1589_v21  ;;  %14896 = vst [vmem:[#allocation54_spill] sm:$0xff] %v7255_v47  ;;  %v191_v14 = vld [vmem:[%s14194_s0 + $0x110] sm:$0xff]  ;;  %v1801_v63 = vsel %vm1306_vm4, %v1584_v27, %v1800_v44  ;;  %v420_v44 = vld [vmem:[#allocation2 + $0x130] sm:$0x3] }
  0xcd   :  { %v1807_v53 = vsel %vm1304_vm3, %v1591_v50, %v1806_v43  ;;  %14897 = vst [vmem:[#allocation55_spill] sm:$0xff] %v7262_v56  ;;  %v1802_v21 = vsel %vm1308_vm5, %v1585_v29, %v1801_v63  ;;  %v7274_v43 = vperm.slane %v681_v60, 0  ;;  %v426_v29 = vld [vmem:[#allocation2 + $0x160] sm:$0x3]  ;;  %v7280_v50 = vperm.slane %v683_v49, 0 }
  0xce   :  { %304 = vst.msk [vmem:[#allocation2 + $0x1b1] sm:$0xff] %vm21_vm0, %v191_v14  ;;  %v1808_v8 = vsel %vm1306_vm4, %v1592_v24, %v1807_v53  ;;  %v1803_v51 = vsel %vm1310_vm6, %v1586_v13, %v1802_v21  ;;  %v7282_v53 = vperm.slane %v684_v19, 0  ;;  %v192_v13 = vld [vmem:[%s14194_s0 + $0x118] sm:$0xff]  ;;  %v14268_v60 = vperm.slane %v7206_v16, 0 }
  0xcf   :  { %14898 = vst [vmem:[#allocation56_spill] sm:$0xff] %v7268_v52  ;;  %v1809_v27 = vsel %vm1308_vm5, %v1593_v22, %v1808_v8  ;;  %v1804_v1 = vsel %vm1312_vm7, %v1587_v11, %v1803_v51  ;;  %v7298_v19 = vperm.slane %v686_v33, 0  ;;  %v7300_v49 = vperm.slane %v687_v55, 0 }
  0xd0   :  { %14899 = vst [vmem:[#allocation57_spill] sm:$0xff] %v7270_v6  ;;  %v1810_v0 = vsel %vm1310_vm6, %v1594_v32, %v1809_v27  ;;  %v7288_v45 = vsel %vm1314_vm8, %v1588_v17, %v1804_v1  ;;  %v2043_v24 = vperm.slane %v420_v44, 0  ;;  %v2044_v22 = vperm.slane %v426_v29, 0  ;;  %v173_v1 = vld [vmem:[%s14194_s0 + $0x80] sm:$0xff] }
  0xd1   :  { %14900 = vst [vmem:[#allocation58_spill] sm:$0xff] %v7274_v43  ;;  %v1811_v5 = vsel %vm1312_vm7, %v1595_v37, %v1810_v0  ;;  %v2107_v37 = vsel %vm1302_vm2, %v7255_v47, %v7253_v15  ;;  %v2114_v34 = vsel %vm1302_vm2, %v7280_v50, %v7276_v31  ;;  %v14909_v33 = vrot.slane %v6971_v25, 2  ;;  %v177_v0 = vld [vmem:[%s14194_s0 + $0xa0] sm:$0xff] }
  0xd2   :  { %14901 = vst [vmem:[#allocation59_spill] sm:$0xff] %v7276_v31  ;;  %v7296_v11 = vsel %vm1314_vm8, %v1596_v58, %v1811_v5  ;;  %v2108_v58 = vsel %vm1304_vm3, %v7262_v56, %v2107_v37  ;;  %v2115_v55 = vsel %vm1304_vm3, %v7282_v53, %v2114_v34  ;;  %v14910_v14 = vrot.slane %v6971_v25, 4 }
  0xd3   :  { %14902 = vst [vmem:[#allocation60_spill] sm:$0xff] %v7280_v50  ;;  %v5901_v17 = vpack.i.bf16 %v7296_v11, %v7288_v45  ;;  %v7316_v32 = vperm.slane %v14909_v33, 0  ;;  %v2109_v21 = vsel %vm1306_vm4, %v14269_v23, %v2108_v58  ;;  %v2116_v8 = vsel %vm1306_vm4, %v14268_v60, %v2115_v55  ;;  %v396_v33 = vld [vmem:[#allocation2 + $0x70] sm:$0x3]  ;;  %v430_v23 = vld [vmem:[#allocation2 + $0x180] sm:$0xff] }
  0xd4   :  { %14903 = vst [vmem:[#allocation61_spill] sm:$0xff] %v7282_v53  ;;  %v7320_v63 = vperm.slane %v14910_v14, 0  ;;  %v14911_v51 = vrot.slane %v6971_v25, 6  ;;  %v2110_v29 = vsel %vm1308_vm5, %v7268_v52, %v2109_v21  ;;  %v14912_v5 = vrot.slane %v6986_v10, 2 }
  0xd5   :  { %14904 = vst [vmem:[#allocation62_spill] sm:$0xff] %v7288_v45  ;;  %5902 = vrot.lane.b32.xlu0 %v5901_v17, %s6350_s26  ;;  %v14913_v37 = vrot.slane %v6986_v10, 4  ;;  %v2111_v58 = vsel %vm1310_vm6, %v7270_v6, %v2110_v29  ;;  %v14914_v14 = vrot.slane %v6986_v10, 6  ;;  %v1597_v53 = vperm.slane %v430_v23, 1 }
  0xd6   :  { %14905 = vst [vmem:[#allocation63_spill] sm:$0xff] %v7292_v61  ;;  %v7331_v27 = vperm.slane %v14911_v51, 0  ;;  %v7346_v17 = vperm.slane %v14912_v5, 0  ;;  %v402_v5 = vld [vmem:[#allocation2 + $0xa0] sm:$0x3]  ;;  %v2079_v45 = vsel %vm1302_vm2, %v7320_v63, %v7316_v32  ;;  %v3325_v47 = vsel %vm1302_vm2, %v6887_v35, %v6883_v18 }
  0xd7   :  { %305 = vst.msk [vmem:[#allocation2 + $0x1b9] sm:$0xff] %vm21_vm0, %v192_v13  ;;  %v2117_v13 = vsel %vm1308_vm5, %v7292_v61, %v2116_v8  ;;  %v7350_v34 = vperm.slane %v14913_v37, 0  ;;  %v7359_v21 = vperm.slane %v14914_v14, 0  ;;  %v14915_v8 = vrot.slane %v7005_v46, 2 }
  0xd8   :  { %14906 = vst [vmem:[#allocation64_spill] sm:$0xff] %v7296_v11  ;;  %v2118_v55 = vsel %vm1310_vm6, %v7298_v19, %v2117_v13  ;;  %v14916_v13 = vrot.slane %v7005_v46, 4  ;;  %v14917_v14 = vrot.slane %v7005_v46, 6  ;;  %v178_v46 = vld [vmem:[%s14194_s0 + $0xa8] sm:$0xff]  ;;  %v2040_v11 = vperm.slane %v402_v5, 0 }
  0xd9   :  { %14907 = vst [vmem:[#allocation65_spill] sm:$0xff] %v7298_v19  ;;  %v7363_v51 = vperm.slane %v14915_v8, 0  ;;  %v2119_v29 = vsel %vm1312_vm7, %v7300_v49, %v2118_v55  ;;  %v14920_v55 = vrot.slane %v7034_v42, 2  ;;  %v689_v5 = vrot.slane %v430_v23, 4 }
  0xda   :  { %14908 = vst [vmem:[#allocation66_spill] sm:$0xff] %v7300_v49  ;;  %v7372_v37 = vperm.slane %v14916_v13, 0  ;;  %v7376_v60 = vperm.slane %v14917_v14, 0  ;;  %v174_v13 = vld [vmem:[%s14194_s0 + $0x88] sm:$0xff]  ;;  %v14925_v19 = vperm.slane %v7034_v42, 0  ;;  %v14930_v18 = vperm.slane %v6858_v48, 0 }
  0xdb   :  { %286 = vst.msk [vmem:[#allocation2 + $0xd9] sm:$0xff] %vm21_vm0, %v173_v1  ;;  %v2112_v1 = vsel %vm1312_vm7, %v7274_v43, %v2111_v58  ;;  %v7387_v44 = vperm.slane %v14920_v55, 0  ;;  %v2039_v55 = vperm.slane %v396_v33, 0  ;;  %v7405_v58 = vld [vmem:[#allocation2 + $0x188] sm:$0xff]  ;;  %v2080_v33 = vsel %vm1304_vm3, %v7331_v27, %v2079_v45 }
  0xdc   :  { %290 = vst.msk [vmem:[#allocation2 + $0x109] sm:$0xff] %vm21_vm0, %v177_v0  ;;  %v7379_v8 = vsel %vm1314_vm8, %v2043_v24, %v2112_v1  ;;  %v7382_v0 = vsel %vm1314_vm8, %v2044_v22, %v2119_v29  ;;  %v14921_v22 = vrot.slane %v7034_v42, 4  ;;  %v14922_v29 = vrot.slane %v7034_v42, 6 }
  0xdd   :  { %14918 = vst [vmem:[#allocation67_spill] sm:$0xff] %v7379_v8  ;;  %v5906_v24 = vpack.i.bf16 %v7382_v0, %v7379_v8  ;;  %v14924_v8 = vperm.slane %v6986_v10, 0  ;;  %v693_v16 = vrot.slane %v7405_v58, 6  ;;  %v1599_v50 = vperm.slane %v689_v5, 1 }
  0xde   :  { %14919 = vst [vmem:[#allocation68_spill] sm:$0xff] %v7382_v0  ;;  %v7399_v1 = vperm.slane %v14921_v22, 0  ;;  %v7403_v14 = vperm.slane %v14922_v29, 0  ;;  %v2086_v0 = vsel %vm1302_vm2, %v7372_v37, %v7363_v51  ;;  %v688_v22 = vrot.slane %v430_v23, 2 }
  0xdf   :  { %14923 = vst [vmem:[#allocation69_spill] sm:$0xff] %v7405_v58  ;;  %5907 = vrot.lane.b32.xlu1 %v5906_v24, %s6352_s11  ;;  %v690_v29 = vrot.slane %v430_v23, 6  ;;  %v2081_v49 = vsel %vm1306_vm4, %v14924_v8, %v2080_v33  ;;  %v692_v24 = vrot.slane %v7405_v58, 4  ;;  %v1604_v38 = vperm.slane %v693_v16, 1 }
  0xe0   :  { %287 = vst.msk [vmem:[#allocation2 + $0xe1] sm:$0xff] %vm21_vm0, %v174_v13  ;;  %v2087_v13 = vsel %vm1304_vm3, %v7376_v60, %v2086_v0  ;;  %v2082_v45 = vsel %vm1308_vm5, %v7346_v17, %v2081_v49  ;;  %v7455_v15 = vperm.slane %v688_v22, 0 }
  0xe1   :  { %291 = vst.msk [vmem:[#allocation2 + $0x111] sm:$0xff] %vm21_vm0, %v178_v46  ;;  %v2088_v61 = vsel %vm1306_vm4, %v14925_v19, %v2087_v13  ;;  %v691_v46 = vrot.slane %v7405_v58, 2  ;;  %v2083_v8 = vsel %vm1310_vm6, %v7350_v34, %v2082_v45  ;;  %v387_v19 = vld [vmem:[#allocation2 + $0x28] sm:$0x3]  ;;  %v1598_v13 = vperm.slane %v688_v22, 1 }
  0xe2   :  { %v2089_v0 = vsel %vm1308_vm5, %v7387_v44, %v2088_v61  ;;  %v2084_v31 = vsel %vm1312_vm7, %v7359_v21, %v2083_v8  ;;  %v1600_v43 = vperm.slane %v690_v29, 1  ;;  %v1601_v61 = vperm.slane %v7405_v58, 1 }
  0xe3   :  { %v2090_v33 = vsel %vm1310_vm6, %v7399_v1, %v2089_v0  ;;  %v7443_v23 = vsel %vm1314_vm8, %v2039_v55, %v2084_v31  ;;  %v1602_v6 = vperm.slane %v691_v46, 1  ;;  %v1603_v0 = vperm.slane %v692_v24, 1  ;;  %v6238_v31 = vld [vmem:[#allocation2 + $0x30] sm:$0xff] }
  0xe4   :  { %v2091_v49 = vsel %vm1312_vm7, %v7403_v14, %v2090_v33  ;;  %14926 = vst [vmem:[#allocation70_spill] sm:$0xff] %v7443_v23  ;;  %v1813_v8 = vsel %vm1302_vm2, %v1598_v13, %v1597_v53  ;;  %v3297_v56 = vperm.slane %v387_v19, 0  ;;  %v1086_v55 = vperm.slane %v6238_v31, 0 }
  0xe5   :  { %v7446_v45 = vsel %vm1314_vm8, %v2040_v11, %v2091_v49  ;;  %v1814_v33 = vsel %vm1304_vm3, %v1599_v50, %v1813_v8  ;;  %v3326_v49 = vsel %vm1304_vm3, %v6891_v36, %v3325_v47  ;;  %v7461_v53 = vperm.slane %v689_v5, 0 }
  0xe6   :  { %14927 = vst [vmem:[#allocation71_spill] sm:$0xff] %v7446_v45  ;;  %v5876_v52 = vpack.i.bf16 %v7446_v45, %v7443_v23  ;;  %v1815_v11 = vsel %vm1306_vm4, %v1600_v43, %v1814_v33  ;;  %v432_v45 = vld [vmem:[#allocation2 + $0x190] sm:$0x3]  ;;  %v7463_v19 = vperm.slane %v690_v29, 0  ;;  %v3327_v35 = vsel %vm1306_vm4, %v14930_v18, %v3326_v49  ;;  %v7482_v29 = vld [vmem:[#allocation2 + $0x78] sm:$0xff] }
  0xe7   :  { %14928 = vst [vmem:[#allocation72_spill] sm:$0xff] %v7461_v53  ;;  %v1816_v50 = vsel %vm1308_vm5, %v1601_v61, %v1815_v11  ;;  %v14300_v22 = vperm.slane %v7405_v58, 0  ;;  %v7470_v13 = vperm.slane %v691_v46, 0  ;;  %v3328_v36 = vsel %vm1308_vm5, %v6917_v57, %v3327_v35  ;;  %v7526_v18 = vld [vmem:[#allocation2 + $0xb0] sm:$0xff] }
  0xe8   :  { %5877 = vrot.lane.b32.xlu2 %v5876_v52, %s6352_s11  ;;  %14929 = vst [vmem:[#allocation73_spill] sm:$0xff] %v7463_v19  ;;  %v195_v52 = vld [vmem:[%s14194_s0 + $0x130] sm:$0xff]  ;;  %v1817_v47 = vsel %vm1310_vm6, %v1602_v6, %v1816_v50  ;;  %v7478_v43 = vperm.slane %v692_v24, 0  ;;  %v7480_v5 = vperm.slane %v693_v16, 0  ;;  %v3329_v61 = vsel %vm1310_vm6, %v6929_v59, %v3328_v36 }
  0xe9   :  { %14931 = vst [vmem:[#allocation74_spill] sm:$0xff] %v7470_v13  ;;  %v1818_v46 = vsel %vm1312_vm7, %v1603_v0, %v1817_v47  ;;  %v1316_v8 = vsel %vm1302_vm2, %v6724_v4, %v1086_v55  ;;  %v2045_v6 = vperm.slane %v432_v45, 0  ;;  %v3330_v57 = vsel %vm1312_vm7, %v6946_v39, %v3329_v61  ;;  %v7500_v0 = vld [vmem:[#allocation2 + $0x80] sm:$0xff] }
  0xea   :  { %14932 = vst [vmem:[#allocation75_spill] sm:$0xff] %v7478_v43  ;;  %v7491_v33 = vsel %vm1314_vm8, %v1604_v38, %v1818_v46  ;;  %v1317_v16 = vsel %vm1304_vm3, %v6716_v2, %v1316_v8  ;;  %v2121_v24 = vsel %vm1302_vm2, %v7461_v53, %v7455_v15  ;;  %v3331_v59 = vsel %vm1314_vm8, %v3297_v56, %v3330_v57  ;;  %v196_v2 = vld [vmem:[%s14194_s0 + $0x138] sm:$0xff] }
  0xeb   :  { %14933 = vst [vmem:[#allocation76_spill] sm:$0xff] %v7480_v5  ;;  %v1318_v4 = vsel %vm1306_vm4, %v6737_v7, %v1317_v16  ;;  %v2122_v38 = vsel %vm1304_vm3, %v7463_v19, %v2121_v24  ;;  %v14298_v45 = vrot.slane %v7482_v29, 2  ;;  %v5916_v39 = vpack.i.bf16 %v7491_v33, %v3331_v59  ;;  %v7518_v7 = vld [vmem:[#allocation2 + $0xa8] sm:$0xff]  ;;  %v185_v16 = vld [vmem:[%s14194_s0 + $0xe0] sm:$0xff] }
  0xec   :  { %14934 = vst [vmem:[#allocation77_spill] sm:$0xff] %v7482_v29  ;;  %v14937_v31 = vperm.slane %v6421_v9, 0  ;;  %v2123_v56 = vsel %vm1306_vm4, %v14300_v22, %v2122_v38  ;;  %v14296_v11 = vrot.slane %v7482_v29, 4  ;;  %v14293_v9 = vrot.slane %v7482_v29, 6 }
  0xed   :  { %308 = vst.msk [vmem:[#allocation2 + $0x1e1] sm:$0xff] %vm21_vm0, %v195_v52  ;;  %v2124_v50 = vsel %vm1308_vm5, %v7470_v13, %v2123_v56  ;;  %v14291_v35 = vrot.slane %v7500_v0, 2  ;;  %5917 = vrot.lane.b32.xlu0 %v5916_v39, %s6350_s26  ;;  %v14289_v36 = vrot.slane %v7500_v0, 4  ;;  %v14292_v8 = vrot.slane %v7518_v7, 2 }
  0xee   :  { %14935 = vst [vmem:[#allocation78_spill] sm:$0xff] %v7491_v33  ;;  %v1319_v55 = vsel %vm1308_vm5, %v14937_v31, %v1318_v4  ;;  %v2125_v47 = vsel %vm1310_vm6, %v7478_v43, %v2124_v50  ;;  %v14294_v57 = vrot.slane %v7518_v7, 4  ;;  %v14297_v59 = vrot.slane %v7526_v18, 2  ;;  %v436_v50 = vld [vmem:[#allocation2 + $0x1b0] sm:$0xff] }
  0xef   :  { %14936 = vst [vmem:[#allocation79_spill] sm:$0xff] %v7500_v0  ;;  %v1320_v49 = vsel %vm1310_vm6, %v6798_v30, %v1319_v55  ;;  %v14290_v30 = vrot.slane %v7500_v0, 6  ;;  %v2126_v61 = vsel %vm1312_vm7, %v7480_v5, %v2125_v47  ;;  %v14299_v4 = vrot.slane %v7526_v18, 4 }
  0xf0   :  { %14938 = vst [vmem:[#allocation80_spill] sm:$0xff] %v7518_v7  ;;  %v1321_v52 = vsel %vm1312_vm7, %v6812_v12, %v1320_v49  ;;  %v181_v12 = vld [vmem:[%s14194_s0 + $0xc0] sm:$0xff]  ;;  %v7552_v24 = vsel %vm1314_vm8, %v2045_v6, %v2126_v61  ;;  %v2361_v39 = vperm.slane %v7482_v29, 0  ;;  %v7564_v31 = vperm.slane %v14298_v45, 0 }
  0xf1   :  { %309 = vst.msk [vmem:[#allocation2 + $0x1e9] sm:$0xff] %vm21_vm0, %v196_v2  ;;  %v7539_v46 = vsel %vm1314_vm8, %v6829_v40, %v1321_v52  ;;  %v14295_v40 = vrot.slane %v7518_v7, 6  ;;  %v14301_v2 = vrot.slane %v7526_v18, 6  ;;  %v7569_v6 = vperm.slane %v14296_v11, 0 }
  0xf2   :  { %14939 = vst [vmem:[#allocation81_spill] sm:$0xff] %v7526_v18  ;;  %v5921_v38 = vpack.i.bf16 %v7552_v24, %v7539_v46  ;;  %v7573_v55 = vperm.slane %v14293_v9, 0  ;;  %v7578_v49 = vperm.slane %v14291_v35, 0  ;;  %v7583_v52 = vperm.slane %v14289_v36, 0  ;;  %v186_v9 = vld [vmem:[%s14194_s0 + $0xe8] sm:$0xff] }
  0xf3   :  { %14940 = vst [vmem:[#allocation82_spill] sm:$0xff] %v7539_v46  ;;  %v7587_v47 = vperm.slane %v14290_v30, 0  ;;  %v2369_v61 = vperm.slane %v7518_v7, 0  ;;  %v7601_v36 = vperm.slane %v14294_v57, 0  ;;  %v7605_v30 = vperm.slane %v14295_v40, 0 }
  0xf4   :  { %14941 = vst [vmem:[#allocation83_spill] sm:$0xff] %v7552_v24  ;;  %5922 = vrot.lane.b32.xlu1 %v5921_v38, %s6352_s11  ;;  %v182_v38 = vld [vmem:[%s14194_s0 + $0xc8] sm:$0xff]  ;;  %v7618_v57 = vperm.slane %v14299_v4, 0  ;;  %v7622_v40 = vperm.slane %v14301_v2, 0  ;;  %v2583_v11 = vsel %vm1302_vm2, %v7564_v31, %v2361_v39  ;;  %v694_v4 = vrot.slane %v436_v50, 2 }
  0xf5   :  { %294 = vst.msk [vmem:[#allocation2 + $0x139] sm:$0xff] %vm21_vm0, %v181_v12  ;;  %v7592_v12 = vperm.slane %v14292_v8, 0  ;;  %v7610_v8 = vperm.slane %v14297_v59, 0  ;;  %v2584_v45 = vsel %vm1304_vm3, %v7569_v6, %v2583_v11  ;;  %v695_v22 = vrot.slane %v436_v50, 4 }
  0xf6   :  { %298 = vst.msk [vmem:[#allocation2 + $0x169] sm:$0xff] %vm21_vm0, %v185_v16  ;;  %v7594_v16 = vld [vmem:[#allocation2 + $0x1b8] sm:$0xff]  ;;  %v2585_v2 = vsel %vm1306_vm4, %v7573_v55, %v2584_v45  ;;  %v696_v39 = vrot.slane %v436_v50, 6  ;;  %v14944_v11 = vperm.slane %v7526_v18, 0  ;;  %v1605_v24 = vperm.slane %v436_v50, 1 }
  0xf7   :  { %14942 = vst [vmem:[#allocation84_spill] sm:$0xff] %v7594_v16  ;;  %v2590_v59 = vsel %vm1302_vm2, %v7592_v12, %v2369_v61  ;;  %v697_v56 = vrot.slane %v7594_v16, 2  ;;  %v14943_v61 = vperm.slane %v7500_v0, 0  ;;  %v699_v29 = vrot.slane %v7594_v16, 6 }
  0xf8   :  { %295 = vst.msk [vmem:[#allocation2 + $0x141] sm:$0xff] %vm21_vm0, %v182_v38  ;;  %v2591_v38 = vsel %vm1304_vm3, %v7601_v36, %v2590_v59  ;;  %v698_v59 = vrot.slane %v7594_v16, 4  ;;  %v1606_v46 = vperm.slane %v694_v4, 1  ;;  %v1609_v48 = vperm.slane %v7594_v16, 1 }
  0xf9   :  { %299 = vst.msk [vmem:[#allocation2 + $0x171] sm:$0xff] %vm21_vm0, %v186_v9  ;;  %v2592_v35 = vsel %vm1306_vm4, %v7605_v30, %v2591_v38  ;;  %v2586_v9 = vsel %vm1308_vm5, %v14943_v61, %v2585_v2  ;;  %v393_v61 = vld [vmem:[#allocation2 + $0x58] sm:$0x3]  ;;  %v1612_v43 = vperm.slane %v699_v29, 1  ;;  %v3332_v58 = vsel %vm1302_vm2, %v6900_v41, %v6896_v20  ;;  %v438_v20 = vld [vmem:[#allocation2 + $0x1c0] sm:$0x3] }
  0xfa   :  { %v2593_v7 = vsel %vm1308_vm5, %v14944_v11, %v2592_v35  ;;  %v2587_v45 = vsel %vm1310_vm6, %v7578_v49, %v2586_v9  ;;  %v1607_v35 = vperm.slane %v695_v22, 1  ;;  %v1608_v11 = vperm.slane %v696_v39, 1 }
  0xfb   :  { %v2594_v38 = vsel %vm1310_vm6, %v7610_v8, %v2593_v7  ;;  %v2588_v33 = vsel %vm1312_vm7, %v7583_v52, %v2587_v45  ;;  %v1610_v7 = vperm.slane %v697_v56, 1  ;;  %v1611_v5 = vperm.slane %v698_v59, 1 }
  0xfc   :  { %v2595_v2 = vsel %vm1312_vm7, %v7618_v57, %v2594_v38  ;;  %v2589_v23 = vsel %vm1314_vm8, %v7587_v47, %v2588_v33  ;;  %v1820_v45 = vsel %vm1302_vm2, %v1606_v46, %v1605_v24  ;;  %v3298_v38 = vperm.slane %v393_v61, 0 }
  0xfd   :  { %v2596_v9 = vsel %vm1314_vm8, %v7622_v40, %v2595_v2  ;;  %v1821_v13 = vsel %vm1304_vm3, %v1607_v35, %v1820_v45  ;;  %v1094_v33 = vperm.slane %v6971_v25, 0  ;;  %v7671_v19 = vperm.slane %v695_v22, 0  ;;  %v7707_v45 = vld [vmem:[#allocation2 + $0xe0] sm:$0xff] }
  0xfe   :  { %v5881_v50 = vpack.i.bf16 %v2596_v9, %v2589_v23  ;;  %v1822_v2 = vsel %vm1306_vm4, %v1608_v11, %v1821_v13  ;;  %v3333_v23 = vsel %vm1304_vm3, %v6904_v28, %v3332_v58  ;;  %v7669_v9 = vperm.slane %v694_v4, 0  ;;  %v199_v13 = vld [vmem:[%s14194_s0 + $0x150] sm:$0xff]  ;;  %v7690_v4 = vld [vmem:[#allocation2 + $0xd8] sm:$0xff]  ;;  %14954 = vst [vmem:[#allocation93_spill] sm:$0xff] %v7707_v45 }
  0xff   :  { %14946 = vst [vmem:[#allocation86_spill] sm:$0xff] %v7671_v19  ;;  %v1823_v46 = vsel %vm1308_vm5, %v1609_v48, %v1822_v2  ;;  %v14947_v24 = vperm.slane %v6873_v3, 0  ;;  %v7677_v41 = vperm.slane %v696_v39, 0  ;;  %v14329_v25 = vperm.slane %v7594_v16, 0 }
 0x100   :  { %5882 = vrot.lane.b32.xlu2 %v5881_v50, %s6351_s10  ;;  %14945 = vst [vmem:[#allocation85_spill] sm:$0xff] %v7669_v9  ;;  %v1824_v28 = vsel %vm1310_vm6, %v1610_v7, %v1823_v46  ;;  %v7686_v22 = vperm.slane %v697_v56, 0  ;;  %v7688_v48 = vperm.slane %v698_v59, 0  ;;  %v7696_v11 = vperm.slane %v699_v29, 0 }
 0x101   :  { %v3334_v61 = vsel %vm1306_vm4, %v14947_v24, %v3333_v23  ;;  %14948 = vst [vmem:[#allocation87_spill] sm:$0xff] %v7677_v41  ;;  %v1825_v39 = vsel %vm1312_vm7, %v1611_v5, %v1824_v28  ;;  %v1323_v7 = vsel %vm1302_vm2, %v7316_v32, %v1094_v33  ;;  %v2046_v50 = vperm.slane %v438_v20, 0  ;;  %v7734_v24 = vld [vmem:[#allocation2 + $0x110] sm:$0xff] }
 0x102   :  { %v3335_v58 = vsel %vm1308_vm5, %v6921_v54, %v3334_v61  ;;  %14949 = vst [vmem:[#allocation88_spill] sm:$0xff] %v7686_v22  ;;  %v7701_v54 = vsel %vm1314_vm8, %v1612_v43, %v1825_v39  ;;  %v1324_v59 = vsel %vm1304_vm3, %v7320_v63, %v1323_v7  ;;  %v2128_v32 = vsel %vm1302_vm2, %v7671_v19, %v7669_v9  ;;  %v6239_v9 = vld [vmem:[#allocation2 + $0x90] sm:$0xff] }
 0x103   :  { %14950 = vst [vmem:[#allocation89_spill] sm:$0xff] %v7688_v48  ;;  %v3336_v35 = vsel %vm1310_vm6, %v6933_v62, %v3335_v58  ;;  %v1325_v62 = vsel %vm1306_vm4, %v7331_v27, %v1324_v59  ;;  %v14326_v43 = vrot.slane %v7690_v4, 2  ;;  %v14955_v29 = vperm.slane %v6986_v10, 0  ;;  %v7725_v27 = vld [vmem:[#allocation2 + $0x108] sm:$0xff] }
 0x104   :  { %14951 = vst [vmem:[#allocation90_spill] sm:$0xff] %v7690_v4  ;;  %v3337_v56 = vsel %vm1312_vm7, %v6950_v26, %v3336_v35  ;;  %v200_v26 = vld [vmem:[%s14194_s0 + $0x158] sm:$0xff]  ;;  %v14324_v2 = vrot.slane %v7690_v4, 4  ;;  %v14320_v10 = vrot.slane %v7690_v4, 6  ;;  %v14319_v61 = vrot.slane %v7707_v45, 2 }
 0x105   :  { %312 = vst.msk [vmem:[#allocation2 + $0x211] sm:$0xff] %vm21_vm0, %v199_v13  ;;  %v3338_v5 = vsel %vm1314_vm8, %v3298_v38, %v3337_v56  ;;  %v1326_v33 = vsel %vm1308_vm5, %v14955_v29, %v1325_v62  ;;  %v2129_v38 = vsel %vm1304_vm3, %v7677_v41, %v2128_v32  ;;  %v14318_v28 = vrot.slane %v7707_v45, 6 }
 0x106   :  { %14952 = vst [vmem:[#allocation91_spill] sm:$0xff] %v7696_v11  ;;  %v5931_v63 = vpack.i.bf16 %v7701_v54, %v3338_v5  ;;  %v1327_v23 = vsel %vm1310_vm6, %v7346_v17, %v1326_v33  ;;  %v2130_v46 = vsel %vm1306_vm4, %v14329_v25, %v2129_v38  ;;  %v14317_v17 = vrot.slane %v7707_v45, 4 }
 0x107   :  { %14953 = vst [vmem:[#allocation92_spill] sm:$0xff] %v7701_v54  ;;  %v1328_v20 = vsel %vm1312_vm7, %v7350_v34, %v1327_v23  ;;  %v2131_v13 = vsel %vm1308_vm5, %v7686_v22, %v2130_v46  ;;  %v14323_v35 = vrot.slane %v7725_v27, 2  ;;  %v14321_v7 = vrot.slane %v7725_v27, 4  ;;  %v399_v54 = vld [vmem:[#allocation2 + $0x88] sm:$0x3] }
 0x108   :  { %14956 = vst [vmem:[#allocation94_spill] sm:$0xff] %v7725_v27  ;;  %5932 = vrot.lane.b32.xlu0 %v5931_v63, %s6350_s26  ;;  %v7747_v58 = vsel %vm1314_vm8, %v7359_v21, %v1328_v20  ;;  %v2132_v39 = vsel %vm1310_vm6, %v7688_v48, %v2131_v13  ;;  %v14322_v56 = vrot.slane %v7725_v27, 6  ;;  %v14325_v59 = vrot.slane %v7734_v24, 2  ;;  %v442_v13 = vld [vmem:[#allocation2 + $0x1e0] sm:$0xff] }
 0x109   :  { %313 = vst.msk [vmem:[#allocation2 + $0x219] sm:$0xff] %vm21_vm0, %v200_v26  ;;  %v2133_v34 = vsel %vm1312_vm7, %v7696_v11, %v2132_v39  ;;  %v14327_v5 = vrot.slane %v7734_v24, 4  ;;  %v14328_v21 = vrot.slane %v7734_v24, 6  ;;  %v2377_v32 = vperm.slane %v7690_v4, 0 }
 0x10a   :  { %14957 = vst [vmem:[#allocation95_spill] sm:$0xff] %v7734_v24  ;;  %v7759_v62 = vsel %vm1314_vm8, %v2046_v50, %v2133_v34  ;;  %v7765_v26 = vperm.slane %v14326_v43, 0  ;;  %v7771_v29 = vperm.slane %v14324_v2, 0  ;;  %v7775_v33 = vperm.slane %v14320_v10, 0 }
 0x10b   :  { %14958 = vst [vmem:[#allocation96_spill] sm:$0xff] %v7747_v58  ;;  %v5936_v63 = vpack.i.bf16 %v7759_v62, %v7747_v58  ;;  %v14336_v50 = vperm.slane %v7707_v45, 0  ;;  %v7780_v38 = vperm.slane %v14319_v61, 0  ;;  %v7784_v23 = vperm.slane %v14317_v17, 0  ;;  %v7805_v61 = vld [vmem:[#allocation2 + $0x1e8] sm:$0xff] }
 0x10c   :  { %14959 = vst [vmem:[#allocation97_spill] sm:$0xff] %v7759_v62  ;;  %v7788_v46 = vperm.slane %v14318_v28, 0  ;;  %v2385_v20 = vperm.slane %v7725_v27, 0  ;;  %v7794_v39 = vperm.slane %v14323_v35, 0  ;;  %v7798_v34 = vperm.slane %v14321_v7, 0  ;;  %v203_v35 = vld [vmem:[%s14194_s0 + $0x170] sm:$0xff] }
 0x10d   :  { %5937 = vrot.lane.b32.xlu1 %v5936_v63, %s6352_s11  ;;  %v7802_v17 = vperm.slane %v14322_v56, 0  ;;  %14960 = vst [vmem:[#allocation98_spill] sm:$0xff] %v7805_v61  ;;  %v7809_v10 = vperm.slane %v14325_v59, 0  ;;  %v7813_v63 = vperm.slane %v14327_v5, 0  ;;  %v7817_v7 = vperm.slane %v14328_v21, 0 }
 0x10e   :  { %v2597_v56 = vsel %vm1302_vm2, %v7765_v26, %v2377_v32  ;;  %v2604_v59 = vsel %vm1302_vm2, %v7794_v39, %v2385_v20  ;;  %v700_v43 = vrot.slane %v442_v13, 2  ;;  %v701_v5 = vrot.slane %v442_v13, 4  ;;  %316 = vst.msk [vmem:[#allocation2 + $0x241] sm:$0xff] %vm21_vm0, %v203_v35 }
 0x10f   :  { %v2598_v2 = vsel %vm1304_vm3, %v7771_v29, %v2597_v56  ;;  %v2605_v32 = vsel %vm1304_vm3, %v7798_v34, %v2604_v59  ;;  %v702_v25 = vrot.slane %v442_v13, 6  ;;  %v703_v28 = vrot.slane %v7805_v61, 2 }
 0x110   :  { %v2599_v21 = vsel %vm1306_vm4, %v7775_v33, %v2598_v2  ;;  %v2606_v20 = vsel %vm1306_vm4, %v7802_v17, %v2605_v32  ;;  %v704_v27 = vrot.slane %v7805_v61, 4  ;;  %v705_v35 = vrot.slane %v7805_v61, 6 }
 0x111   :  { %v2600_v56 = vsel %vm1308_vm5, %v14336_v50, %v2599_v21  ;;  %v14961_v4 = vperm.slane %v7734_v24, 0  ;;  %v1613_v58 = vperm.slane %v442_v13, 1  ;;  %v1614_v62 = vperm.slane %v700_v43, 1  ;;  %v204_v21 = vld [vmem:[%s14194_s0 + $0x178] sm:$0xff] }
 0x112   :  { %v2601_v2 = vsel %vm1310_vm6, %v7780_v38, %v2600_v56  ;;  %v1615_v3 = vperm.slane %v701_v5, 1  ;;  %v1616_v11 = vperm.slane %v702_v25, 1  ;;  %317 = vst.msk [vmem:[#allocation2 + $0x249] sm:$0xff] %vm21_vm0, %v204_v21  ;;  %v1617_v56 = vperm.slane %v7805_v61, 1 }
 0x113   :  { %v2607_v59 = vsel %vm1308_vm5, %v14961_v4, %v2606_v20  ;;  %v2602_v32 = vsel %vm1312_vm7, %v7784_v23, %v2601_v2  ;;  %v1618_v20 = vperm.slane %v703_v28, 1  ;;  %v1619_v48 = vperm.slane %v704_v27, 1 }
 0x114   :  { %v2608_v50 = vsel %vm1310_vm6, %v7809_v10, %v2607_v59  ;;  %v2603_v4 = vsel %vm1314_vm8, %v7788_v46, %v2602_v32  ;;  %v1620_v22 = vperm.slane %v705_v35, 1  ;;  %v1827_v59 = vsel %vm1302_vm2, %v1614_v62, %v1613_v58 }
 0x115   :  { %v2609_v13 = vsel %vm1312_vm7, %v7813_v63, %v2608_v50  ;;  %v1828_v41 = vsel %vm1304_vm3, %v1615_v3, %v1827_v59  ;;  %v3299_v21 = vperm.slane %v399_v54, 0  ;;  %v3339_v32 = vsel %vm1302_vm2, %v7569_v6, %v7564_v31  ;;  %v193_v50 = vld [vmem:[%s14194_s0 + $0x120] sm:$0xff]  ;;  %v444_v54 = vld [vmem:[#allocation2 + $0x1f0] sm:$0x3]  ;;  %v7924_v59 = vld [vmem:[#allocation2 + $0x168] sm:$0xff] }
 0x116   :  { %v2610_v2 = vsel %vm1314_vm8, %v7817_v7, %v2609_v13  ;;  %v1829_v19 = vsel %vm1306_vm4, %v1616_v11, %v1828_v41  ;;  %v3340_v13 = vsel %vm1304_vm3, %v7573_v55, %v3339_v32  ;;  %v1102_v53 = vperm.slane %v6239_v9, 0  ;;  %306 = vst.msk [vmem:[#allocation2 + $0x1c9] sm:$0xff] %vm21_vm0, %v193_v50 }
 0x117   :  { %v5896_v16 = vpack.i.bf16 %v2610_v2, %v2603_v4  ;;  %v7872_v58 = vperm.slane %v700_v43, 0  ;;  %v1830_v3 = vsel %vm1308_vm5, %v1617_v56, %v1829_v19  ;;  %v14963_v31 = vperm.slane %v7500_v0, 0  ;;  %v194_v56 = vld [vmem:[%s14194_s0 + $0x128] sm:$0xff]  ;;  %14972 = vst [vmem:[#allocation108_spill] sm:$0xff] %v7924_v59 }
 0x118   :  { %v7880_v62 = vperm.slane %v701_v5, 0  ;;  %v7882_v41 = vperm.slane %v702_v25, 0  ;;  %v1831_v55 = vsel %vm1310_vm6, %v1618_v20, %v1830_v3  ;;  %v14360_v11 = vperm.slane %v7805_v61, 0  ;;  %v7909_v2 = vld [vmem:[#allocation2 + $0x140] sm:$0xff]  ;;  %307 = vst.msk [vmem:[#allocation2 + $0x1d1] sm:$0xff] %vm21_vm0, %v194_v56 }
 0x119   :  { %14962 = vst [vmem:[#allocation99_spill] sm:$0xff] %v7872_v58  ;;  %5897 = vrot.lane.b32.xlu2 %v5896_v16, %s6351_s10  ;;  %v3341_v6 = vsel %vm1306_vm4, %v14963_v31, %v3340_v13  ;;  %v7888_v43 = vperm.slane %v703_v28, 0  ;;  %v7890_v16 = vld [vmem:[#allocation2 + $0x138] sm:$0xff]  ;;  %v1832_v19 = vsel %vm1312_vm7, %v1619_v48, %v1831_v55  ;;  %v7895_v5 = vperm.slane %v704_v27, 0  ;;  %v7933_v13 = vld [vmem:[#allocation2 + $0x170] sm:$0xff] }
 0x11a   :  { %14964 = vst [vmem:[#allocation100_spill] sm:$0xff] %v7880_v62  ;;  %v3342_v9 = vsel %vm1308_vm5, %v7578_v49, %v3341_v6  ;;  %v7897_v25 = vperm.slane %v705_v35, 0  ;;  %v7903_v49 = vsel %vm1314_vm8, %v1620_v22, %v1832_v19  ;;  %v1330_v48 = vsel %vm1302_vm2, %v7363_v51, %v1102_v53 }
 0x11b   :  { %14965 = vst [vmem:[#allocation101_spill] sm:$0xff] %v7882_v41  ;;  %v3343_v4 = vsel %vm1310_vm6, %v7583_v52, %v3342_v9  ;;  %v2047_v20 = vperm.slane %v444_v54, 0  ;;  %v1331_v27 = vsel %vm1304_vm3, %v7372_v37, %v1330_v48  ;;  %v2135_v22 = vsel %vm1302_vm2, %v7880_v62, %v7872_v58 }
 0x11c   :  { %14966 = vst [vmem:[#allocation102_spill] sm:$0xff] %v7888_v43  ;;  %v3344_v28 = vsel %vm1312_vm7, %v7587_v47, %v3343_v4  ;;  %v14359_v35 = vrot.slane %v7890_v16, 2  ;;  %v1332_v51 = vsel %vm1306_vm4, %v7376_v60, %v1331_v27  ;;  %v2136_v53 = vsel %vm1304_vm3, %v7882_v41, %v2135_v22  ;;  %v6240_v41 = vld [vmem:[#allocation2 + $0xc0] sm:$0xff] }
 0x11d   :  { %14967 = vst [vmem:[#allocation103_spill] sm:$0xff] %v7890_v16  ;;  %v3345_v52 = vsel %vm1314_vm8, %v3299_v21, %v3344_v28  ;;  %v14356_v21 = vrot.slane %v7890_v16, 4  ;;  %v14973_v37 = vperm.slane %v7034_v42, 0  ;;  %v2137_v50 = vsel %vm1306_vm4, %v14360_v11, %v2136_v53 }
 0x11e   :  { %14968 = vst [vmem:[#allocation104_spill] sm:$0xff] %v7895_v5  ;;  %v5946_v47 = vpack.i.bf16 %v7903_v49, %v3345_v52  ;;  %v14354_v3 = vrot.slane %v7890_v16, 6  ;;  %v14353_v60 = vrot.slane %v7909_v2, 2  ;;  %v2138_v42 = vsel %vm1308_vm5, %v7888_v43, %v2137_v50 }
 0x11f   :  { %14969 = vst [vmem:[#allocation105_spill] sm:$0xff] %v7897_v25  ;;  %v1333_v32 = vsel %vm1308_vm5, %v14973_v37, %v1332_v51  ;;  %v14348_v6 = vrot.slane %v7909_v2, 4  ;;  %v14349_v54 = vrot.slane %v7909_v2, 6  ;;  %v2139_v9 = vsel %vm1310_vm6, %v7895_v5, %v2138_v42  ;;  %v448_v42 = vld [vmem:[#allocation2 + $0x210] sm:$0xff]  ;;  %v198_v5 = vld [vmem:[%s14194_s0 + $0x148] sm:$0xff] }
 0x120   :  { %14970 = vst [vmem:[#allocation106_spill] sm:$0xff] %v7903_v49  ;;  %5947 = vrot.lane.b32.xlu0 %v5946_v47, %s6350_s26  ;;  %v1334_v31 = vsel %vm1310_vm6, %v7387_v44, %v1333_v32  ;;  %v14350_v19 = vrot.slane %v7924_v59, 2  ;;  %v14351_v4 = vrot.slane %v7924_v59, 4  ;;  %v2140_v56 = vsel %vm1312_vm7, %v7897_v25, %v2139_v9 }
 0x121   :  { %14971 = vst [vmem:[#allocation107_spill] sm:$0xff] %v7909_v2  ;;  %v1335_v55 = vsel %vm1312_vm7, %v7399_v1, %v1334_v31  ;;  %v14352_v28 = vrot.slane %v7924_v59, 6  ;;  %v14355_v48 = vrot.slane %v7933_v13, 2  ;;  %v7959_v1 = vsel %vm1314_vm8, %v2047_v20, %v2140_v56 }
 0x122   :  { %14974 = vst [vmem:[#allocation109_spill] sm:$0xff] %v7933_v13  ;;  %v7952_v44 = vsel %vm1314_vm8, %v7403_v14, %v1335_v55  ;;  %v14357_v52 = vrot.slane %v7933_v13, 4  ;;  %v14358_v27 = vrot.slane %v7933_v13, 6  ;;  %v2393_v22 = vperm.slane %v7890_v16, 0  ;;  %v207_v14 = vld [vmem:[%s14194_s0 + $0x190] sm:$0xff] }
 0x123   :  { %14975 = vst [vmem:[#allocation110_spill] sm:$0xff] %v7952_v44  ;;  %v5951_v47 = vpack.i.bf16 %v7959_v1, %v7952_v44  ;;  %v7971_v51 = vperm.slane %v14359_v35, 0  ;;  %v7975_v20 = vperm.slane %v14356_v21, 0  ;;  %v7979_v53 = vperm.slane %v14354_v3, 0 }
 0x124   :  { %14976 = vst [vmem:[#allocation111_spill] sm:$0xff] %v7959_v1  ;;  %v7985_v32 = vperm.slane %v14353_v60, 0  ;;  %v7989_v50 = vperm.slane %v14348_v6, 0  ;;  %v7993_v31 = vperm.slane %v14349_v54, 0  ;;  %v2401_v55 = vperm.slane %v7924_v59, 0  ;;  %v8009_v6 = vld [vmem:[#allocation2 + $0x218] sm:$0xff] }
 0x125   :  { %320 = vst.msk [vmem:[#allocation2 + $0x271] sm:$0xff] %vm21_vm0, %v207_v14  ;;  %5952 = vrot.lane.b32.xlu1 %v5951_v47, %s6352_s11  ;;  %v7999_v9 = vperm.slane %v14350_v19, 0  ;;  %v8003_v56 = vperm.slane %v14351_v4, 0  ;;  %v8007_v14 = vperm.slane %v14352_v28, 0  ;;  %v8014_v47 = vperm.slane %v14355_v48, 0  ;;  %v208_v28 = vld [vmem:[%s14194_s0 + $0x198] sm:$0xff] }
 0x126   :  { %v8018_v19 = vperm.slane %v14357_v52, 0  ;;  %v8022_v4 = vperm.slane %v14358_v27, 0  ;;  %v2611_v60 = vsel %vm1302_vm2, %v7971_v51, %v2393_v22  ;;  %v706_v48 = vrot.slane %v448_v42, 2  ;;  %321 = vst.msk [vmem:[#allocation2 + $0x279] sm:$0xff] %vm21_vm0, %v208_v28  ;;  %v405_v1 = vld [vmem:[#allocation2 + $0xb8] sm:$0x3] }
 0x127   :  { %v2618_v3 = vsel %vm1302_vm2, %v7999_v9, %v2401_v55  ;;  %v707_v21 = vrot.slane %v448_v42, 4  ;;  %v2612_v52 = vsel %vm1304_vm3, %v7975_v20, %v2611_v60  ;;  %v708_v35 = vrot.slane %v448_v42, 6  ;;  %v197_v60 = vld [vmem:[%s14194_s0 + $0x140] sm:$0xff]  ;;  %311 = vst.msk [vmem:[#allocation2 + $0x201] sm:$0xff] %vm21_vm0, %v198_v5 }
 0x128   :  { %v2619_v27 = vsel %vm1304_vm3, %v8003_v56, %v2618_v3  ;;  %v709_v11 = vrot.slane %v8009_v6, 2  ;;  %v2613_v54 = vsel %vm1306_vm4, %v7979_v53, %v2612_v52  ;;  %v710_v55 = vrot.slane %v8009_v6, 4  ;;  %310 = vst.msk [vmem:[#allocation2 + $0x1f9] sm:$0xff] %vm21_vm0, %v197_v60 }
 0x129   :  { %v2620_v22 = vsel %vm1306_vm4, %v8007_v14, %v2619_v27  ;;  %v711_v37 = vrot.slane %v8009_v6, 6  ;;  %v14977_v28 = vperm.slane %v7909_v2, 0  ;;  %v14978_v59 = vperm.slane %v7933_v13, 0 }
 0x12a   :  { %v1621_v52 = vperm.slane %v448_v42, 1  ;;  %v1622_v0 = vperm.slane %v706_v48, 1  ;;  %v1623_v49 = vperm.slane %v707_v21, 1  ;;  %v1624_v25 = vperm.slane %v708_v35, 1 }
 0x12b   :  { %v2614_v3 = vsel %vm1308_vm5, %v14977_v28, %v2613_v54  ;;  %v2621_v16 = vsel %vm1308_vm5, %v14978_v59, %v2620_v22  ;;  %v1625_v59 = vperm.slane %v8009_v6, 1  ;;  %v1626_v42 = vperm.slane %v709_v11, 1 }
 0x12c   :  { %v2615_v27 = vsel %vm1310_vm6, %v7985_v32, %v2614_v3  ;;  %v2622_v44 = vsel %vm1310_vm6, %v8014_v47, %v2621_v16  ;;  %v1627_v3 = vperm.slane %v710_v55, 1  ;;  %v1628_v16 = vperm.slane %v711_v37, 1 }
 0x12d   :  { %v2616_v54 = vsel %vm1312_vm7, %v7989_v50, %v2615_v27  ;;  %v2623_v28 = vsel %vm1312_vm7, %v8018_v19, %v2622_v44  ;;  %v1834_v27 = vsel %vm1302_vm2, %v1622_v0, %v1621_v52  ;;  %v3300_v61 = vperm.slane %v405_v1, 0 }
 0x12e   :  { %v2617_v22 = vsel %vm1314_vm8, %v7993_v31, %v2616_v54  ;;  %v2624_v60 = vsel %vm1314_vm8, %v8022_v4, %v2623_v28  ;;  %v3346_v44 = vsel %vm1302_vm2, %v7601_v36, %v7592_v12  ;;  %v1835_v54 = vsel %vm1304_vm3, %v1623_v49, %v1834_v27  ;;  %v450_v36 = vld [vmem:[#allocation2 + $0x220] sm:$0x3] }
 0x12f   :  { %v5911_v43 = vpack.i.bf16 %v2624_v60, %v2617_v22  ;;  %v3347_v28 = vsel %vm1304_vm3, %v7605_v30, %v3346_v44  ;;  %v1110_v62 = vperm.slane %v6240_v41, 0  ;;  %v8077_v58 = vperm.slane %v706_v48, 0 }
 0x130   :  { %v1836_v0 = vsel %vm1306_vm4, %v1624_v25, %v1835_v54  ;;  %v14979_v1 = vperm.slane %v7526_v18, 0  ;;  %v8084_v12 = vperm.slane %v707_v21, 0  ;;  %v8086_v5 = vperm.slane %v708_v35, 0  ;;  %v454_v35 = vld [vmem:[#allocation2 + $0x240] sm:$0xff]  ;;  %v14984_v54 = vld [vmem:[#allocation37_spill] sm:$0xff] }
 0x131   :  { %5912 = vrot.lane.b32.xlu2 %v5911_v43, %s6351_s10  ;;  %v1837_v49 = vsel %vm1308_vm5, %v1625_v59, %v1836_v0  ;;  %v14377_v41 = vperm.slane %v8009_v6, 0  ;;  %v8092_v48 = vperm.slane %v709_v11, 0  ;;  %v8097_v22 = vperm.slane %v710_v55, 0  ;;  %v14985_v0 = vld [vmem:[#allocation31_spill] sm:$0xff] }
 0x132   :  { %v3348_v52 = vsel %vm1306_vm4, %v14979_v1, %v3347_v28  ;;  %v1838_v43 = vsel %vm1310_vm6, %v1626_v42, %v1837_v49  ;;  %v8099_v21 = vperm.slane %v711_v37, 0  ;;  %v2048_v11 = vperm.slane %v450_v36, 0 }
 0x133   :  { %v3349_v30 = vsel %vm1308_vm5, %v7610_v8, %v3348_v52  ;;  %v1839_v60 = vsel %vm1312_vm7, %v1627_v3, %v1838_v43  ;;  %v14980_v8 = vld [vmem:[#allocation35_spill] sm:$0xff]  ;;  %v2142_v37 = vsel %vm1302_vm2, %v8084_v12, %v8077_v58  ;;  %v8115_v3 = vld [vmem:[#allocation2 + $0x248] sm:$0xff]  ;;  %v712_v28 = vrot.slane %v454_v35, 2 }
 0x134   :  { %v3350_v25 = vsel %vm1310_vm6, %v7618_v57, %v3349_v30  ;;  %v1337_v27 = vsel %vm1302_vm2, %v14980_v8, %v1110_v62  ;;  %v8107_v44 = vsel %vm1314_vm8, %v1628_v16, %v1839_v60  ;;  %v14982_v57 = vld [vmem:[#allocation36_spill] sm:$0xff]  ;;  %v2143_v16 = vsel %vm1304_vm3, %v8086_v5, %v2142_v37  ;;  %v14987_v30 = vld [vmem:[#allocation38_spill] sm:$0xff]  ;;  %v14988_v8 = vld [vmem:[#allocation39_spill] sm:$0xff] }
 0x135   :  { %v3351_v59 = vsel %vm1312_vm7, %v7622_v40, %v3350_v25  ;;  %14981 = vst [vmem:[#allocation35_spill] sm:$0xff] %v8107_v44  ;;  %v1338_v55 = vsel %vm1304_vm3, %v14982_v57, %v1337_v27  ;;  %v2144_v52 = vsel %vm1306_vm4, %v14377_v41, %v2143_v16  ;;  %v713_v36 = vrot.slane %v454_v35, 4  ;;  %v14989_v57 = vld [vmem:[#allocation19_spill] sm:$0xff]  ;;  %v201_v41 = vld [vmem:[%s14194_s0 + $0x160] sm:$0xff] }
 0x136   :  { %v3352_v42 = vsel %vm1314_vm8, %v3300_v61, %v3351_v59  ;;  %14983 = vst [vmem:[#allocation36_spill] sm:$0xff] %v8115_v3  ;;  %v1339_v62 = vsel %vm1306_vm4, %v14984_v54, %v1338_v55  ;;  %v14986_v61 = vperm.slane %v14985_v0, 0  ;;  %v714_v49 = vrot.slane %v454_v35, 6  ;;  %v14990_v55 = vld [vmem:[#allocation7_spill] sm:$0xff] }
 0x137   :  { %v5961_v40 = vpack.i.bf16 %v8107_v44, %v3352_v42  ;;  %v2145_v25 = vsel %vm1308_vm5, %v8092_v48, %v2144_v52  ;;  %v715_v60 = vrot.slane %v8115_v3, 2  ;;  %v716_v59 = vrot.slane %v8115_v3, 4  ;;  %314 = vst.msk [vmem:[#allocation2 + $0x229] sm:$0xff] %vm21_vm0, %v201_v41  ;;  %v8187_v41 = vld [vmem:[#allocation2 + $0x1c8] sm:$0xff] }
 0x138   :  { %v1340_v1 = vsel %vm1308_vm5, %v14986_v61, %v1339_v62  ;;  %v2146_v42 = vsel %vm1310_vm6, %v8097_v22, %v2145_v25  ;;  %v14991_v37 = vpack.i.bf16 %v14989_v57, %v14990_v55  ;;  %v1629_v54 = vperm.slane %v454_v35, 1  ;;  %v14992_v62 = vld [vmem:[#allocation40_spill] sm:$0xff]  ;;  %14999 = vst [vmem:[#allocation7_spill] sm:$0xff] %v8187_v41 }
 0x139   :  { %5962 = vrot.lane.b32.xlu0 %v5961_v40, %s6350_s26  ;;  %v1341_v43 = vsel %vm1310_vm6, %v14987_v30, %v1340_v1  ;;  %v717_v40 = vrot.slane %v8115_v3, 6  ;;  %v2147_v0 = vsel %vm1312_vm7, %v8099_v21, %v2146_v42  ;;  %v411_v61 = vld [vmem:[#allocation2 + $0xe8] sm:$0x3]  ;;  %v1630_v1 = vperm.slane %v712_v28, 1 }
 0x13a   :  { %v1342_v27 = vsel %vm1312_vm7, %v14988_v8, %v1341_v43  ;;  %5927 = vrot.lane.b32.xlu2 %v14991_v37, %s6351_s10  ;;  %v1631_v52 = vperm.slane %v713_v36, 1  ;;  %v8151_v30 = vsel %vm1314_vm8, %v2048_v11, %v2147_v0  ;;  %v1632_v43 = vperm.slane %v714_v49, 1  ;;  %v6241_v11 = vld [vmem:[#allocation2 + $0xf0] sm:$0xff] }
 0x13b   :  { %v8146_v16 = vsel %vm1314_vm8, %v14992_v62, %v1342_v27  ;;  %14994 = vst [vmem:[#allocation31_spill] sm:$0xff] %v8151_v30  ;;  %v1633_v25 = vperm.slane %v8115_v3, 1  ;;  %v1634_v8 = vperm.slane %v715_v60, 1  ;;  %v1635_v57 = vperm.slane %v716_v59, 1 }
 0x13c   :  { %14993 = vst [vmem:[#allocation37_spill] sm:$0xff] %v8146_v16  ;;  %v5966_v35 = vpack.i.bf16 %v8151_v30, %v8146_v16  ;;  %v1636_v55 = vperm.slane %v717_v40, 1  ;;  %v1841_v27 = vsel %vm1302_vm2, %v1630_v1, %v1629_v54  ;;  %v3301_v42 = vperm.slane %v411_v61, 0 }
 0x13d   :  { %v1842_v37 = vsel %vm1304_vm3, %v1631_v52, %v1841_v27  ;;  %v3353_v62 = vsel %vm1302_vm2, %v7771_v29, %v7765_v26  ;;  %v1118_v0 = vperm.slane %v6241_v11, 0  ;;  %v8168_v1 = vperm.slane %v712_v28, 0  ;;  %v456_v27 = vld [vmem:[#allocation2 + $0x250] sm:$0x3] }
 0x13e   :  { %5967 = vrot.lane.b32.xlu1 %v5966_v35, %s6352_s11  ;;  %v1843_v18 = vsel %vm1306_vm4, %v1632_v43, %v1842_v37  ;;  %v3354_v54 = vsel %vm1304_vm3, %v7775_v33, %v3353_v62  ;;  %v8170_v61 = vperm.slane %v713_v36, 0  ;;  %v14995_v29 = vperm.slane %v7707_v45, 0  ;;  %v15001_v37 = vld [vmem:[#allocation41_spill] sm:$0xff] }
 0x13f   :  { %v1844_v26 = vsel %vm1308_vm5, %v1633_v25, %v1843_v18  ;;  %v8177_v11 = vperm.slane %v714_v49, 0  ;;  %v14386_v43 = vperm.slane %v8115_v3, 0  ;;  %v8183_v28 = vperm.slane %v715_v60, 0 }
 0x140   :  { %v3355_v52 = vsel %vm1306_vm4, %v14995_v29, %v3354_v54  ;;  %v1845_v35 = vsel %vm1310_vm6, %v1634_v8, %v1844_v26  ;;  %v8185_v36 = vperm.slane %v716_v59, 0  ;;  %v8192_v49 = vperm.slane %v717_v40, 0  ;;  %v15003_v8 = vld [vmem:[#allocation42_spill] sm:$0xff] }
 0x141   :  { %14996 = vst [vmem:[#allocation38_spill] sm:$0xff] %v8177_v11  ;;  %v3356_v33 = vsel %vm1308_vm5, %v7780_v38, %v3355_v52  ;;  %v1846_v18 = vsel %vm1312_vm7, %v1635_v57, %v1845_v35  ;;  %v1344_v62 = vsel %vm1302_vm2, %v15001_v37, %v1118_v0  ;;  %v202_v38 = vld [vmem:[%s14194_s0 + $0x168] sm:$0xff]  ;;  %v2049_v54 = vperm.slane %v456_v27, 0  ;;  %v15006_v52 = vld [vmem:[#allocation32_spill] sm:$0xff] }
 0x142   :  { %14997 = vst [vmem:[#allocation39_spill] sm:$0xff] %v8183_v28  ;;  %v3357_v25 = vsel %vm1310_vm6, %v7784_v23, %v3356_v33  ;;  %v8200_v60 = vsel %vm1314_vm8, %v1636_v55, %v1846_v18  ;;  %v1345_v57 = vsel %vm1304_vm3, %v15003_v8, %v1344_v62  ;;  %v8206_v23 = vld [vmem:[#allocation2 + $0x1d0] sm:$0xff]  ;;  %v15005_v0 = vld [vmem:[#allocation43_spill] sm:$0xff]  ;;  %v2149_v55 = vsel %vm1302_vm2, %v8170_v61, %v8168_v1  ;;  %v15008_v18 = vld [vmem:[#allocation46_spill] sm:$0xff] }
 0x143   :  { %14998 = vst [vmem:[#allocation19_spill] sm:$0xff] %v8185_v36  ;;  %v3358_v59 = vsel %vm1312_vm7, %v7788_v46, %v3357_v25  ;;  %v1346_v26 = vsel %vm1306_vm4, %v15005_v0, %v1345_v57  ;;  %v14384_v29 = vrot.slane %v8187_v41, 2  ;;  %v15007_v35 = vperm.slane %v15006_v52, 0 }
 0x144   :  { %15000 = vst [vmem:[#allocation40_spill] sm:$0xff] %v8192_v49  ;;  %v3359_v40 = vsel %vm1314_vm8, %v3301_v42, %v3358_v59  ;;  %v2150_v33 = vsel %vm1304_vm3, %v8177_v11, %v2149_v55  ;;  %v14382_v42 = vrot.slane %v8187_v41, 4  ;;  %v14380_v62 = vrot.slane %v8187_v41, 6  ;;  %v15009_v59 = vld [vmem:[#allocation47_spill] sm:$0xff] }
 0x145   :  { %15002 = vst [vmem:[#allocation41_spill] sm:$0xff] %v8200_v60  ;;  %v5976_v46 = vpack.i.bf16 %v8200_v60, %v3359_v40  ;;  %v1347_v27 = vsel %vm1308_vm5, %v15007_v35, %v1346_v26  ;;  %v2151_v37 = vsel %vm1306_vm4, %v14386_v43, %v2150_v33  ;;  %v14383_v40 = vrot.slane %v8206_v23, 4  ;;  %v15010_v26 = vld [vmem:[#allocation49_spill] sm:$0xff]  ;;  %v6242_v11 = vld [vmem:[#allocation2 + $0x120] sm:$0xff] }
 0x146   :  { %15004 = vst [vmem:[#allocation42_spill] sm:$0xff] %v8206_v23  ;;  %v1348_v25 = vsel %vm1310_vm6, %v15008_v18, %v1347_v27  ;;  %v2152_v57 = vsel %vm1308_vm5, %v8183_v28, %v2151_v37  ;;  %v14385_v0 = vrot.slane %v8206_v23, 6  ;;  %v2417_v35 = vperm.slane %v8187_v41, 0  ;;  %v460_v27 = vld [vmem:[#allocation2 + $0x270] sm:$0xff]  ;;  %v417_v41 = vld [vmem:[#allocation2 + $0x118] sm:$0x3] }
 0x147   :  { %315 = vst.msk [vmem:[#allocation2 + $0x231] sm:$0xff] %vm21_vm0, %v202_v38  ;;  %v14381_v38 = vrot.slane %v8206_v23, 2  ;;  %5977 = vrot.lane.b32.xlu0 %v5976_v46, %s6350_s26  ;;  %v1349_v8 = vsel %vm1312_vm7, %v15009_v59, %v1348_v25  ;;  %v2153_v52 = vsel %vm1310_vm6, %v8185_v36, %v2152_v57  ;;  %v8246_v46 = vperm.slane %v14384_v29, 0  ;;  %v8259_v59 = vld [vmem:[#allocation2 + $0x278] sm:$0xff] }
 0x148   :  { %v8239_v55 = vsel %vm1314_vm8, %v15010_v26, %v1349_v8  ;;  %v2154_v33 = vsel %vm1312_vm7, %v8192_v49, %v2153_v52  ;;  %v8252_v18 = vperm.slane %v14382_v42, 0  ;;  %v8256_v25 = vperm.slane %v14380_v62, 0  ;;  %15012 = vst [vmem:[#allocation32_spill] sm:$0xff] %v8259_v59  ;;  %v215_v62 = vld [vmem:[%s14194_s0 + $0x1d0] sm:$0xff] }
 0x149   :  { %15011 = vst [vmem:[#allocation43_spill] sm:$0xff] %v8239_v55  ;;  %v8262_v8 = vsel %vm1314_vm8, %v2049_v54, %v2154_v33  ;;  %v8266_v57 = vperm.slane %v14381_v38, 0  ;;  %v8270_v26 = vperm.slane %v14383_v40, 0  ;;  %v8274_v52 = vperm.slane %v14385_v0, 0 }
 0x14a   :  { %15013 = vst [vmem:[#allocation46_spill] sm:$0xff] %v8262_v8  ;;  %v5981_v54 = vpack.i.bf16 %v8262_v8, %v8239_v55  ;;  %v2632_v33 = vsel %vm1302_vm2, %v8246_v46, %v2417_v35  ;;  %v718_v38 = vrot.slane %v460_v27, 2  ;;  %v719_v42 = vrot.slane %v460_v27, 4 }
 0x14b   :  { %328 = vst.msk [vmem:[#allocation2 + $0x301] sm:$0xff] %vm21_vm0, %v215_v62  ;;  %v2633_v40 = vsel %vm1304_vm3, %v8252_v18, %v2632_v33  ;;  %v720_v29 = vrot.slane %v460_v27, 6  ;;  %v721_v0 = vrot.slane %v8259_v59, 2  ;;  %v722_v43 = vrot.slane %v8259_v59, 4 }
 0x14c   :  { %5982 = vrot.lane.b32.xlu1 %v5981_v54, %s6352_s11  ;;  %v2634_v37 = vsel %vm1306_vm4, %v8256_v25, %v2633_v40  ;;  %v723_v35 = vrot.slane %v8259_v59, 6  ;;  %v1637_v45 = vperm.slane %v460_v27, 1  ;;  %v1638_v55 = vperm.slane %v718_v38, 1  ;;  %v216_v54 = vld [vmem:[%s14194_s0 + $0x1d8] sm:$0xff] }
 0x14d   :  { %v15014_v62 = vperm.slane %v8206_v23, 0  ;;  %v1639_v33 = vperm.slane %v719_v42, 1  ;;  %v1640_v60 = vperm.slane %v720_v29, 1  ;;  %v1641_v8 = vperm.slane %v8259_v59, 1  ;;  %329 = vst.msk [vmem:[#allocation2 + $0x309] sm:$0xff] %vm21_vm0, %v216_v54 }
 0x14e   :  { %v1642_v30 = vperm.slane %v721_v0, 1  ;;  %v1643_v44 = vperm.slane %v722_v43, 1  ;;  %v1644_v49 = vperm.slane %v723_v35, 1  ;;  %v3360_v36 = vsel %vm1302_vm2, %v7798_v34, %v7794_v39 }
 0x14f   :  { %v2635_v16 = vsel %vm1308_vm5, %v15014_v62, %v2634_v37  ;;  %v1848_v37 = vsel %vm1302_vm2, %v1638_v55, %v1637_v45  ;;  %v3302_v62 = vperm.slane %v417_v41, 0  ;;  %v3361_v3 = vsel %vm1304_vm3, %v7802_v17, %v3360_v36  ;;  %v15015_v45 = vld [vmem:[#allocation33_spill] sm:$0xff]  ;;  %v462_v36 = vld [vmem:[#allocation2 + $0x280] sm:$0x3] }
 0x150   :  { %v2636_v40 = vsel %vm1310_vm6, %v8266_v57, %v2635_v16  ;;  %v1849_v16 = vsel %vm1304_vm3, %v1639_v33, %v1848_v37  ;;  %v1126_v54 = vperm.slane %v6242_v11, 0  ;;  %v15016_v39 = vperm.slane %v7734_v24, 0 }
 0x151   :  { %v2637_v27 = vsel %vm1312_vm7, %v8270_v26, %v2636_v40  ;;  %v205_v40 = vld [vmem:[%s14194_s0 + $0x180] sm:$0xff]  ;;  %v1850_v55 = vsel %vm1306_vm4, %v1640_v60, %v1849_v16  ;;  %v8327_v33 = vperm.slane %v719_v42, 0  ;;  %v8329_v37 = vperm.slane %v720_v29, 0 }
 0x152   :  { %v2638_v28 = vsel %vm1314_vm8, %v8274_v52, %v2637_v27  ;;  %v3362_v34 = vsel %vm1306_vm4, %v15016_v39, %v3361_v3  ;;  %v8321_v27 = vperm.slane %v718_v38, 0  ;;  %318 = vst.msk [vmem:[#allocation2 + $0x259] sm:$0xff] %vm21_vm0, %v205_v40  ;;  %v1851_v17 = vsel %vm1308_vm5, %v1641_v8, %v1850_v55  ;;  %v8338_v8 = vld [vmem:[#allocation2 + $0x1f8] sm:$0xff]  ;;  %v15025_v40 = vld [vmem:[#allocation53_spill] sm:$0xff] }
 0x153   :  { %v5941_v41 = vpack.i.bf16 %v2638_v28, %v15015_v45  ;;  %v3363_v11 = vsel %vm1308_vm5, %v7809_v10, %v3362_v34  ;;  %15018 = vst [vmem:[#allocation49_spill] sm:$0xff] %v8327_v33  ;;  %v1852_v28 = vsel %vm1310_vm6, %v1642_v30, %v1851_v17  ;;  %v14408_v60 = vperm.slane %v8259_v59, 0  ;;  %v206_v30 = vld [vmem:[%s14194_s0 + $0x188] sm:$0xff] }
 0x154   :  { %15017 = vst [vmem:[#allocation47_spill] sm:$0xff] %v8321_v27  ;;  %v3364_v3 = vsel %vm1310_vm6, %v7813_v63, %v3363_v11  ;;  %v8336_v38 = vperm.slane %v721_v0, 0  ;;  %v1853_v10 = vsel %vm1312_vm7, %v1643_v44, %v1852_v28  ;;  %v8343_v29 = vperm.slane %v722_v43, 0  ;;  %v15027_v43 = vld [vmem:[#allocation54_spill] sm:$0xff]  ;;  %v15029_v11 = vld [vmem:[#allocation48_spill] sm:$0xff] }
 0x155   :  { %15019 = vst [vmem:[#allocation33_spill] sm:$0xff] %v8329_v37  ;;  %5942 = vrot.lane.b32.xlu2 %v5941_v41, %s6351_s10  ;;  %v3365_v42 = vsel %vm1312_vm7, %v7817_v7, %v3364_v3  ;;  %v8345_v16 = vperm.slane %v723_v35, 0  ;;  %v8351_v63 = vsel %vm1314_vm8, %v1644_v49, %v1853_v10  ;;  %v1351_v45 = vsel %vm1302_vm2, %v15025_v40, %v1126_v54  ;;  %v8356_v41 = vld [vmem:[#allocation2 + $0x200] sm:$0xff] }
 0x156   :  { %15020 = vst [vmem:[#allocation112_spill] sm:$0xff] %v8336_v38  ;;  %v3366_v0 = vsel %vm1314_vm8, %v3302_v62, %v3365_v42  ;;  %v2050_v44 = vperm.slane %v462_v36, 0  ;;  %v1352_v35 = vsel %vm1304_vm3, %v15027_v43, %v1351_v45  ;;  %v2156_v49 = vsel %vm1302_vm2, %v8327_v33, %v8321_v27  ;;  %v15028_v62 = vld [vmem:[#allocation55_spill] sm:$0xff]  ;;  %v15032_v43 = vld [vmem:[#allocation57_spill] sm:$0xff] }
 0x157   :  { %15021 = vst [vmem:[#allocation113_spill] sm:$0xff] %v8338_v8  ;;  %v5991_v7 = vpack.i.bf16 %v8351_v63, %v3366_v0  ;;  %v14407_v55 = vrot.slane %v8338_v8, 2  ;;  %v1353_v39 = vsel %vm1306_vm4, %v15028_v62, %v1352_v35  ;;  %v2157_v54 = vsel %vm1304_vm3, %v8329_v37, %v2156_v49  ;;  %v6243_v27 = vld [vmem:[#allocation2 + $0x150] sm:$0xff] }
 0x158   :  { %15022 = vst [vmem:[#allocation114_spill] sm:$0xff] %v8343_v29  ;;  %v14405_v34 = vrot.slane %v8338_v8, 4  ;;  %v14403_v17 = vrot.slane %v8338_v8, 6  ;;  %v15030_v36 = vperm.slane %v15029_v11, 0  ;;  %v2158_v3 = vsel %vm1306_vm4, %v14408_v60, %v2157_v54  ;;  %v469_v54 = vld [vmem:[#allocation2 + $0x2d0] sm:$0xff]  ;;  %v15033_v11 = vld [vmem:[#allocation58_spill] sm:$0xff] }
 0x159   :  { %15023 = vst [vmem:[#allocation115_spill] sm:$0xff] %v8345_v16  ;;  %5992 = vrot.lane.b32.xlu0 %v5991_v7, %s6350_s26  ;;  %v14402_v10 = vrot.slane %v8356_v41, 2  ;;  %v14404_v42 = vrot.slane %v8356_v41, 4  ;;  %v2159_v40 = vsel %vm1308_vm5, %v8336_v38, %v2158_v3  ;;  %v14406_v45 = vrot.slane %v8356_v41, 6 }
 0x15a   :  { %15024 = vst [vmem:[#allocation116_spill] sm:$0xff] %v8351_v63  ;;  %v1354_v28 = vsel %vm1308_vm5, %v15030_v36, %v1353_v39  ;;  %v2425_v7 = vperm.slane %v8338_v8, 0  ;;  %v2160_v49 = vsel %vm1310_vm6, %v8343_v29, %v2159_v40  ;;  %v8393_v62 = vperm.slane %v14407_v55, 0 }
 0x15b   :  { %15026 = vst [vmem:[#allocation53_spill] sm:$0xff] %v8356_v41  ;;  %v8397_v39 = vperm.slane %v14405_v34, 0  ;;  %v8407_v3 = vperm.slane %v14403_v17, 0  ;;  %v725_v17 = vrot.slane %v469_v54, 4  ;;  %v726_v34 = vrot.slane %v469_v54, 6 }
 0x15c   :  { %319 = vst.msk [vmem:[#allocation2 + $0x261] sm:$0xff] %vm21_vm0, %v206_v30  ;;  %v15031_v30 = vld [vmem:[#allocation56_spill] sm:$0xff]  ;;  %v1645_v8 = vperm.slane %v469_v54, 1  ;;  %v3367_v59 = vsel %vm1302_vm2, %v7975_v20, %v7971_v51  ;;  %v15039_v51 = vperm.slane %v7909_v2, 0 }
 0x15d   :  { %v1355_v0 = vsel %vm1310_vm6, %v15031_v30, %v1354_v28  ;;  %v2161_v28 = vsel %vm1312_vm7, %v8345_v16, %v2160_v49  ;;  %v8425_v49 = vperm.slane %v14406_v45, 0  ;;  %v423_v30 = vld [vmem:[#allocation2 + $0x148] sm:$0x3]  ;;  %v1648_v63 = vperm.slane %v726_v34, 1 }
 0x15e   :  { %v1356_v35 = vsel %vm1312_vm7, %v15032_v43, %v1355_v0  ;;  %v8410_v0 = vld [vmem:[#allocation2 + $0x2d8] sm:$0xff]  ;;  %v8413_v40 = vsel %vm1314_vm8, %v2050_v44, %v2161_v28  ;;  %v8417_v43 = vperm.slane %v14402_v10, 0  ;;  %v2639_v28 = vsel %vm1302_vm2, %v8393_v62, %v2425_v7 }
 0x15f   :  { %v8401_v36 = vsel %vm1314_vm8, %v15033_v11, %v1356_v35  ;;  %15035 = vst [vmem:[#allocation55_spill] sm:$0xff] %v8410_v0  ;;  %v8421_v35 = vperm.slane %v14404_v42, 0  ;;  %v219_v11 = vld [vmem:[%s14194_s0 + $0x1f0] sm:$0xff]  ;;  %v724_v10 = vrot.slane %v469_v54, 2  ;;  %v2640_v42 = vsel %vm1304_vm3, %v8397_v39, %v2639_v28 }
 0x160   :  { %15034 = vst [vmem:[#allocation54_spill] sm:$0xff] %v8401_v36  ;;  %v5996_v44 = vpack.i.bf16 %v8413_v40, %v8401_v36  ;;  %v727_v45 = vrot.slane %v8410_v0, 2  ;;  %v728_v55 = vrot.slane %v8410_v0, 4  ;;  %v2641_v60 = vsel %vm1306_vm4, %v8407_v3, %v2640_v42 }
 0x161   :  { %15036 = vst [vmem:[#allocation48_spill] sm:$0xff] %v8413_v40  ;;  %v729_v7 = vrot.slane %v8410_v0, 6  ;;  %v1646_v24 = vperm.slane %v724_v10, 1  ;;  %v1647_v28 = vperm.slane %v725_v17, 1  ;;  %v1649_v40 = vperm.slane %v8410_v0, 1 }
 0x162   :  { %332 = vst.msk [vmem:[#allocation2 + $0x331] sm:$0xff] %vm21_vm0, %v219_v11  ;;  %5997 = vrot.lane.b32.xlu1 %v5996_v44, %s6352_s11  ;;  %v15037_v11 = vperm.slane %v8356_v41, 0  ;;  %v220_v44 = vld [vmem:[%s14194_s0 + $0x1f8] sm:$0xff]  ;;  %v1650_v16 = vperm.slane %v727_v45, 1  ;;  %v1651_v29 = vperm.slane %v728_v55, 1  ;;  %v3368_v33 = vsel %vm1304_vm3, %v7979_v53, %v3367_v59 }
 0x163   :  { %v1652_v38 = vperm.slane %v729_v7, 1  ;;  %333 = vst.msk [vmem:[#allocation2 + $0x339] sm:$0xff] %vm21_vm0, %v220_v44  ;;  %v1134_v44 = vperm.slane %v6243_v27, 0  ;;  %v3369_v20 = vsel %vm1306_vm4, %v15039_v51, %v3368_v33  ;;  %v471_v27 = vld [vmem:[#allocation2 + $0x2e0] sm:$0x3]  ;;  %v15050_v51 = vld [vmem:[#allocation61_spill] sm:$0xff] }
 0x164   :  { %v2642_v36 = vsel %vm1308_vm5, %v15037_v11, %v2641_v60  ;;  %v1855_v60 = vsel %vm1302_vm2, %v1646_v24, %v1645_v8  ;;  %v3303_v11 = vperm.slane %v423_v30, 0  ;;  %v15038_v24 = vld [vmem:[#allocation34_spill] sm:$0xff]  ;;  %v3370_v59 = vsel %vm1308_vm5, %v7985_v32, %v3369_v20 }
 0x165   :  { %v2643_v42 = vsel %vm1310_vm6, %v8417_v43, %v2642_v36  ;;  %v1856_v36 = vsel %vm1304_vm3, %v1647_v28, %v1855_v60  ;;  %v8478_v28 = vperm.slane %v725_v17, 0  ;;  %v8480_v60 = vperm.slane %v726_v34, 0 }
 0x166   :  { %v2644_v54 = vsel %vm1312_vm7, %v8421_v35, %v2643_v42  ;;  %v209_v42 = vld [vmem:[%s14194_s0 + $0x1a0] sm:$0xff]  ;;  %v1857_v30 = vsel %vm1306_vm4, %v1648_v63, %v1856_v36  ;;  %v3371_v33 = vsel %vm1310_vm6, %v7989_v50, %v3370_v59  ;;  %v14423_v63 = vperm.slane %v8410_v0, 0 }
 0x167   :  { %v2645_v37 = vsel %vm1314_vm8, %v8425_v49, %v2644_v54  ;;  %v8472_v54 = vperm.slane %v724_v10, 0  ;;  %322 = vst.msk [vmem:[#allocation2 + $0x289] sm:$0xff] %vm21_vm0, %v209_v42  ;;  %v1858_v53 = vsel %vm1308_vm5, %v1649_v40, %v1857_v30  ;;  %v8487_v10 = vperm.slane %v727_v45, 0  ;;  %v8489_v40 = vld [vmem:[#allocation2 + $0x228] sm:$0xff]  ;;  %v15047_v42 = vld [vmem:[#allocation59_spill] sm:$0xff]  ;;  %v15051_v59 = vld [vmem:[#allocation50_spill] sm:$0xff] }
 0x168   :  { %v5956_v8 = vpack.i.bf16 %v2645_v37, %v15038_v24  ;;  %15041 = vst [vmem:[#allocation57_spill] sm:$0xff] %v8478_v28  ;;  %v1859_v37 = vsel %vm1310_vm6, %v1650_v16, %v1858_v53  ;;  %v3372_v17 = vsel %vm1312_vm7, %v7993_v31, %v3371_v33  ;;  %v8494_v34 = vperm.slane %v728_v55, 0  ;;  %v210_v16 = vld [vmem:[%s14194_s0 + $0x1a8] sm:$0xff]  ;;  %v15049_v55 = vld [vmem:[#allocation60_spill] sm:$0xff] }
 0x169   :  { %15040 = vst [vmem:[#allocation56_spill] sm:$0xff] %v8472_v54  ;;  %v1860_v32 = vsel %vm1312_vm7, %v1651_v29, %v1859_v37  ;;  %v8496_v36 = vperm.slane %v729_v7, 0  ;;  %v3373_v45 = vsel %vm1314_vm8, %v3303_v11, %v3372_v17  ;;  %v1358_v24 = vsel %vm1302_vm2, %v15047_v42, %v1134_v44  ;;  %v8505_v29 = vld [vmem:[#allocation2 + $0x230] sm:$0xff] }
 0x16a   :  { %15042 = vst [vmem:[#allocation58_spill] sm:$0xff] %v8480_v60  ;;  %5957 = vrot.lane.b32.xlu2 %v5956_v8, %s6351_s10  ;;  %v1861_v50 = vsel %vm1314_vm8, %v1652_v38, %v1860_v32  ;;  %v2051_v8 = vperm.slane %v471_v27, 0  ;;  %v1359_v7 = vsel %vm1304_vm3, %v15049_v55, %v1358_v24  ;;  %v2163_v30 = vsel %vm1302_vm2, %v8478_v28, %v8472_v54  ;;  %v15054_v55 = vld [vmem:[#allocation65_spill] sm:$0xff] }
 0x16b   :  { %15043 = vst [vmem:[#allocation34_spill] sm:$0xff] %v8487_v10  ;;  %v6006_v31 = vpack.i.bf16 %v1861_v50, %v3373_v45  ;;  %v14429_v38 = vrot.slane %v8489_v40, 2  ;;  %v1360_v11 = vsel %vm1306_vm4, %v15050_v51, %v1359_v7  ;;  %v2164_v44 = vsel %vm1304_vm3, %v8480_v60, %v2163_v30 }
 0x16c   :  { %15044 = vst [vmem:[#allocation117_spill] sm:$0xff] %v8489_v40  ;;  %v14428_v20 = vrot.slane %v8489_v40, 4  ;;  %v14427_v53 = vrot.slane %v8489_v40, 6  ;;  %v15052_v27 = vperm.slane %v15051_v59, 0  ;;  %v2165_v33 = vsel %vm1306_vm4, %v14423_v63, %v2164_v44  ;;  %v475_v44 = vld [vmem:[#allocation2 + $0x300] sm:$0xff]  ;;  %v15055_v59 = vld [vmem:[#allocation66_spill] sm:$0xff] }
 0x16d   :  { %15045 = vst [vmem:[#allocation118_spill] sm:$0xff] %v8494_v34  ;;  %6007 = vrot.lane.b32.xlu0 %v6006_v31, %s6350_s26  ;;  %v14425_v32 = vrot.slane %v8505_v29, 2  ;;  %v14424_v17 = vrot.slane %v8505_v29, 4  ;;  %v2166_v45 = vsel %vm1308_vm5, %v8487_v10, %v2165_v33  ;;  %v14426_v42 = vrot.slane %v8505_v29, 6  ;;  %v4034_v31 = vld [vmem:[%s14195_s1 + $0x78] sm:$0xff] }
 0x16e   :  { %15046 = vst [vmem:[#allocation119_spill] sm:$0xff] %v8496_v36  ;;  %v1361_v37 = vsel %vm1308_vm5, %v15052_v27, %v1360_v11  ;;  %v2433_v24 = vperm.slane %v8489_v40, 0  ;;  %v2167_v30 = vsel %vm1310_vm6, %v8494_v34, %v2166_v45  ;;  %v8544_v51 = vperm.slane %v14429_v38, 0  ;;  %4115 = vmatpush.msra.mxu0 %v4034_v31 }
 0x16f   :  { %15048 = vst [vmem:[#allocation59_spill] sm:$0xff] %v8505_v29  ;;  %v8548_v11 = vperm.slane %v14428_v20, 0  ;;  %v8558_v33 = vperm.slane %v14427_v53, 0  ;;  %v8566_v31 = vperm.slane %v14425_v32, 0  ;;  %v731_v63 = vrot.slane %v475_v44, 4 }
 0x170   :  { %323 = vst.msk [vmem:[#allocation2 + $0x291] sm:$0xff] %vm21_vm0, %v210_v16  ;;  %v15053_v16 = vld [vmem:[#allocation63_spill] sm:$0xff]  ;;  %v732_v32 = vrot.slane %v475_v44, 6  ;;  %v429_v20 = vld [vmem:[#allocation2 + $0x178] sm:$0x3]  ;;  %v1653_v38 = vperm.slane %v475_v44, 1  ;;  %v3374_v54 = vsel %vm1302_vm2, %v8003_v56, %v7999_v9 }
 0x171   :  { %v1362_v50 = vsel %vm1310_vm6, %v15053_v16, %v1361_v37  ;;  %v2168_v37 = vsel %vm1312_vm7, %v8496_v36, %v2167_v30  ;;  %v223_v30 = vld [vmem:[%s14194_s0 + $0x210] sm:$0xff]  ;;  %v3375_v2 = vsel %vm1304_vm3, %v8007_v14, %v3374_v54  ;;  %v15060_v9 = vperm.slane %v7933_v13, 0 }
 0x172   :  { %v1363_v7 = vsel %vm1312_vm7, %v15054_v55, %v1362_v50  ;;  %v8561_v50 = vld [vmem:[#allocation2 + $0x308] sm:$0xff]  ;;  %v2169_v45 = vsel %vm1314_vm8, %v2051_v8, %v2168_v37  ;;  %v8570_v55 = vperm.slane %v14424_v17, 0  ;;  %v2646_v8 = vsel %vm1302_vm2, %v8544_v51, %v2433_v24  ;;  %336 = vst.msk [vmem:[#allocation2 + $0x361] sm:$0xff] %vm21_vm0, %v223_v30 }
 0x173   :  { %v8552_v27 = vsel %vm1314_vm8, %v15055_v59, %v1363_v7  ;;  %15057 = vst [vmem:[#allocation61_spill] sm:$0xff] %v8561_v50  ;;  %v8574_v7 = vperm.slane %v14426_v42, 0  ;;  %v730_v37 = vrot.slane %v475_v44, 2  ;;  %v2647_v17 = vsel %vm1304_vm3, %v8548_v11, %v2646_v8 }
 0x174   :  { %15056 = vst [vmem:[#allocation60_spill] sm:$0xff] %v8552_v27  ;;  %v6011_v59 = vpack.i.bf16 %v2169_v45, %v8552_v27  ;;  %v733_v42 = vrot.slane %v8561_v50, 2  ;;  %v734_v53 = vrot.slane %v8561_v50, 4  ;;  %v2648_v45 = vsel %vm1306_vm4, %v8558_v33, %v2647_v17  ;;  %v6244_v27 = vld [vmem:[#allocation2 + $0x180] sm:$0xff] }
 0x175   :  { %v735_v24 = vrot.slane %v8561_v50, 6  ;;  %v1654_v16 = vperm.slane %v730_v37, 1  ;;  %v15058_v30 = vperm.slane %v8505_v29, 0  ;;  %v1655_v8 = vperm.slane %v731_v63, 1 }
 0x176   :  { %6012 = vrot.lane.b32.xlu1 %v6011_v59, %s6352_s11  ;;  %v1656_v34 = vperm.slane %v732_v32, 1  ;;  %v1657_v10 = vperm.slane %v8561_v50, 1  ;;  %v224_v59 = vld [vmem:[%s14194_s0 + $0x218] sm:$0xff]  ;;  %v1658_v0 = vperm.slane %v733_v42, 1  ;;  %v1659_v60 = vperm.slane %v734_v53, 1 }
 0x177   :  { %v2649_v36 = vsel %vm1308_vm5, %v15058_v30, %v2648_v45  ;;  %v1660_v28 = vperm.slane %v735_v24, 1  ;;  %337 = vst.msk [vmem:[#allocation2 + $0x369] sm:$0xff] %vm21_vm0, %v224_v59  ;;  %v1862_v45 = vsel %vm1302_vm2, %v1654_v16, %v1653_v38  ;;  %v3304_v30 = vperm.slane %v429_v20, 0  ;;  %v15059_v38 = vld [vmem:[#allocation44_spill] sm:$0xff] }
 0x178   :  { %v2650_v17 = vsel %vm1310_vm6, %v8566_v31, %v2649_v36  ;;  %v1863_v36 = vsel %vm1304_vm3, %v1655_v8, %v1862_v45  ;;  %v1142_v59 = vperm.slane %v6244_v27, 0  ;;  %v3376_v56 = vsel %vm1306_vm4, %v15060_v9, %v3375_v2  ;;  %v477_v27 = vld [vmem:[#allocation2 + $0x310] sm:$0x3] }
 0x179   :  { %v2651_v44 = vsel %vm1312_vm7, %v8570_v55, %v2650_v17  ;;  %v213_v17 = vld [vmem:[%s14194_s0 + $0x1c0] sm:$0xff]  ;;  %v1864_v16 = vsel %vm1306_vm4, %v1656_v34, %v1863_v36  ;;  %v3377_v54 = vsel %vm1308_vm5, %v8014_v47, %v3376_v56  ;;  %v8626_v8 = vperm.slane %v731_v63, 0 }
 0x17a   :  { %v2652_v40 = vsel %vm1314_vm8, %v8574_v7, %v2651_v44  ;;  %v8620_v44 = vperm.slane %v730_v37, 0  ;;  %326 = vst.msk [vmem:[#allocation2 + $0x2e9] sm:$0xff] %vm21_vm0, %v213_v17  ;;  %v1865_v14 = vsel %vm1308_vm5, %v1657_v10, %v1864_v16  ;;  %v8628_v45 = vperm.slane %v732_v32, 0  ;;  %v8640_v47 = vld [vmem:[#allocation2 + $0x258] sm:$0xff] }
 0x17b   :  { %v5971_v20 = vpack.i.bf16 %v2652_v40, %v15059_v38  ;;  %15062 = vst [vmem:[#allocation63_spill] sm:$0xff] %v8626_v8  ;;  %v4033_v40 = vld [vmem:[%s14195_s1 + $0x70] sm:$0xff]  ;;  %v1866_v2 = vsel %vm1310_vm6, %v1658_v0, %v1865_v14  ;;  %v3378_v34 = vsel %vm1310_vm6, %v8018_v19, %v3377_v54  ;;  %v14448_v10 = vperm.slane %v8561_v50, 0  ;;  %v214_v19 = vld [vmem:[%s14194_s0 + $0x1c8] sm:$0xff]  ;;  %v15072_v14 = vld [vmem:[#allocation69_spill] sm:$0xff] }
 0x17c   :  { %15061 = vst [vmem:[#allocation50_spill] sm:$0xff] %v8620_v44  ;;  %v8638_v37 = vperm.slane %v733_v42, 0  ;;  %4116 = vmatpush.msra.mxu0 %v4033_v40  ;;  %v1867_v63 = vsel %vm1312_vm7, %v1659_v60, %v1866_v2  ;;  %v3379_v32 = vsel %vm1312_vm7, %v8022_v4, %v3378_v34  ;;  %v8645_v36 = vperm.slane %v734_v53, 0  ;;  %v15070_v53 = vld [vmem:[#allocation72_spill] sm:$0xff]  ;;  %v15085_v50 = vld [vmem:[#allocation10_spill] sm:$0xff] }
 0x17d   :  { %15063 = vst [vmem:[#allocation65_spill] sm:$0xff] %v8628_v45  ;;  %5972 = vrot.lane.b32.xlu2 %v5971_v20, %s6351_s10  ;;  %v8647_v17 = vperm.slane %v735_v24, 0  ;;  %v8653_v0 = vsel %vm1314_vm8, %v1660_v28, %v1867_v63  ;;  %v3380_v42 = vsel %vm1314_vm8, %v3304_v30, %v3379_v32  ;;  %v1365_v38 = vsel %vm1302_vm2, %v7455_v15, %v1142_v59  ;;  %v8658_v20 = vld [vmem:[#allocation2 + $0x260] sm:$0xff]  ;;  %v15071_v30 = vld [vmem:[#allocation73_spill] sm:$0xff]  ;;  %v15074_v63 = vld [vmem:[#allocation74_spill] sm:$0xff] }
 0x17e   :  { %15064 = vst [vmem:[#allocation66_spill] sm:$0xff] %v8638_v37  ;;  %v2052_v60 = vperm.slane %v477_v27, 0  ;;  %v6021_v4 = vpack.i.bf16 %v8653_v0, %v3380_v42  ;;  %v1366_v24 = vsel %vm1304_vm3, %v15070_v53, %v1365_v38  ;;  %v2170_v28 = vsel %vm1302_vm2, %v8626_v8, %v8620_v44  ;;  %v4031_v53 = vld [vmem:[%s14195_s1 + $0x60] sm:$0xff]  ;;  %v15086_v44 = vld [vmem:[#allocation12_spill] sm:$0xff] }
 0x17f   :  { %15065 = vst [vmem:[#allocation44_spill] sm:$0xff] %v8640_v47  ;;  %v14447_v16 = vrot.slane %v8640_v47, 2  ;;  %v1367_v9 = vsel %vm1306_vm4, %v15071_v30, %v1366_v24  ;;  %v2171_v15 = vsel %vm1304_vm3, %v8628_v45, %v2170_v28  ;;  %v14444_v59 = vrot.slane %v8640_v47, 4  ;;  %v15075_v24 = vld [vmem:[#allocation75_spill] sm:$0xff] }
 0x180   :  { %15066 = vst [vmem:[#allocation120_spill] sm:$0xff] %v8645_v36  ;;  %v14442_v56 = vrot.slane %v8640_v47, 6  ;;  %6022 = vrot.lane.b32.xlu0 %v6021_v4, %s6350_s26  ;;  %v15073_v54 = vperm.slane %v15072_v14, 0  ;;  %v2172_v40 = vsel %vm1306_vm4, %v14448_v10, %v2171_v15  ;;  %v14443_v2 = vrot.slane %v8658_v20, 2  ;;  %v4032_v4 = vld [vmem:[%s14195_s1 + $0x68] sm:$0xff]  ;;  %v481_v14 = vld [vmem:[#allocation2 + $0x330] sm:$0xff] }
 0x181   :  { %15067 = vst [vmem:[#allocation121_spill] sm:$0xff] %v8647_v17  ;;  %v14445_v34 = vrot.slane %v8658_v20, 4  ;;  %v14446_v42 = vrot.slane %v8658_v20, 6  ;;  %v2441_v38 = vperm.slane %v8640_v47, 0  ;;  %v8705_v15 = vperm.slane %v14444_v59, 0  ;;  %4117 = vmatpush.msra.mxu0 %v4032_v4 }
 0x182   :  { %15068 = vst [vmem:[#allocation122_spill] sm:$0xff] %v8653_v0  ;;  %v1368_v27 = vsel %vm1308_vm5, %v15073_v54, %v1367_v9  ;;  %v8701_v9 = vperm.slane %v14447_v16, 0  ;;  %v15076_v54 = vld [vmem:[#allocation76_spill] sm:$0xff]  ;;  %v737_v59 = vrot.slane %v481_v14, 4  ;;  %v1661_v47 = vperm.slane %v481_v14, 1 }
 0x183   :  { %15069 = vst [vmem:[#allocation123_spill] sm:$0xff] %v8658_v20  ;;  %v1369_v32 = vsel %vm1310_vm6, %v15074_v63, %v1368_v27  ;;  %v8715_v63 = vperm.slane %v14442_v56, 0  ;;  %4118 = vmatpush.msra.mxu0 %v4031_v53  ;;  %v227_v56 = vld [vmem:[%s14194_s0 + $0x230] sm:$0xff] }
 0x184   :  { %327 = vst.msk [vmem:[#allocation2 + $0x2f1] sm:$0xff] %vm21_vm0, %v214_v19  ;;  %v2173_v19 = vsel %vm1308_vm5, %v8638_v37, %v2172_v40  ;;  %v1370_v28 = vsel %vm1312_vm7, %v15075_v24, %v1369_v32  ;;  %v4030_v24 = vld [vmem:[%s14195_s1 + $0x58] sm:$0xff]  ;;  %v435_v32 = vld [vmem:[#allocation2 + $0x1a8] sm:$0x3]  ;;  %v1663_v13 = vperm.slane %v737_v59, 1 }
 0x185   :  { %v2174_v30 = vsel %vm1310_vm6, %v8645_v36, %v2173_v19  ;;  %v8709_v27 = vsel %vm1314_vm8, %v15076_v54, %v1370_v28  ;;  %v8718_v19 = vld [vmem:[#allocation2 + $0x338] sm:$0xff]  ;;  %v8728_v28 = vperm.slane %v14443_v2, 0  ;;  %v8736_v54 = vperm.slane %v14446_v42, 0  ;;  %340 = vst.msk [vmem:[#allocation2 + $0x391] sm:$0xff] %vm21_vm0, %v227_v56  ;;  %4119 = vmatpush.msra.mxu0 %v4030_v24  ;;  %v228_v24 = vld [vmem:[%s14194_s0 + $0x238] sm:$0xff] }
 0x186   :  { %15077 = vst [vmem:[#allocation72_spill] sm:$0xff] %v8709_v27  ;;  %v2175_v40 = vsel %vm1312_vm7, %v8647_v17, %v2174_v30  ;;  %v8732_v30 = vperm.slane %v14445_v34, 0  ;;  %v736_v2 = vrot.slane %v481_v14, 2  ;;  %v738_v42 = vrot.slane %v481_v14, 6  ;;  %v15084_v37 = vld [vmem:[#allocation9_spill] sm:$0xff] }
 0x187   :  { %15078 = vst [vmem:[#allocation73_spill] sm:$0xff] %v8718_v19  ;;  %v8724_v4 = vsel %vm1314_vm8, %v2052_v60, %v2175_v40  ;;  %v2653_v40 = vsel %vm1302_vm2, %v8701_v9, %v2441_v38  ;;  %v739_v53 = vrot.slane %v8718_v19, 2  ;;  %v740_v16 = vrot.slane %v8718_v19, 4 }
 0x188   :  { %15079 = vst [vmem:[#allocation69_spill] sm:$0xff] %v8724_v4  ;;  %v6026_v60 = vpack.i.bf16 %v8724_v4, %v8709_v27  ;;  %v2654_v34 = vsel %vm1304_vm3, %v8705_v15, %v2653_v40  ;;  %v741_v38 = vrot.slane %v8718_v19, 6  ;;  %v1662_v4 = vperm.slane %v736_v2, 1 }
 0x189   :  { %15080 = vst [vmem:[#allocation74_spill] sm:$0xff] %v8728_v28  ;;  %v2655_v10 = vsel %vm1306_vm4, %v8715_v63, %v2654_v34  ;;  %v15083_v56 = vperm.slane %v8658_v20, 0  ;;  %v1664_v27 = vperm.slane %v738_v42, 1  ;;  %v1665_v0 = vperm.slane %v8718_v19, 1  ;;  %v6245_v20 = vld [vmem:[#allocation2 + $0x1b0] sm:$0xff] }
 0x18a   :  { %15081 = vst [vmem:[#allocation75_spill] sm:$0xff] %v8732_v30  ;;  %6027 = vrot.lane.b32.xlu1 %v6026_v60, %s6352_s11  ;;  %v1666_v60 = vperm.slane %v739_v53, 1  ;;  %v1667_v17 = vperm.slane %v740_v16, 1  ;;  %v1668_v36 = vperm.slane %v741_v38, 1  ;;  %v3381_v45 = vsel %vm1302_vm2, %v15085_v50, %v15084_v37 }
 0x18b   :  { %15082 = vst [vmem:[#allocation76_spill] sm:$0xff] %v8736_v54  ;;  %v2656_v40 = vsel %vm1308_vm5, %v15083_v56, %v2655_v10  ;;  %v1869_v10 = vsel %vm1302_vm2, %v1662_v4, %v1661_v47  ;;  %v3305_v56 = vperm.slane %v435_v32, 0  ;;  %v15087_v47 = vld [vmem:[#allocation45_spill] sm:$0xff] }
 0x18c   :  { %v2657_v34 = vsel %vm1310_vm6, %v8728_v28, %v2656_v40  ;;  %341 = vst.msk [vmem:[#allocation2 + $0x399] sm:$0xff] %vm21_vm0, %v228_v24  ;;  %v1870_v40 = vsel %vm1304_vm3, %v1663_v13, %v1869_v10  ;;  %v3382_v28 = vsel %vm1304_vm3, %v15086_v44, %v3381_v45  ;;  %v1150_v24 = vperm.slane %v6245_v20, 0  ;;  %v15091_v44 = vld [vmem:[#allocation13_spill] sm:$0xff]  ;;  %v483_v20 = vld [vmem:[#allocation2 + $0x340] sm:$0x3] }
 0x18d   :  { %v2658_v14 = vsel %vm1312_vm7, %v8732_v30, %v2657_v34  ;;  %v217_v34 = vld [vmem:[%s14194_s0 + $0x1e0] sm:$0xff]  ;;  %v1871_v4 = vsel %vm1306_vm4, %v1664_v27, %v1870_v40  ;;  %v15088_v30 = vld [vmem:[#allocation11_spill] sm:$0xff]  ;;  %v8789_v10 = vperm.slane %v737_v59, 0  ;;  %v15094_v27 = vld [vmem:[#allocation16_spill] sm:$0xff]  ;;  %v8801_v40 = vperm.slane %v739_v53, 0 }
 0x18e   :  { %v2659_v8 = vsel %vm1314_vm8, %v8736_v54, %v2658_v14  ;;  %v15089_v50 = vperm.slane %v15088_v30, 0  ;;  %v8783_v14 = vperm.slane %v736_v2, 0  ;;  %330 = vst.msk [vmem:[#allocation2 + $0x319] sm:$0xff] %vm21_vm0, %v217_v34  ;;  %v1872_v13 = vsel %vm1308_vm5, %v1665_v0, %v1871_v4  ;;  %v8803_v34 = vld [vmem:[#allocation2 + $0x288] sm:$0xff]  ;;  %v441_v30 = vld [vmem:[#allocation2 + $0x1d8] sm:$0x3] }
 0x18f   :  { %v5986_v32 = vpack.i.bf16 %v2659_v8, %v15087_v47  ;;  %15092 = vst [vmem:[#allocation10_spill] sm:$0xff] %v8789_v10  ;;  %v8791_v54 = vperm.slane %v738_v42, 0  ;;  %v4029_v8 = vld [vmem:[%s14195_s1 + $0x50] sm:$0xff]  ;;  %v1873_v2 = vsel %vm1310_vm6, %v1666_v60, %v1872_v13  ;;  %v14468_v0 = vperm.slane %v8718_v19, 0  ;;  %v15097_v42 = vld [vmem:[#allocation18_spill] sm:$0xff]  ;;  %v218_v60 = vld [vmem:[%s14194_s0 + $0x1e8] sm:$0xff] }
 0x190   :  { %v3383_v37 = vsel %vm1306_vm4, %v15089_v50, %v3382_v28  ;;  %15090 = vst [vmem:[#allocation9_spill] sm:$0xff] %v8783_v14  ;;  %4120 = vmatpush.msra.mxu0 %v4029_v8  ;;  %v1874_v59 = vsel %vm1312_vm7, %v1667_v17, %v1873_v2  ;;  %v8808_v4 = vperm.slane %v740_v16, 0  ;;  %v2053_v17 = vperm.slane %v483_v20, 0 }
 0x191   :  { %v3384_v45 = vsel %vm1308_vm5, %v15091_v44, %v3383_v37  ;;  %15093 = vst [vmem:[#allocation12_spill] sm:$0xff] %v8791_v54  ;;  %5987 = vrot.lane.b32.xlu2 %v5986_v32, %s6351_s10  ;;  %v8810_v32 = vperm.slane %v741_v38, 0  ;;  %v8816_v50 = vsel %vm1314_vm8, %v1668_v36, %v1874_v59  ;;  %v15101_v37 = vld [vmem:[#allocation85_spill] sm:$0xff]  ;;  %v15103_v38 = vld [vmem:[#allocation86_spill] sm:$0xff]  ;;  %v2177_v36 = vsel %vm1302_vm2, %v8789_v10, %v8783_v14 }
 0x192   :  { %v3385_v28 = vsel %vm1310_vm6, %v15094_v27, %v3384_v45  ;;  %15095 = vst [vmem:[#allocation45_spill] sm:$0xff] %v8801_v40  ;;  %v1372_v13 = vsel %vm1302_vm2, %v15101_v37, %v1150_v24  ;;  %v8821_v44 = vld [vmem:[#allocation2 + $0x290] sm:$0xff]  ;;  %v14469_v8 = vrot.slane %v8803_v34, 2  ;;  %v2178_v24 = vsel %vm1304_vm3, %v8791_v54, %v2177_v36  ;;  %v15107_v37 = vld [vmem:[#allocation88_spill] sm:$0xff]  ;;  %v4028_v36 = vld [vmem:[%s14195_s1 + $0x48] sm:$0xff] }
 0x193   :  { %15096 = vst [vmem:[#allocation13_spill] sm:$0xff] %v8803_v34  ;;  %v3386_v47 = vsel %vm1312_vm7, %v15097_v42, %v3385_v28  ;;  %v1373_v45 = vsel %vm1304_vm3, %v15103_v38, %v1372_v13  ;;  %v14470_v20 = vrot.slane %v8803_v34, 4  ;;  %v14471_v27 = vrot.slane %v8803_v34, 6  ;;  %v15105_v28 = vld [vmem:[#allocation84_spill] sm:$0xff]  ;;  %4121 = vmatpush.msra.mxu0 %v4028_v36 }
 0x194   :  { %15098 = vst [vmem:[#allocation16_spill] sm:$0xff] %v8808_v4  ;;  %v3387_v53 = vsel %vm1314_vm8, %v3305_v56, %v3386_v47  ;;  %v15104_v56 = vld [vmem:[#allocation87_spill] sm:$0xff]  ;;  %v15106_v59 = vperm.slane %v15105_v28, 0  ;;  %v2179_v47 = vsel %vm1306_vm4, %v14468_v0, %v2178_v24  ;;  %v3388_v10 = vsel %vm1302_vm2, %v8252_v18, %v8246_v46  ;;  %v221_v46 = vld [vmem:[%s14194_s0 + $0x200] sm:$0xff] }
 0x195   :  { %15099 = vst [vmem:[#allocation18_spill] sm:$0xff] %v8810_v32  ;;  %v6036_v16 = vpack.i.bf16 %v8816_v50, %v3387_v53  ;;  %v1374_v2 = vsel %vm1306_vm4, %v15104_v56, %v1373_v45  ;;  %v14473_v53 = vrot.slane %v8821_v44, 4  ;;  %v2180_v38 = vsel %vm1308_vm5, %v8801_v40, %v2179_v47  ;;  %v4027_v56 = vld [vmem:[%s14195_s1 + $0x40] sm:$0xff]  ;;  %v487_v47 = vld [vmem:[#allocation2 + $0x360] sm:$0xff] }
 0x196   :  { %15100 = vst [vmem:[#allocation124_spill] sm:$0xff] %v8816_v50  ;;  %v1375_v42 = vsel %vm1308_vm5, %v15106_v59, %v1374_v2  ;;  %v2449_v45 = vperm.slane %v8803_v34, 0  ;;  %v15108_v2 = vld [vmem:[#allocation89_spill] sm:$0xff]  ;;  %v2181_v28 = vsel %vm1310_vm6, %v8808_v4, %v2180_v38  ;;  %v8864_v59 = vperm.slane %v14469_v8, 0  ;;  %v8881_v8 = vld [vmem:[#allocation2 + $0x368] sm:$0xff]  ;;  %4122 = vmatpush.msra.mxu0 %v4027_v56 }
 0x197   :  { %15102 = vst [vmem:[#allocation85_spill] sm:$0xff] %v8821_v44  ;;  %6037 = vrot.lane.b32.xlu0 %v6036_v16, %s6350_s26  ;;  %v1376_v13 = vsel %vm1310_vm6, %v15107_v37, %v1375_v42  ;;  %v14474_v16 = vrot.slane %v8821_v44, 6  ;;  %v8868_v42 = vperm.slane %v14470_v20, 0  ;;  %v15110_v37 = vld [vmem:[#allocation91_spill] sm:$0xff]  ;;  %v8878_v38 = vperm.slane %v14471_v27, 0  ;;  %v4026_v20 = vld [vmem:[%s14195_s1 + $0x38] sm:$0xff] }
 0x198   :  { %331 = vst.msk [vmem:[#allocation2 + $0x321] sm:$0xff] %vm21_vm0, %v218_v60  ;;  %v14472_v60 = vrot.slane %v8821_v44, 2  ;;  %v1377_v24 = vsel %vm1312_vm7, %v15108_v2, %v1376_v13  ;;  %v2182_v13 = vsel %vm1312_vm7, %v8810_v32, %v2181_v28  ;;  %v8895_v28 = vperm.slane %v14473_v53, 0  ;;  %v231_v27 = vld [vmem:[%s14194_s0 + $0x250] sm:$0xff]  ;;  %4123 = vmatpush.msra.mxu0 %v4026_v20  ;;  %v232_v20 = vld [vmem:[%s14194_s0 + $0x258] sm:$0xff] }
 0x199   :  { %15109 = vst [vmem:[#allocation86_spill] sm:$0xff] %v8868_v42  ;;  %v8872_v0 = vsel %vm1314_vm8, %v15110_v37, %v1377_v24  ;;  %v8887_v36 = vsel %vm1314_vm8, %v2053_v17, %v2182_v13  ;;  %v8899_v37 = vperm.slane %v14474_v16, 0  ;;  %v2660_v13 = vsel %vm1302_vm2, %v8864_v59, %v2449_v45 }
 0x19a   :  { %15111 = vst [vmem:[#allocation87_spill] sm:$0xff] %v8872_v0  ;;  %v8891_v24 = vperm.slane %v14472_v60, 0  ;;  %v6041_v17 = vpack.i.bf16 %v8887_v36, %v8872_v0  ;;  %v742_v60 = vrot.slane %v487_v47, 2  ;;  %v743_v2 = vrot.slane %v487_v47, 4 }
 0x19b   :  { %15112 = vst [vmem:[#allocation84_spill] sm:$0xff] %v8878_v38  ;;  %v2661_v53 = vsel %vm1304_vm3, %v8868_v42, %v2660_v13  ;;  %v744_v16 = vrot.slane %v487_v47, 6  ;;  %v745_v56 = vrot.slane %v8881_v8, 2  ;;  %v746_v34 = vrot.slane %v8881_v8, 4 }
 0x19c   :  { %15113 = vst [vmem:[#allocation88_spill] sm:$0xff] %v8881_v8  ;;  %6042 = vrot.lane.b32.xlu1 %v6041_v17, %s6352_s11  ;;  %v747_v45 = vrot.slane %v8881_v8, 6  ;;  %v1669_v0 = vperm.slane %v487_v47, 1  ;;  %v1670_v50 = vperm.slane %v742_v60, 1  ;;  %v1671_v32 = vperm.slane %v743_v2, 1 }
 0x19d   :  { %15114 = vst [vmem:[#allocation89_spill] sm:$0xff] %v8887_v36  ;;  %v2662_v36 = vsel %vm1306_vm4, %v8878_v38, %v2661_v53  ;;  %v1672_v4 = vperm.slane %v744_v16, 1  ;;  %v1673_v40 = vperm.slane %v8881_v8, 1  ;;  %v1674_v17 = vperm.slane %v745_v56, 1  ;;  %v15117_v38 = vld [vmem:[#allocation62_spill] sm:$0xff] }
 0x19e   :  { %15115 = vst [vmem:[#allocation91_spill] sm:$0xff] %v8891_v24  ;;  %v1675_v19 = vperm.slane %v746_v34, 1  ;;  %v1676_v54 = vperm.slane %v747_v45, 1 }
 0x19f   :  { %344 = vst.msk [vmem:[#allocation2 + $0x3c1] sm:$0xff] %vm21_vm0, %v231_v27  ;;  %v15116_v27 = vperm.slane %v8821_v44, 0  ;;  %v6246_v44 = vld [vmem:[#allocation2 + $0x1e0] sm:$0xff] }
 0x1a0   :  { %345 = vst.msk [vmem:[#allocation2 + $0x3c9] sm:$0xff] %vm21_vm0, %v232_v20  ;;  %v1158_v20 = vperm.slane %v6246_v44, 0 }
 0x1a1   :  { %v2663_v13 = vsel %vm1308_vm5, %v15116_v27, %v2662_v36  ;;  %v1876_v36 = vsel %vm1302_vm2, %v1670_v50, %v1669_v0  ;;  %v3306_v27 = vperm.slane %v441_v30, 0  ;;  %v15118_v30 = vperm.slane %v8206_v23, 0  ;;  %334 = vst.msk [vmem:[#allocation2 + $0x349] sm:$0xff] %vm21_vm0, %v221_v46 }
 0x1a2   :  { %v2664_v53 = vsel %vm1310_vm6, %v8891_v24, %v2663_v13  ;;  %v1877_v13 = vsel %vm1304_vm3, %v1671_v32, %v1876_v36  ;;  %v3389_v24 = vsel %vm1304_vm3, %v8256_v25, %v3388_v10  ;;  %v8943_v50 = vperm.slane %v742_v60, 0  ;;  %v489_v10 = vld [vmem:[#allocation2 + $0x370] sm:$0x3] }
 0x1a3   :  { %v2665_v47 = vsel %vm1312_vm7, %v8895_v28, %v2664_v53  ;;  %v1878_v53 = vsel %vm1306_vm4, %v1672_v4, %v1877_v13  ;;  %v3390_v0 = vsel %vm1306_vm4, %v15118_v30, %v3389_v24  ;;  %v8951_v32 = vperm.slane %v743_v2, 0  ;;  %v4025_v4 = vld [vmem:[%s14195_s1 + $0x30] sm:$0xff]  ;;  %v8981_v13 = vld [vmem:[#allocation2 + $0x2f0] sm:$0xff] }
 0x1a4   :  { %v2666_v14 = vsel %vm1314_vm8, %v8899_v37, %v2665_v47  ;;  %15119 = vst [vmem:[#allocation62_spill] sm:$0xff] %v8943_v50  ;;  %v1879_v18 = vsel %vm1308_vm5, %v1673_v40, %v1878_v53  ;;  %v3391_v25 = vsel %vm1308_vm5, %v8266_v57, %v3390_v0  ;;  %v14498_v57 = vperm.slane %v8881_v8, 0  ;;  %4124 = vmatpush.msra.mxu0 %v4025_v4  ;;  %v15127_v47 = vld [vmem:[#allocation99_spill] sm:$0xff] }
 0x1a5   :  { %v6001_v42 = vpack.i.bf16 %v2666_v14, %v15117_v38  ;;  %15120 = vst [vmem:[#allocation125_spill] sm:$0xff] %v8951_v32  ;;  %v8953_v14 = vperm.slane %v744_v16, 0  ;;  %v1880_v44 = vsel %vm1310_vm6, %v1674_v17, %v1879_v18  ;;  %v3392_v40 = vsel %vm1310_vm6, %v8270_v26, %v3391_v25  ;;  %v8966_v38 = vld [vmem:[#allocation2 + $0x2e8] sm:$0xff]  ;;  %v15131_v18 = vld [vmem:[#allocation98_spill] sm:$0xff] }
 0x1a6   :  { %v8964_v60 = vperm.slane %v745_v56, 0  ;;  %15123 = vst [vmem:[#allocation128_spill] sm:$0xff] %v8966_v38  ;;  %v1881_v16 = vsel %vm1312_vm7, %v1675_v19, %v1880_v44  ;;  %v3393_v2 = vsel %vm1312_vm7, %v8274_v52, %v3392_v40  ;;  %v8971_v24 = vperm.slane %v746_v34, 0  ;;  %v222_v19 = vld [vmem:[%s14194_s0 + $0x208] sm:$0xff]  ;;  %v15129_v34 = vld [vmem:[#allocation100_spill] sm:$0xff] }
 0x1a7   :  { %15121 = vst [vmem:[#allocation126_spill] sm:$0xff] %v8953_v14  ;;  %6002 = vrot.lane.b32.xlu2 %v6001_v42, %s6351_s10  ;;  %v8973_v42 = vperm.slane %v747_v45, 0  ;;  %v8976_v17 = vsel %vm1314_vm8, %v1676_v54, %v1881_v16  ;;  %v3394_v26 = vsel %vm1314_vm8, %v3306_v27, %v3393_v2  ;;  %v1379_v56 = vsel %vm1302_vm2, %v15127_v47, %v1158_v20  ;;  %v15130_v20 = vld [vmem:[#allocation101_spill] sm:$0xff]  ;;  %v15133_v16 = vld [vmem:[#allocation102_spill] sm:$0xff] }
 0x1a8   :  { %15122 = vst [vmem:[#allocation127_spill] sm:$0xff] %v8964_v60  ;;  %v2054_v36 = vperm.slane %v489_v10, 0  ;;  %v6051_v52 = vpack.i.bf16 %v8976_v17, %v3394_v26  ;;  %v1380_v45 = vsel %vm1304_vm3, %v15129_v34, %v1379_v56  ;;  %v2184_v54 = vsel %vm1302_vm2, %v8951_v32, %v8943_v50  ;;  %v15134_v34 = vld [vmem:[#allocation104_spill] sm:$0xff] }
 0x1a9   :  { %15124 = vst [vmem:[#allocation129_spill] sm:$0xff] %v8971_v24  ;;  %v14496_v27 = vrot.slane %v8966_v38, 2  ;;  %v1381_v53 = vsel %vm1306_vm4, %v15130_v20, %v1380_v45  ;;  %v2185_v30 = vsel %vm1304_vm3, %v8953_v14, %v2184_v54  ;;  %v14494_v0 = vrot.slane %v8966_v38, 4  ;;  %v15139_v14 = vld [vmem:[#allocation64_spill] sm:$0xff] }
 0x1aa   :  { %15125 = vst [vmem:[#allocation130_spill] sm:$0xff] %v8973_v42  ;;  %v14492_v46 = vrot.slane %v8966_v38, 6  ;;  %6052 = vrot.lane.b32.xlu0 %v6051_v52, %s6350_s26  ;;  %v15132_v25 = vperm.slane %v15131_v18, 0  ;;  %v2186_v4 = vsel %vm1306_vm4, %v14498_v57, %v2185_v30  ;;  %v14493_v44 = vrot.slane %v8981_v13, 2  ;;  %v4023_v52 = vld [vmem:[%s14195_s1 + $0x20] sm:$0xff]  ;;  %v493_v30 = vld [vmem:[#allocation2 + $0x390] sm:$0xff] }
 0x1ab   :  { %15126 = vst [vmem:[#allocation131_spill] sm:$0xff] %v8976_v17  ;;  %v14495_v40 = vrot.slane %v8981_v13, 4  ;;  %v2187_v26 = vsel %vm1308_vm5, %v8964_v60, %v2186_v4  ;;  %v14497_v47 = vrot.slane %v8981_v13, 6  ;;  %v2457_v56 = vperm.slane %v8966_v38, 0  ;;  %v15135_v18 = vld [vmem:[#allocation105_spill] sm:$0xff] }
 0x1ac   :  { %15128 = vst [vmem:[#allocation99_spill] sm:$0xff] %v8981_v13  ;;  %v1382_v10 = vsel %vm1308_vm5, %v15132_v25, %v1381_v53  ;;  %v2188_v54 = vsel %vm1310_vm6, %v8971_v24, %v2187_v26  ;;  %v9027_v20 = vperm.slane %v14496_v27, 0  ;;  %v9031_v53 = vperm.slane %v14494_v0, 0  ;;  %v4022_v26 = vld [vmem:[%s14195_s1 + $0x18] sm:$0xff] }
 0x1ad   :  { %335 = vst.msk [vmem:[#allocation2 + $0x351] sm:$0xff] %vm21_vm0, %v222_v19  ;;  %v1383_v2 = vsel %vm1310_vm6, %v15133_v16, %v1382_v10  ;;  %v4024_v19 = vld [vmem:[%s14195_s1 + $0x28] sm:$0xff]  ;;  %v2189_v10 = vsel %vm1312_vm7, %v8973_v42, %v2188_v54  ;;  %v9041_v4 = vperm.slane %v14492_v46, 0  ;;  %v14506_v16 = vperm.slane %v8981_v13, 0 }
 0x1ae   :  { %v1384_v45 = vsel %vm1312_vm7, %v15134_v34, %v1383_v2  ;;  %4125 = vmatpush.msra.mxu0 %v4024_v19  ;;  %v9044_v2 = vld [vmem:[#allocation2 + $0x398] sm:$0xff]  ;;  %v9050_v19 = vsel %vm1314_vm8, %v2054_v36, %v2189_v10  ;;  %v9054_v34 = vperm.slane %v14493_v44, 0  ;;  %v9062_v54 = vperm.slane %v14497_v47, 0 }
 0x1af   :  { %v9035_v25 = vsel %vm1314_vm8, %v15135_v18, %v1384_v45  ;;  %15137 = vst [vmem:[#allocation101_spill] sm:$0xff] %v9044_v2  ;;  %v9058_v45 = vperm.slane %v14495_v40, 0  ;;  %v2667_v36 = vsel %vm1302_vm2, %v9027_v20, %v2457_v56  ;;  %v748_v10 = vrot.slane %v493_v30, 2 }
 0x1b0   :  { %15136 = vst [vmem:[#allocation100_spill] sm:$0xff] %v9035_v25  ;;  %4126 = vmatpush.msra.mxu0 %v4023_v52  ;;  %v6056_v18 = vpack.i.bf16 %v9050_v19, %v9035_v25  ;;  %v749_v46 = vrot.slane %v493_v30, 4  ;;  %v2668_v44 = vsel %vm1304_vm3, %v9031_v53, %v2667_v36  ;;  %v750_v0 = vrot.slane %v493_v30, 6  ;;  %v447_v36 = vld [vmem:[#allocation2 + $0x208] sm:$0x3] }
 0x1b1   :  { %15138 = vst [vmem:[#allocation98_spill] sm:$0xff] %v9050_v19  ;;  %v751_v40 = vrot.slane %v9044_v2, 2  ;;  %v752_v27 = vrot.slane %v9044_v2, 4  ;;  %v2669_v52 = vsel %vm1306_vm4, %v9041_v4, %v2668_v44  ;;  %v753_v47 = vrot.slane %v9044_v2, 6 }
 0x1b2   :  { %4127 = vmatpush.msra.mxu0 %v4022_v26  ;;  %6057 = vrot.lane.b32.xlu1 %v6056_v18, %s6352_s11  ;;  %v1677_v57 = vperm.slane %v493_v30, 1  ;;  %v1678_v56 = vperm.slane %v748_v10, 1  ;;  %v2670_v38 = vsel %vm1308_vm5, %v14506_v16, %v2669_v52  ;;  %v1679_v19 = vperm.slane %v749_v46, 1  ;;  %v4050_v26 = vld [vmem:[%s14195_s1 + $0xf8] sm:$0xff] }
 0x1b3   :  { %v1680_v23 = vperm.slane %v750_v0, 1  ;;  %v9085_v18 = vld [vmem:[%s14195_s1 + $0x118] sm:$0xff]  ;;  %v2671_v44 = vsel %vm1310_vm6, %v9054_v34, %v2670_v38  ;;  %v1681_v30 = vperm.slane %v9044_v2, 1  ;;  %v1682_v25 = vperm.slane %v751_v40, 1  ;;  %4216 = vmatpush.msra.mxu1 %v4050_v26 }
 0x1b4   :  { %v1683_v17 = vperm.slane %v752_v27, 1  ;;  %5841 = vmatpush.msra.mxu2 %v9085_v18  ;;  %v2672_v52 = vsel %vm1312_vm7, %v9058_v45, %v2671_v44  ;;  %v1684_v16 = vperm.slane %v753_v47, 1  ;;  %v1883_v42 = vsel %vm1302_vm2, %v1678_v56, %v1677_v57  ;;  %5842 = vmatpush.msra.mxu3 %v9085_v18 }
 0x1b5   :  { %v3395_v24 = vsel %vm1302_vm2, %v8397_v39, %v8393_v62  ;;  %v2673_v38 = vsel %vm1314_vm8, %v9062_v54, %v2672_v52  ;;  %v1884_v60 = vsel %vm1304_vm3, %v1679_v19, %v1883_v42  ;;  %v3307_v26 = vperm.slane %v447_v36, 0  ;;  %v6247_v62 = vld [vmem:[#allocation2 + $0x210] sm:$0xff] }
 0x1b6   :  { %v3396_v8 = vsel %vm1304_vm3, %v8407_v3, %v3395_v24  ;;  %v6016_v44 = vpack.i.bf16 %v2673_v38, %v15139_v14  ;;  %v1885_v32 = vsel %vm1306_vm4, %v1680_v23, %v1884_v60  ;;  %v15140_v57 = vperm.slane %v8356_v41, 0  ;;  %v235_v3 = vld [vmem:[%s14194_s0 + $0x270] sm:$0xff] }
 0x1b7   :  { %v1166_v39 = vperm.slane %v6247_v62, 0  ;;  %v1886_v50 = vsel %vm1308_vm5, %v1681_v30, %v1885_v32  ;;  %v9111_v42 = vperm.slane %v748_v10, 0  ;;  %v9113_v19 = vperm.slane %v749_v46, 0  ;;  %v4021_v60 = vld [vmem:[%s14195_s1 + $0x10] sm:$0xff]  ;;  %348 = vst.msk [vmem:[#allocation2 + $0x3f1] sm:$0xff] %vm21_vm0, %v235_v3 }
 0x1b8   :  { %v3397_v56 = vsel %vm1306_vm4, %v15140_v57, %v3396_v8  ;;  %6017 = vrot.lane.b32.xlu2 %v6016_v44, %s6351_s10  ;;  %v1887_v23 = vsel %vm1310_vm6, %v1682_v25, %v1886_v50  ;;  %v9122_v14 = vperm.slane %v750_v0, 0  ;;  %v14520_v32 = vperm.slane %v9044_v2, 0  ;;  %4128 = vmatpush.msra.mxu0 %v4021_v60  ;;  %v495_v10 = vld [vmem:[#allocation2 + $0x3a0] sm:$0x3] }
 0x1b9   :  { %v3398_v52 = vsel %vm1308_vm5, %v8417_v43, %v3397_v56  ;;  %15141 = vst [vmem:[#allocation102_spill] sm:$0xff] %v9111_v42  ;;  %v9125_v43 = vld [vmem:[#allocation2 + $0x318] sm:$0xff]  ;;  %v1888_v24 = vsel %vm1312_vm7, %v1683_v17, %v1887_v23  ;;  %v9134_v46 = vperm.slane %v751_v40, 0  ;;  %v9142_v36 = vperm.slane %v753_v47, 0  ;;  %v9146_v17 = vld [vmem:[#allocation2 + $0x320] sm:$0xff]  ;;  %v236_v47 = vld [vmem:[%s14194_s0 + $0x278] sm:$0xff] }
 0x1ba   :  { %15142 = vst [vmem:[#allocation104_spill] sm:$0xff] %v9113_v19  ;;  %v3399_v8 = vsel %vm1310_vm6, %v8421_v35, %v3398_v52  ;;  %v9136_v35 = vperm.slane %v752_v27, 0  ;;  %v9139_v0 = vsel %vm1314_vm8, %v1684_v16, %v1888_v24  ;;  %v1386_v30 = vsel %vm1302_vm2, %v8077_v58, %v1166_v39  ;;  %v225_v58 = vld [vmem:[%s14194_s0 + $0x220] sm:$0xff] }
 0x1bb   :  { %15143 = vst [vmem:[#allocation105_spill] sm:$0xff] %v9122_v14  ;;  %v3400_v50 = vsel %vm1312_vm7, %v8425_v49, %v3399_v8  ;;  %v1387_v27 = vsel %vm1304_vm3, %v8084_v12, %v1386_v30  ;;  %v2191_v40 = vsel %vm1302_vm2, %v9113_v19, %v9111_v42  ;;  %v14519_v16 = vrot.slane %v9125_v43, 2 }
 0x1bc   :  { %15144 = vst [vmem:[#allocation64_spill] sm:$0xff] %v9125_v43  ;;  %v3401_v25 = vsel %vm1314_vm8, %v3307_v26, %v3400_v50  ;;  %v1388_v38 = vsel %vm1306_vm4, %v8086_v5, %v1387_v27  ;;  %v2192_v12 = vsel %vm1304_vm3, %v9122_v14, %v2191_v40  ;;  %v14515_v26 = vrot.slane %v9125_v43, 4  ;;  %v4049_v50 = vld [vmem:[%s14195_s1 + $0xf0] sm:$0xff]  ;;  %v4048_v40 = vld [vmem:[%s14195_s1 + $0xe8] sm:$0xff] }
 0x1bd   :  { %15145 = vst [vmem:[#allocation132_spill] sm:$0xff] %v9134_v46  ;;  %v6066_v49 = vpack.i.bf16 %v9139_v0, %v3401_v25  ;;  %v14514_v44 = vrot.slane %v9125_v43, 6  ;;  %v15150_v57 = vperm.slane %v8009_v6, 0  ;;  %v2055_v62 = vperm.slane %v495_v10, 0  ;;  %v4053_v25 = vld [vmem:[%s14195_s1 + $0x110] sm:$0xff]  ;;  %4217 = vmatpush.msra.mxu1 %v4049_v50  ;;  %v6248_v14 = vld [vmem:[#allocation2 + $0x240] sm:$0xff] }
 0x1be   :  { %15146 = vst [vmem:[#allocation133_spill] sm:$0xff] %v9136_v35  ;;  %v2193_v5 = vsel %vm1306_vm4, %v14520_v32, %v2192_v12  ;;  %v14516_v39 = vrot.slane %v9146_v17, 2  ;;  %v14518_v23 = vrot.slane %v9146_v17, 4  ;;  %v2465_v6 = vperm.slane %v9125_v43, 0  ;;  %5843 = vmatpush.msra.mxu2 %v4053_v25  ;;  %5844 = vmatpush.msra.mxu3 %v4053_v25 }
 0x1bf   :  { %15147 = vst [vmem:[#allocation134_spill] sm:$0xff] %v9139_v0  ;;  %6067 = vrot.lane.b32.xlu0 %v6066_v49, %s6350_s26  ;;  %v1389_v56 = vsel %vm1308_vm5, %v15150_v57, %v1388_v38  ;;  %v2194_v3 = vsel %vm1308_vm5, %v9134_v46, %v2193_v5  ;;  %v9189_v24 = vperm.slane %v14519_v16, 0  ;;  %v14517_v49 = vrot.slane %v9146_v17, 6  ;;  %4218 = vmatpush.msra.mxu1 %v4048_v40 }
 0x1c0   :  { %15148 = vst [vmem:[#allocation135_spill] sm:$0xff] %v9142_v36  ;;  %v1390_v52 = vsel %vm1310_vm6, %v8092_v48, %v1389_v56  ;;  %v2195_v60 = vsel %vm1310_vm6, %v9136_v35, %v2194_v3  ;;  %v9193_v48 = vperm.slane %v14515_v26, 0  ;;  %v9213_v27 = vperm.slane %v14514_v44, 0  ;;  %v9236_v3 = vld [vmem:[#allocation2 + $0x3c0] sm:$0xff] }
 0x1c1   :  { %15149 = vst [vmem:[#allocation136_spill] sm:$0xff] %v9146_v17  ;;  %v1391_v8 = vsel %vm1312_vm7, %v8097_v22, %v1390_v52  ;;  %v4020_v22 = vld [vmem:[%s14195_s1 + $0x8] sm:$0xff]  ;;  %v2196_v30 = vsel %vm1312_vm7, %v9142_v36, %v2195_v60  ;;  %v14521_v52 = vperm.slane %v9146_v17, 0  ;;  %v15156_v60 = vld [vmem:[#allocation24_spill] sm:$0xff]  ;;  %v9273_v40 = vperm.slane %v14517_v49, 0  ;;  %v4051_v49 = vld [vmem:[%s14195_s1 + $0x100] sm:$0xff] }
 0x1c2   :  { %349 = vst.msk [vmem:[#allocation2 + $0x3f9] sm:$0xff] %vm21_vm0, %v236_v47  ;;  %v9206_v10 = vsel %vm1314_vm8, %v8099_v21, %v1391_v8  ;;  %v4052_v21 = vld [vmem:[%s14195_s1 + $0x108] sm:$0xff]  ;;  %v4019_v47 = vld [vmem:[%s14195_s1] sm:$0xff]  ;;  %v9233_v5 = vsel %vm1314_vm8, %v2055_v62, %v2196_v30  ;;  %4129 = vmatpush.msra.mxu0 %v4020_v22  ;;  %v15157_v50 = vrot.slane %v15156_v60, 2  ;;  %v9249_v62 = vperm.slane %v14516_v39, 0  ;;  %v9253_v22 = vld [vmem:[#allocation2 + $0x3c8] sm:$0xff] }
 0x1c3   :  { %338 = vst.msk [vmem:[#allocation2 + $0x379] sm:$0xff] %vm21_vm0, %v225_v58  ;;  %v15152_v58 = vld [vmem:[#allocation23_spill] sm:$0xff]  ;;  %v2674_v30 = vsel %vm1302_vm2, %v9189_v24, %v2465_v6  ;;  %5845 = vmatpush.msra.mxu2 %v4052_v21  ;;  %v15160_v44 = vrot.slane %v15156_v60, 6  ;;  %v9266_v39 = vperm.slane %v14518_v23, 0  ;;  %5846 = vmatpush.msra.mxu3 %v4052_v21  ;;  %v453_v23 = vld [vmem:[#allocation2 + $0x238] sm:$0x3]  ;;  %v3402_v2 = vsel %vm1302_vm2, %v8548_v11, %v8544_v51 }
 0x1c4   :  { %15151 = vst [vmem:[#allocation137_spill] sm:$0xff] %v9206_v10  ;;  %v15153_v38 = vrot.slane %v15152_v58, 4  ;;  %v15154_v57 = vrot.slane %v15152_v58, 6  ;;  %v226_v8 = vld [vmem:[%s14194_s0 + $0x228] sm:$0xff]  ;;  %v6071_v58 = vpack.i.bf16 %v9233_v5, %v9206_v10  ;;  %v2675_v6 = vsel %vm1304_vm3, %v9193_v48, %v2674_v30  ;;  %4130 = vmatpush.msra.mxu0 %v4019_v47  ;;  %v15162_v10 = vld [vmem:[#allocation70_spill] sm:$0xff] }
 0x1c5   :  { %15155 = vst [vmem:[#allocation23_spill] sm:$0xff] %v9233_v5  ;;  %v9262_v26 = vperm.slane %v15160_v44, 1  ;;  %v754_v44 = vrot.slane %v9236_v3, 2  ;;  %v756_v30 = vrot.slane %v9236_v3, 6  ;;  %v1685_v16 = vperm.slane %v9236_v3, 1  ;;  %5847 = vmatpush.msra.mxu2 %v4051_v49  ;;  %5848 = vmatpush.msra.mxu3 %v4051_v49 }
 0x1c6   :  { %v9226_v12 = vperm.slane %v15153_v38, 1  ;;  %v9230_v56 = vperm.slane %v15154_v57, 1  ;;  %v9243_v38 = vperm.slane %v15157_v50, 1  ;;  %15158 = vst [vmem:[#allocation24_spill] sm:$0xff] %v9253_v22  ;;  %v15159_v57 = vrot.slane %v15156_v60, 4  ;;  %6072 = vrot.lane.b32.xlu1 %v6071_v58, %s6352_s11  ;;  %4329 = vmatpush.msrb.mxu0 %v9085_v18 }
 0x1c7   :  { %339 = vst.msk [vmem:[#allocation2 + $0x381] sm:$0xff] %vm21_vm0, %v226_v8  ;;  %v2676_v8 = vsel %vm1306_vm4, %v9213_v27, %v2675_v6  ;;  %v755_v60 = vrot.slane %v9236_v3, 4  ;;  %v757_v58 = vrot.slane %v9253_v22, 2  ;;  %v4047_v6 = vld [vmem:[%s14195_s1 + $0xe0] sm:$0xff]  ;;  %v1686_v32 = vperm.slane %v754_v44, 1  ;;  %5807 = vmatmul.msk.f32.vlgmr.msra.gmra.mxu2 %vm21_vm0, %v15162_v10 }
 0x1c8   :  { %v9258_v50 = vperm.slane %v15159_v57, 1  ;;  %15161 = vst [vmem:[#allocation138_spill] sm:$0xff] %v9262_v26  ;;  %v2677_v47 = vsel %vm1308_vm5, %v14521_v52, %v2676_v8  ;;  %v758_v57 = vrot.slane %v9253_v22, 4  ;;  %v759_v8 = vrot.slane %v9253_v22, 6  ;;  %4219 = vmatpush.msra.mxu1 %v4047_v6  ;;  %4330 = vmatpush.msrb.mxu0 %v4053_v25  ;;  %v15163_v6 = vld [vmem:[#allocation78_spill] sm:$0xff]  ;;  %v4046_v25 = vld [vmem:[%s14195_s1 + $0xd8] sm:$0xff] }
 0x1c9   :  { %v2678_v18 = vsel %vm1310_vm6, %v9249_v62, %v2677_v47  ;;  %v1687_v43 = vperm.slane %v755_v60, 1  ;;  %v1688_v5 = vperm.slane %v756_v30, 1  ;;  %v1689_v41 = vperm.slane %v9253_v22, 1  ;;  %v6250_v26 = vld [vmem:[#allocation2 + $0x270] sm:$0xff] }
 0x1ca   :  { %v2679_v52 = vsel %vm1312_vm7, %v9266_v39, %v2678_v18  ;;  %v1690_v0 = vperm.slane %v757_v58, 1  ;;  %v1691_v36 = vperm.slane %v758_v57, 1  ;;  %v1692_v3 = vperm.slane %v759_v8, 1  ;;  %4331 = vmatpush.msrb.mxu0 %v4052_v21  ;;  %4220 = vmatpush.msra.mxu1 %v4046_v25  ;;  %v15175_v25 = vld [vmem:[#allocation38_spill] sm:$0xff] }
 0x1cb   :  { %v2680_v47 = vsel %vm1314_vm8, %v9273_v40, %v2679_v52  ;;  %v1890_v46 = vsel %vm1302_vm2, %v1686_v32, %v1685_v16  ;;  %v3308_v18 = vperm.slane %v453_v23, 0  ;;  %v3403_v52 = vsel %vm1304_vm3, %v8558_v33, %v3402_v2  ;;  %v9317_v32 = vpop.permute.xlu0 %5857  ;;  %v501_v23 = vld [vmem:[#allocation2 + $0x3d0] sm:$0x3] }
 0x1cc   :  { %v6031_v35 = vpack.i.bf16 %v2680_v47, %v15163_v6  ;;  %v1891_v10 = vsel %vm1304_vm3, %v1687_v43, %v1890_v46  ;;  %v1174_v19 = vperm.slane %v6248_v14, 0  ;;  %v9314_v47 = vperm.slane %v754_v44, 0  ;;  %4332 = vmatpush.msrb.mxu0 %v4051_v49 }
 0x1cd   :  { %v1892_v51 = vsel %vm1306_vm4, %v1688_v5, %v1891_v10  ;;  %v15165_v11 = vperm.slane %v8505_v29, 0  ;;  %v9323_v43 = vperm.slane %v755_v60, 0  ;;  %v9325_v46 = vperm.slane %v756_v30, 0  ;;  %v9340_v30 = vld [vmem:[#allocation2 + $0x348] sm:$0xff] }
 0x1ce   :  { %15164 = vst [vmem:[#allocation70_spill] sm:$0xff] %v9314_v47  ;;  %6032 = vrot.lane.b32.xlu2 %v6031_v35, %s6351_s10  ;;  %v1893_v33 = vsel %vm1308_vm5, %v1689_v41, %v1892_v51  ;;  %v14540_v14 = vperm.slane %v9253_v22, 0  ;;  %v9331_v35 = vperm.slane %v757_v58, 0  ;;  %v9336_v44 = vperm.slane %v758_v57, 0  ;;  %v239_v41 = vld [vmem:[%s14194_s0 + $0x290] sm:$0xff] }
 0x1cf   :  { %v3404_v16 = vsel %vm1306_vm4, %v15165_v11, %v3403_v52  ;;  %15166 = vst [vmem:[#allocation78_spill] sm:$0xff] %v9323_v43  ;;  %v1894_v21 = vsel %vm1310_vm6, %v1690_v0, %v1893_v33  ;;  %v9338_v60 = vperm.slane %v759_v8, 0  ;;  %v1393_v0 = vsel %vm1302_vm2, %v8168_v1, %v1174_v19  ;;  %v9363_v1 = vld [vmem:[#allocation2 + $0x350] sm:$0xff]  ;;  %v15174_v19 = vld [vmem:[#allocation71_spill] sm:$0xff] }
 0x1d0   :  { %15167 = vst [vmem:[#allocation139_spill] sm:$0xff] %v9325_v46  ;;  %v3405_v2 = vsel %vm1308_vm5, %v8566_v31, %v3404_v16  ;;  %v1895_v31 = vsel %vm1312_vm7, %v1691_v36, %v1894_v21  ;;  %v2056_v58 = vperm.slane %v501_v23, 0  ;;  %v1394_v36 = vsel %vm1304_vm3, %v8170_v61, %v1393_v0  ;;  %5808 = vmatmul.msk.f32.gmra.mxu2 %vm21_vm0, %v15174_v19  ;;  %v15176_v61 = vld [vmem:[#allocation36_spill] sm:$0xff]  ;;  %v240_v33 = vld [vmem:[%s14194_s0 + $0x298] sm:$0xff]  ;;  %v15179_v0 = vld [vmem:[#allocation19_spill] sm:$0xff] }
 0x1d1   :  { %15168 = vst [vmem:[#allocation140_spill] sm:$0xff] %v9331_v35  ;;  %v3406_v5 = vsel %vm1310_vm6, %v8570_v55, %v3405_v2  ;;  %v211_v55 = vld [vmem:[%s14194_s0 + $0x1b0] sm:$0xff]  ;;  %v9355_v57 = vsel %vm1314_vm8, %v1692_v3, %v1895_v31  ;;  %v1395_v3 = vsel %vm1306_vm4, %v15175_v25, %v1394_v36  ;;  %v14538_v10 = vrot.slane %v9340_v30, 2  ;;  %v15178_v2 = vld [vmem:[#allocation39_spill] sm:$0xff] }
 0x1d2   :  { %15169 = vst [vmem:[#allocation141_spill] sm:$0xff] %v9336_v44  ;;  %v3407_v49 = vsel %vm1312_vm7, %v8574_v7, %v3406_v5  ;;  %v2198_v7 = vsel %vm1302_vm2, %v9323_v43, %v9314_v47  ;;  %v15177_v52 = vperm.slane %v15176_v61, 0  ;;  %v14537_v16 = vrot.slane %v9340_v30, 4  ;;  %v15180_v19 = vld [vmem:[#allocation40_spill] sm:$0xff]  ;;  %v229_v61 = vld [vmem:[%s14194_s0 + $0x240] sm:$0xff] }
 0x1d3   :  { %15170 = vst [vmem:[#allocation142_spill] sm:$0xff] %v9338_v60  ;;  %v3408_v8 = vsel %vm1314_vm8, %v3308_v18, %v3407_v49  ;;  %v2199_v18 = vsel %vm1304_vm3, %v9325_v46, %v2198_v7  ;;  %v14535_v23 = vrot.slane %v9340_v30, 6  ;;  %v14539_v31 = vrot.slane %v9363_v1, 4  ;;  %v212_v49 = vld [vmem:[%s14194_s0 + $0x1b8] sm:$0xff]  ;;  %v15194_v43 = vld [vmem:[#allocation6_spill] sm:$0xff] }
 0x1d4   :  { %15171 = vst [vmem:[#allocation143_spill] sm:$0xff] %v9340_v30  ;;  %v6081_v6 = vpack.i.bf16 %v9355_v57, %v3408_v8  ;;  %v1396_v51 = vsel %vm1308_vm5, %v15177_v52, %v1395_v3  ;;  %v2200_v11 = vsel %vm1306_vm4, %v14540_v14, %v2199_v18  ;;  %v14541_v36 = vrot.slane %v9363_v1, 6  ;;  %v15182_v52 = vld [vmem:[#allocation25_spill] sm:$0xff] }
 0x1d5   :  { %352 = vst.msk [vmem:[#allocation2 + $0x421] sm:$0xff] %vm21_vm0, %v239_v41  ;;  %v1397_v21 = vsel %vm1310_vm6, %v15178_v2, %v1396_v51  ;;  %v2201_v5 = vsel %vm1308_vm5, %v9331_v35, %v2200_v11  ;;  %v14536_v41 = vrot.slane %v9363_v1, 2  ;;  %v2473_v7 = vperm.slane %v9340_v30, 0  ;;  %v15193_v35 = vld [vmem:[#allocation17_spill] sm:$0xff] }
 0x1d6   :  { %15172 = vst [vmem:[#allocation144_spill] sm:$0xff] %v9355_v57  ;;  %6082 = vrot.lane.b32.xlu0 %v6081_v6, %s6350_s26  ;;  %v2202_v8 = vsel %vm1310_vm6, %v9336_v44, %v2201_v5  ;;  %v9411_v3 = vperm.slane %v14538_v10, 0  ;;  %v9415_v18 = vperm.slane %v14537_v16, 0  ;;  %v15183_v51 = vrot.slane %v15182_v52, 2  ;;  %v9432_v5 = vpop.permute.xlu0 %5862  ;;  %v15188_v16 = vld [vmem:[#allocation51_spill] sm:$0xff]  ;;  %v15192_v44 = vld [vmem:[#allocation92_spill] sm:$0xff] }
 0x1d7   :  { %15173 = vst [vmem:[#allocation145_spill] sm:$0xff] %v9363_v1  ;;  %v2203_v25 = vsel %vm1312_vm7, %v9338_v60, %v2202_v8  ;;  %v9429_v2 = vperm.slane %v14535_v23, 0  ;;  %v9457_v23 = vld [vmem:[#allocation2 + $0x3f0] sm:$0xff]  ;;  %v5864_v14 = vunpack.i.l.bf16 %v9432_v5  ;;  %v6249_v10 = vld [vmem:[#allocation2] sm:$0xff]  ;;  %v15195_v47 = vperm.slane %v15194_v43, 0  ;;  %v15197_v43 = vld [vmem:[#allocation52_spill] sm:$0xff] }
 0x1d8   :  { %324 = vst.msk [vmem:[#allocation2 + $0x2a1] sm:$0xff] %vm21_vm0, %v211_v55  ;;  %v1398_v55 = vsel %vm1312_vm7, %v15179_v0, %v1397_v21  ;;  %v9422_v11 = vperm.slane %v15183_v51, 1  ;;  %v14545_v21 = vperm.slane %v9363_v1, 0  ;;  %v2681_v8 = vsel %vm1302_vm2, %v9411_v3, %v2473_v7  ;;  %v9449_v51 = vpop.permute.xlu1 %5867  ;;  %v4044_v7 = vld [vmem:[%s14195_s1 + $0xc8] sm:$0xff]  ;;  %5809 = vmatmul.msk.f32.gmra.mxu2 %vm21_vm0, %v15188_v16 }
 0x1d9   :  { %353 = vst.msk [vmem:[#allocation2 + $0x429] sm:$0xff] %vm21_vm0, %v240_v33  ;;  %v9405_v6 = vsel %vm1314_vm8, %v15180_v19, %v1398_v55  ;;  %v9425_v33 = vsel %vm1314_vm8, %v2056_v58, %v2203_v25  ;;  %v9443_v58 = vperm.slane %v14536_v41, 0  ;;  %v4045_v41 = vld [vmem:[%s14195_s1 + $0xd0] sm:$0xff]  ;;  %v9476_v19 = vld [vmem:[#allocation2 + $0x3f8] sm:$0xff]  ;;  %v230_v16 = vld [vmem:[%s14194_s0 + $0x248] sm:$0xff]  ;;  %v1078_v25 = vperm.slane %v6249_v10, 0 }
 0x1da   :  { %325 = vst.msk [vmem:[#allocation2 + $0x2a9] sm:$0xff] %vm21_vm0, %v212_v49  ;;  %v15186_v49 = vrot.slane %v15182_v52, 4  ;;  %v6086_v55 = vpack.i.bf16 %v9425_v33, %v9405_v6  ;;  %4221 = vmatpush.msra.mxu1 %v4045_v41  ;;  %v761_v30 = vrot.slane %v9457_v23, 4  ;;  %v763_v29 = vrot.slane %v9476_v19, 2 }
 0x1db   :  { %15181 = vst [vmem:[#allocation71_spill] sm:$0xff] %v9405_v6  ;;  %v15191_v6 = vld [vmem:[#allocation14_spill] sm:$0xff]  ;;  %v765_v60 = vrot.slane %v9476_v19, 6 }
 0x1dc   :  { %15184 = vst [vmem:[#allocation38_spill] sm:$0xff] %v9422_v11  ;;  %v9437_v0 = vperm.slane %v15186_v49, 1  ;;  %v2682_v49 = vsel %vm1304_vm3, %v9415_v18, %v2681_v8  ;;  %6087 = vrot.lane.b32.xlu1 %v6086_v55, %s6352_s11  ;;  %v9471_v8 = vperm.slane %v14541_v36, 0  ;;  %v760_v36 = vrot.slane %v9457_v23, 2  ;;  %4222 = vmatpush.msra.mxu1 %v4044_v7 }
 0x1dd   :  { %15185 = vst [vmem:[#allocation36_spill] sm:$0xff] %v9425_v33  ;;  %v762_v33 = vrot.slane %v9457_v23, 6  ;;  %v1693_v7 = vperm.slane %v9457_v23, 1  ;;  %v1695_v46 = vperm.slane %v761_v30, 1  ;;  %v15196_v23 = vld [vmem:[#allocation20_spill] sm:$0xff] }
 0x1de   :  { %342 = vst.msk [vmem:[#allocation2 + $0x3a9] sm:$0xff] %vm21_vm0, %v229_v61  ;;  %v9453_v61 = vperm.slane %v14539_v31, 0  ;;  %v2683_v31 = vsel %vm1306_vm4, %v9429_v2, %v2682_v49  ;;  %v4043_v49 = vld [vmem:[%s14195_s1 + $0xc0] sm:$0xff]  ;;  %v1694_v22 = vperm.slane %v760_v36, 1 }
 0x1df   :  { %15187 = vst [vmem:[#allocation39_spill] sm:$0xff] %v9437_v0  ;;  %v2684_v55 = vsel %vm1308_vm5, %v14545_v21, %v2683_v31  ;;  %v15190_v31 = vld [vmem:[#allocation15_spill] sm:$0xff]  ;;  %4223 = vmatpush.msra.mxu1 %v4043_v49  ;;  %v1696_v42 = vperm.slane %v762_v33, 1 }
 0x1e0   :  { %15189 = vst [vmem:[#allocation19_spill] sm:$0xff] %v9476_v19  ;;  %v2685_v41 = vsel %vm1310_vm6, %v9443_v58, %v2684_v55  ;;  %v1303_v21 = vsel %vm1302_vm2, %v15190_v31, %v1078_v25  ;;  %v459_v31 = vld [vmem:[#allocation2 + $0x268] sm:$0x3]  ;;  %5810 = vmatmul.msk.f32.gmra.mxu2 %vm21_vm0, %v15197_v43 }
 0x1e1   :  { %343 = vst.msk [vmem:[#allocation2 + $0x3b1] sm:$0xff] %vm21_vm0, %v230_v16  ;;  %v2686_v10 = vsel %vm1312_vm7, %v9453_v61, %v2685_v41  ;;  %v764_v16 = vrot.slane %v9476_v19, 4  ;;  %v1305_v57 = vsel %vm1304_vm3, %v15191_v6, %v1303_v21  ;;  %v1697_v6 = vperm.slane %v9476_v19, 1 }
 0x1e2   :  { %v2687_v55 = vsel %vm1314_vm8, %v9471_v8, %v2686_v10  ;;  %v1307_v25 = vsel %vm1306_vm4, %v15193_v35, %v1305_v57  ;;  %v1698_v21 = vperm.slane %v763_v29, 1  ;;  %v1897_v35 = vsel %vm1302_vm2, %v1694_v22, %v1693_v7  ;;  %v4042_v57 = vld [vmem:[%s14195_s1 + $0xb8] sm:$0xff]  ;;  %v15199_v7 = vld [vmem:[#allocation22_spill] sm:$0xff] }
 0x1e3   :  { %v6046_v41 = vpack.i.bf16 %v2687_v55, %v15192_v44  ;;  %v1309_v10 = vsel %vm1308_vm5, %v15195_v47, %v1307_v25  ;;  %v1699_v44 = vperm.slane %v764_v16, 1  ;;  %v1700_v55 = vperm.slane %v765_v60, 1  ;;  %v243_v47 = vld [vmem:[%s14194_s0 + $0x2b0] sm:$0xff]  ;;  %v15198_v25 = vld [vmem:[#allocation21_spill] sm:$0xff]  ;;  %4224 = vmatpush.msra.mxu1 %v4042_v57 }
 0x1e4   :  { %v1311_v49 = vsel %vm1310_vm6, %v15196_v23, %v1309_v10  ;;  %v1898_v10 = vsel %vm1304_vm3, %v1695_v46, %v1897_v35  ;;  %v3309_v23 = vperm.slane %v459_v31, 0  ;;  %v3409_v22 = vsel %vm1302_vm2, %v8705_v15, %v8701_v9  ;;  %356 = vst.msk [vmem:[#allocation2 + $0x451] sm:$0xff] %vm21_vm0, %v243_v47  ;;  %v15201_v9 = vld [vmem:[#allocation123_spill] sm:$0xff] }
 0x1e5   :  { %6047 = vrot.lane.b32.xlu2 %v6046_v41, %s6351_s10  ;;  %v1313_v41 = vsel %vm1312_vm7, %v15198_v25, %v1311_v49  ;;  %v1899_v11 = vsel %vm1306_vm4, %v1696_v42, %v1898_v10  ;;  %v3410_v43 = vsel %vm1304_vm3, %v8715_v63, %v3409_v22  ;;  %v1182_v49 = vperm.slane %v6250_v26, 0  ;;  %v15207_v10 = vld [vmem:[#allocation75_spill] sm:$0xff] }
 0x1e6   :  { %v1315_v0 = vsel %vm1314_vm8, %v15199_v7, %v1313_v41  ;;  %v15200_v46 = vunpack.i.l.bf16 %v9317_v32  ;;  %v1900_v35 = vsel %vm1308_vm5, %v1697_v6, %v1899_v11  ;;  %v15202_v15 = vperm.slane %v15201_v9, 0  ;;  %v15204_v41 = vld [vmem:[#allocation74_spill] sm:$0xff]  ;;  %v507_v22 = vld [vmem:[#allocation2 + $0x400] sm:$0x3]  ;;  %v15210_v7 = vld [vmem:[#allocation76_spill] sm:$0xff] }
 0x1e7   :  { %v9543_v47 = vperm.slane %v760_v36, 0  ;;  %v1901_v42 = vsel %vm1310_vm6, %v1698_v21, %v1900_v35  ;;  %v9549_v26 = vperm.slane %v761_v30, 0  ;;  %v15206_v11 = vunpack.i.l.bf16 %v9449_v51 }
 0x1e8   :  { %v3849_v31 = vsel %vm21_vm0, %v1315_v0, %v15200_v46  ;;  %v3411_v57 = vsel %vm1306_vm4, %v15202_v15, %v3410_v43  ;;  %v244_v0 = vld [vmem:[%s14194_s0 + $0x2b8] sm:$0xff]  ;;  %v1902_v36 = vsel %vm1312_vm7, %v1699_v44, %v1901_v42  ;;  %v9560_v21 = vperm.slane %v762_v33, 0  ;;  %v9571_v44 = vld [vmem:[#allocation2 + $0x378] sm:$0xff] }
 0x1e9   :  { %15203 = vst [vmem:[#allocation40_spill] sm:$0xff] %v9543_v47  ;;  %v3878_v25 = vsel %vm3877_vm10, %v3849_v31, %v5864_v14  ;;  %v3412_v63 = vsel %vm1308_vm5, %v15204_v41, %v3411_v57  ;;  %v9564_v30 = vsel %vm1314_vm8, %v1700_v55, %v1902_v36  ;;  %v14562_v46 = vperm.slane %v9476_v19, 0  ;;  %v15215_v57 = vld [vmem:[#allocation47_spill] sm:$0xff]  ;;  %v15217_v41 = vld [vmem:[#allocation49_spill] sm:$0xff]  ;;  %v15220_v36 = vld [vmem:[#allocation32_spill] sm:$0xff] }
 0x1ea   :  { %15205 = vst [vmem:[#allocation25_spill] sm:$0xff] %v9549_v26  ;;  %v3907_v6 = vsel %vm3906_vm11, %v3878_v25, %v15206_v11  ;;  %v3413_v14 = vsel %vm1310_vm6, %v15207_v10, %v3412_v63  ;;  %v9569_v31 = vperm.slane %v763_v29, 0  ;;  %v9574_v15 = vperm.slane %v764_v16, 0  ;;  %v9580_v55 = vld [vmem:[#allocation2 + $0x380] sm:$0xff]  ;;  %v9721_v19 = vld [vmem:[#allocation2 + $0x2a8] sm:$0xff] }
 0x1eb   :  { %15208 = vst [vmem:[#allocation51_spill] sm:$0xff] %v9560_v21  ;;  %4131 = vmatmul.f32.vlgmr.msra.gmra.mxu0 %v3907_v6  ;;  %v3414_v43 = vsel %vm1312_vm7, %v15210_v7, %v3413_v14  ;;  %v9576_v33 = vperm.slane %v765_v60, 0  ;;  %v1400_v25 = vsel %vm1302_vm2, %v15215_v57, %v1182_v49  ;;  %v2057_v29 = vperm.slane %v507_v22, 0  ;;  %v15219_v60 = vld [vmem:[#allocation33_spill] sm:$0xff]  ;;  %v15222_v57 = vld [vmem:[#allocation112_spill] sm:$0xff] }
 0x1ec   :  { %357 = vst.msk [vmem:[#allocation2 + $0x459] sm:$0xff] %vm21_vm0, %v244_v0  ;;  %v3415_v35 = vsel %vm1314_vm8, %v3309_v23, %v3414_v43  ;;  %v1401_v63 = vsel %vm1304_vm3, %v15217_v41, %v1400_v25  ;;  %v2205_v0 = vsel %vm1302_vm2, %v9549_v26, %v9543_v47  ;;  %v15218_v23 = vld [vmem:[#allocation67_spill] sm:$0xff]  ;;  %v14560_v11 = vrot.slane %v9571_v44, 2 }
 0x1ed   :  { %15209 = vst [vmem:[#allocation15_spill] sm:$0xff] %v9564_v30  ;;  %v6096_v42 = vpack.i.bf16 %v9564_v30, %v3415_v35  ;;  %5811 = vmatmul.msk.f32.gmra.mxu2 %vm21_vm0, %v15218_v23  ;;  %v1402_v16 = vsel %vm1306_vm4, %v15219_v60, %v1401_v63  ;;  %v2206_v49 = vsel %vm1304_vm3, %v9560_v21, %v2205_v0  ;;  %v14558_v6 = vrot.slane %v9571_v44, 4  ;;  %v233_v35 = vld [vmem:[%s14194_s0 + $0x260] sm:$0xff] }
 0x1ee   :  { %15211 = vst [vmem:[#allocation14_spill] sm:$0xff] %v9569_v31  ;;  %v15221_v10 = vperm.slane %v15220_v36, 0  ;;  %v2207_v22 = vsel %vm1306_vm4, %v14562_v46, %v2206_v49  ;;  %v14559_v7 = vrot.slane %v9571_v44, 6  ;;  %v14561_v43 = vrot.slane %v9580_v55, 2  ;;  %v15223_v0 = vld [vmem:[#allocation114_spill] sm:$0xff]  ;;  %v15224_v36 = vld [vmem:[#allocation115_spill] sm:$0xff] }
 0x1ef   :  { %15212 = vst [vmem:[#allocation92_spill] sm:$0xff] %v9571_v44  ;;  %6097 = vrot.lane.b32.xlu0 %v6096_v42, %s6350_s26  ;;  %v2208_v42 = vsel %vm1308_vm5, %v9569_v31, %v2207_v22  ;;  %v14563_v41 = vrot.slane %v9580_v55, 4  ;;  %v14567_v63 = vrot.slane %v9580_v55, 6  ;;  %v9622_v49 = vperm.slane %v14560_v11, 0  ;;  %v9674_v46 = vld [vmem:[#allocation2 + $0x428] sm:$0xff] }
 0x1f0   :  { %15213 = vst [vmem:[#allocation17_spill] sm:$0xff] %v9574_v15  ;;  %v1403_v14 = vsel %vm1308_vm5, %v15221_v10, %v1402_v16  ;;  %v2209_v60 = vsel %vm1310_vm6, %v9574_v15, %v2208_v42  ;;  %v2481_v16 = vperm.slane %v9571_v44, 0  ;;  %v9632_v22 = vperm.slane %v14558_v6, 0  ;;  %v9651_v6 = vpop.permute.xlu2 %5877  ;;  %v15234_v44 = vld [vmem:[#allocation82_spill] sm:$0xff] }
 0x1f1   :  { %15214 = vst [vmem:[#allocation6_spill] sm:$0xff] %v9576_v33  ;;  %v1404_v25 = vsel %vm1310_vm6, %v15222_v57, %v1403_v14  ;;  %v2210_v14 = vsel %vm1312_vm7, %v9576_v33, %v2209_v60  ;;  %v15226_v57 = vrot.slane %v15182_v52, 6  ;;  %v5865_v42 = vunpack.i.h.bf16 %v9432_v5  ;;  %v234_v60 = vld [vmem:[%s14194_s0 + $0x268] sm:$0xff] }
 0x1f2   :  { %15216 = vst [vmem:[#allocation20_spill] sm:$0xff] %v9580_v55  ;;  %v1405_v23 = vsel %vm1312_vm7, %v15223_v0, %v1404_v25  ;;  %v9644_v0 = vsel %vm1314_vm8, %v2057_v29, %v2210_v14  ;;  %v2688_v5 = vsel %vm1302_vm2, %v9622_v49, %v2481_v16  ;;  %v9661_v29 = vld [vmem:[#allocation2 + $0x420] sm:$0xff]  ;;  %v9670_v11 = vperm.slane %v14563_v41, 0  ;;  %v4041_v16 = vld [vmem:[%s14195_s1 + $0xb0] sm:$0xff] }
 0x1f3   :  { %346 = vst.msk [vmem:[#allocation2 + $0x3d9] sm:$0xff] %vm21_vm0, %v233_v35  ;;  %v9626_v10 = vsel %vm1314_vm8, %v15224_v36, %v1405_v23  ;;  %v9636_v35 = vperm.slane %v14559_v7, 0  ;;  %v9640_v25 = vperm.slane %v15226_v57, 1  ;;  %v5870_v36 = vunpack.i.h.bf16 %v9449_v51  ;;  %v9666_v7 = vpop.permute.xlu1 %5872  ;;  %v15231_v14 = vld [vmem:[#allocation68_spill] sm:$0xff]  ;;  %4225 = vmatpush.msra.mxu1 %v4041_v16  ;;  %v9717_v33 = vld [vmem:[#allocation2 + $0x2a0] sm:$0xff] }
 0x1f4   :  { %15225 = vst [vmem:[#allocation52_spill] sm:$0xff] %v9626_v10  ;;  %v6101_v52 = vpack.i.bf16 %v9644_v0, %v9626_v10  ;;  %v9657_v57 = vperm.slane %v14561_v43, 0  ;;  %v2689_v43 = vsel %vm1304_vm3, %v9632_v22, %v2688_v5  ;;  %v9688_v5 = vperm.slane %v14567_v63, 0 }
 0x1f5   :  { %15227 = vst [vmem:[#allocation21_spill] sm:$0xff] %v9644_v0  ;;  %5812 = vmatmul.msk.f32.gmra.mxu2 %vm21_vm0, %v15231_v14  ;;  %v2690_v41 = vsel %vm1306_vm4, %v9636_v35, %v2689_v43  ;;  %v15233_v23 = vunpack.i.h.bf16 %v9317_v32  ;;  %v15235_v9 = vperm.slane %v9580_v55, 0  ;;  %v767_v63 = vrot.slane %v9661_v29, 4  ;;  %v4039_v43 = vld [vmem:[%s14195_s1 + $0xa0] sm:$0xff] }
 0x1f6   :  { %15228 = vst [vmem:[#allocation22_spill] sm:$0xff] %v9657_v57  ;;  %6102 = vrot.lane.b32.xlu1 %v6101_v52, %s6352_s11  ;;  %v766_v52 = vrot.slane %v9661_v29, 2  ;;  %v769_v16 = vrot.slane %v9674_v46, 2  ;;  %v1701_v10 = vperm.slane %v9661_v29, 1 }
 0x1f7   :  { %347 = vst.msk [vmem:[#allocation2 + $0x3e1] sm:$0xff] %vm21_vm0, %v234_v60  ;;  %v4040_v60 = vld [vmem:[%s14195_s1 + $0xa8] sm:$0xff]  ;;  %v3850_v0 = vsel %vm21_vm0, %v15234_v44, %v15233_v23  ;;  %v2691_v14 = vsel %vm1308_vm5, %v15235_v9, %v2690_v41  ;;  %v768_v23 = vrot.slane %v9661_v29, 6  ;;  %v465_v41 = vld [vmem:[#allocation2 + $0x298] sm:$0x3] }
 0x1f8   :  { %15229 = vst [vmem:[#allocation74_spill] sm:$0xff] %v9670_v11  ;;  %v3879_v51 = vsel %vm3877_vm10, %v3850_v0, %v5865_v42  ;;  %v2692_v32 = vsel %vm1310_vm6, %v9657_v57, %v2691_v14  ;;  %4226 = vmatpush.msra.mxu1 %v4040_v60  ;;  %v770_v42 = vrot.slane %v9674_v46, 4  ;;  %v771_v0 = vrot.slane %v9674_v46, 6  ;;  %v15236_v60 = vld [vmem:[#allocation106_spill] sm:$0xff]  ;;  %v15240_v57 = vld [vmem:[#allocation83_spill] sm:$0xff] }
 0x1f9   :  { %15230 = vst [vmem:[#allocation75_spill] sm:$0xff] %v9674_v46  ;;  %v3908_v44 = vsel %vm3906_vm11, %v3879_v51, %v5870_v36  ;;  %v2693_v9 = vsel %vm1312_vm7, %v9670_v11, %v2692_v32  ;;  %v1702_v36 = vperm.slane %v766_v52, 1  ;;  %v1703_v51 = vperm.slane %v767_v63, 1 }
 0x1fa   :  { %15232 = vst [vmem:[#allocation76_spill] sm:$0xff] %v9688_v5  ;;  %4134 = vmatmul.f32.gmra.mxu0 %v3908_v44  ;;  %v2694_v14 = vsel %vm1314_vm8, %v9688_v5, %v2693_v9  ;;  %v1704_v30 = vperm.slane %v768_v23, 1  ;;  %4227 = vmatpush.msra.mxu1 %v4039_v43  ;;  %v1705_v32 = vperm.slane %v9674_v46, 1  ;;  %v1706_v44 = vperm.slane %v769_v16, 1  ;;  %v15238_v9 = vld [vmem:[#allocation86_spill] sm:$0xff]  ;;  %v15239_v5 = vld [vmem:[#allocation84_spill] sm:$0xff] }
 0x1fb   :  { %v6061_v15 = vpack.i.bf16 %v2694_v14, %v15236_v60  ;;  %v1707_v31 = vperm.slane %v770_v42, 1  ;;  %15237 = vst [vmem:[#allocation47_spill] sm:$0xff] %v9721_v19  ;;  %v1708_v21 = vperm.slane %v771_v0, 1  ;;  %v1904_v29 = vsel %vm1302_vm2, %v1702_v36, %v1701_v10 }
 0x1fc   :  { %v3310_v26 = vperm.slane %v465_v41, 0  ;;  %v3416_v47 = vsel %vm1302_vm2, %v15238_v9, %v8864_v59  ;;  %v1905_v43 = vsel %vm1304_vm3, %v1703_v51, %v1904_v29  ;;  %v14584_v60 = vrot.slane %v9717_v33, 2  ;;  %v15241_v41 = vld [vmem:[#allocation85_spill] sm:$0xff]  ;;  %v15243_v29 = vld [vmem:[#allocation91_spill] sm:$0xff] }
 0x1fd   :  { %6062 = vrot.lane.b32.xlu2 %v6061_v15, %s6351_s10  ;;  %v3417_v14 = vsel %vm1304_vm3, %v15239_v5, %v3416_v47  ;;  %v14582_v11 = vrot.slane %v9717_v33, 4  ;;  %5813 = vmatmul.msk.f32.gmra.mxu2 %vm21_vm0, %v15240_v57  ;;  %v1906_v10 = vsel %vm1306_vm4, %v1704_v30, %v1905_v43  ;;  %v15242_v36 = vperm.slane %v15241_v41, 0  ;;  %v4038_v47 = vld [vmem:[%s14195_s1 + $0x98] sm:$0xff] }
 0x1fe   :  { %v1907_v5 = vsel %vm1308_vm5, %v1705_v32, %v1906_v10  ;;  %v14581_v57 = vrot.slane %v9721_v19, 4  ;;  %v14583_v30 = vrot.slane %v9721_v19, 6  ;;  %4228 = vmatpush.msra.mxu1 %v4038_v47  ;;  %v9752_v51 = vperm.slane %v766_v52, 0 }
 0x1ff   :  { %v3418_v59 = vsel %vm1306_vm4, %v15242_v36, %v3417_v14  ;;  %v1908_v43 = vsel %vm1310_vm6, %v1706_v44, %v1907_v5  ;;  %v513_v36 = vld [vmem:[#allocation2 + $0x430] sm:$0x3]  ;;  %v9754_v15 = vperm.slane %v767_v63, 0  ;;  %v247_v44 = vld [vmem:[%s14194_s0 + $0x2d0] sm:$0xff]  ;;  %v9769_v63 = vperm.slane %v769_v16, 0 }
 0x200   :  { %v3419_v9 = vsel %vm1308_vm5, %v15243_v29, %v3418_v59  ;;  %15244 = vst [vmem:[#allocation49_spill] sm:$0xff] %v9752_v51  ;;  %v1909_v32 = vsel %vm1312_vm7, %v1707_v31, %v1908_v43  ;;  %v9759_v59 = vperm.slane %v768_v23, 0  ;;  %v14580_v29 = vperm.slane %v9674_v46, 0 }
 0x201   :  { %v3420_v14 = vsel %vm1310_vm6, %v8895_v28, %v3419_v9  ;;  %15245 = vst [vmem:[#allocation67_spill] sm:$0xff] %v9754_v15  ;;  %v9766_v28 = vsel %vm1314_vm8, %v1708_v21, %v1909_v32  ;;  %v9771_v47 = vperm.slane %v770_v42, 0  ;;  %v9777_v23 = vperm.slane %v771_v0, 0  ;;  %v9793_v0 = vld [vmem:[#allocation2 + $0x3a8] sm:$0xff]  ;;  %v4036_v32 = vld [vmem:[%s14195_s1 + $0x88] sm:$0xff] }
 0x202   :  { %v3421_v10 = vsel %vm1312_vm7, %v8899_v37, %v3420_v14  ;;  %15246 = vst [vmem:[#allocation33_spill] sm:$0xff] %v9759_v59  ;;  %v9774_v37 = vpop.permute.xlu2 %5882  ;;  %v2058_v5 = vperm.slane %v513_v36, 0  ;;  %v2212_v21 = vsel %vm1302_vm2, %v9754_v15, %v9752_v51  ;;  %v3605_v16 = vperm.slane %v9717_v33, 0 }
 0x203   :  { %15247 = vst [vmem:[#allocation32_spill] sm:$0xff] %v9766_v28  ;;  %v3422_v52 = vsel %vm1314_vm8, %v3310_v26, %v3421_v10  ;;  %v2213_v26 = vsel %vm1304_vm3, %v9759_v59, %v2212_v21  ;;  %v9787_v42 = vperm.slane %v14584_v60, 0  ;;  %v9791_v9 = vperm.slane %v14582_v11, 0  ;;  %v15259_v21 = vld [vmem:[#allocation97_spill] sm:$0xff]  ;;  %v474_v59 = vld [vmem:[#allocation2 + $0x2f8] sm:$0x3] }
 0x204   :  { %15248 = vst [vmem:[#allocation112_spill] sm:$0xff] %v9769_v63  ;;  %v6111_v31 = vpack.i.bf16 %v9766_v28, %v3422_v52  ;;  %v2214_v43 = vsel %vm1306_vm4, %v14580_v29, %v2213_v26  ;;  %v15254_v14 = vrot.slane %v9717_v33, 6  ;;  %v15256_v10 = vrot.slane %v9721_v19, 2  ;;  %v9808_v52 = vld [vmem:[#allocation2 + $0x3b0] sm:$0xff]  ;;  %v9883_v28 = vpop.permute.xlu1 %5892 }
 0x205   :  { %15249 = vst [vmem:[#allocation114_spill] sm:$0xff] %v9771_v47  ;;  %5814 = vmatmul.msk.f32.gmra.mxu2 %vm21_vm0, %v15259_v21  ;;  %v2215_v26 = vsel %vm1308_vm5, %v9769_v63, %v2214_v43  ;;  %v3621_v29 = vsel %vm1302_vm2, %v9787_v42, %v3605_v16  ;;  %v237_v21 = vld [vmem:[%s14194_s0 + $0x280] sm:$0xff]  ;;  %v15264_v60 = vrot.slane %v9793_v0, 2  ;;  %v15279_v63 = vld [vmem:[#allocation96_spill] sm:$0xff] }
 0x206   :  { %360 = vst.msk [vmem:[#allocation2 + $0x481] sm:$0xff] %vm21_vm0, %v247_v44  ;;  %6112 = vrot.lane.b32.xlu0 %v6111_v31, %s6350_s26  ;;  %v9801_v36 = vperm.slane %v15254_v14, 0  ;;  %v9806_v44 = vperm.slane %v15256_v10, 0  ;;  %v248_v31 = vld [vmem:[%s14194_s0 + $0x2d8] sm:$0xff]  ;;  %v9819_v14 = vperm.slane %v14581_v57, 0  ;;  %v9823_v10 = vperm.slane %v14583_v30, 0 }
 0x207   :  { %15250 = vst [vmem:[#allocation115_spill] sm:$0xff] %v9777_v23  ;;  %v2216_v43 = vsel %vm1310_vm6, %v9771_v47, %v2215_v26  ;;  %v3622_v57 = vsel %vm1304_vm3, %v9791_v9, %v3621_v29  ;;  %v15263_v29 = vperm.slane %v9721_v19, 0  ;;  %v9857_v41 = vperm.slane %v15264_v60, 0  ;;  %v9919_v47 = vld [vmem:[#allocation2 + $0x458] sm:$0xff] }
 0x208   :  { %15251 = vst [vmem:[#allocation68_spill] sm:$0xff] %v9787_v42  ;;  %v2217_v16 = vsel %vm1312_vm7, %v9777_v23, %v2216_v43 }
 0x209   :  { %15252 = vst [vmem:[#allocation82_spill] sm:$0xff] %v9791_v9  ;;  %v9845_v26 = vsel %vm1314_vm8, %v2058_v5, %v2217_v16  ;;  %v15266_v5 = vrot.slane %v9793_v0, 4 }
 0x20a   :  { %15253 = vst [vmem:[#allocation106_spill] sm:$0xff] %v9793_v0  ;;  %v9897_v9 = vpop.permute.xlu2 %5897 }
 0x20b   :  { %15255 = vst [vmem:[#allocation86_spill] sm:$0xff] %v9801_v36  ;;  %v9861_v16 = vperm.slane %v15266_v5, 0  ;;  %v4037_v5 = vld [vmem:[%s14195_s1 + $0x90] sm:$0xff] }
 0x20c   :  { %15257 = vst [vmem:[#allocation84_spill] sm:$0xff] %v9806_v44  ;;  %4229 = vmatpush.msra.mxu1 %v4037_v5  ;;  %v15274_v5 = vld [vmem:[#allocation111_spill] sm:$0xff]  ;;  %v9961_v55 = vpop.permute.xlu1 %5907 }
 0x20d   :  { %15258 = vst [vmem:[#allocation83_spill] sm:$0xff] %v9808_v52  ;;  %5815 = vmatmul.msk.f32.gmra.mxu2 %vm21_vm0, %v15274_v5  ;;  %v15278_v5 = vperm.slane %v9808_v52, 0 }
 0x20e   :  { %15260 = vst [vmem:[#allocation91_spill] sm:$0xff] %v9819_v14  ;;  %4230 = vmatpush.msra.mxu1 %v4036_v32 }
 0x20f   :  { %15261 = vst [vmem:[#allocation97_spill] sm:$0xff] %v9823_v10 }
 0x210   :  { %361 = vst.msk [vmem:[#allocation2 + $0x489] sm:$0xff] %vm21_vm0, %v248_v31  ;;  %v3623_v31 = vsel %vm1306_vm4, %v9801_v36, %v3622_v57  ;;  %v2489_v57 = vperm.slane %v9793_v0, 0  ;;  %v9881_v36 = vpop.permute.xlu0 %5887 }
 0x211   :  { %350 = vst.msk [vmem:[#allocation2 + $0x409] sm:$0xff] %vm21_vm0, %v237_v21  ;;  %v3624_v11 = vsel %vm1308_vm5, %v15263_v29, %v3623_v31  ;;  %v238_v31 = vld [vmem:[%s14194_s0 + $0x288] sm:$0xff]  ;;  %v5874_v29 = vunpack.i.l.bf16 %v9666_v7 }
 0x212   :  { %15262 = vst [vmem:[#allocation146_spill] sm:$0xff] %v9845_v26  ;;  %v3625_v43 = vsel %vm1310_vm6, %v9806_v44, %v3624_v11  ;;  %v15268_v11 = vrot.slane %v9793_v0, 6  ;;  %v2695_v0 = vsel %vm1302_vm2, %v9857_v41, %v2489_v57  ;;  %v5884_v44 = vunpack.i.l.bf16 %v9774_v37  ;;  %v4035_v57 = vld [vmem:[%s14195_s1 + $0x80] sm:$0xff] }
 0x213   :  { %15265 = vst [vmem:[#allocation147_spill] sm:$0xff] %v9857_v41  ;;  %v3626_v21 = vsel %vm1312_vm7, %v9819_v14, %v3625_v43  ;;  %v9893_v14 = vld [vmem:[#allocation2 + $0x450] sm:$0xff]  ;;  %v3851_v23 = vsel %vm21_vm0, %v15279_v63, %v5874_v29  ;;  %4231 = vmatpush.msra.mxu1 %v4035_v57  ;;  %v775_v63 = vrot.slane %v9919_v47, 2  ;;  %v776_v29 = vrot.slane %v9919_v47, 4  ;;  %v15281_v57 = vld [vmem:[#allocation35_spill] sm:$0xff] }
 0x214   :  { %15267 = vst [vmem:[#allocation148_spill] sm:$0xff] %v9861_v16  ;;  %v9871_v30 = vperm.slane %v15268_v11, 0  ;;  %v3627_v43 = vsel %vm1314_vm8, %v9823_v10, %v3626_v21  ;;  %v15270_v11 = vrot.slane %v9808_v52, 2  ;;  %v15272_v21 = vrot.slane %v9808_v52, 4 }
 0x215   :  { %351 = vst.msk [vmem:[#allocation2 + $0x411] sm:$0xff] %vm21_vm0, %v238_v31  ;;  %v6116_v42 = vpack.i.bf16 %v9845_v26, %v3627_v43  ;;  %v15275_v43 = vrot.slane %v9808_v52, 6  ;;  %v1715_v52 = vperm.slane %v776_v29, 1 }
 0x216   :  { %15269 = vst [vmem:[#allocation149_spill] sm:$0xff] %v9871_v30  ;;  %v9889_v60 = vperm.slane %v15270_v11, 0  ;;  %v9902_v10 = vperm.slane %v15272_v21, 0  ;;  %v2696_v11 = vsel %vm1304_vm3, %v9861_v16, %v2695_v0  ;;  %v773_v0 = vrot.slane %v9893_v14, 4  ;;  %v15282_v16 = vld [vmem:[#allocation31_spill] sm:$0xff] }
 0x217   :  { %v9915_v26 = vperm.slane %v15275_v43, 0  ;;  %v2697_v21 = vsel %vm1306_vm4, %v9871_v30, %v2696_v11  ;;  %15277 = vst [vmem:[#allocation152_spill] sm:$0xff] %v9919_v47  ;;  %6117 = vrot.lane.b32.xlu1 %v6116_v42, %s6352_s11  ;;  %v772_v43 = vrot.slane %v9893_v14, 2  ;;  %v15280_v11 = vunpack.i.l.bf16 %v9651_v6  ;;  %5816 = vmatmul.msk.f32.gmra.mxu2 %vm21_vm0, %v15282_v16  ;;  %v519_v16 = vld [vmem:[#allocation2 + $0x460] sm:$0x3] }
 0x218   :  { %15271 = vst [vmem:[#allocation150_spill] sm:$0xff] %v9889_v60  ;;  %v2698_v31 = vsel %vm1308_vm5, %v15278_v5, %v2697_v21  ;;  %v774_v42 = vrot.slane %v9893_v14, 6  ;;  %v9959_v41 = vpop.permute.xlu0 %5902 }
 0x219   :  { %15273 = vst [vmem:[#allocation151_spill] sm:$0xff] %v9902_v10  ;;  %v2699_v46 = vsel %vm1310_vm6, %v9889_v60, %v2698_v31  ;;  %v3880_v32 = vsel %vm3877_vm10, %v3851_v23, %v15280_v11  ;;  %v777_v23 = vrot.slane %v9919_v47, 6  ;;  %v1709_v11 = vperm.slane %v9893_v14, 1 }
 0x21a   :  { %15276 = vst [vmem:[#allocation111_spill] sm:$0xff] %v9915_v26  ;;  %v2700_v21 = vsel %vm1312_vm7, %v9902_v10, %v2699_v46  ;;  %v3909_v5 = vsel %vm3906_vm11, %v3880_v32, %v5884_v44  ;;  %v1710_v15 = vperm.slane %v772_v43, 1  ;;  %v1711_v60 = vperm.slane %v773_v0, 1  ;;  %v251_v32 = vld [vmem:[%s14194_s0 + $0x2f0] sm:$0xff] }
 0x21b   :  { %v2701_v31 = vsel %vm1314_vm8, %v9915_v26, %v2700_v21  ;;  %4137 = vmatmul.f32.gmra.mxu0 %v3909_v5  ;;  %v1712_v46 = vperm.slane %v774_v42, 1  ;;  %v1713_v44 = vperm.slane %v9919_v47, 1  ;;  %v1714_v10 = vperm.slane %v775_v63, 1  ;;  %364 = vst.msk [vmem:[#allocation2 + $0x4b1] sm:$0xff] %vm21_vm0, %v251_v32  ;;  %v6251_v26 = vld [vmem:[#allocation2 + $0x300] sm:$0xff] }
 0x21c   :  { %v6076_v51 = vpack.i.bf16 %v2701_v31, %v15281_v57  ;;  %v1716_v21 = vperm.slane %v777_v23, 1  ;;  %v1911_v5 = vsel %vm1302_vm2, %v1710_v15, %v1709_v11  ;;  %v3311_v31 = vperm.slane %v474_v59, 0  ;;  %v9970_v11 = vpop.permute.xlu2 %5912 }
 0x21d   :  { %v1912_v14 = vsel %vm1304_vm3, %v1711_v60, %v1911_v5  ;;  %v3423_v57 = vsel %vm1302_vm2, %v9031_v53, %v9027_v20  ;;  %v1198_v30 = vperm.slane %v6251_v26, 0  ;;  %v9966_v60 = vperm.slane %v772_v43, 0 }
 0x21e   :  { %6077 = vrot.lane.b32.xlu2 %v6076_v51, %s6351_s10  ;;  %v1913_v15 = vsel %vm1306_vm4, %v1712_v46, %v1912_v14  ;;  %v3424_v51 = vsel %vm1304_vm3, %v9041_v4, %v3423_v57  ;;  %v9968_v59 = vperm.slane %v773_v0, 0  ;;  %v15285_v53 = vperm.slane %v8981_v13, 0  ;;  %v252_v4 = vld [vmem:[%s14194_s0 + $0x2f8] sm:$0xff]  ;;  %v9989_v14 = vld [vmem:[#allocation2 + $0x3d8] sm:$0xff] }
 0x21f   :  { %15283 = vst [vmem:[#allocation96_spill] sm:$0xff] %v9966_v60  ;;  %v1914_v20 = vsel %vm1308_vm5, %v1713_v44, %v1913_v15  ;;  %v9976_v32 = vperm.slane %v774_v42, 0  ;;  %v14613_v46 = vperm.slane %v9919_v47, 0  ;;  %v9985_v5 = vperm.slane %v775_v63, 0  ;;  %v15309_v13 = vld [vmem:[#allocation110_spill] sm:$0xff] }
 0x220   :  { %15284 = vst [vmem:[#allocation35_spill] sm:$0xff] %v9968_v59  ;;  %v3425_v26 = vsel %vm1306_vm4, %v15285_v53, %v3424_v51  ;;  %v1915_v0 = vsel %vm1310_vm6, %v1714_v10, %v1914_v20  ;;  %v9987_v44 = vperm.slane %v776_v29, 0  ;;  %v9995_v15 = vperm.slane %v777_v23, 0  ;;  %v15291_v51 = vld [vmem:[#allocation50_spill] sm:$0xff]  ;;  %v15293_v29 = vld [vmem:[#allocation63_spill] sm:$0xff] }
 0x221   :  { %15286 = vst [vmem:[#allocation31_spill] sm:$0xff] %v9976_v32  ;;  %v3426_v43 = vsel %vm1308_vm5, %v9054_v34, %v3425_v26  ;;  %v1916_v42 = vsel %vm1312_vm7, %v1715_v52, %v1915_v0  ;;  %v1414_v10 = vsel %vm1302_vm2, %v15291_v51, %v1198_v30  ;;  %v2059_v53 = vperm.slane %v519_v16, 0  ;;  %v10006_v26 = vld [vmem:[#allocation2 + $0x3e0] sm:$0xff] }
 0x222   :  { %15287 = vst [vmem:[#allocation153_spill] sm:$0xff] %v9985_v5  ;;  %v3427_v57 = vsel %vm1310_vm6, %v9058_v45, %v3426_v43  ;;  %v10000_v34 = vsel %vm1314_vm8, %v1716_v21, %v1916_v42  ;;  %v1415_v20 = vsel %vm1304_vm3, %v15293_v29, %v1414_v10  ;;  %v15295_v45 = vld [vmem:[#allocation65_spill] sm:$0xff]  ;;  %v2219_v30 = vsel %vm1302_vm2, %v9968_v59, %v9966_v60  ;;  %v15298_v42 = vld [vmem:[#allocation66_spill] sm:$0xff] }
 0x223   :  { %15288 = vst [vmem:[#allocation154_spill] sm:$0xff] %v9987_v44  ;;  %v3428_v63 = vsel %vm1312_vm7, %v9062_v54, %v3427_v57  ;;  %v1416_v23 = vsel %vm1306_vm4, %v15295_v45, %v1415_v20  ;;  %v14612_v21 = vrot.slane %v9989_v14, 2  ;;  %v15296_v54 = vld [vmem:[#allocation61_spill] sm:$0xff]  ;;  %v2220_v16 = vsel %vm1304_vm3, %v9976_v32, %v2219_v30  ;;  %v15299_v29 = vld [vmem:[#allocation46_spill] sm:$0xff]  ;;  %v15300_v20 = vld [vmem:[#allocation120_spill] sm:$0xff] }
 0x224   :  { %15289 = vst [vmem:[#allocation155_spill] sm:$0xff] %v9989_v14  ;;  %v3429_v52 = vsel %vm1314_vm8, %v3311_v31, %v3428_v63  ;;  %v15297_v0 = vperm.slane %v15296_v54, 0  ;;  %v14614_v31 = vrot.slane %v9989_v14, 4  ;;  %v2221_v51 = vsel %vm1306_vm4, %v14613_v46, %v2220_v16  ;;  %5817 = vmatmul.msk.f32.gmra.mxu2 %vm21_vm0, %v15299_v29  ;;  %v241_v54 = vld [vmem:[%s14194_s0 + $0x2a0] sm:$0xff]  ;;  %v10074_v46 = vpop.permute.xlu2 %5927 }
 0x225   :  { %365 = vst.msk [vmem:[#allocation2 + $0x4b9] sm:$0xff] %vm21_vm0, %v252_v4  ;;  %v6126_v4 = vpack.i.bf16 %v10000_v34, %v3429_v52  ;;  %v14615_v10 = vrot.slane %v9989_v14, 6  ;;  %v14616_v63 = vrot.slane %v10006_v26, 2  ;;  %v2222_v45 = vsel %vm1308_vm5, %v9985_v5, %v2221_v51  ;;  %v6252_v60 = vld [vmem:[#allocation2 + $0x18] sm:$0xff] }
 0x226   :  { %15290 = vst [vmem:[#allocation156_spill] sm:$0xff] %v9995_v15  ;;  %v1417_v43 = vsel %vm1308_vm5, %v15297_v0, %v1416_v23  ;;  %v14619_v23 = vrot.slane %v10006_v26, 4  ;;  %v14621_v30 = vrot.slane %v10006_v26, 6  ;;  %v15301_v0 = vld [vmem:[#allocation121_spill] sm:$0xff]  ;;  %v2497_v16 = vperm.slane %v9989_v14, 0 }
 0x227   :  { %15292 = vst [vmem:[#allocation50_spill] sm:$0xff] %v10000_v34  ;;  %v1418_v57 = vsel %vm1310_vm6, %v15298_v42, %v1417_v43  ;;  %6127 = vrot.lane.b32.xlu0 %v6126_v4, %s6350_s26  ;;  %v2223_v4 = vsel %vm1310_vm6, %v9987_v44, %v2222_v45  ;;  %v10050_v42 = vperm.slane %v14612_v21, 0  ;;  %v10058_v29 = vperm.slane %v14614_v31, 0  ;;  %v10066_v45 = vpop.permute.xlu1 %5922  ;;  %v10076_v31 = vld [vmem:[#allocation2 + $0x480] sm:$0xff] }
 0x228   :  { %15294 = vst [vmem:[#allocation63_spill] sm:$0xff] %v10006_v26  ;;  %v1419_v52 = vsel %vm1312_vm7, %v15300_v20, %v1418_v57  ;;  %v2224_v51 = vsel %vm1312_vm7, %v9995_v15, %v2223_v4  ;;  %v10062_v20 = vperm.slane %v14615_v10, 0  ;;  %v10082_v57 = vperm.slane %v14616_v63, 0 }
 0x229   :  { %v10043_v43 = vsel %vm1314_vm8, %v15301_v0, %v1419_v52  ;;  %354 = vst.msk [vmem:[#allocation2 + $0x439] sm:$0xff] %vm21_vm0, %v241_v54  ;;  %v10064_v52 = vpop.permute.xlu0 %5917  ;;  %v10071_v21 = vsel %vm1314_vm8, %v2059_v53, %v2224_v51  ;;  %v10086_v0 = vperm.slane %v14619_v23, 0  ;;  %v2702_v53 = vsel %vm1302_vm2, %v10050_v42, %v2497_v16  ;;  %v242_v51 = vld [vmem:[%s14194_s0 + $0x2a8] sm:$0xff]  ;;  %v10101_v23 = vld [vmem:[#allocation2 + $0x488] sm:$0xff] }
 0x22a   :  { %15302 = vst [vmem:[#allocation65_spill] sm:$0xff] %v10043_v43  ;;  %v6131_v10 = vpack.i.bf16 %v10071_v21, %v10043_v43  ;;  %v10095_v54 = vperm.slane %v14621_v30, 0  ;;  %v2703_v4 = vsel %vm1304_vm3, %v10058_v29, %v2702_v53  ;;  %v15308_v30 = vunpack.i.h.bf16 %v9666_v7 }
 0x22b   :  { %15303 = vst [vmem:[#allocation61_spill] sm:$0xff] %v10071_v21  ;;  %v2704_v16 = vsel %vm1306_vm4, %v10062_v20, %v2703_v4  ;;  %v778_v63 = vrot.slane %v10076_v31, 2  ;;  %v15310_v14 = vperm.slane %v10006_v26, 0  ;;  %v779_v34 = vrot.slane %v10076_v31, 4  ;;  %v15312_v21 = vld [vmem:[#allocation48_spill] sm:$0xff] }
 0x22c   :  { %15304 = vst [vmem:[#allocation66_spill] sm:$0xff] %v10082_v57  ;;  %6132 = vrot.lane.b32.xlu1 %v6131_v10, %s6352_s11  ;;  %v3852_v53 = vsel %vm21_vm0, %v15309_v13, %v15308_v30  ;;  %v780_v4 = vrot.slane %v10076_v31, 6  ;;  %5818 = vmatmul.msk.f32.gmra.mxu2 %vm21_vm0, %v15312_v21  ;;  %v15313_v7 = vunpack.i.h.bf16 %v9774_v37  ;;  %v1717_v21 = vperm.slane %v10076_v31, 1 }
 0x22d   :  { %15305 = vst [vmem:[#allocation46_spill] sm:$0xff] %v10086_v0  ;;  %v2705_v43 = vsel %vm1308_vm5, %v15310_v14, %v2704_v16  ;;  %v781_v14 = vrot.slane %v10101_v23, 2  ;;  %v1718_v15 = vperm.slane %v778_v63, 1  ;;  %v1719_v37 = vperm.slane %v779_v34, 1 }
 0x22e   :  { %15306 = vst [vmem:[#allocation120_spill] sm:$0xff] %v10095_v54  ;;  %v2706_v13 = vsel %vm1310_vm6, %v10082_v57, %v2705_v43  ;;  %v1720_v44 = vperm.slane %v780_v4, 1  ;;  %v3430_v31 = vsel %vm1302_vm2, %v9193_v48, %v9189_v24  ;;  %v6254_v57 = vld [vmem:[#allocation2 + $0x330] sm:$0xff]  ;;  %v15316_v24 = vld [vmem:[#allocation27_spill] sm:$0xff] }
 0x22f   :  { %15307 = vst [vmem:[#allocation121_spill] sm:$0xff] %v10101_v23  ;;  %v2707_v16 = vsel %vm1312_vm7, %v10086_v0, %v2706_v13  ;;  %v1722_v47 = vperm.slane %v781_v14, 1  ;;  %v1918_v13 = vsel %vm1302_vm2, %v1718_v15, %v1717_v21  ;;  %v2849_v0 = vperm.slane %v6252_v60, 1 }
 0x230   :  { %355 = vst.msk [vmem:[#allocation2 + $0x441] sm:$0xff] %vm21_vm0, %v242_v51  ;;  %v15311_v51 = vunpack.i.h.bf16 %v9651_v6  ;;  %v782_v6 = vrot.slane %v10101_v23, 4  ;;  %v2708_v43 = vsel %vm1314_vm8, %v10095_v54, %v2707_v16  ;;  %v1919_v16 = vsel %vm1304_vm3, %v1719_v37, %v1918_v13  ;;  %v15318_v37 = vld [vmem:[#allocation28_spill] sm:$0xff] }
 0x231   :  { %v3431_v54 = vsel %vm1304_vm3, %v9213_v27, %v3430_v31  ;;  %v1206_v26 = vperm.slane %v6254_v57, 0  ;;  %v1920_v15 = vsel %vm1306_vm4, %v1720_v44, %v1919_v16  ;;  %v3073_v48 = vsel %vm1302_vm2, %v15316_v24, %v2849_v0  ;;  %v15320_v31 = vld [vmem:[#allocation29_spill] sm:$0xff] }
 0x232   :  { %v3881_v10 = vsel %vm3877_vm10, %v3852_v53, %v15311_v51  ;;  %v480_v53 = vld [vmem:[#allocation2 + $0x328] sm:$0x3]  ;;  %v783_v51 = vrot.slane %v10101_v23, 6  ;;  %v1723_v32 = vperm.slane %v782_v6, 1  ;;  %v10152_v60 = vperm.slane %v778_v63, 0 }
 0x233   :  { %v3910_v30 = vsel %vm3906_vm11, %v3881_v10, %v15313_v7  ;;  %v1721_v10 = vperm.slane %v10101_v23, 1  ;;  %v15314_v7 = vld [vmem:[#allocation41_spill] sm:$0xff]  ;;  %v3074_v13 = vsel %vm1304_vm3, %v15318_v37, %v3073_v48  ;;  %v10159_v57 = vperm.slane %v779_v34, 0 }
 0x234   :  { %4140 = vmatmul.f32.gmra.mxu0 %v3910_v30  ;;  %v6091_v5 = vpack.i.bf16 %v2708_v43, %v15314_v7  ;;  %v1724_v59 = vperm.slane %v783_v51, 1  ;;  %v3312_v30 = vperm.slane %v480_v53, 0  ;;  %v6253_v43 = vld [vmem:[#allocation2 + $0x20] sm:$0xff]  ;;  %v15315_v53 = vperm.slane %v9146_v17, 0  ;;  %15317 = vst [vmem:[#allocation110_spill] sm:$0xff] %v10152_v60  ;;  %v15328_v48 = vld [vmem:[#allocation9_spill] sm:$0xff] }
 0x235   :  { %v2853_v7 = vperm.slane %v6253_v43, 1  ;;  %15319 = vst [vmem:[#allocation48_spill] sm:$0xff] %v10159_v57  ;;  %v3075_v0 = vsel %vm1306_vm4, %v15320_v31, %v3074_v13  ;;  %v10166_v63 = vperm.slane %v780_v4, 0  ;;  %v525_v43 = vld [vmem:[#allocation2 + $0x490] sm:$0x3]  ;;  %v14643_v34 = vperm.slane %v10101_v23, 0 }
 0x236   :  { %6092 = vrot.lane.b32.xlu2 %v6091_v5, %s6351_s10  ;;  %v3432_v21 = vsel %vm1306_vm4, %v15315_v53, %v3431_v54  ;;  %v1921_v5 = vsel %vm1308_vm5, %v1721_v10, %v1920_v15  ;;  %v15323_v15 = vld [vmem:[#allocation30_spill] sm:$0xff]  ;;  %v10182_v53 = vperm.slane %v781_v14, 0  ;;  %v10190_v24 = vperm.slane %v782_v6, 0  ;;  %v10209_v13 = vld [vmem:[#allocation2 + $0x410] sm:$0xff] }
 0x237   :  { %v3433_v27 = vsel %vm1308_vm5, %v9249_v62, %v3432_v21  ;;  %v1922_v44 = vsel %vm1310_vm6, %v1722_v47, %v1921_v5  ;;  %15321 = vst [vmem:[#allocation41_spill] sm:$0xff] %v10166_v63  ;;  %v3076_v16 = vsel %vm1308_vm5, %v2853_v7, %v3075_v0  ;;  %v255_v47 = vld [vmem:[%s14194_s0 + $0x310] sm:$0xff]  ;;  %v1421_v14 = vsel %vm1302_vm2, %v15328_v48, %v1206_v26  ;;  %v15330_v6 = vld [vmem:[#allocation10_spill] sm:$0xff] }
 0x238   :  { %v3434_v54 = vsel %vm1310_vm6, %v9266_v39, %v3433_v27  ;;  %v1923_v10 = vsel %vm1312_vm7, %v1723_v32, %v1922_v44  ;;  %v3077_v32 = vsel %vm1310_vm6, %v15323_v15, %v3076_v16  ;;  %15324 = vst [vmem:[#allocation28_spill] sm:$0xff] %v10182_v53  ;;  %v2060_v5 = vperm.slane %v525_v43, 0  ;;  %v256_v44 = vld [vmem:[%s14194_s0 + $0x318] sm:$0xff]  ;;  %v15333_v0 = vld [vmem:[#allocation12_spill] sm:$0xff] }
 0x239   :  { %v3435_v62 = vsel %vm1312_vm7, %v9273_v40, %v3434_v54  ;;  %v10177_v39 = vsel %vm1314_vm8, %v1724_v59, %v1923_v10  ;;  %v10184_v40 = vld [vmem:[#allocation2 + $0x408] sm:$0xff]  ;;  %368 = vst.msk [vmem:[#allocation2 + $0x4e1] sm:$0xff] %vm21_vm0, %v255_v47  ;;  %v3078_v21 = vsel %vm1312_vm7, %v9226_v12, %v3077_v32  ;;  %v10192_v59 = vperm.slane %v783_v51, 0 }
 0x23a   :  { %15322 = vst [vmem:[#allocation27_spill] sm:$0xff] %v10177_v39  ;;  %v3436_v4 = vsel %vm1314_vm8, %v3312_v30, %v3435_v62  ;;  %v3079_v30 = vsel %vm1314_vm8, %v9230_v56, %v3078_v21  ;;  %v2226_v27 = vsel %vm1302_vm2, %v10159_v57, %v10152_v60  ;;  %v15329_v37 = vunpack.i.l.bf16 %v10064_v52  ;;  %v6256_v60 = vld [vmem:[#allocation2 + $0x50] sm:$0xff] }
 0x23b   :  { %15325 = vst [vmem:[#allocation29_spill] sm:$0xff] %v10184_v40  ;;  %v6141_v7 = vpack.i.bf16 %v10177_v39, %v3436_v4  ;;  %v1422_v51 = vsel %vm1304_vm3, %v15330_v6, %v1421_v14  ;;  %v2227_v56 = vsel %vm1304_vm3, %v10166_v63, %v2226_v27  ;;  %v14641_v26 = vrot.slane %v10184_v40, 2  ;;  %v15335_v4 = vld [vmem:[#allocation73_spill] sm:$0xff] }
 0x23c   :  { %15326 = vst [vmem:[#allocation30_spill] sm:$0xff] %v10190_v24  ;;  %v3935_v12 = vsel %vm21_vm0, %v3079_v30, %v15329_v37  ;;  %v15332_v54 = vunpack.i.l.bf16 %v10066_v45  ;;  %v1423_v10 = vsel %vm1306_vm4, %v15333_v0, %v1422_v51  ;;  %v2228_v62 = vsel %vm1306_vm4, %v14643_v34, %v2227_v56  ;;  %v15337_v30 = vld [vmem:[#allocation45_spill] sm:$0xff] }
 0x23d   :  { %15327 = vst [vmem:[#allocation157_spill] sm:$0xff] %v10192_v59  ;;  %6142 = vrot.lane.b32.xlu0 %v6141_v7, %s6350_s26  ;;  %v14640_v16 = vrot.slane %v10184_v40, 4  ;;  %v15334_v43 = vunpack.i.l.bf16 %v10074_v46  ;;  %v15336_v15 = vperm.slane %v15335_v4, 0  ;;  %v2229_v7 = vsel %vm1308_vm5, %v10182_v53, %v2228_v62  ;;  %v15345_v34 = vld [vmem:[#allocation37_spill] sm:$0xff] }
 0x23e   :  { %15331 = vst [vmem:[#allocation9_spill] sm:$0xff] %v10209_v13  ;;  %v3963_v31 = vsel %vm3877_vm10, %v3935_v12, %v15332_v54  ;;  %v14638_v21 = vrot.slane %v10184_v40, 6  ;;  %v2230_v14 = vsel %vm1310_vm6, %v10190_v24, %v2229_v7  ;;  %v14639_v27 = vrot.slane %v10209_v13, 2  ;;  %v15338_v12 = vld [vmem:[#allocation16_spill] sm:$0xff]  ;;  %v15339_v54 = vld [vmem:[#allocation18_spill] sm:$0xff]  ;;  %v10273_v7 = vpop.permute.xlu2 %5942 }
 0x23f   :  { %369 = vst.msk [vmem:[#allocation2 + $0x4e9] sm:$0xff] %vm21_vm0, %v256_v44  ;;  %v3991_v47 = vsel %vm3906_vm11, %v3963_v31, %v15334_v43  ;;  %v1424_v32 = vsel %vm1308_vm5, %v15336_v15, %v1423_v10  ;;  %v14642_v37 = vrot.slane %v10209_v13, 4  ;;  %v2231_v51 = vsel %vm1312_vm7, %v10192_v59, %v2230_v14  ;;  %v10261_v43 = vpop.permute.xlu0 %5932 }
 0x240   :  { %4232 = vmatmul.f32.vlgmr.msra.gmra.mxu1 %v3991_v47  ;;  %v1425_v48 = vsel %vm1310_vm6, %v15337_v30, %v1424_v32  ;;  %v14644_v56 = vrot.slane %v10209_v13, 6  ;;  %v2505_v44 = vperm.slane %v10184_v40, 0  ;;  %v10251_v0 = vsel %vm1314_vm8, %v2060_v5, %v2231_v51  ;;  %v10271_v32 = vpop.permute.xlu1 %5937 }
 0x241   :  { %v1426_v6 = vsel %vm1312_vm7, %v15338_v12, %v1425_v48  ;;  %15341 = vst [vmem:[#allocation12_spill] sm:$0xff] %v10251_v0  ;;  %v10255_v10 = vperm.slane %v14641_v26, 0  ;;  %v10259_v62 = vperm.slane %v14640_v16, 0  ;;  %v10268_v15 = vperm.slane %v14638_v21, 0  ;;  %v10295_v16 = vld [vmem:[#allocation2 + $0x4b8] sm:$0xff] }
 0x242   :  { %v10248_v31 = vsel %vm1314_vm8, %v15339_v54, %v1426_v6  ;;  %v14647_v5 = vperm.slane %v10209_v13, 0  ;;  %v10279_v14 = vperm.slane %v14639_v27, 0  ;;  %v529_v6 = vld [vmem:[#allocation2 + $0x4b0] sm:$0xff]  ;;  %v10286_v51 = vperm.slane %v14642_v37, 0  ;;  %15343 = vst [vmem:[#allocation45_spill] sm:$0xff] %v10295_v16 }
 0x243   :  { %15340 = vst [vmem:[#allocation10_spill] sm:$0xff] %v10248_v31  ;;  %v6146_v4 = vpack.i.bf16 %v10251_v0, %v10248_v31  ;;  %v2709_v12 = vsel %vm1302_vm2, %v10255_v10, %v2505_v44  ;;  %v10290_v54 = vperm.slane %v14644_v56, 0  ;;  %v15344_v37 = vunpack.i.l.bf16 %v9881_v36 }
 0x244   :  { %v2710_v21 = vsel %vm1304_vm3, %v10259_v62, %v2709_v12  ;;  %v245_v12 = vld [vmem:[%s14194_s0 + $0x2c0] sm:$0xff]  ;;  %v15346_v47 = vunpack.i.l.bf16 %v9883_v28  ;;  %v784_v30 = vrot.slane %v529_v6, 2  ;;  %v786_v27 = vrot.slane %v529_v6, 6 }
 0x245   :  { %6147 = vrot.lane.b32.xlu1 %v6146_v4, %s6352_s11  ;;  %15342 = vst [vmem:[#allocation73_spill] sm:$0xff] %v10290_v54  ;;  %v2711_v44 = vsel %vm1306_vm4, %v10268_v15, %v2710_v21  ;;  %v3853_v56 = vsel %vm21_vm0, %v15345_v34, %v15344_v37  ;;  %v785_v4 = vrot.slane %v529_v6, 4  ;;  %v15347_v34 = vunpack.i.l.bf16 %v9897_v9 }
 0x246   :  { %v2712_v48 = vsel %vm1308_vm5, %v14647_v5, %v2711_v44  ;;  %v3882_v21 = vsel %vm3877_vm10, %v3853_v56, %v15346_v47  ;;  %358 = vst.msk [vmem:[#allocation2 + $0x469] sm:$0xff] %vm21_vm0, %v245_v12  ;;  %v787_v40 = vrot.slane %v10295_v16, 2  ;;  %v486_v5 = vld [vmem:[#allocation2 + $0x358] sm:$0x3]  ;;  %v788_v56 = vrot.slane %v10295_v16, 4 }
 0x247   :  { %v2713_v26 = vsel %vm1310_vm6, %v10279_v14, %v2712_v48  ;;  %v3911_v37 = vsel %vm3906_vm11, %v3882_v21, %v15347_v34  ;;  %v789_v47 = vrot.slane %v10295_v16, 6  ;;  %v1725_v12 = vperm.slane %v529_v6, 1  ;;  %v246_v21 = vld [vmem:[%s14194_s0 + $0x2c8] sm:$0xff]  ;;  %v15348_v34 = vld [vmem:[#allocation116_spill] sm:$0xff] }
 0x248   :  { %v2714_v44 = vsel %vm1312_vm7, %v10286_v51, %v2713_v26  ;;  %4143 = vmatmul.f32.gmra.mxu0 %v3911_v37  ;;  %v1726_v0 = vperm.slane %v784_v30, 1  ;;  %v1727_v17 = vperm.slane %v785_v4, 1  ;;  %v1728_v31 = vperm.slane %v786_v27, 1  ;;  %359 = vst.msk [vmem:[#allocation2 + $0x471] sm:$0xff] %vm21_vm0, %v246_v21 }
 0x249   :  { %v2715_v48 = vsel %vm1314_vm8, %v10290_v54, %v2714_v44  ;;  %v1729_v26 = vperm.slane %v10295_v16, 1  ;;  %v1730_v37 = vperm.slane %v787_v40, 1  ;;  %v1731_v24 = vperm.slane %v788_v56, 1 }
 0x24a   :  { %v6106_v59 = vpack.i.bf16 %v2715_v48, %v15348_v34  ;;  %v1732_v53 = vperm.slane %v789_v47, 1  ;;  %v1925_v6 = vsel %vm1302_vm2, %v1726_v0, %v1725_v12  ;;  %v3313_v23 = vperm.slane %v486_v5, 0  ;;  %v6255_v34 = vld [vmem:[#allocation2 + $0x48] sm:$0xff]  ;;  %v6257_v12 = vld [vmem:[#allocation2 + $0x360] sm:$0xff] }
 0x24b   :  { %v3437_v44 = vsel %vm1302_vm2, %v9415_v18, %v9411_v3  ;;  %v1926_v63 = vsel %vm1304_vm3, %v1727_v17, %v1925_v6  ;;  %v2857_v57 = vperm.slane %v6255_v34, 1  ;;  %v2861_v39 = vperm.slane %v6256_v60, 1  ;;  %v15353_v6 = vld [vmem:[#allocation138_spill] sm:$0xff] }
 0x24c   :  { %6107 = vrot.lane.b32.xlu2 %v6106_v59, %s6351_s10  ;;  %v3438_v48 = vsel %vm1304_vm3, %v9429_v2, %v3437_v44  ;;  %v1927_v21 = vsel %vm1306_vm4, %v1728_v31, %v1926_v63  ;;  %v15349_v0 = vperm.slane %v9363_v1, 0  ;;  %v1214_v54 = vperm.slane %v6257_v12, 0  ;;  %v10374_v44 = vld [vmem:[#allocation2 + $0x438] sm:$0xff] }
 0x24d   :  { %v10345_v3 = vperm.slane %v784_v30, 0  ;;  %v1928_v18 = vsel %vm1308_vm5, %v1729_v26, %v1927_v21  ;;  %v3080_v2 = vsel %vm1302_vm2, %v9243_v38, %v2857_v57  ;;  %v10352_v59 = vperm.slane %v785_v4, 0  ;;  %v531_v57 = vld [vmem:[#allocation2 + $0x4c0] sm:$0x3]  ;;  %15356 = vst [vmem:[#allocation158_spill] sm:$0xff] %v10374_v44 }
 0x24e   :  { %v3439_v5 = vsel %vm1306_vm4, %v15349_v0, %v3438_v48  ;;  %v1929_v60 = vsel %vm1310_vm6, %v1730_v37, %v1928_v18  ;;  %v3081_v31 = vsel %vm1304_vm3, %v9258_v50, %v3080_v2  ;;  %v10359_v30 = vperm.slane %v786_v27, 0  ;;  %v10401_v2 = vld [vmem:[#allocation2 + $0x440] sm:$0xff] }
 0x24f   :  { %15350 = vst [vmem:[#allocation16_spill] sm:$0xff] %v10345_v3  ;;  %v3440_v17 = vsel %vm1308_vm5, %v9443_v58, %v3439_v5  ;;  %v1930_v26 = vsel %vm1312_vm7, %v1731_v24, %v1929_v60  ;;  %v3082_v38 = vsel %vm1306_vm4, %v15353_v6, %v3081_v31  ;;  %v14667_v4 = vperm.slane %v10295_v16, 0  ;;  %v15365_v31 = vld [vmem:[#allocation126_spill] sm:$0xff] }
 0x250   :  { %15351 = vst [vmem:[#allocation18_spill] sm:$0xff] %v10352_v59  ;;  %v3441_v63 = vsel %vm1310_vm6, %v9453_v61, %v3440_v17  ;;  %v10368_v37 = vsel %vm1314_vm8, %v1732_v53, %v1930_v26  ;;  %v3083_v50 = vsel %vm1308_vm5, %v2861_v39, %v3082_v38  ;;  %v10372_v27 = vperm.slane %v787_v40, 0  ;;  %v259_v53 = vld [vmem:[%s14194_s0 + $0x330] sm:$0xff]  ;;  %v15361_v40 = vld [vmem:[#allocation62_spill] sm:$0xff] }
 0x251   :  { %15352 = vst [vmem:[#allocation37_spill] sm:$0xff] %v10359_v30  ;;  %v3442_v58 = vsel %vm1312_vm7, %v9471_v8, %v3441_v63  ;;  %v15357_v8 = vld [vmem:[#allocation38_spill] sm:$0xff]  ;;  %v10379_v34 = vperm.slane %v788_v56, 0  ;;  %v10381_v21 = vperm.slane %v789_v47, 0  ;;  %v1428_v0 = vsel %vm1302_vm2, %v15361_v40, %v1214_v54  ;;  %v15362_v47 = vld [vmem:[#allocation125_spill] sm:$0xff] }
 0x252   :  { %15354 = vst [vmem:[#allocation116_spill] sm:$0xff] %v10368_v37  ;;  %v3443_v61 = vsel %vm1314_vm8, %v3313_v23, %v3442_v58  ;;  %v3084_v48 = vsel %vm1310_vm6, %v15357_v8, %v3083_v50  ;;  %v15360_v23 = vld [vmem:[#allocation39_spill] sm:$0xff]  ;;  %v2061_v5 = vperm.slane %v531_v57, 0  ;;  %v2233_v12 = vsel %vm1302_vm2, %v10352_v59, %v10345_v3  ;;  %v15367_v57 = vld [vmem:[#allocation88_spill] sm:$0xff] }
 0x253   :  { %15355 = vst [vmem:[#allocation138_spill] sm:$0xff] %v10372_v27  ;;  %v6156_v24 = vpack.i.bf16 %v10368_v37, %v3443_v61  ;;  %v3085_v39 = vsel %vm1312_vm7, %v15360_v23, %v3084_v48  ;;  %v1429_v18 = vsel %vm1304_vm3, %v15362_v47, %v1428_v0  ;;  %v2234_v17 = vsel %vm1304_vm3, %v10359_v30, %v2233_v12  ;;  %v260_v48 = vld [vmem:[%s14194_s0 + $0x338] sm:$0xff]  ;;  %v15435_v30 = vld [vmem:[#allocation147_spill] sm:$0xff]  ;;  %v15436_v59 = vld [vmem:[#allocation148_spill] sm:$0xff] }
 0x254   :  { %15358 = vst [vmem:[#allocation38_spill] sm:$0xff] %v10379_v34  ;;  %v3086_v56 = vsel %vm1314_vm8, %v9640_v25, %v3085_v39  ;;  %v14666_v54 = vrot.slane %v10374_v44, 2  ;;  %v15364_v60 = vunpack.i.l.bf16 %v10261_v43  ;;  %v1430_v26 = vsel %vm1306_vm4, %v15365_v31, %v1429_v18  ;;  %v15370_v39 = vld [vmem:[#allocation127_spill] sm:$0xff]  ;;  %v15387_v37 = vld [vmem:[#allocation77_spill] sm:$0xff]  ;;  %v6261_v3 = vld [vmem:[#allocation2 + $0xa8] sm:$0xff] }
 0x255   :  { %15359 = vst [vmem:[#allocation159_spill] sm:$0xff] %v10381_v21  ;;  %6157 = vrot.lane.b32.xlu0 %v6156_v24, %s6350_s26  ;;  %v2235_v25 = vsel %vm1306_vm4, %v14667_v4, %v2234_v17  ;;  %v14665_v58 = vrot.slane %v10374_v44, 4  ;;  %v15366_v6 = vunpack.i.l.bf16 %v10271_v32  ;;  %v15368_v61 = vperm.slane %v15367_v57, 0 }
 0x256   :  { %372 = vst.msk [vmem:[#allocation2 + $0x511] sm:$0xff] %vm21_vm0, %v259_v53  ;;  %v3936_v63 = vsel %vm21_vm0, %v3086_v56, %v15364_v60  ;;  %v2236_v24 = vsel %vm1308_vm5, %v10372_v27, %v2235_v25  ;;  %v14664_v8 = vrot.slane %v10374_v44, 6  ;;  %v15369_v53 = vunpack.i.l.bf16 %v10273_v7  ;;  %v15371_v56 = vld [vmem:[#allocation129_spill] sm:$0xff] }
 0x257   :  { %15363 = vst [vmem:[#allocation39_spill] sm:$0xff] %v10401_v2  ;;  %v3964_v38 = vsel %vm3877_vm10, %v3936_v63, %v15366_v6  ;;  %v1431_v50 = vsel %vm1308_vm5, %v15368_v61, %v1430_v26  ;;  %v2237_v0 = vsel %vm1310_vm6, %v10379_v34, %v2236_v24  ;;  %v14662_v12 = vrot.slane %v10401_v2, 2  ;;  %v15372_v63 = vld [vmem:[#allocation130_spill] sm:$0xff]  ;;  %v15389_v34 = vld [vmem:[#allocation20_spill] sm:$0xff] }
 0x258   :  { %v3992_v23 = vsel %vm3906_vm11, %v3964_v38, %v15369_v53  ;;  %v1432_v40 = vsel %vm1310_vm6, %v15370_v39, %v1431_v50  ;;  %373 = vst.msk [vmem:[#allocation2 + $0x519] sm:$0xff] %vm21_vm0, %v260_v48  ;;  %v2238_v18 = vsel %vm1312_vm7, %v10381_v21, %v2237_v0  ;;  %v14661_v17 = vrot.slane %v10401_v2, 4  ;;  %v10521_v50 = vld [vmem:[#allocation2 + $0x4e8] sm:$0xff] }
 0x259   :  { %4235 = vmatmul.f32.gmra.mxu1 %v3992_v23  ;;  %v1433_v47 = vsel %vm1312_vm7, %v15371_v56, %v1432_v40  ;;  %v14663_v60 = vrot.slane %v10401_v2, 6  ;;  %v10445_v26 = vsel %vm1314_vm8, %v2061_v5, %v2238_v18  ;;  %v2513_v25 = vperm.slane %v10374_v44, 0  ;;  %15382 = vst [vmem:[#allocation88_spill] sm:$0xff] %v10521_v50 }
 0x25a   :  { %v10442_v31 = vsel %vm1314_vm8, %v15372_v63, %v1433_v47  ;;  %15374 = vst [vmem:[#allocation125_spill] sm:$0xff] %v10445_v26  ;;  %v10450_v6 = vperm.slane %v14666_v54, 0  ;;  %v10456_v57 = vperm.slane %v14665_v58, 0  ;;  %v10460_v61 = vperm.slane %v14664_v8, 0  ;;  %v10500_v58 = vpop.permute.xlu1 %5952 }
 0x25b   :  { %15373 = vst [vmem:[#allocation62_spill] sm:$0xff] %v10442_v31  ;;  %v6161_v38 = vpack.i.bf16 %v10445_v26, %v10442_v31  ;;  %v14668_v5 = vperm.slane %v10401_v2, 0  ;;  %v10466_v24 = vperm.slane %v14662_v12, 0  ;;  %v10470_v48 = vperm.slane %v14661_v17, 0  ;;  %v10491_v17 = vpop.permute.xlu0 %5947 }
 0x25c   :  { %v2716_v53 = vsel %vm1302_vm2, %v10450_v6, %v2513_v25  ;;  %v3719_v39 = vperm.slane %v9717_v33, 1  ;;  %v15375_v40 = vrot.slane %v9717_v33, 2  ;;  %v15376_v56 = vrot.slane %v9717_v33, 4 }
 0x25d   :  { %6162 = vrot.lane.b32.xlu1 %v6161_v38, %s6352_s11  ;;  %v2717_v23 = vsel %vm1304_vm3, %v10456_v57, %v2716_v53  ;;  %v10484_v18 = vperm.slane %v14663_v60, 0  ;;  %v15378_v25 = vrot.slane %v9717_v33, 6  ;;  %v3723_v53 = vperm.slane %v9721_v19, 1 }
 0x25e   :  { %v3720_v0 = vperm.slane %v15375_v40, 1  ;;  %v3721_v47 = vperm.slane %v15376_v56, 1  ;;  %v2718_v63 = vsel %vm1306_vm4, %v10460_v61, %v2717_v23  ;;  %v15379_v56 = vrot.slane %v9721_v19, 2  ;;  %v10502_v23 = vpop.permute.xlu2 %5957 }
 0x25f   :  { %15377 = vst [vmem:[#allocation126_spill] sm:$0xff] %v10484_v18  ;;  %v3722_v38 = vperm.slane %v15378_v25, 1  ;;  %v2719_v40 = vsel %vm1308_vm5, %v14668_v5, %v2718_v63  ;;  %v15380_v54 = vrot.slane %v9721_v19, 4  ;;  %v10510_v63 = vld [vmem:[#allocation2 + $0x4e0] sm:$0xff]  ;;  %v15390_v27 = vperm.slane %v15389_v34, 0  ;;  %v15396_v34 = vld [vmem:[#allocation74_spill] sm:$0xff] }
 0x260   :  { %v3724_v60 = vperm.slane %v15379_v56, 1  ;;  %v3735_v8 = vsel %vm1302_vm2, %v3720_v0, %v3719_v39  ;;  %v2720_v25 = vsel %vm1310_vm6, %v10466_v24, %v2719_v40  ;;  %v249_v39 = vld [vmem:[%s14194_s0 + $0x2e0] sm:$0xff]  ;;  %v15381_v56 = vrot.slane %v9721_v19, 6 }
 0x261   :  { %v3725_v4 = vperm.slane %v15380_v54, 1  ;;  %v3736_v12 = vsel %vm1304_vm3, %v3721_v47, %v3735_v8  ;;  %v2721_v0 = vsel %vm1312_vm7, %v10470_v48, %v2720_v25  ;;  %362 = vst.msk [vmem:[#allocation2 + $0x499] sm:$0xff] %vm21_vm0, %v249_v39  ;;  %v790_v40 = vrot.slane %v10510_v63, 2 }
 0x262   :  { %v3726_v5 = vperm.slane %v15381_v56, 1  ;;  %v3737_v33 = vsel %vm1306_vm4, %v3722_v38, %v3736_v12  ;;  %v2722_v54 = vsel %vm1314_vm8, %v10484_v18, %v2721_v0  ;;  %v15383_v56 = vunpack.i.h.bf16 %v9881_v36  ;;  %v15384_v12 = vld [vmem:[#allocation43_spill] sm:$0xff] }
 0x263   :  { %v3738_v8 = vsel %vm1308_vm5, %v3723_v53, %v3737_v33  ;;  %v791_v39 = vrot.slane %v10510_v63, 4  ;;  %v15385_v0 = vunpack.i.h.bf16 %v9883_v28  ;;  %v792_v33 = vrot.slane %v10510_v63, 6  ;;  %v250_v36 = vld [vmem:[%s14194_s0 + $0x2e8] sm:$0xff] }
 0x264   :  { %v3739_v44 = vsel %vm1310_vm6, %v3724_v60, %v3738_v8  ;;  %v3854_v38 = vsel %vm21_vm0, %v15384_v12, %v15383_v56  ;;  %v793_v25 = vrot.slane %v10521_v50, 2  ;;  %v15386_v8 = vunpack.i.h.bf16 %v9897_v9  ;;  %v492_v12 = vld [vmem:[#allocation2 + $0x388] sm:$0x3]  ;;  %363 = vst.msk [vmem:[#allocation2 + $0x4a1] sm:$0xff] %vm21_vm0, %v250_v36 }
 0x265   :  { %v3740_v26 = vsel %vm1312_vm7, %v3725_v4, %v3739_v44  ;;  %v3883_v53 = vsel %vm3877_vm10, %v3854_v38, %v15385_v0  ;;  %v794_v4 = vrot.slane %v10521_v50, 4  ;;  %v795_v28 = vrot.slane %v10521_v50, 6 }
 0x266   :  { %v3741_v60 = vsel %vm1314_vm8, %v3726_v5, %v3740_v26  ;;  %v3912_v56 = vsel %vm3906_vm11, %v3883_v53, %v15386_v8  ;;  %v1733_v38 = vperm.slane %v10510_v63, 1  ;;  %v1734_v0 = vperm.slane %v790_v40, 1 }
 0x267   :  { %v6121_v44 = vpack.i.bf16 %v2722_v54, %v3741_v60  ;;  %4146 = vmatmul.f32.gmra.mxu0 %v3912_v56  ;;  %v1735_v47 = vperm.slane %v791_v39, 1  ;;  %v1736_v1 = vperm.slane %v792_v33, 1  ;;  %v1737_v26 = vperm.slane %v10521_v50, 1  ;;  %v6258_v60 = vld [vmem:[#allocation2 + $0x78] sm:$0xff] }
 0x268   :  { %v1738_v5 = vperm.slane %v793_v25, 1  ;;  %v1739_v9 = vperm.slane %v794_v4, 1  ;;  %v1740_v53 = vperm.slane %v795_v28, 1  ;;  %v1932_v8 = vsel %vm1302_vm2, %v1734_v0, %v1733_v38 }
 0x269   :  { %6122 = vrot.lane.b32.xlu2 %v6121_v44, %s6351_s10  ;;  %v3314_v31 = vperm.slane %v492_v12, 0  ;;  %v3444_v54 = vsel %vm1302_vm2, %v9632_v22, %v9622_v49  ;;  %v1933_v36 = vsel %vm1304_vm3, %v1735_v47, %v1932_v8  ;;  %v2865_v56 = vperm.slane %v6258_v60, 1 }
 0x26a   :  { %v3445_v63 = vsel %vm1304_vm3, %v9636_v35, %v3444_v54  ;;  %v15388_v19 = vrot.slane %v15387_v37, 2  ;;  %v1934_v44 = vsel %vm1306_vm4, %v1736_v1, %v1933_v36  ;;  %v15391_v38 = vrot.slane %v15387_v37, 4  ;;  %v15393_v35 = vld [vmem:[#allocation22_spill] sm:$0xff]  ;;  %v6259_v54 = vld [vmem:[#allocation2 + $0x80] sm:$0xff] }
 0x26b   :  { %v3446_v12 = vsel %vm1306_vm4, %v15390_v27, %v3445_v63  ;;  %v15392_v49 = vrot.slane %v15387_v37, 6  ;;  %v1935_v47 = vsel %vm1308_vm5, %v1737_v26, %v1934_v44  ;;  %v2869_v60 = vperm.slane %v6259_v54, 1  ;;  %v15399_v44 = vld [vmem:[#allocation76_spill] sm:$0xff]  ;;  %v6260_v54 = vld [vmem:[#allocation2 + $0x390] sm:$0xff] }
 0x26c   :  { %v2866_v21 = vperm.slane %v15388_v19, 1  ;;  %v2867_v0 = vperm.slane %v15391_v38, 1  ;;  %v3447_v8 = vsel %vm1308_vm5, %v15393_v35, %v3446_v12  ;;  %v15394_v19 = vld [vmem:[#allocation79_spill] sm:$0xff]  ;;  %v1936_v36 = vsel %vm1310_vm6, %v1738_v5, %v1935_v47  ;;  %v263_v5 = vld [vmem:[%s14194_s0 + $0x350] sm:$0xff] }
 0x26d   :  { %v2868_v22 = vperm.slane %v15392_v49, 1  ;;  %v15395_v16 = vrot.slane %v15394_v19, 2  ;;  %v3448_v27 = vsel %vm1310_vm6, %v15396_v34, %v3447_v8  ;;  %v15397_v63 = vrot.slane %v15394_v19, 4  ;;  %376 = vst.msk [vmem:[#allocation2 + $0x541] sm:$0xff] %vm21_vm0, %v263_v5 }
 0x26e   :  { %v15398_v37 = vrot.slane %v15394_v19, 6  ;;  %v1937_v26 = vsel %vm1312_vm7, %v1739_v9, %v1936_v36  ;;  %v3449_v12 = vsel %vm1312_vm7, %v15399_v44, %v3448_v27  ;;  %v3087_v35 = vsel %vm1302_vm2, %v2866_v21, %v2865_v56  ;;  %v537_v19 = vld [vmem:[#allocation2 + $0x4f0] sm:$0x3] }
 0x26f   :  { %v2870_v1 = vperm.slane %v15395_v16, 1  ;;  %v2871_v38 = vperm.slane %v15397_v63, 1  ;;  %v1222_v16 = vperm.slane %v6260_v54, 0  ;;  %v10592_v34 = vsel %vm1314_vm8, %v1740_v53, %v1937_v26  ;;  %v10605_v63 = vld [vmem:[#allocation2 + $0x468] sm:$0xff]  ;;  %v15411_v54 = vld [vmem:[#allocation105_spill] sm:$0xff] }
 0x270   :  { %v2872_v49 = vperm.slane %v15398_v37, 1  ;;  %15400 = vst [vmem:[#allocation127_spill] sm:$0xff] %v10592_v34  ;;  %v3450_v47 = vsel %vm1314_vm8, %v3314_v31, %v3449_v12  ;;  %v3088_v8 = vsel %vm1304_vm3, %v2867_v0, %v3087_v35  ;;  %v10596_v9 = vperm.slane %v790_v40, 0 }
 0x271   :  { %v6171_v21 = vpack.i.bf16 %v10592_v34, %v3450_v47  ;;  %v3089_v56 = vsel %vm1306_vm4, %v2868_v22, %v3088_v8  ;;  %v10601_v36 = vperm.slane %v791_v39, 0  ;;  %v10603_v27 = vperm.slane %v792_v33, 0  ;;  %15404 = vst [vmem:[#allocation77_spill] sm:$0xff] %v10605_v63  ;;  %v15408_v39 = vld [vmem:[#allocation102_spill] sm:$0xff] }
 0x272   :  { %15401 = vst [vmem:[#allocation129_spill] sm:$0xff] %v10596_v9  ;;  %v3090_v53 = vsel %vm1308_vm5, %v2869_v60, %v3089_v56  ;;  %v14684_v31 = vperm.slane %v10521_v50, 0  ;;  %v10609_v0 = vperm.slane %v793_v25, 0  ;;  %v10611_v40 = vperm.slane %v794_v4, 0  ;;  %v264_v60 = vld [vmem:[%s14194_s0 + $0x358] sm:$0xff]  ;;  %v15409_v25 = vld [vmem:[#allocation104_spill] sm:$0xff] }
 0x273   :  { %15402 = vst [vmem:[#allocation130_spill] sm:$0xff] %v10601_v36  ;;  %6172 = vrot.lane.b32.xlu0 %v6171_v21, %s6350_s26  ;;  %v3091_v37 = vsel %vm1310_vm6, %v2870_v1, %v3090_v53  ;;  %v10615_v26 = vperm.slane %v795_v28, 0  ;;  %v1435_v33 = vsel %vm1302_vm2, %v15408_v39, %v1222_v16  ;;  %v2062_v22 = vperm.slane %v537_v19, 0  ;;  %v10628_v1 = vld [vmem:[#allocation2 + $0x470] sm:$0xff]  ;;  %v15434_v50 = vld [vmem:[#allocation122_spill] sm:$0xff] }
 0x274   :  { %15403 = vst [vmem:[#allocation43_spill] sm:$0xff] %v10603_v27  ;;  %v3092_v44 = vsel %vm1312_vm7, %v2871_v38, %v3091_v37  ;;  %v1436_v4 = vsel %vm1304_vm3, %v15409_v25, %v1435_v33  ;;  %v2240_v12 = vsel %vm1302_vm2, %v10601_v36, %v10596_v9  ;;  %v14683_v28 = vrot.slane %v10605_v63, 2  ;;  %v15413_v19 = vld [vmem:[#allocation101_spill] sm:$0xff]  ;;  %v15416_v33 = vld [vmem:[#allocation132_spill] sm:$0xff] }
 0x275   :  { %15405 = vst [vmem:[#allocation22_spill] sm:$0xff] %v10609_v0  ;;  %v3093_v35 = vsel %vm1314_vm8, %v2872_v49, %v3092_v44  ;;  %v1437_v16 = vsel %vm1306_vm4, %v15411_v54, %v1436_v4  ;;  %v2241_v38 = vsel %vm1304_vm3, %v10603_v27, %v2240_v12  ;;  %v14682_v5 = vrot.slane %v10605_v63, 4 }
 0x276   :  { %15406 = vst [vmem:[#allocation79_spill] sm:$0xff] %v10611_v40  ;;  %v15412_v47 = vunpack.i.l.bf16 %v10491_v17  ;;  %v15414_v21 = vperm.slane %v15413_v19, 0  ;;  %v2242_v49 = vsel %vm1306_vm4, %v14684_v31, %v2241_v38  ;;  %v14681_v53 = vrot.slane %v10605_v63, 6 }
 0x277   :  { %15407 = vst [vmem:[#allocation74_spill] sm:$0xff] %v10615_v26  ;;  %v15415_v37 = vunpack.i.l.bf16 %v10500_v58  ;;  %v2243_v44 = vsel %vm1308_vm5, %v10609_v0, %v2242_v49  ;;  %v14685_v25 = vrot.slane %v10628_v1, 2  ;;  %v15417_v4 = vunpack.i.l.bf16 %v10502_v23 }
 0x278   :  { %15410 = vst [vmem:[#allocation76_spill] sm:$0xff] %v10628_v1  ;;  %v3937_v8 = vsel %vm21_vm0, %v3093_v35, %v15412_v47  ;;  %v1438_v56 = vsel %vm1308_vm5, %v15414_v21, %v1437_v16  ;;  %v15418_v35 = vld [vmem:[#allocation133_spill] sm:$0xff]  ;;  %v2244_v16 = vsel %vm1310_vm6, %v10611_v40, %v2243_v44  ;;  %v14686_v38 = vrot.slane %v10628_v1, 4  ;;  %v15419_v47 = vld [vmem:[#allocation135_spill] sm:$0xff]  ;;  %v10689_v44 = vpop.permute.xlu1 %5967 }
 0x279   :  { %377 = vst.msk [vmem:[#allocation2 + $0x549] sm:$0xff] %vm21_vm0, %v264_v60  ;;  %v3965_v39 = vsel %vm3877_vm10, %v3937_v8, %v15415_v37  ;;  %v1439_v60 = vsel %vm1310_vm6, %v15416_v33, %v1438_v56  ;;  %v2245_v19 = vsel %vm1312_vm7, %v10615_v26, %v2244_v16  ;;  %v14687_v21 = vrot.slane %v10628_v1, 6  ;;  %v10698_v16 = vld [vmem:[#allocation2 + $0x510] sm:$0xff] }
 0x27a   :  { %v3993_v12 = vsel %vm3906_vm11, %v3965_v39, %v15417_v4  ;;  %v1440_v54 = vsel %vm1312_vm7, %v15418_v35, %v1439_v60  ;;  %v2521_v56 = vperm.slane %v10605_v63, 0  ;;  %v10673_v49 = vsel %vm1314_vm8, %v2062_v22, %v2245_v19  ;;  %v10687_v60 = vpop.permute.xlu0 %5962  ;;  %v15430_v4 = vld [vmem:[#allocation54_spill] sm:$0xff] }
 0x27b   :  { %4238 = vmatmul.f32.gmra.mxu1 %v3993_v12  ;;  %v10666_v8 = vsel %vm1314_vm8, %v15419_v47, %v1440_v54  ;;  %15421 = vst [vmem:[#allocation104_spill] sm:$0xff] %v10673_v49  ;;  %v10677_v37 = vperm.slane %v14683_v28, 0  ;;  %v10681_v39 = vperm.slane %v14682_v5, 0  ;;  %v10685_v33 = vperm.slane %v14681_v53, 0  ;;  %v10696_v54 = vpop.permute.xlu2 %5972  ;;  %v253_v47 = vld [vmem:[%s14194_s0 + $0x300] sm:$0xff] }
 0x27c   :  { %15420 = vst [vmem:[#allocation102_spill] sm:$0xff] %v10666_v8  ;;  %v6176_v12 = vpack.i.bf16 %v10673_v49, %v10666_v8  ;;  %v10706_v53 = vperm.slane %v14685_v25, 0  ;;  %v10710_v5 = vperm.slane %v14686_v38, 0  ;;  %v10718_v31 = vperm.slane %v14687_v21, 0  ;;  %v10724_v38 = vld [vmem:[#allocation2 + $0x518] sm:$0xff] }
 0x27d   :  { %15422 = vst [vmem:[#allocation105_spill] sm:$0xff] %v10677_v37  ;;  %v2723_v28 = vsel %vm1302_vm2, %v10677_v37, %v2521_v56  ;;  %v796_v35 = vrot.slane %v10698_v16, 2  ;;  %v15432_v22 = vunpack.i.l.bf16 %v9961_v55  ;;  %v797_v49 = vrot.slane %v10698_v16, 4 }
 0x27e   :  { %15423 = vst [vmem:[#allocation101_spill] sm:$0xff] %v10681_v39  ;;  %6177 = vrot.lane.b32.xlu1 %v6176_v12, %s6352_s11  ;;  %v2724_v19 = vsel %vm1304_vm3, %v10681_v39, %v2723_v28  ;;  %v15429_v12 = vunpack.i.l.bf16 %v9959_v41  ;;  %v15431_v28 = vperm.slane %v10628_v1, 0  ;;  %v801_v34 = vrot.slane %v10724_v38, 6 }
 0x27f   :  { %15424 = vst [vmem:[#allocation132_spill] sm:$0xff] %v10685_v33  ;;  %v2725_v56 = vsel %vm1306_vm4, %v10685_v33, %v2724_v19  ;;  %v798_v19 = vrot.slane %v10698_v16, 6  ;;  %v1741_v26 = vperm.slane %v10698_v16, 1  ;;  %v1745_v0 = vperm.slane %v10724_v38, 1 }
 0x280   :  { %15425 = vst [vmem:[#allocation133_spill] sm:$0xff] %v10706_v53  ;;  %v3855_v21 = vsel %vm21_vm0, %v15430_v4, %v15429_v12  ;;  %v2726_v25 = vsel %vm1308_vm5, %v15431_v28, %v2725_v56  ;;  %v15433_v12 = vunpack.i.l.bf16 %v9970_v11  ;;  %v799_v56 = vrot.slane %v10724_v38, 2 }
 0x281   :  { %15426 = vst [vmem:[#allocation135_spill] sm:$0xff] %v10710_v5  ;;  %v3884_v63 = vsel %vm3877_vm10, %v3855_v21, %v15432_v22  ;;  %v2727_v4 = vsel %vm1310_vm6, %v10706_v53, %v2726_v25  ;;  %v800_v28 = vrot.slane %v10724_v38, 4  ;;  %v498_v22 = vld [vmem:[#allocation2 + $0x3b8] sm:$0x3]  ;;  %v1742_v25 = vperm.slane %v796_v35, 1 }
 0x282   :  { %366 = vst.msk [vmem:[#allocation2 + $0x4c9] sm:$0xff] %vm21_vm0, %v253_v47  ;;  %v254_v47 = vld [vmem:[%s14194_s0 + $0x308] sm:$0xff]  ;;  %v3913_v8 = vsel %vm3906_vm11, %v3884_v63, %v15433_v12  ;;  %v2728_v21 = vsel %vm1312_vm7, %v10710_v5, %v2727_v4  ;;  %v1743_v63 = vperm.slane %v797_v49, 1  ;;  %v1744_v12 = vperm.slane %v798_v19, 1 }
 0x283   :  { %15427 = vst [vmem:[#allocation160_spill] sm:$0xff] %v10718_v31  ;;  %4149 = vmatmul.f32.gmra.mxu0 %v3913_v8  ;;  %v2729_v40 = vsel %vm1314_vm8, %v10718_v31, %v2728_v21  ;;  %v1747_v36 = vperm.slane %v800_v28, 1  ;;  %v1748_v9 = vperm.slane %v801_v34, 1  ;;  %v1939_v8 = vsel %vm1302_vm2, %v1742_v25, %v1741_v26  ;;  %v15437_v31 = vld [vmem:[#allocation149_spill] sm:$0xff]  ;;  %v15441_v25 = vld [vmem:[#allocation83_spill] sm:$0xff] }
 0x284   :  { %15428 = vst [vmem:[#allocation161_spill] sm:$0xff] %v10724_v38  ;;  %v6136_v27 = vpack.i.bf16 %v2729_v40, %v15434_v50  ;;  %v3315_v4 = vperm.slane %v498_v22, 0  ;;  %v3451_v16 = vsel %vm1302_vm2, %v15436_v59, %v15435_v30  ;;  %v2873_v5 = vperm.slane %v6261_v3, 1  ;;  %v15438_v50 = vld [vmem:[#allocation80_spill] sm:$0xff] }
 0x285   :  { %367 = vst.msk [vmem:[#allocation2 + $0x4d1] sm:$0xff] %vm21_vm0, %v254_v47  ;;  %v1746_v47 = vperm.slane %v799_v56, 1  ;;  %v1940_v21 = vsel %vm1304_vm3, %v1743_v63, %v1939_v8  ;;  %v3452_v53 = vsel %vm1304_vm3, %v15437_v31, %v3451_v16  ;;  %v15439_v40 = vrot.slane %v15438_v50, 2  ;;  %v15444_v31 = vld [vmem:[#allocation150_spill] sm:$0xff] }
 0x286   :  { %6137 = vrot.lane.b32.xlu2 %v6136_v27, %s6351_s10  ;;  %v15440_v33 = vrot.slane %v15438_v50, 4  ;;  %v1941_v22 = vsel %vm1306_vm4, %v1744_v12, %v1940_v21  ;;  %v15442_v39 = vperm.slane %v15441_v25, 0  ;;  %v15443_v3 = vrot.slane %v15438_v50, 6  ;;  %v6262_v27 = vld [vmem:[#allocation2 + $0xb0] sm:$0xff]  ;;  %v15448_v25 = vld [vmem:[#allocation151_spill] sm:$0xff] }
 0x287   :  { %v2874_v1 = vperm.slane %v15439_v40, 1  ;;  %v2877_v63 = vperm.slane %v6262_v27, 1  ;;  %v1942_v8 = vsel %vm1308_vm5, %v1745_v0, %v1941_v22  ;;  %v15445_v40 = vld [vmem:[#allocation81_spill] sm:$0xff]  ;;  %v15450_v22 = vld [vmem:[#allocation111_spill] sm:$0xff] }
 0x288   :  { %v2875_v26 = vperm.slane %v15440_v33, 1  ;;  %v3453_v59 = vsel %vm1306_vm4, %v15442_v39, %v3452_v53  ;;  %v2876_v30 = vperm.slane %v15443_v3, 1  ;;  %v15446_v37 = vrot.slane %v15445_v40, 2  ;;  %v6263_v27 = vld [vmem:[#allocation2 + $0x3c0] sm:$0xff] }
 0x289   :  { %v3454_v16 = vsel %vm1308_vm5, %v15444_v31, %v3453_v59  ;;  %v15447_v33 = vrot.slane %v15445_v40, 4  ;;  %v1943_v21 = vsel %vm1310_vm6, %v1746_v47, %v1942_v8  ;;  %v15449_v39 = vrot.slane %v15445_v40, 6  ;;  %v543_v8 = vld [vmem:[#allocation2 + $0x520] sm:$0x3] }
 0x28a   :  { %v2878_v18 = vperm.slane %v15446_v37, 1  ;;  %v3455_v53 = vsel %vm1310_vm6, %v15448_v25, %v3454_v16  ;;  %v3094_v3 = vsel %vm1302_vm2, %v2874_v1, %v2873_v5  ;;  %v1944_v0 = vsel %vm1312_vm7, %v1747_v36, %v1943_v21 }
 0x28b   :  { %v2879_v12 = vperm.slane %v15447_v33, 1  ;;  %v2880_v50 = vperm.slane %v15449_v39, 1  ;;  %v3456_v59 = vsel %vm1312_vm7, %v15450_v22, %v3455_v53  ;;  %v3095_v37 = vsel %vm1304_vm3, %v2875_v26, %v3094_v3  ;;  %v10809_v26 = vld [vmem:[#allocation2 + $0x498] sm:$0xff]  ;;  %v15463_v22 = vld [vmem:[#allocation139_spill] sm:$0xff] }
 0x28c   :  { %v1230_v31 = vperm.slane %v6263_v27, 0  ;;  %v10797_v33 = vsel %vm1314_vm8, %v1748_v9, %v1944_v0  ;;  %v3457_v47 = vsel %vm1314_vm8, %v3315_v4, %v3456_v59  ;;  %v3096_v25 = vsel %vm1306_vm4, %v2876_v30, %v3095_v37  ;;  %15455 = vst [vmem:[#allocation149_spill] sm:$0xff] %v10809_v26  ;;  %v15460_v3 = vld [vmem:[#allocation78_spill] sm:$0xff] }
 0x28d   :  { %15451 = vst [vmem:[#allocation54_spill] sm:$0xff] %v10797_v33  ;;  %v10801_v16 = vperm.slane %v796_v35, 0  ;;  %v6186_v1 = vpack.i.bf16 %v10797_v33, %v3457_v47  ;;  %v3097_v36 = vsel %vm1308_vm5, %v2877_v63, %v3096_v25  ;;  %v10805_v5 = vperm.slane %v797_v49, 0  ;;  %v15459_v49 = vld [vmem:[#allocation70_spill] sm:$0xff]  ;;  %v15465_v47 = vld [vmem:[#allocation24_spill] sm:$0xff] }
 0x28e   :  { %v10807_v40 = vperm.slane %v798_v19, 0  ;;  %v3098_v9 = vsel %vm1310_vm6, %v2878_v18, %v3097_v36  ;;  %v14715_v21 = vperm.slane %v10724_v38, 0  ;;  %v10813_v4 = vperm.slane %v799_v56, 0  ;;  %v15481_v33 = vld [vmem:[#allocation124_spill] sm:$0xff] }
 0x28f   :  { %15452 = vst [vmem:[#allocation122_spill] sm:$0xff] %v10801_v16  ;;  %v10815_v30 = vperm.slane %v800_v28, 0  ;;  %6187 = vrot.lane.b32.xlu0 %v6186_v1, %s6350_s26  ;;  %v3099_v35 = vsel %vm1312_vm7, %v2879_v12, %v3098_v9  ;;  %v10819_v53 = vperm.slane %v801_v34, 0  ;;  %v1442_v19 = vsel %vm1302_vm2, %v15459_v49, %v1230_v31  ;;  %v10829_v28 = vld [vmem:[#allocation2 + $0x4a0] sm:$0xff]  ;;  %v257_v9 = vld [vmem:[%s14194_s0 + $0x320] sm:$0xff] }
 0x290   :  { %15453 = vst [vmem:[#allocation147_spill] sm:$0xff] %v10805_v5  ;;  %v2063_v63 = vperm.slane %v543_v8, 0  ;;  %v3100_v39 = vsel %vm1314_vm8, %v2880_v50, %v3099_v35  ;;  %v1443_v18 = vsel %vm1304_vm3, %v15460_v3, %v1442_v19  ;;  %v2247_v56 = vsel %vm1302_vm2, %v10805_v5, %v10801_v16  ;;  %v15468_v19 = vld [vmem:[#allocation140_spill] sm:$0xff] }
 0x291   :  { %15454 = vst [vmem:[#allocation148_spill] sm:$0xff] %v10807_v40  ;;  %v14714_v0 = vrot.slane %v10809_v26, 2  ;;  %v15462_v34 = vunpack.i.l.bf16 %v10687_v60  ;;  %v1444_v59 = vsel %vm1306_vm4, %v15463_v22, %v1443_v18  ;;  %v2248_v50 = vsel %vm1304_vm3, %v10807_v40, %v2247_v56  ;;  %v15469_v56 = vld [vmem:[#allocation141_spill] sm:$0xff] }
 0x292   :  { %15456 = vst [vmem:[#allocation80_spill] sm:$0xff] %v10813_v4  ;;  %v14713_v37 = vrot.slane %v10809_v26, 4  ;;  %v15464_v27 = vunpack.i.l.bf16 %v10689_v44  ;;  %v15466_v25 = vperm.slane %v15465_v47, 0  ;;  %v2249_v1 = vsel %vm1306_vm4, %v14715_v21, %v2248_v50  ;;  %v15470_v50 = vld [vmem:[#allocation142_spill] sm:$0xff]  ;;  %v10922_v21 = vld [vmem:[#allocation2 + $0x548] sm:$0xff] }
 0x293   :  { %15457 = vst [vmem:[#allocation150_spill] sm:$0xff] %v10815_v30  ;;  %v3938_v12 = vsel %vm21_vm0, %v3100_v39, %v15462_v34  ;;  %v14712_v36 = vrot.slane %v10809_v26, 6  ;;  %v15467_v35 = vunpack.i.l.bf16 %v10696_v54  ;;  %v2250_v3 = vsel %vm1308_vm5, %v10813_v4, %v2249_v1  ;;  %v15476_v1 = vld [vmem:[#allocation60_spill] sm:$0xff] }
 0x294   :  { %15458 = vst [vmem:[#allocation81_spill] sm:$0xff] %v10819_v53  ;;  %v3966_v31 = vsel %vm3877_vm10, %v3938_v12, %v15464_v27  ;;  %v1445_v8 = vsel %vm1308_vm5, %v15466_v25, %v1444_v59  ;;  %v14716_v18 = vrot.slane %v10829_v28, 2  ;;  %v2251_v12 = vsel %vm1310_vm6, %v10815_v30, %v2250_v3  ;;  %v258_v3 = vld [vmem:[%s14194_s0 + $0x328] sm:$0xff] }
 0x295   :  { %15461 = vst [vmem:[#allocation151_spill] sm:$0xff] %v10829_v28  ;;  %v3994_v49 = vsel %vm3906_vm11, %v3966_v31, %v15467_v35  ;;  %v1446_v39 = vsel %vm1310_vm6, %v15468_v19, %v1445_v8  ;;  %v14717_v22 = vrot.slane %v10829_v28, 4  ;;  %v14718_v59 = vrot.slane %v10829_v28, 6  ;;  %v10879_v8 = vpop.permute.xlu0 %5977  ;;  %v10893_v19 = vpop.permute.xlu1 %5982 }
 0x296   :  { %370 = vst.msk [vmem:[#allocation2 + $0x4f9] sm:$0xff] %vm21_vm0, %v257_v9  ;;  %4241 = vmatmul.f32.gmra.mxu1 %v3994_v49  ;;  %v1447_v34 = vsel %vm1312_vm7, %v15469_v56, %v1446_v39  ;;  %v2252_v31 = vsel %vm1312_vm7, %v10819_v53, %v2251_v12  ;;  %v2529_v47 = vperm.slane %v10809_v26, 0  ;;  %v10877_v25 = vperm.slane %v14714_v0, 0  ;;  %v10895_v39 = vpop.permute.xlu2 %5987 }
 0x297   :  { %v10870_v27 = vsel %vm1314_vm8, %v15470_v50, %v1447_v34  ;;  %v10883_v9 = vsel %vm1314_vm8, %v2063_v63, %v2252_v31  ;;  %v10887_v35 = vperm.slane %v14713_v37, 0  ;;  %v10891_v49 = vperm.slane %v14712_v36, 0  ;;  %v10905_v50 = vld [vmem:[#allocation2 + $0x540] sm:$0xff]  ;;  %371 = vst.msk [vmem:[#allocation2 + $0x501] sm:$0xff] %vm21_vm0, %v258_v3 }
 0x298   :  { %15471 = vst [vmem:[#allocation111_spill] sm:$0xff] %v10870_v27  ;;  %v6191_v34 = vpack.i.bf16 %v10883_v9, %v10870_v27  ;;  %v10910_v31 = vperm.slane %v14716_v18, 0  ;;  %v10914_v36 = vperm.slane %v14717_v22, 0  ;;  %v10918_v37 = vperm.slane %v14718_v59, 0 }
 0x299   :  { %15472 = vst [vmem:[#allocation70_spill] sm:$0xff] %v10883_v9  ;;  %v2730_v0 = vsel %vm1302_vm2, %v10877_v25, %v2529_v47  ;;  %v15475_v56 = vunpack.i.h.bf16 %v9959_v41  ;;  %v802_v12 = vrot.slane %v10905_v50, 2  ;;  %v15478_v63 = vunpack.i.h.bf16 %v9961_v55 }
 0x29a   :  { %15473 = vst [vmem:[#allocation78_spill] sm:$0xff] %v10918_v37  ;;  %6192 = vrot.lane.b32.xlu1 %v6191_v34, %s6352_s11  ;;  %v2731_v3 = vsel %vm1304_vm3, %v10887_v35, %v2730_v0  ;;  %v803_v34 = vrot.slane %v10905_v50, 4  ;;  %v15477_v0 = vperm.slane %v10829_v28, 0  ;;  %v804_v26 = vrot.slane %v10905_v50, 6 }
 0x29b   :  { %15474 = vst [vmem:[#allocation139_spill] sm:$0xff] %v10922_v21  ;;  %v2732_v59 = vsel %vm1306_vm4, %v10891_v49, %v2731_v3  ;;  %v3856_v47 = vsel %vm21_vm0, %v15476_v1, %v15475_v56  ;;  %v15479_v1 = vunpack.i.h.bf16 %v9970_v11  ;;  %v806_v9 = vrot.slane %v10922_v21, 4 }
 0x29c   :  { %v2733_v18 = vsel %vm1308_vm5, %v15477_v0, %v2732_v59  ;;  %v3885_v22 = vsel %vm3877_vm10, %v3856_v47, %v15478_v63  ;;  %v807_v27 = vrot.slane %v10922_v21, 6  ;;  %v504_v59 = vld [vmem:[#allocation2 + $0x3e8] sm:$0x3]  ;;  %v1749_v63 = vperm.slane %v10905_v50, 1 }
 0x29d   :  { %v2734_v41 = vsel %vm1310_vm6, %v10910_v31, %v2733_v18  ;;  %v3914_v56 = vsel %vm3906_vm11, %v3885_v22, %v15479_v1  ;;  %v1750_v47 = vperm.slane %v802_v12, 1  ;;  %v1751_v0 = vperm.slane %v803_v34, 1 }
 0x29e   :  { %v2735_v55 = vsel %vm1312_vm7, %v10914_v36, %v2734_v41  ;;  %4152 = vmatmul.f32.gmra.mxu0 %v3914_v56  ;;  %v1752_v3 = vperm.slane %v804_v26, 1  ;;  %v1753_v11 = vperm.slane %v10922_v21, 1  ;;  %v15480_v22 = vrot.slane %v10922_v21, 2 }
 0x29f   :  { %v2736_v18 = vsel %vm1314_vm8, %v10918_v37, %v2735_v55  ;;  %v1755_v30 = vperm.slane %v806_v9, 1  ;;  %v1756_v4 = vperm.slane %v807_v27, 1  ;;  %v1946_v41 = vsel %vm1302_vm2, %v1750_v47, %v1749_v63  ;;  %v6264_v55 = vld [vmem:[#allocation2 + $0xd8] sm:$0xff] }
 0x2a0   :  { %v1754_v1 = vperm.slane %v15480_v22, 1  ;;  %v6151_v53 = vpack.i.bf16 %v2736_v18, %v15481_v33  ;;  %v1947_v56 = vsel %vm1304_vm3, %v1751_v0, %v1946_v41  ;;  %v3316_v50 = vperm.slane %v504_v59, 0  ;;  %v15482_v18 = vld [vmem:[#allocation90_spill] sm:$0xff]  ;;  %v15485_v0 = vld [vmem:[#allocation63_spill] sm:$0xff] }
 0x2a1   :  { %v3458_v38 = vsel %vm1302_vm2, %v10058_v29, %v10050_v42  ;;  %v2881_v40 = vperm.slane %v6264_v55, 1  ;;  %v1948_v5 = vsel %vm1306_vm4, %v1752_v3, %v1947_v56  ;;  %v15483_v22 = vrot.slane %v15482_v18, 2  ;;  %v6265_v55 = vld [vmem:[#allocation2 + $0xe0] sm:$0xff]  ;;  %v15488_v56 = vld [vmem:[#allocation66_spill] sm:$0xff] }
 0x2a2   :  { %6152 = vrot.lane.b32.xlu2 %v6151_v53, %s6351_s10  ;;  %v3459_v33 = vsel %vm1304_vm3, %v10062_v20, %v3458_v38  ;;  %v15484_v63 = vrot.slane %v15482_v18, 4  ;;  %v1949_v59 = vsel %vm1308_vm5, %v1753_v11, %v1948_v5  ;;  %v15486_v41 = vperm.slane %v15485_v0, 0  ;;  %v261_v20 = vld [vmem:[%s14194_s0 + $0x340] sm:$0xff] }
 0x2a3   :  { %v2882_v16 = vperm.slane %v15483_v22, 1  ;;  %v15487_v29 = vrot.slane %v15482_v18, 6  ;;  %v2885_v3 = vperm.slane %v6265_v55, 1  ;;  %v1950_v38 = vsel %vm1310_vm6, %v1754_v1, %v1949_v59  ;;  %374 = vst.msk [vmem:[#allocation2 + $0x529] sm:$0xff] %vm21_vm0, %v261_v20 }
 0x2a4   :  { %v2883_v47 = vperm.slane %v15484_v63, 1  ;;  %v3460_v42 = vsel %vm1306_vm4, %v15486_v41, %v3459_v33  ;;  %v15489_v63 = vld [vmem:[#allocation93_spill] sm:$0xff]  ;;  %v1951_v18 = vsel %vm1312_vm7, %v1755_v30, %v1950_v38  ;;  %v15492_v41 = vld [vmem:[#allocation46_spill] sm:$0xff] }
 0x2a5   :  { %v2884_v53 = vperm.slane %v15487_v29, 1  ;;  %v3461_v22 = vsel %vm1308_vm5, %v15488_v56, %v3460_v42  ;;  %v15490_v5 = vrot.slane %v15489_v63, 2  ;;  %v15491_v0 = vrot.slane %v15489_v63, 4  ;;  %v15495_v42 = vld [vmem:[#allocation120_spill] sm:$0xff] }
 0x2a6   :  { %v3462_v29 = vsel %vm1310_vm6, %v15492_v41, %v3461_v22  ;;  %v15493_v55 = vrot.slane %v15489_v63, 6  ;;  %v3101_v1 = vsel %vm1302_vm2, %v2882_v16, %v2881_v40  ;;  %v10999_v59 = vsel %vm1314_vm8, %v1756_v4, %v1951_v18  ;;  %v549_v22 = vld [vmem:[#allocation2 + $0x550] sm:$0x3]  ;;  %v262_v16 = vld [vmem:[%s14194_s0 + $0x348] sm:$0xff] }
 0x2a7   :  { %v2886_v11 = vperm.slane %v15490_v5, 1  ;;  %v2887_v33 = vperm.slane %v15491_v0, 1  ;;  %15494 = vst [vmem:[#allocation24_spill] sm:$0xff] %v10999_v59  ;;  %v3463_v56 = vsel %vm1312_vm7, %v15495_v42, %v3462_v29  ;;  %v3102_v0 = vsel %vm1304_vm3, %v2883_v47, %v3101_v1  ;;  %v6266_v5 = vld [vmem:[#allocation2 + $0x3f0] sm:$0xff] }
 0x2a8   :  { %v2888_v37 = vperm.slane %v15493_v55, 1  ;;  %v1238_v20 = vperm.slane %v6266_v5, 0  ;;  %v3464_v30 = vsel %vm1314_vm8, %v3316_v50, %v3463_v56  ;;  %v3103_v38 = vsel %vm1306_vm4, %v2884_v53, %v3102_v0  ;;  %v11018_v50 = vld [vmem:[#allocation2 + $0x4c8] sm:$0xff]  ;;  %375 = vst.msk [vmem:[#allocation2 + $0x531] sm:$0xff] %vm21_vm0, %v262_v16  ;;  %v15502_v0 = vld [vmem:[#allocation25_spill] sm:$0xff] }
 0x2a9   :  { %v11006_v41 = vperm.slane %v802_v12, 0  ;;  %v11008_v63 = vperm.slane %v803_v34, 0  ;;  %v6201_v40 = vpack.i.bf16 %v10999_v59, %v3464_v30  ;;  %v3104_v4 = vsel %vm1308_vm5, %v2885_v3, %v3103_v38  ;;  %15496 = vst [vmem:[#allocation140_spill] sm:$0xff] %v11018_v50  ;;  %v15501_v3 = vld [vmem:[#allocation40_spill] sm:$0xff]  ;;  %v11042_v5 = vld [vmem:[#allocation2 + $0x4d0] sm:$0xff]  ;;  %v15504_v38 = vld [vmem:[#allocation51_spill] sm:$0xff] }
 0x2aa   :  { %v11015_v47 = vperm.slane %v804_v26, 0  ;;  %v14735_v18 = vperm.slane %v10922_v21, 0  ;;  %v3105_v12 = vsel %vm1310_vm6, %v2886_v11, %v3104_v4  ;;  %v15497_v34 = vrot.slane %v10922_v21, 2 }
 0x2ab   :  { %v11026_v29 = vperm.slane %v806_v9, 0  ;;  %v11028_v55 = vperm.slane %v807_v27, 0  ;;  %6202 = vrot.lane.b32.xlu0 %v6201_v40, %s6350_s26  ;;  %v3106_v26 = vsel %vm1312_vm7, %v2887_v33, %v3105_v12  ;;  %v1449_v1 = vsel %vm1302_vm2, %v15501_v3, %v1238_v20  ;;  %v15506_v12 = vld [vmem:[#allocation19_spill] sm:$0xff] }
 0x2ac   :  { %v11024_v53 = vperm.slane %v15497_v34, 0  ;;  %v2064_v42 = vperm.slane %v549_v22, 0  ;;  %v2254_v11 = vsel %vm1302_vm2, %v11008_v63, %v11006_v41  ;;  %v3107_v56 = vsel %vm1314_vm8, %v2888_v37, %v3106_v26 }
 0x2ad   :  { %15499 = vst [vmem:[#allocation142_spill] sm:$0xff] %v11026_v29  ;;  %v1450_v9 = vsel %vm1304_vm3, %v15502_v0, %v1449_v1  ;;  %v2255_v27 = vsel %vm1304_vm3, %v11015_v47, %v2254_v11  ;;  %v14734_v33 = vrot.slane %v11018_v50, 2  ;;  %v15503_v30 = vunpack.i.l.bf16 %v10879_v8  ;;  %v15509_v0 = vld [vmem:[#allocation14_spill] sm:$0xff] }
 0x2ae   :  { %15498 = vst [vmem:[#allocation141_spill] sm:$0xff] %v11024_v53  ;;  %v1451_v22 = vsel %vm1306_vm4, %v15504_v38, %v1450_v9  ;;  %v2256_v37 = vsel %vm1306_vm4, %v14735_v18, %v2255_v27  ;;  %v14733_v16 = vrot.slane %v11018_v50, 4  ;;  %v15505_v40 = vunpack.i.l.bf16 %v10893_v19 }
 0x2af   :  { %15500 = vst [vmem:[#allocation60_spill] sm:$0xff] %v11028_v55  ;;  %v3939_v20 = vsel %vm21_vm0, %v3107_v56, %v15503_v30  ;;  %v15507_v34 = vperm.slane %v15506_v12, 0  ;;  %v2257_v3 = vsel %vm1308_vm5, %v11024_v53, %v2256_v37  ;;  %v14732_v1 = vrot.slane %v11018_v50, 6  ;;  %v15570_v53 = vld [vmem:[#allocation100_spill] sm:$0xff] }
 0x2b0   :  { %v3967_v4 = vsel %vm3877_vm10, %v3939_v20, %v15505_v40  ;;  %v15508_v11 = vunpack.i.l.bf16 %v10895_v39  ;;  %v2258_v27 = vsel %vm1310_vm6, %v11026_v29, %v2257_v3  ;;  %v14736_v30 = vrot.slane %v11042_v5, 2  ;;  %v15510_v20 = vld [vmem:[#allocation17_spill] sm:$0xff] }
 0x2b1   :  { %v1452_v26 = vsel %vm1308_vm5, %v15507_v34, %v1451_v22  ;;  %v2259_v22 = vsel %vm1312_vm7, %v11028_v55, %v2258_v27  ;;  %v14737_v37 = vrot.slane %v11042_v5, 4  ;;  %v14738_v40 = vrot.slane %v11042_v5, 6  ;;  %v11099_v27 = vpop.permute.xlu1 %5997 }
 0x2b2   :  { %v3995_v56 = vsel %vm3906_vm11, %v3967_v4, %v15508_v11  ;;  %v1453_v9 = vsel %vm1310_vm6, %v15509_v0, %v1452_v26  ;;  %v15511_v4 = vld [vmem:[#allocation6_spill] sm:$0xff]  ;;  %v2260_v34 = vsel %vm1314_vm8, %v2064_v42, %v2259_v22  ;;  %v2537_v26 = vperm.slane %v11018_v50, 0  ;;  %v11087_v11 = vpop.permute.xlu0 %5992  ;;  %v15514_v50 = vld [vmem:[#allocation72_spill] sm:$0xff] }
 0x2b3   :  { %4244 = vmatmul.f32.gmra.mxu1 %v3995_v56  ;;  %v1454_v38 = vsel %vm1312_vm7, %v15510_v20, %v1453_v9  ;;  %v11085_v3 = vperm.slane %v14734_v33, 0  ;;  %v11092_v0 = vperm.slane %v14733_v16, 0  ;;  %v11096_v9 = vperm.slane %v14732_v1, 0  ;;  %v11101_v20 = vpop.permute.xlu2 %6002  ;;  %5832 = vmatmul.msk.f32.vlgmr.msra.gmra.mxu3 %vm21_vm0, %v2260_v34  ;;  %v510_v16 = vld [vmem:[#allocation2 + $0x418] sm:$0x3] }
 0x2b4   :  { %v11079_v12 = vsel %vm1314_vm8, %v15511_v4, %v1454_v38  ;;  %v14749_v42 = vperm.slane %v11042_v5, 0  ;;  %v11108_v4 = vperm.slane %v14736_v30, 0  ;;  %v516_v33 = vld [vmem:[#allocation2 + $0x448] sm:$0x3]  ;;  %v11120_v22 = vperm.slane %v14738_v40, 0 }
 0x2b5   :  { %15512 = vst [vmem:[#allocation124_spill] sm:$0xff] %v11079_v12  ;;  %v6206_v56 = vpack.i.bf16 %v2260_v34, %v11079_v12  ;;  %v2737_v1 = vsel %vm1302_vm2, %v11085_v3, %v2537_v26  ;;  %v11116_v34 = vperm.slane %v14737_v37, 0  ;;  %v265_v26 = vld [vmem:[%s14194_s0 + $0x360] sm:$0xff]  ;;  %v3317_v59 = vperm.slane %v510_v16, 0 }
 0x2b6   :  { %v2738_v30 = vsel %vm1304_vm3, %v11092_v0, %v2737_v1  ;;  %378 = vst.msk [vmem:[#allocation2 + $0x559] sm:$0xff] %vm21_vm0, %v265_v26  ;;  %v15513_v1 = vunpack.i.h.bf16 %v10064_v52  ;;  %v3318_v55 = vperm.slane %v516_v33, 0  ;;  %v15515_v38 = vunpack.i.h.bf16 %v10066_v45 }
 0x2b7   :  { %6207 = vrot.lane.b32.xlu1 %v6206_v56, %s6352_s11  ;;  %v2739_v18 = vsel %vm1306_vm4, %v11096_v9, %v2738_v30  ;;  %v5994_v56 = vunpack.i.l.bf16 %v11087_v11  ;;  %v3465_v26 = vsel %vm1302_vm2, %v10259_v62, %v10255_v10  ;;  %v3472_v52 = vsel %vm1302_vm2, %v10456_v57, %v10450_v6  ;;  %v266_v10 = vld [vmem:[%s14194_s0 + $0x368] sm:$0xff] }
 0x2b8   :  { %v2740_v40 = vsel %vm1308_vm5, %v14749_v42, %v2739_v18  ;;  %v3857_v12 = vsel %vm21_vm0, %v15514_v50, %v15513_v1  ;;  %v15516_v50 = vunpack.i.h.bf16 %v10074_v46  ;;  %v3466_v45 = vsel %vm1304_vm3, %v10268_v15, %v3465_v26  ;;  %v6267_v15 = vld [vmem:[#allocation2 + $0x108] sm:$0xff]  ;;  %379 = vst.msk [vmem:[#allocation2 + $0x561] sm:$0xff] %vm21_vm0, %v266_v10 }
 0x2b9   :  { %v2741_v30 = vsel %vm1310_vm6, %v11108_v4, %v2740_v40  ;;  %v3886_v37 = vsel %vm3877_vm10, %v3857_v12, %v15515_v38  ;;  %v3473_v16 = vsel %vm1304_vm3, %v10460_v61, %v3472_v52  ;;  %v15517_v6 = vperm.slane %v10209_v13, 0  ;;  %v15519_v61 = vld [vmem:[#allocation131_spill] sm:$0xff]  ;;  %v11337_v13 = vld [vmem:[#allocation2 + $0x530] sm:$0xff] }
 0x2ba   :  { %v2742_v18 = vsel %vm1312_vm7, %v11116_v34, %v2741_v30  ;;  %v3915_v33 = vsel %vm3906_vm11, %v3886_v37, %v15516_v50  ;;  %v15518_v57 = vperm.slane %v10401_v2, 0  ;;  %v2889_v40 = vperm.slane %v6267_v15, 1  ;;  %v15520_v30 = vld [vmem:[#allocation94_spill] sm:$0xff] }
 0x2bb   :  { %v2743_v62 = vsel %vm1314_vm8, %v11120_v22, %v2742_v18  ;;  %4155 = vmatmul.f32.gmra.mxu0 %v3915_v33  ;;  %v3467_v46 = vsel %vm1306_vm4, %v15517_v6, %v3466_v45  ;;  %v15521_v26 = vrot.slane %v15520_v30, 2  ;;  %v15522_v33 = vrot.slane %v15520_v30, 4 }
 0x2bc   :  { %v3474_v37 = vsel %vm1306_vm4, %v15518_v57, %v3473_v16  ;;  %v6166_v12 = vpack.i.bf16 %v2743_v62, %v15519_v61  ;;  %v3468_v38 = vsel %vm1308_vm5, %v10279_v14, %v3467_v46  ;;  %v15523_v16 = vrot.slane %v15520_v30, 6  ;;  %v15524_v14 = vld [vmem:[#allocation73_spill] sm:$0xff]  ;;  %v15525_v62 = vld [vmem:[#allocation126_spill] sm:$0xff] }
 0x2bd   :  { %v3475_v1 = vsel %vm1308_vm5, %v10466_v24, %v3474_v37  ;;  %v2890_v52 = vperm.slane %v15521_v26, 1  ;;  %v3469_v18 = vsel %vm1310_vm6, %v10286_v51, %v3468_v38  ;;  %v2891_v45 = vperm.slane %v15522_v33, 1  ;;  %v6268_v46 = vld [vmem:[#allocation2 + $0x110] sm:$0xff]  ;;  %v15526_v51 = vld [vmem:[#allocation95_spill] sm:$0xff] }
 0x2be   :  { %v3476_v50 = vsel %vm1310_vm6, %v10470_v48, %v3475_v1  ;;  %v2892_v10 = vperm.slane %v15523_v16, 1  ;;  %6167 = vrot.lane.b32.xlu2 %v6166_v12, %s6351_s10  ;;  %v3470_v24 = vsel %vm1312_vm7, %v15524_v14, %v3469_v18  ;;  %v2893_v57 = vperm.slane %v6268_v46, 1  ;;  %v11194_v48 = vld [vmem:[#allocation2 + $0x4f8] sm:$0xff]  ;;  %v11202_v18 = vld [vmem:[#allocation2 + $0x500] sm:$0xff] }
 0x2bf   :  { %v3477_v6 = vsel %vm1312_vm7, %v15525_v62, %v3476_v50  ;;  %v15527_v37 = vrot.slane %v15526_v51, 2  ;;  %15528 = vst [vmem:[#allocation90_spill] sm:$0xff] %v11194_v48  ;;  %v3471_v61 = vsel %vm1314_vm8, %v3317_v59, %v3470_v24  ;;  %v15529_v1 = vrot.slane %v15526_v51, 4  ;;  %v6269_v16 = vld [vmem:[#allocation2 + $0x420] sm:$0xff]  ;;  %v6270_v62 = vld [vmem:[#allocation2 + $0x450] sm:$0xff] }
 0x2c0   :  { %v3478_v38 = vsel %vm1314_vm8, %v3318_v55, %v3477_v6  ;;  %v15530_v30 = vrot.slane %v15526_v51, 6  ;;  %v3108_v33 = vsel %vm1302_vm2, %v2890_v52, %v2889_v40  ;;  %v1246_v14 = vperm.slane %v6269_v16, 0  ;;  %v15531_v51 = vld [vmem:[#allocation49_spill] sm:$0xff]  ;;  %v15532_v40 = vld [vmem:[#allocation96_spill] sm:$0xff] }
 0x2c1   :  { %v2894_v15 = vperm.slane %v15527_v37, 1  ;;  %v2895_v12 = vperm.slane %v15529_v1, 1  ;;  %v6216_v50 = vpack.i.bf16 %v3478_v38, %v3471_v61  ;;  %v1254_v46 = vperm.slane %v6270_v62, 0  ;;  %v15533_v1 = vld [vmem:[#allocation67_spill] sm:$0xff]  ;;  %v15535_v62 = vld [vmem:[#allocation33_spill] sm:$0xff] }
 0x2c2   :  { %v2896_v26 = vperm.slane %v15530_v30, 1  ;;  %v3109_v37 = vsel %vm1304_vm3, %v2891_v45, %v3108_v33  ;;  %v14748_v59 = vrot.slane %v11194_v48, 2  ;;  %v14746_v55 = vrot.slane %v11194_v48, 4  ;;  %v15534_v33 = vld [vmem:[#allocation35_spill] sm:$0xff] }
 0x2c3   :  { %v14745_v24 = vrot.slane %v11194_v48, 6  ;;  %6217 = vrot.lane.b32.xlu0 %v6216_v50, %s6350_s26  ;;  %v3110_v6 = vsel %vm1306_vm4, %v2892_v10, %v3109_v37  ;;  %v1456_v61 = vsel %vm1302_vm2, %v15531_v51, %v1246_v14  ;;  %v1463_v52 = vsel %vm1302_vm2, %v15532_v40, %v1254_v46  ;;  %v15536_v37 = vld [vmem:[#allocation31_spill] sm:$0xff] }
 0x2c4   :  { %v14744_v38 = vrot.slane %v11202_v18, 2  ;;  %v3111_v45 = vsel %vm1308_vm5, %v2893_v57, %v3110_v6  ;;  %v1457_v30 = vsel %vm1304_vm3, %v15533_v1, %v1456_v61  ;;  %v1464_v16 = vsel %vm1304_vm3, %v15534_v33, %v1463_v52  ;;  %v15537_v6 = vld [vmem:[#allocation75_spill] sm:$0xff]  ;;  %v15539_v1 = vld [vmem:[#allocation152_spill] sm:$0xff] }
 0x2c5   :  { %v14747_v50 = vrot.slane %v11202_v18, 4  ;;  %v3112_v10 = vsel %vm1310_vm6, %v2894_v15, %v3111_v45  ;;  %v1458_v14 = vsel %vm1306_vm4, %v15535_v62, %v1457_v30  ;;  %v1465_v46 = vsel %vm1306_vm4, %v15536_v37, %v1464_v16  ;;  %v15541_v30 = vld [vmem:[#allocation112_spill] sm:$0xff]  ;;  %v15542_v16 = vld [vmem:[#allocation153_spill] sm:$0xff] }
 0x2c6   :  { %v14750_v51 = vrot.slane %v11202_v18, 6  ;;  %v3113_v57 = vsel %vm1312_vm7, %v2895_v12, %v3112_v10  ;;  %v15538_v40 = vperm.slane %v15537_v6, 0  ;;  %v15540_v52 = vperm.slane %v15539_v1, 0  ;;  %v15544_v6 = vld [vmem:[#allocation154_spill] sm:$0xff]  ;;  %v15546_v1 = vld [vmem:[#allocation115_spill] sm:$0xff] }
 0x2c7   :  { %v2545_v15 = vperm.slane %v11194_v48, 0  ;;  %v3114_v45 = vsel %vm1314_vm8, %v2896_v26, %v3113_v57  ;;  %v11243_v12 = vperm.slane %v14748_v59, 0  ;;  %v11254_v57 = vperm.slane %v14746_v55, 0  ;;  %v15553_v55 = vld [vmem:[#allocation87_spill] sm:$0xff] }
 0x2c8   :  { %v1459_v61 = vsel %vm1308_vm5, %v15538_v40, %v1458_v14  ;;  %v1466_v33 = vsel %vm1308_vm5, %v15540_v52, %v1465_v46  ;;  %v3940_v10 = vsel %vm21_vm0, %v3114_v45, %v5994_v56  ;;  %v15543_v14 = vld [vmem:[#allocation114_spill] sm:$0xff]  ;;  %v15545_v40 = vunpack.i.l.bf16 %v11099_v27 }
 0x2c9   :  { %v1460_v62 = vsel %vm1310_vm6, %v15541_v30, %v1459_v61  ;;  %v1467_v37 = vsel %vm1310_vm6, %v15542_v16, %v1466_v33  ;;  %v15548_v33 = vld [vmem:[#allocation156_spill] sm:$0xff]  ;;  %v11269_v45 = vperm.slane %v14745_v24, 0  ;;  %v15554_v59 = vunpack.i.h.bf16 %v10271_v32  ;;  %v15561_v30 = vld [vmem:[#allocation107_spill] sm:$0xff] }
 0x2ca   :  { %v1461_v46 = vsel %vm1312_vm7, %v15543_v14, %v1460_v62  ;;  %v1468_v26 = vsel %vm1312_vm7, %v15544_v6, %v1467_v37  ;;  %v3968_v61 = vsel %vm3877_vm10, %v3940_v10, %v15545_v40  ;;  %v15550_v62 = vunpack.i.l.bf16 %v11101_v20  ;;  %v11278_v14 = vpop.permute.xlu0 %6007 }
 0x2cb   :  { %v11261_v52 = vsel %vm1314_vm8, %v15546_v1, %v1461_v46  ;;  %v11265_v56 = vsel %vm1314_vm8, %v15548_v33, %v1468_v26  ;;  %v14751_v10 = vperm.slane %v11202_v18, 0  ;;  %v11284_v26 = vperm.slane %v14744_v38, 0  ;;  %v11299_v38 = vpop.permute.xlu1 %6012  ;;  %v15555_v1 = vld [vmem:[#allocation103_spill] sm:$0xff]  ;;  %v11320_v46 = vld [vmem:[#allocation2 + $0x528] sm:$0xff] }
 0x2cc   :  { %15547 = vst [vmem:[#allocation66_spill] sm:$0xff] %v11261_v52  ;;  %v3996_v16 = vsel %vm3906_vm11, %v3968_v61, %v15550_v62  ;;  %v6221_v37 = vpack.i.bf16 %v11265_v56, %v11261_v52  ;;  %v2744_v40 = vsel %vm1302_vm2, %v11243_v12, %v2545_v15  ;;  %v15551_v61 = vld [vmem:[#allocation50_spill] sm:$0xff]  ;;  %v11295_v62 = vperm.slane %v14747_v50, 0 }
 0x2cd   :  { %15549 = vst [vmem:[#allocation93_spill] sm:$0xff] %v11265_v56  ;;  %4247 = vmatmul.f32.gmra.mxu1 %v3996_v16  ;;  %3791 = vrot.lane.b32.xlu0 %v15551_v61, %s6351_s10  ;;  %v2745_v16 = vsel %vm1304_vm3, %v11254_v57, %v2744_v40  ;;  %v11303_v15 = vperm.slane %v14750_v51, 0  ;;  %v6009_v24 = vunpack.i.l.bf16 %v11278_v14  ;;  %v6271_v51 = vld [vmem:[#allocation2 + $0x138] sm:$0xff]  ;;  %v15556_v6 = vrot.slane %v15555_v1, 2  ;;  %v11349_v56 = vpop.permute.xlu2 %6017 }
 0x2ce   :  { %6222 = vrot.lane.b32.xlu1 %v6221_v37, %s6352_s11  ;;  %v2746_v61 = vsel %vm1306_vm4, %v11269_v45, %v2745_v16  ;;  %v15552_v37 = vunpack.i.h.bf16 %v10261_v43  ;;  %v2897_v33 = vperm.slane %v6271_v51, 1  ;;  %15557 = vst [vmem:[#allocation46_spill] sm:$0xff] %v11320_v46  ;;  %v15560_v32 = vrot.slane %v15555_v1, 6  ;;  %v6272_v51 = vld [vmem:[#allocation2 + $0x140] sm:$0xff] }
 0x2cf   :  { %v2747_v40 = vsel %vm1308_vm5, %v14751_v10, %v2746_v61  ;;  %v2898_v16 = vperm.slane %v15556_v6, 1  ;;  %v15559_v61 = vrot.slane %v15555_v1, 4  ;;  %v2901_v6 = vperm.slane %v6272_v51, 1 }
 0x2d0   :  { %v3858_v50 = vsel %vm21_vm0, %v15553_v55, %v15552_v37  ;;  %v2748_v43 = vsel %vm1310_vm6, %v11284_v26, %v2747_v40  ;;  %v15558_v55 = vunpack.i.h.bf16 %v10273_v7  ;;  %v15562_v48 = vrot.slane %v15561_v30, 2 }
 0x2d1   :  { %v3887_v42 = vsel %vm3877_vm10, %v3858_v50, %v15554_v59  ;;  %v2899_v10 = vperm.slane %v15559_v61, 1  ;;  %v2900_v59 = vperm.slane %v15560_v32, 1  ;;  %v2749_v50 = vsel %vm1312_vm7, %v11295_v62, %v2748_v43 }
 0x2d2   :  { %v3916_v37 = vsel %vm3906_vm11, %v3887_v42, %v15558_v55  ;;  %v2902_v2 = vperm.slane %v15562_v48, 1  ;;  %v15563_v40 = vrot.slane %v15561_v30, 4  ;;  %v2750_v42 = vsel %vm1314_vm8, %v11303_v15, %v2749_v50 }
 0x2d3   :  { %4158 = vmatmul.f32.gmra.mxu0 %v3916_v37  ;;  %v15564_v1 = vrot.slane %v15561_v30, 6  ;;  %v3115_v61 = vsel %vm1302_vm2, %v2898_v16, %v2897_v33  ;;  %v14761_v43 = vrot.slane %v11320_v46, 2  ;;  %v15565_v37 = vld [vmem:[#allocation134_spill] sm:$0xff]  ;;  %v14760_v48 = vrot.slane %v11320_v46, 4  ;;  %v15566_v16 = vld [vmem:[#allocation27_spill] sm:$0xff] }
 0x2d4   :  { %v2903_v7 = vperm.slane %v15563_v40, 1  ;;  %v6181_v32 = vpack.i.bf16 %v2750_v42, %v15565_v37  ;;  %v3116_v51 = vsel %vm1304_vm3, %v2899_v10, %v3115_v61  ;;  %v14762_v40 = vrot.slane %v11320_v46, 6 }
 0x2d5   :  { %v2904_v55 = vperm.slane %v15564_v1, 1  ;;  %v3117_v52 = vsel %vm1306_vm4, %v2900_v59, %v3116_v51  ;;  %v14763_v50 = vrot.slane %v11337_v13, 2  ;;  %v14766_v30 = vrot.slane %v11337_v13, 4  ;;  %3793 = vrot.lane.b32.xlu0 %v15566_v16, %s6351_s10 }
 0x2d6   :  { %v14768_v33 = vrot.slane %v11337_v13, 6  ;;  %6182 = vrot.lane.b32.xlu2 %v6181_v32, %s6351_s10  ;;  %v3118_v10 = vsel %vm1308_vm5, %v2901_v6, %v3117_v52  ;;  %v2553_v42 = vperm.slane %v11320_v46, 0  ;;  %v11362_v1 = vperm.slane %v14761_v43, 0  ;;  %v11383_v43 = vpop.permute.xlu0 %6022 }
 0x2d7   :  { %v11366_v59 = vperm.slane %v14760_v48, 0  ;;  %v6014_v61 = vunpack.i.l.bf16 %v11299_v38  ;;  %v3119_v37 = vsel %vm1310_vm6, %v2902_v2, %v3118_v10  ;;  %v11372_v51 = vperm.slane %v14762_v40, 0  ;;  %v11385_v2 = vpop.permute.xlu1 %6027 }
 0x2d8   :  { %v6019_v6 = vunpack.i.l.bf16 %v11349_v56  ;;  %v3120_v32 = vsel %vm1312_vm7, %v2903_v7, %v3119_v37  ;;  %v11379_v16 = vperm.slane %v14763_v50, 0  ;;  %v2751_v48 = vsel %vm1302_vm2, %v11362_v1, %v2553_v42  ;;  %v522_v37 = vld [vmem:[#allocation2 + $0x478] sm:$0x3]  ;;  %v15572_v50 = vld [vmem:[#allocation105_spill] sm:$0xff] }
 0x2d9   :  { %v3121_v40 = vsel %vm1314_vm8, %v2904_v55, %v3120_v32  ;;  %v11391_v52 = vperm.slane %v14766_v30, 0  ;;  %v2752_v7 = vsel %vm1304_vm3, %v11366_v59, %v2751_v48  ;;  %v11399_v46 = vperm.slane %v14768_v33, 0  ;;  %v528_v55 = vld [vmem:[#allocation2 + $0x4a8] sm:$0x3] }
 0x2da   :  { %v3941_v42 = vsel %vm21_vm0, %v3121_v40, %v6009_v24  ;;  %v2753_v10 = vsel %vm1306_vm4, %v11372_v51, %v2752_v7  ;;  %v15568_v30 = vperm.slane %v11337_v13, 0  ;;  %v15569_v33 = vunpack.i.h.bf16 %v10491_v17 }
 0x2db   :  { %15567 = vst [vmem:[#allocation120_spill] sm:$0xff] %v11399_v46  ;;  %v3969_v32 = vsel %vm3877_vm10, %v3941_v42, %v6014_v61  ;;  %v3319_v21 = vperm.slane %v522_v37, 0  ;;  %v3320_v42 = vperm.slane %v528_v55, 0 }
 0x2dc   :  { %v2754_v29 = vsel %vm1308_vm5, %v15568_v30, %v2753_v10  ;;  %v3997_v24 = vsel %vm3906_vm11, %v3969_v32, %v6019_v6  ;;  %v3859_v7 = vsel %vm21_vm0, %v15570_v53, %v15569_v33  ;;  %v15571_v30 = vunpack.i.h.bf16 %v10500_v58  ;;  %v15573_v6 = vld [vmem:[#allocation101_spill] sm:$0xff]  ;;  %v15575_v33 = vld [vmem:[#allocation132_spill] sm:$0xff] }
 0x2dd   :  { %v2755_v40 = vsel %vm1310_vm6, %v11379_v16, %v2754_v29  ;;  %4250 = vmatmul.f32.gmra.mxu1 %v3997_v24  ;;  %v3479_v32 = vsel %vm1302_vm2, %v15573_v6, %v15572_v50  ;;  %v15574_v29 = vunpack.i.h.bf16 %v10502_v23  ;;  %v3486_v58 = vsel %vm1302_vm2, %v10887_v35, %v10877_v25  ;;  %v15576_v24 = vld [vmem:[#allocation144_spill] sm:$0xff]  ;;  %v15579_v6 = vld [vmem:[#allocation133_spill] sm:$0xff] }
 0x2de   :  { %v2756_v61 = vsel %vm1312_vm7, %v11391_v52, %v2755_v40  ;;  %v3888_v10 = vsel %vm3877_vm10, %v3859_v7, %v15571_v30  ;;  %v3480_v37 = vsel %vm1304_vm3, %v15575_v33, %v3479_v32  ;;  %v11435_v40 = vpop.permute.xlu2 %6032  ;;  %v15577_v50 = vld [vmem:[#allocation76_spill] sm:$0xff]  ;;  %v3487_v23 = vsel %vm1304_vm3, %v10891_v49, %v3486_v58 }
 0x2df   :  { %v2757_v17 = vsel %vm1314_vm8, %v11399_v46, %v2756_v61  ;;  %v3917_v53 = vsel %vm3906_vm11, %v3888_v10, %v15574_v29  ;;  %v15578_v7 = vperm.slane %v15577_v50, 0  ;;  %v6273_v30 = vld [vmem:[#allocation2 + $0x168] sm:$0xff]  ;;  %v15580_v29 = vperm.slane %v10829_v28, 0 }
 0x2e0   :  { %v6196_v55 = vpack.i.bf16 %v2757_v17, %v15576_v24  ;;  %4161 = vmatmul.f32.gmra.mxu0 %v3917_v53  ;;  %v2905_v10 = vperm.slane %v6273_v30, 1  ;;  %v15581_v35 = vld [vmem:[#allocation108_spill] sm:$0xff]  ;;  %v6274_v30 = vld [vmem:[#allocation2 + $0x170] sm:$0xff] }
 0x2e1   :  { %v3481_v61 = vsel %vm1306_vm4, %v15578_v7, %v3480_v37  ;;  %v3488_v25 = vsel %vm1306_vm4, %v15580_v29, %v3487_v23  ;;  %v15582_v17 = vrot.slane %v15581_v35, 2  ;;  %v15583_v53 = vrot.slane %v15581_v35, 4  ;;  %v15584_v37 = vld [vmem:[#allocation135_spill] sm:$0xff]  ;;  %v11458_v23 = vld [vmem:[#allocation2 + $0x558] sm:$0xff]  ;;  %v15587_v29 = vld [vmem:[#allocation160_spill] sm:$0xff] }
 0x2e2   :  { %v3482_v32 = vsel %vm1308_vm5, %v15579_v6, %v3481_v61  ;;  %6197 = vrot.lane.b32.xlu2 %v6196_v55, %s6351_s10  ;;  %v3489_v58 = vsel %vm1308_vm5, %v10910_v31, %v3488_v25  ;;  %v15585_v7 = vrot.slane %v15581_v35, 6  ;;  %v2909_v6 = vperm.slane %v6274_v30, 1  ;;  %15586 = vst [vmem:[#allocation40_spill] sm:$0xff] %v11458_v23  ;;  %v15588_v55 = vld [vmem:[#allocation109_spill] sm:$0xff]  ;;  %v11468_v31 = vld [vmem:[#allocation2 + $0x560] sm:$0xff]  ;;  %v15592_v35 = vld [vmem:[#allocation78_spill] sm:$0xff] }
 0x2e3   :  { %v2906_v33 = vperm.slane %v15582_v17, 1  ;;  %v2907_v24 = vperm.slane %v15583_v53, 1  ;;  %v3483_v49 = vsel %vm1310_vm6, %v15584_v37, %v3482_v32  ;;  %v3490_v53 = vsel %vm1310_vm6, %v10914_v36, %v3489_v58  ;;  %15591 = vst [vmem:[#allocation25_spill] sm:$0xff] %v11468_v31 }
 0x2e4   :  { %v2908_v61 = vperm.slane %v15585_v7, 1  ;;  %v3484_v17 = vsel %vm1312_vm7, %v15587_v29, %v3483_v49  ;;  %v15589_v48 = vrot.slane %v15588_v55, 2  ;;  %v15590_v32 = vrot.slane %v15588_v55, 4 }
 0x2e5   :  { %v3485_v25 = vsel %vm1314_vm8, %v3319_v21, %v3484_v17  ;;  %v3491_v7 = vsel %vm1312_vm7, %v15592_v35, %v3490_v53  ;;  %v15593_v30 = vrot.slane %v15588_v55, 6  ;;  %v3122_v49 = vsel %vm1302_vm2, %v2906_v33, %v2905_v10  ;;  %v11483_v53 = vpop.permute.xlu0 %6037 }
 0x2e6   :  { %v2910_v28 = vperm.slane %v15589_v48, 1  ;;  %v2911_v37 = vperm.slane %v15590_v32, 1  ;;  %v3492_v36 = vsel %vm1314_vm8, %v3320_v42, %v3491_v7  ;;  %v3123_v58 = vsel %vm1304_vm3, %v2907_v24, %v3122_v49  ;;  %v11489_v24 = vpop.permute.xlu1 %6042 }
 0x2e7   :  { %v2912_v50 = vperm.slane %v15593_v30, 1  ;;  %v14777_v48 = vrot.slane %v11458_v23, 2  ;;  %v14775_v29 = vrot.slane %v11458_v23, 4  ;;  %v6226_v32 = vpack.i.bf16 %v3492_v36, %v3485_v25 }
 0x2e8   :  { %v3124_v46 = vsel %vm1306_vm4, %v2908_v61, %v3123_v58  ;;  %v14774_v21 = vrot.slane %v11458_v23, 6  ;;  %v14776_v17 = vrot.slane %v11468_v31, 2  ;;  %v14778_v10 = vrot.slane %v11468_v31, 4 }
 0x2e9   :  { %v3125_v55 = vsel %vm1308_vm5, %v2909_v6, %v3124_v46  ;;  %v14779_v42 = vrot.slane %v11468_v31, 6  ;;  %v2561_v33 = vperm.slane %v11458_v23, 0  ;;  %6227 = vrot.lane.b32.xlu1 %v6226_v32, %s6350_s26  ;;  %v11495_v25 = vperm.slane %v14777_v48, 0 }
 0x2ea   :  { %v3126_v61 = vsel %vm1310_vm6, %v2910_v28, %v3125_v55  ;;  %v11499_v35 = vperm.slane %v14775_v29, 0  ;;  %v11503_v46 = vperm.slane %v14774_v21, 0  ;;  %v6034_v7 = vunpack.i.l.bf16 %v11435_v40  ;;  %v11517_v55 = vpop.permute.xlu2 %6047  ;;  %v15602_v21 = vld [vmem:[#allocation137_spill] sm:$0xff] }
 0x2eb   :  { %v3127_v30 = vsel %vm1312_vm7, %v2911_v37, %v3126_v61  ;;  %v14780_v28 = vperm.slane %v11468_v31, 0  ;;  %v11513_v58 = vperm.slane %v14776_v17, 0  ;;  %v2758_v32 = vsel %vm1302_vm2, %v11495_v25, %v2561_v33 }
 0x2ec   :  { %15594 = vst [vmem:[#allocation51_spill] sm:$0xff] %v11499_v35  ;;  %v3128_v36 = vsel %vm1314_vm8, %v2912_v50, %v3127_v30  ;;  %v15597_v29 = vunpack.i.l.bf16 %v11383_v43  ;;  %v11525_v61 = vperm.slane %v14778_v10, 0  ;;  %v2759_v50 = vsel %vm1304_vm3, %v11499_v35, %v2758_v32 }
 0x2ed   :  { %15595 = vst [vmem:[#allocation19_spill] sm:$0xff] %v11503_v46  ;;  %v15599_v17 = vunpack.i.l.bf16 %v11385_v2  ;;  %v11535_v48 = vperm.slane %v14779_v42, 0  ;;  %v15601_v30 = vunpack.i.h.bf16 %v10687_v60  ;;  %v15603_v42 = vunpack.i.h.bf16 %v10689_v44 }
 0x2ee   :  { %15596 = vst [vmem:[#allocation14_spill] sm:$0xff] %v11513_v58  ;;  %v3942_v37 = vsel %vm21_vm0, %v3128_v36, %v15597_v29  ;;  %v2760_v29 = vsel %vm1306_vm4, %v11503_v46, %v2759_v50  ;;  %v6275_v36 = vld [vmem:[#allocation2 + $0x198] sm:$0xff]  ;;  %v15606_v60 = vunpack.i.h.bf16 %v10696_v54  ;;  %v15609_v54 = vld [vmem:[#allocation15_spill] sm:$0xff] }
 0x2ef   :  { %15598 = vst [vmem:[#allocation17_spill] sm:$0xff] %v11525_v61  ;;  %v3970_v33 = vsel %vm3877_vm10, %v3942_v37, %v15599_v17  ;;  %v2761_v32 = vsel %vm1308_vm5, %v14780_v28, %v2760_v29  ;;  %v3860_v17 = vsel %vm21_vm0, %v15602_v21, %v15601_v30  ;;  %v2913_v49 = vperm.slane %v6275_v36, 1  ;;  %v11568_v28 = vpop.permute.xlu0 %6052  ;;  %v15615_v46 = vld [vmem:[#allocation18_spill] sm:$0xff] }
 0x2f0   :  { %15600 = vst [vmem:[#allocation6_spill] sm:$0xff] %v11535_v48  ;;  %v3998_v10 = vsel %vm3906_vm11, %v3970_v33, %v6034_v7  ;;  %v2762_v37 = vsel %vm1310_vm6, %v11513_v58, %v2761_v32  ;;  %v3889_v50 = vsel %vm3877_vm10, %v3860_v17, %v15603_v42  ;;  %v15604_v7 = vld [vmem:[#allocation8_spill] sm:$0xff]  ;;  %v6039_v17 = vunpack.i.l.bf16 %v11483_v53  ;;  %v11574_v42 = vpop.permute.xlu1 %6057 }
 0x2f1   :  { %4253 = vmatmul.f32.gmra.mxu1 %v3998_v10  ;;  %v15605_v33 = vrot.slane %v15604_v7, 2  ;;  %v2763_v29 = vsel %vm1312_vm7, %v11525_v61, %v2762_v37  ;;  %v3918_v21 = vsel %vm3906_vm11, %v3889_v50, %v15606_v60  ;;  %v15607_v10 = vrot.slane %v15604_v7, 4  ;;  %v15610_v60 = vld [vmem:[#allocation11_spill] sm:$0xff] }
 0x2f2   :  { %v15608_v32 = vrot.slane %v15604_v7, 6  ;;  %v2764_v36 = vsel %vm1314_vm8, %v11535_v48, %v2763_v29  ;;  %4164 = vmatmul.f32.gmra.mxu0 %v3918_v21  ;;  %v15611_v23 = vrot.slane %v15610_v60, 2  ;;  %v6044_v29 = vunpack.i.l.bf16 %v11489_v24 }
 0x2f3   :  { %v2914_v6 = vperm.slane %v15605_v33, 1  ;;  %v2915_v30 = vperm.slane %v15607_v10, 1  ;;  %v6276_v33 = vld [vmem:[#allocation2 + $0x1a0] sm:$0xff]  ;;  %v6211_v50 = vpack.i.bf16 %v2764_v36, %v15609_v54  ;;  %v6049_v48 = vunpack.i.l.bf16 %v11517_v55 }
 0x2f4   :  { %v2916_v44 = vperm.slane %v15608_v32, 1  ;;  %v2917_v37 = vperm.slane %v6276_v33, 1  ;;  %v2918_v10 = vperm.slane %v15611_v23, 1  ;;  %v6277_v32 = vld [vmem:[#allocation2 + $0x4b0] sm:$0xff]  ;;  %v15612_v21 = vrot.slane %v15610_v60, 4 }
 0x2f5   :  { %v3129_v7 = vsel %vm1302_vm2, %v2914_v6, %v2913_v49  ;;  %v1270_v61 = vperm.slane %v6277_v32, 0  ;;  %6212 = vrot.lane.b32.xlu2 %v6211_v50, %s6351_s10  ;;  %v15613_v36 = vrot.slane %v15610_v60, 6  ;;  %v15614_v49 = vld [vmem:[#allocation16_spill] sm:$0xff]  ;;  %v15616_v50 = vunpack.i.h.bf16 %v10879_v8  ;;  %v15617_v60 = vld [vmem:[#allocation71_spill] sm:$0xff] }
 0x2f6   :  { %v2919_v33 = vperm.slane %v15612_v21, 1  ;;  %v3130_v58 = vsel %vm1304_vm3, %v2915_v30, %v3129_v7  ;;  %v11592_v30 = vpop.permute.xlu2 %6062 }
 0x2f7   :  { %v2920_v23 = vperm.slane %v15613_v36, 1  ;;  %v3131_v6 = vsel %vm1306_vm4, %v2916_v44, %v3130_v58  ;;  %v1477_v54 = vsel %vm1302_vm2, %v15614_v49, %v1270_v61  ;;  %v3861_v7 = vsel %vm21_vm0, %v15617_v60, %v15616_v50  ;;  %v15618_v44 = vld [vmem:[#allocation37_spill] sm:$0xff]  ;;  %v267_v49 = vld [vmem:[%s14194_s0 + $0x370] sm:$0xff] }
 0x2f8   :  { %v3132_v31 = vsel %vm1308_vm5, %v2917_v37, %v3131_v6  ;;  %v1478_v35 = vsel %vm1304_vm3, %v15615_v46, %v1477_v54  ;;  %v15619_v36 = vunpack.i.h.bf16 %v10893_v19  ;;  %v6278_v6 = vld [vmem:[#allocation2 + $0x1c8] sm:$0xff]  ;;  %v15620_v54 = vld [vmem:[#allocation45_spill] sm:$0xff]  ;;  %380 = vst.msk [vmem:[#allocation2 + $0x571] sm:$0xff] %vm21_vm0, %v267_v49 }
 0x2f9   :  { %v3133_v58 = vsel %vm1310_vm6, %v2918_v10, %v3132_v31  ;;  %v1479_v61 = vsel %vm1306_vm4, %v15618_v44, %v1478_v35  ;;  %v2921_v46 = vperm.slane %v6278_v6, 1  ;;  %v15621_v21 = vperm.slane %v15620_v54, 0  ;;  %v15623_v10 = vld [vmem:[#allocation7_spill] sm:$0xff]  ;;  %v15625_v44 = vld [vmem:[#allocation138_spill] sm:$0xff]  ;;  %v6279_v49 = vld [vmem:[#allocation2 + $0x1d0] sm:$0xff] }
 0x2fa   :  { %v3890_v37 = vsel %vm3877_vm10, %v3861_v7, %v15619_v36  ;;  %v3134_v8 = vsel %vm1312_vm7, %v2919_v33, %v3133_v58  ;;  %v15622_v31 = vunpack.i.h.bf16 %v10895_v39  ;;  %v15624_v19 = vrot.slane %v15623_v10, 2  ;;  %v15627_v39 = vld [vmem:[#allocation38_spill] sm:$0xff] }
 0x2fb   :  { %v1480_v50 = vsel %vm1308_vm5, %v15621_v21, %v1479_v61  ;;  %v3135_v7 = vsel %vm1314_vm8, %v2920_v23, %v3134_v8  ;;  %v6064_v33 = vunpack.i.l.bf16 %v11592_v30  ;;  %v15626_v58 = vrot.slane %v15623_v10, 4  ;;  %v468_v23 = vld [vmem:[#allocation2 + $0x2b0] sm:$0x3] }
 0x2fc   :  { %v3919_v35 = vsel %vm3906_vm11, %v3890_v37, %v15622_v31  ;;  %v2922_v60 = vperm.slane %v15624_v19, 1  ;;  %v1481_v36 = vsel %vm1310_vm6, %v15625_v44, %v1480_v50  ;;  %v3943_v21 = vsel %vm21_vm0, %v3135_v7, %v6039_v17  ;;  %v15629_v50 = vld [vmem:[#allocation159_spill] sm:$0xff]  ;;  %v15631_v44 = vld [vmem:[#allocation42_spill] sm:$0xff] }
 0x2fd   :  { %v2923_v6 = vperm.slane %v15626_v58, 1  ;;  %v1482_v61 = vsel %vm1312_vm7, %v15627_v39, %v1481_v36  ;;  %4167 = vmatmul.f32.gmra.mxu0 %v3919_v35  ;;  %v15628_v37 = vrot.slane %v15623_v10, 6  ;;  %v2925_v31 = vperm.slane %v6279_v49, 1  ;;  %v534_v36 = vld [vmem:[#allocation2 + $0x4d8] sm:$0x3]  ;;  %v268_v35 = vld [vmem:[%s14194_s0 + $0x378] sm:$0xff] }
 0x2fe   :  { %v3971_v8 = vsel %vm3877_vm10, %v3943_v21, %v6044_v29  ;;  %v11631_v19 = vsel %vm1314_vm8, %v15629_v50, %v1482_v61  ;;  %v15632_v58 = vrot.slane %v15631_v44, 2  ;;  %v15633_v17 = vrot.slane %v15631_v44, 4  ;;  %v15635_v61 = vld [vmem:[#allocation68_spill] sm:$0xff]  ;;  %381 = vst.msk [vmem:[#allocation2 + $0x579] sm:$0xff] %vm21_vm0, %v268_v35 }
 0x2ff   :  { %v2924_v54 = vperm.slane %v15628_v37, 1  ;;  %15630 = vst [vmem:[#allocation72_spill] sm:$0xff] %v11631_v19  ;;  %v3999_v10 = vsel %vm3906_vm11, %v3971_v8, %v6049_v48  ;;  %3681 = vrot.lane.b32.xlu1 %v11631_v19, %s6352_s11  ;;  %v15634_v29 = vrot.slane %v15631_v44, 6  ;;  %v3136_v39 = vsel %vm1302_vm2, %v2922_v60, %v2921_v46  ;;  %v15636_v37 = vld [vmem:[#allocation82_spill] sm:$0xff]  ;;  %v15637_v50 = vld [vmem:[#allocation32_spill] sm:$0xff]  ;;  %v6280_v44 = vld [vmem:[#allocation2 + $0x4e0] sm:$0xff] }
 0x300   :  { %v2926_v32 = vperm.slane %v15632_v58, 1  ;;  %v2927_v7 = vperm.slane %v15633_v17, 1  ;;  %v3835_v49 = vsel %vm1302_vm2, %v15636_v37, %v15635_v61  ;;  %4256 = vmatmul.f32.gmra.mxu1 %v3999_v10  ;;  %3789 = vrot.lane.b32.xlu2 %v15637_v50, %s6351_s10  ;;  %v3137_v48 = vsel %vm1304_vm3, %v2923_v6, %v3136_v39  ;;  %v15638_v58 = vld [vmem:[#allocation86_spill] sm:$0xff]  ;;  %v15639_v60 = vld [vmem:[#allocation47_spill] sm:$0xff]  ;;  %v15641_v6 = vld [vmem:[#allocation84_spill] sm:$0xff] }
 0x301   :  { %v2928_v21 = vperm.slane %v15634_v29, 1  ;;  %v3833_v8 = vperm.slane %v468_v23, 0  ;;  %v3836_v17 = vsel %vm1304_vm3, %v15638_v58, %v3835_v49  ;;  %v1278_v29 = vperm.slane %v6280_v44, 0  ;;  %v15642_v39 = vld [vmem:[#allocation129_spill] sm:$0xff] }
 0x302   :  { %v3138_v46 = vsel %vm1306_vm4, %v2924_v54, %v3137_v48  ;;  %v15640_v19 = vperm.slane %v15639_v60, 0  ;;  %v3321_v37 = vperm.slane %v534_v36, 0  ;;  %v3493_v35 = vsel %vm1302_vm2, %v11092_v0, %v11085_v3  ;;  %v15643_v48 = vld [vmem:[#allocation91_spill] sm:$0xff]  ;;  %v15644_v36 = vld [vmem:[#allocation130_spill] sm:$0xff] }
 0x303   :  { %v3139_v10 = vsel %vm1308_vm5, %v2925_v31, %v3138_v46  ;;  %v1484_v49 = vsel %vm1302_vm2, %v15642_v39, %v1278_v29  ;;  %v3494_v54 = vsel %vm1304_vm3, %v11096_v9, %v3493_v35  ;;  %v15645_v3 = vperm.slane %v11042_v5, 0  ;;  %v15647_v29 = vld [vmem:[#allocation43_spill] sm:$0xff]  ;;  %v11684_v46 = vpop.permute.xlu0 %6067  ;;  %v15648_v35 = vld [vmem:[#allocation88_spill] sm:$0xff] }
 0x304   :  { %v3837_v61 = vsel %vm1306_vm4, %v15640_v19, %v3836_v17  ;;  %v3140_v50 = vsel %vm1310_vm6, %v2926_v32, %v3139_v10  ;;  %v1485_v58 = vsel %vm1304_vm3, %v15644_v36, %v1484_v49  ;;  %v15646_v17 = vld [vmem:[#allocation97_spill] sm:$0xff]  ;;  %v15649_v10 = vperm.slane %v15648_v35, 0 }
 0x305   :  { %v3838_v23 = vsel %vm1308_vm5, %v15641_v6, %v3837_v61  ;;  %v3495_v0 = vsel %vm1306_vm4, %v15645_v3, %v3494_v54  ;;  %v3141_v31 = vsel %vm1312_vm7, %v2927_v7, %v3140_v50  ;;  %v1486_v9 = vsel %vm1306_vm4, %v15647_v29, %v1485_v58  ;;  %v15656_v29 = vld [vmem:[#allocation52_spill] sm:$0xff] }
 0x306   :  { %v3839_v19 = vsel %vm1310_vm6, %v15643_v48, %v3838_v23  ;;  %v3496_v32 = vsel %vm1308_vm5, %v11108_v4, %v3495_v0  ;;  %v3142_v60 = vsel %vm1314_vm8, %v2928_v21, %v3141_v31  ;;  %v1487_v6 = vsel %vm1308_vm5, %v15649_v10, %v1486_v9  ;;  %v15651_v4 = vld [vmem:[#allocation22_spill] sm:$0xff]  ;;  %v15653_v48 = vld [vmem:[#allocation79_spill] sm:$0xff] }
 0x307   :  { %v3840_v44 = vsel %vm1312_vm7, %v15646_v17, %v3839_v19  ;;  %v3497_v7 = vsel %vm1310_vm6, %v11116_v34, %v3496_v32  ;;  %v6030_v23 = vunpack.i.h.bf16 %v11385_v2  ;;  %v15650_v39 = vunpack.i.l.bf16 %v11568_v28  ;;  %v15654_v31 = vld [vmem:[#allocation74_spill] sm:$0xff]  ;;  %v11717_v17 = vpop.permute.xlu1 %6072  ;;  %v6290_v2 = vld [vmem:[#allocation2 + $0x260] sm:$0xff] }
 0x308   :  { %v3841_v61 = vsel %vm1314_vm8, %v3833_v8, %v3840_v44  ;;  %v1488_v21 = vsel %vm1310_vm6, %v15651_v4, %v1487_v6  ;;  %v3498_v8 = vsel %vm1312_vm7, %v11120_v22, %v3497_v7  ;;  %v6035_v54 = vunpack.i.h.bf16 %v11435_v40  ;;  %v11729_v6 = vpop.permute.xlu2 %6077 }
 0x309   :  { %v3944_v49 = vsel %vm21_vm0, %v3142_v60, %v15650_v39  ;;  %5819 = vmatmul.msk.f32.gmra.mxu2 %vm21_vm0, %v3841_v61  ;;  %v15652_v50 = vunpack.i.l.bf16 %v11574_v42  ;;  %v1489_v19 = vsel %vm1312_vm7, %v15653_v48, %v1488_v21  ;;  %v3499_v36 = vsel %vm1314_vm8, %v3321_v37, %v3498_v8  ;;  %v15657_v60 = vld [vmem:[#allocation113_spill] sm:$0xff]  ;;  %v540_v8 = vld [vmem:[#allocation2 + $0x508] sm:$0x3] }
 0x30a   :  { %v6040_v58 = vunpack.i.h.bf16 %v11483_v53  ;;  %v11714_v22 = vsel %vm1314_vm8, %v15654_v31, %v1489_v19  ;;  %3569 = vrot.lane.b32.xlu0 %v3499_v36, %s6350_s26  ;;  %v15655_v37 = vunpack.i.h.bf16 %v11087_v11  ;;  %v15658_v61 = vrot.slane %v15657_v60, 2  ;;  %v6282_v19 = vld [vmem:[#allocation2 + $0x200] sm:$0xff] }
 0x30b   :  { %v3972_v34 = vsel %vm3877_vm10, %v3944_v49, %v15652_v50  ;;  %3683 = vrot.lane.b32.xlu1 %v11714_v22, %s6352_s11  ;;  %v6069_v10 = vunpack.i.l.bf16 %v11684_v46  ;;  %v15659_v7 = vunpack.i.h.bf16 %v11099_v27  ;;  %v15660_v49 = vrot.slane %v15657_v60, 4 }
 0x30c   :  { %v4000_v0 = vsel %vm3906_vm11, %v3972_v34, %v6064_v33  ;;  %v3862_v9 = vsel %vm21_vm0, %v15656_v29, %v15655_v37  ;;  %v6281_v33 = vld [vmem:[#allocation2 + $0x1f8] sm:$0xff]  ;;  %v2930_v35 = vperm.slane %v15658_v61, 1  ;;  %v15661_v11 = vrot.slane %v15657_v60, 6 }
 0x30d   :  { %4259 = vmatmul.f32.gmra.mxu1 %v4000_v0  ;;  %v2929_v32 = vperm.slane %v6281_v33, 1  ;;  %v3891_v39 = vsel %vm3877_vm10, %v3862_v9, %v15659_v7  ;;  %v2931_v4 = vperm.slane %v15660_v49, 1  ;;  %v6074_v50 = vunpack.i.l.bf16 %v11717_v17  ;;  %v15663_v0 = vld [vmem:[#allocation53_spill] sm:$0xff] }
 0x30e   :  { %v2932_v21 = vperm.slane %v15661_v11, 1  ;;  %v15662_v34 = vunpack.i.h.bf16 %v11101_v20  ;;  %v2933_v36 = vperm.slane %v6282_v19, 1  ;;  %v15664_v31 = vrot.slane %v15663_v0, 2  ;;  %v6283_v33 = vld [vmem:[#allocation2 + $0x510] sm:$0xff] }
 0x30f   :  { %v15665_v37 = vrot.slane %v15663_v0, 4  ;;  %v3143_v9 = vsel %vm1302_vm2, %v2930_v35, %v2929_v32  ;;  %v1286_v60 = vperm.slane %v6283_v33, 0  ;;  %v3500_v61 = vsel %vm1302_vm2, %v11254_v57, %v11243_v12  ;;  %v15668_v32 = vld [vmem:[#allocation122_spill] sm:$0xff]  ;;  %v11763_v57 = vpop.permute.xlu0 %6082  ;;  %v15671_v33 = vld [vmem:[#allocation148_spill] sm:$0xff] }
 0x310   :  { %v3920_v48 = vsel %vm3906_vm11, %v3891_v39, %v15662_v34  ;;  %v2934_v27 = vperm.slane %v15664_v31, 1  ;;  %v15666_v20 = vrot.slane %v15663_v0, 6  ;;  %v3144_v39 = vsel %vm1304_vm3, %v2931_v4, %v3143_v9  ;;  %v6284_v0 = vld [vmem:[#allocation2 + $0x480] sm:$0xff] }
 0x311   :  { %4170 = vmatmul.f32.gmra.mxu0 %v3920_v48  ;;  %v2935_v29 = vperm.slane %v15665_v37, 1  ;;  %v3322_v49 = vperm.slane %v540_v8, 0  ;;  %v3501_v11 = vsel %vm1304_vm3, %v11269_v45, %v3500_v61  ;;  %v3145_v34 = vsel %vm1306_vm4, %v2932_v21, %v3144_v39  ;;  %v15667_v48 = vld [vmem:[#allocation69_spill] sm:$0xff]  ;;  %v15670_v31 = vld [vmem:[#allocation147_spill] sm:$0xff] }
 0x312   :  { %v2936_v7 = vperm.slane %v15666_v20, 1  ;;  %5820 = vmatmul.msk.f32.gmra.mxu2 %vm21_vm0, %v15667_v48  ;;  %v1491_v35 = vsel %vm1302_vm2, %v15668_v32, %v1286_v60  ;;  %v15669_v19 = vperm.slane %v11202_v18, 0  ;;  %v1262_v4 = vperm.slane %v6284_v0, 0  ;;  %v15672_v20 = vld [vmem:[#allocation110_spill] sm:$0xff]  ;;  %v15675_v32 = vld [vmem:[#allocation48_spill] sm:$0xff]  ;;  %v15677_v0 = vld [vmem:[#allocation41_spill] sm:$0xff] }
 0x313   :  { %v6079_v8 = vunpack.i.l.bf16 %v11729_v6  ;;  %v3146_v45 = vsel %vm1308_vm5, %v2933_v36, %v3145_v34  ;;  %v1492_v21 = vsel %vm1304_vm3, %v15670_v31, %v1491_v35  ;;  %v15673_v36 = vld [vmem:[#allocation161_spill] sm:$0xff]  ;;  %v15739_v53 = vunpack.i.h.bf16 %v11517_v55 }
 0x314   :  { %v3502_v12 = vsel %vm1306_vm4, %v15669_v19, %v3501_v11  ;;  %v3147_v9 = vsel %vm1310_vm6, %v2934_v27, %v3146_v45  ;;  %v1493_v60 = vsel %vm1306_vm4, %v15671_v33, %v1492_v21  ;;  %v1470_v39 = vsel %vm1302_vm2, %v15672_v20, %v1262_v4  ;;  %v15676_v19 = vld [vmem:[#allocation80_spill] sm:$0xff]  ;;  %v11792_v4 = vpop.permute.xlu1 %6087  ;;  %v15681_v33 = vld [vmem:[#allocation81_spill] sm:$0xff]  ;;  %v6288_v45 = vld [vmem:[#allocation2 + $0x540] sm:$0xff] }
 0x315   :  { %v3503_v37 = vsel %vm1308_vm5, %v11284_v26, %v3502_v12  ;;  %v3148_v11 = vsel %vm1312_vm7, %v2935_v29, %v3147_v9  ;;  %v15674_v34 = vperm.slane %v15673_v36, 0  ;;  %v1471_v27 = vsel %vm1304_vm3, %v15675_v32, %v1470_v39  ;;  %v15682_v20 = vld [vmem:[#allocation28_spill] sm:$0xff]  ;;  %v11810_v39 = vpop.permute.xlu2 %6092  ;;  %v15683_v36 = vld [vmem:[#allocation30_spill] sm:$0xff]  ;;  %v15684_v32 = vld [vmem:[#allocation157_spill] sm:$0xff] }
 0x316   :  { %v3504_v61 = vsel %vm1310_vm6, %v11295_v62, %v3503_v37  ;;  %v3149_v35 = vsel %vm1314_vm8, %v2936_v7, %v3148_v11  ;;  %v1472_v29 = vsel %vm1306_vm4, %v15677_v0, %v1471_v27  ;;  %v15679_v7 = vld [vmem:[#allocation121_spill] sm:$0xff] }
 0x317   :  { %v1494_v48 = vsel %vm1308_vm5, %v15674_v34, %v1493_v60  ;;  %v3505_v26 = vsel %vm1312_vm7, %v11303_v15, %v3504_v61  ;;  %v3945_v31 = vsel %vm21_vm0, %v3149_v35, %v6069_v10  ;;  %v15678_v15 = vld [vmem:[#allocation150_spill] sm:$0xff]  ;;  %v15680_v37 = vperm.slane %v15679_v7, 0  ;;  %v6286_v35 = vld [vmem:[#allocation2 + $0x228] sm:$0xff] }
 0x318   :  { %v1495_v62 = vsel %vm1310_vm6, %v15676_v19, %v1494_v48  ;;  %v3506_v12 = vsel %vm1314_vm8, %v3322_v49, %v3505_v26  ;;  %v3973_v49 = vsel %vm3877_vm10, %v3945_v31, %v6074_v50  ;;  %v6084_v61 = vunpack.i.l.bf16 %v11763_v57  ;;  %v6285_v48 = vld [vmem:[#allocation2 + $0x2d0] sm:$0xff]  ;;  %v15690_v7 = vld [vmem:[#allocation56_spill] sm:$0xff] }
 0x319   :  { %v1496_v21 = vsel %vm1312_vm7, %v15678_v15, %v1495_v62  ;;  %3571 = vrot.lane.b32.xlu0 %v3506_v12, %s6350_s26  ;;  %v1473_v9 = vsel %vm1308_vm5, %v15680_v37, %v1472_v29  ;;  %v4001_v11 = vsel %vm3906_vm11, %v3973_v49, %v6079_v8  ;;  %v6089_v50 = vunpack.i.l.bf16 %v11792_v4  ;;  %v15685_v62 = vld [vmem:[#allocation117_spill] sm:$0xff]  ;;  %v11828_v15 = vpop.f32.mrf.mxu0 }
 0x31a   :  { %v11805_v60 = vsel %vm1314_vm8, %v15681_v33, %v1496_v21  ;;  %v1474_v10 = vsel %vm1310_vm6, %v15682_v20, %v1473_v9  ;;  %v1190_v26 = vperm.slane %v6285_v48, 0  ;;  %4262 = vmatmul.f32.gmra.mxu1 %v4001_v11  ;;  %v2937_v19 = vperm.slane %v6286_v35, 1  ;;  %v15688_v31 = vld [vmem:[#allocation89_spill] sm:$0xff]  ;;  %15689 = vst [vmem:[#allocation131_spill] sm:$0xff] %v11828_v15 }
 0x31b   :  { %3685 = vrot.lane.b32.xlu1 %v11805_v60, %s6352_s11  ;;  %v1475_v34 = vsel %vm1312_vm7, %v15683_v36, %v1474_v10  ;;  %v15686_v12 = vrot.slane %v15685_v62, 2  ;;  %v15687_v0 = vrot.slane %v15685_v62, 4  ;;  %5821 = vmatmul.msk.f32.gmra.mxu2 %vm21_vm0, %v15688_v31  ;;  %v6094_v21 = vunpack.i.l.bf16 %v11810_v39  ;;  %v6287_v33 = vld [vmem:[#allocation2 + $0x230] sm:$0xff]  ;;  %v546_v10 = vld [vmem:[#allocation2 + $0x538] sm:$0x3]  ;;  %v11844_v31 = vpop.permute.xlu0 %6097 }
 0x31c   :  { %v11820_v27 = vsel %vm1314_vm8, %v15684_v32, %v1475_v34  ;;  %v1407_v37 = vsel %vm1302_vm2, %v15690_v7, %v1190_v26  ;;  %v15691_v9 = vrot.slane %v15685_v62, 6  ;;  %v2941_v20 = vperm.slane %v6287_v33, 1  ;;  %v15692_v11 = vld [vmem:[#allocation57_spill] sm:$0xff]  ;;  %v15693_v34 = vld [vmem:[#allocation59_spill] sm:$0xff]  ;;  %v15696_v26 = vld [vmem:[#allocation58_spill] sm:$0xff] }
 0x31d   :  { %v2938_v8 = vperm.slane %v15686_v12, 1  ;;  %v2939_v29 = vperm.slane %v15687_v0, 1  ;;  %3679 = vrot.lane.b32.xlu2 %v11820_v27, %s6352_s11  ;;  %v1408_v36 = vsel %vm1304_vm3, %v15692_v11, %v1407_v37  ;;  %v15694_v48 = vrot.slane %v15693_v34, 2  ;;  %v15698_v11 = vld [vmem:[#allocation55_spill] sm:$0xff] }
 0x31e   :  { %v2940_v49 = vperm.slane %v15691_v9, 1  ;;  %v15695_v35 = vrot.slane %v15693_v34, 4  ;;  %v1409_v62 = vsel %vm1306_vm4, %v15696_v26, %v1408_v36  ;;  %v15697_v7 = vrot.slane %v15693_v34, 6  ;;  %v11873_v26 = vpop.permute.xlu1 %6102 }
 0x31f   :  { %v2942_v32 = vperm.slane %v15694_v48, 1  ;;  %v3150_v0 = vsel %vm1302_vm2, %v2938_v8, %v2937_v19  ;;  %v1294_v37 = vperm.slane %v6288_v45, 0  ;;  %v15699_v44 = vperm.slane %v15698_v11, 0  ;;  %v15700_v8 = vld [vmem:[#allocation34_spill] sm:$0xff] }
 0x320   :  { %v2943_v12 = vperm.slane %v15695_v35, 1  ;;  %v2944_v9 = vperm.slane %v15697_v7, 1  ;;  %v3151_v33 = vsel %vm1304_vm3, %v2939_v29, %v3150_v0  ;;  %v3323_v3 = vperm.slane %v546_v10, 0  ;;  %v15701_v0 = vld [vmem:[#allocation118_spill] sm:$0xff] }
 0x321   :  { %v1410_v48 = vsel %vm1308_vm5, %v15699_v44, %v1409_v62  ;;  %v3152_v35 = vsel %vm1306_vm4, %v2940_v49, %v3151_v33  ;;  %v3507_v19 = vsel %vm1302_vm2, %v11366_v59, %v11362_v1  ;;  %v1498_v29 = vsel %vm1302_vm2, %v11006_v41, %v1294_v37  ;;  %v15705_v37 = vld [vmem:[#allocation139_spill] sm:$0xff] }
 0x322   :  { %v1411_v36 = vsel %vm1310_vm6, %v15700_v8, %v1410_v48  ;;  %v3153_v34 = vsel %vm1308_vm5, %v2941_v20, %v3152_v35  ;;  %v3508_v45 = vsel %vm1304_vm3, %v11372_v51, %v3507_v19  ;;  %v1499_v10 = vsel %vm1304_vm3, %v11008_v63, %v1498_v29  ;;  %v15703_v20 = vld [vmem:[#allocation119_spill] sm:$0xff]  ;;  %v15707_v19 = vld [vmem:[#allocation98_spill] sm:$0xff]  ;;  %v15709_v8 = vld [vmem:[#allocation141_spill] sm:$0xff] }
 0x323   :  { %v1412_v44 = vsel %vm1312_vm7, %v15701_v0, %v1411_v36  ;;  %v3154_v49 = vsel %vm1310_vm6, %v2942_v32, %v3153_v34  ;;  %v15702_v1 = vperm.slane %v11337_v13, 0  ;;  %v1500_v51 = vsel %vm1306_vm4, %v11015_v47, %v1499_v10  ;;  %5822 = vmatmul.msk.f32.gmra.mxu2 %vm21_vm0, %v15707_v19  ;;  %v15710_v36 = vld [vmem:[#allocation120_spill] sm:$0xff] }
 0x324   :  { %v1413_v41 = vsel %vm1314_vm8, %v15703_v20, %v1412_v44  ;;  %v3155_v62 = vsel %vm1312_vm7, %v2943_v12, %v3154_v49  ;;  %v15704_v7 = vunpack.i.h.bf16 %v11278_v14  ;;  %v15706_v11 = vperm.slane %v15705_v37, 0  ;;  %v11891_v12 = vpop.permute.xlu2 %6107  ;;  %v15711_v29 = vld [vmem:[#allocation116_spill] sm:$0xff]  ;;  %v11912_v49 = vpop.f32.mrf.mxu0 }
 0x325   :  { %v3509_v59 = vsel %vm1306_vm4, %v15702_v1, %v3508_v45  ;;  %v3156_v33 = vsel %vm1314_vm8, %v2944_v9, %v3155_v62  ;;  %v15708_v47 = vunpack.i.h.bf16 %v11299_v38  ;;  %3795 = vrot.lane.b32.xlu2 %v15711_v29, %s6351_s10  ;;  %v15713_v38 = vld [vmem:[#allocation142_spill] sm:$0xff]  ;;  %v6060_v10 = vunpack.i.h.bf16 %v11574_v42  ;;  %v15714_v20 = vld [vmem:[#allocation60_spill] sm:$0xff] }
 0x326   :  { %v3510_v32 = vsel %vm1308_vm5, %v11379_v16, %v3509_v59  ;;  %v3863_v63 = vsel %vm21_vm0, %v1413_v41, %v15704_v7  ;;  %v1501_v48 = vsel %vm1308_vm5, %v15706_v11, %v1500_v51  ;;  %v3946_v16 = vsel %vm21_vm0, %v3156_v33, %v6084_v61  ;;  %v15716_v51 = vld [vmem:[#allocation65_spill] sm:$0xff]  ;;  %v11933_v7 = vpop.permute.xlu0 %6112  ;;  %v6289_v33 = vld [vmem:[#allocation2 + $0x258] sm:$0xff]  ;;  %v15717_v11 = vld [vmem:[#allocation44_spill] sm:$0xff] }
 0x327   :  { %v3511_v35 = vsel %vm1310_vm6, %v11391_v52, %v3510_v32  ;;  %v3892_v14 = vsel %vm3877_vm10, %v3863_v63, %v15708_v47  ;;  %v1502_v9 = vsel %vm1310_vm6, %v15709_v8, %v1501_v48  ;;  %v15712_v52 = vunpack.i.h.bf16 %v11349_v56  ;;  %v11931_v32 = vld [vmem:[#allocation2 + $0x570] sm:$0xff] }
 0x328   :  { %v3512_v34 = vsel %vm1312_vm7, %v15710_v36, %v3511_v35  ;;  %v3974_v0 = vsel %vm3877_vm10, %v3946_v16, %v6089_v50  ;;  %v1503_v44 = vsel %vm1312_vm7, %v15713_v38, %v1502_v9  ;;  %v6065_v1 = vunpack.i.h.bf16 %v11592_v30  ;;  %v15757_v30 = vld [vmem:[#allocation99_spill] sm:$0xff] }
 0x329   :  { %v3921_v45 = vsel %vm3906_vm11, %v3892_v14, %v15712_v52  ;;  %v3513_v61 = vsel %vm1314_vm8, %v3323_v3, %v3512_v34  ;;  %v4002_v59 = vsel %vm3906_vm11, %v3974_v0, %v6094_v21  ;;  %v11919_v56 = vsel %vm1314_vm8, %v15714_v20, %v1503_v44  ;;  %v11961_v20 = vpop.permute.xlu1 %6117 }
 0x32a   :  { %4173 = vmatmul.f32.gmra.mxu0 %v3921_v45  ;;  %3573 = vrot.lane.b32.xlu0 %v3513_v61, %s6350_s26  ;;  %v6070_v50 = vunpack.i.h.bf16 %v11684_v46  ;;  %v6075_v41 = vunpack.i.h.bf16 %v11717_v17  ;;  %v6099_v3 = vunpack.i.l.bf16 %v11844_v31  ;;  %v15715_v62 = vunpack.i.h.bf16 %v11383_v43  ;;  %v11942_v43 = vld [vmem:[#allocation2 + $0x578] sm:$0xff] }
 0x32b   :  { %4265 = vmatmul.f32.gmra.mxu1 %v4002_v59  ;;  %3687 = vrot.lane.b32.xlu1 %v11919_v56, %s6352_s11  ;;  %v2945_v37 = vperm.slane %v6289_v33, 1  ;;  %v15718_v48 = vrot.slane %v15717_v11, 2  ;;  %v15719_v19 = vrot.slane %v15717_v11, 4  ;;  %v15720_v16 = vrot.slane %v15717_v11, 6 }
 0x32c   :  { %v3864_v21 = vsel %vm21_vm0, %v15716_v51, %v15715_v62  ;;  %v2949_v9 = vperm.slane %v6290_v2, 1  ;;  %v14797_v40 = vrot.slane %v11931_v32, 2  ;;  %v14796_v44 = vrot.slane %v11931_v32, 4  ;;  %v15725_v62 = vld [vmem:[#allocation23_spill] sm:$0xff] }
 0x32d   :  { %v3893_v63 = vsel %vm3877_vm10, %v3864_v21, %v6030_v23  ;;  %v2946_v35 = vperm.slane %v15718_v48, 1  ;;  %v2947_v47 = vperm.slane %v15719_v19, 1  ;;  %v2948_v8 = vperm.slane %v15720_v16, 1  ;;  %v15721_v23 = vld [vmem:[#allocation123_spill] sm:$0xff]  ;;  %5823 = vmatmul.msk.f32.gmra.mxu2 %vm21_vm0, %v15725_v62  ;;  %v11986_v16 = vpop.f32.mrf.mxu0 }
 0x32e   :  { %v3922_v14 = vsel %vm3906_vm11, %v3893_v63, %v6035_v54  ;;  %v15722_v36 = vrot.slane %v15721_v23, 2  ;;  %v15723_v29 = vrot.slane %v15721_v23, 4  ;;  %v15724_v45 = vrot.slane %v15721_v23, 6 }
 0x32f   :  { %v3157_v38 = vsel %vm1302_vm2, %v2946_v35, %v2945_v37  ;;  %v14795_v61 = vrot.slane %v11931_v32, 6  ;;  %v14793_v59 = vrot.slane %v11942_v43, 2  ;;  %v14792_v21 = vrot.slane %v11942_v43, 4  ;;  %v15726_v37 = vld [vmem:[#allocation127_spill] sm:$0xff] }
 0x330   :  { %v2950_v34 = vperm.slane %v15722_v36, 1  ;;  %v2951_v52 = vperm.slane %v15723_v29, 1  ;;  %v2952_v0 = vperm.slane %v15724_v45, 1  ;;  %v3158_v54 = vsel %vm1304_vm3, %v2947_v47, %v3157_v38  ;;  %3797 = vrot.lane.b32.xlu2 %v15726_v37, %s6351_s10  ;;  %v11984_v47 = vpop.permute.xlu2 %6122 }
 0x331   :  { %v3159_v51 = vsel %vm1306_vm4, %v2948_v8, %v3158_v54  ;;  %v14791_v63 = vrot.slane %v11942_v43, 6  ;;  %v3613_v33 = vperm.slane %v11931_v32, 0  ;;  %v11974_v48 = vperm.slane %v14797_v40, 0  ;;  %v552_v54 = vld [vmem:[#allocation2 + $0x568] sm:$0x3] }
 0x332   :  { %v3160_v11 = vsel %vm1308_vm5, %v2949_v9, %v3159_v51  ;;  %v11978_v35 = vperm.slane %v14796_v44, 0  ;;  %v11982_v19 = vperm.slane %v14795_v61, 0  ;;  %v6104_v2 = vunpack.i.l.bf16 %v11873_v26  ;;  %4176 = vmatmul.f32.gmra.mxu0 %v3922_v14  ;;  %v15727_v51 = vld [vmem:[#allocation51_spill] sm:$0xff]  ;;  %v15749_v44 = vld [vmem:[#allocation62_spill] sm:$0xff] }
 0x333   :  { %v3161_v9 = vsel %vm1310_vm6, %v2950_v34, %v3160_v11  ;;  %v14794_v23 = vperm.slane %v11942_v43, 0  ;;  %v6109_v36 = vunpack.i.l.bf16 %v11891_v12  ;;  %v11996_v45 = vperm.slane %v14793_v59, 0 }
 0x334   :  { %v3162_v29 = vsel %vm1312_vm7, %v2951_v52, %v3161_v9  ;;  %v3628_v38 = vsel %vm1302_vm2, %v11974_v48, %v3613_v33  ;;  %v12003_v14 = vperm.slane %v14792_v21, 0  ;;  %v3514_v52 = vsel %vm1302_vm2, %v15727_v51, %v11495_v25  ;;  %v15729_v33 = vld [vmem:[#allocation19_spill] sm:$0xff] }
 0x335   :  { %v3163_v62 = vsel %vm1314_vm8, %v2952_v0, %v3162_v29  ;;  %v3629_v34 = vsel %vm1304_vm3, %v11978_v35, %v3628_v38  ;;  %v12013_v11 = vperm.slane %v14791_v63, 0  ;;  %v3515_v9 = vsel %vm1304_vm3, %v15729_v33, %v3514_v52  ;;  %v12019_v29 = vpop.permute.xlu0 %6127  ;;  %v15732_v33 = vld [vmem:[#allocation14_spill] sm:$0xff] }
 0x336   :  { %v3947_v37 = vsel %vm21_vm0, %v3163_v62, %v6099_v3  ;;  %v3630_v0 = vsel %vm1306_vm4, %v11982_v19, %v3629_v34  ;;  %v3324_v51 = vperm.slane %v552_v54, 0  ;;  %v15730_v3 = vld [vmem:[#allocation25_spill] sm:$0xff] }
 0x337   :  { %15728 = vst [vmem:[#allocation94_spill] sm:$0xff] %v12013_v11  ;;  %v3975_v38 = vsel %vm3877_vm10, %v3947_v37, %v6104_v2  ;;  %v3631_v25 = vsel %vm1308_vm5, %v14794_v23, %v3630_v0  ;;  %v15731_v62 = vperm.slane %v15730_v3, 0  ;;  %v15733_v2 = vld [vmem:[#allocation36_spill] sm:$0xff]  ;;  %v12055_v23 = vpop.f32.mrf.mxu0 }
 0x338   :  { %v4003_v34 = vsel %vm3906_vm11, %v3975_v38, %v6109_v36  ;;  %v3632_v52 = vsel %vm1310_vm6, %v11996_v45, %v3631_v25  ;;  %5824 = vmatmul.msk.f32.gmra.mxu2 %vm21_vm0, %v15733_v2  ;;  %v15735_v38 = vld [vmem:[#allocation54_spill] sm:$0xff] }
 0x339   :  { %v3516_v63 = vsel %vm1306_vm4, %v15731_v62, %v3515_v9  ;;  %4268 = vmatmul.f32.gmra.mxu1 %v4003_v34  ;;  %v3633_v0 = vsel %vm1312_vm7, %v12003_v14, %v3632_v52  ;;  %v15734_v9 = vld [vmem:[#allocation17_spill] sm:$0xff]  ;;  %3799 = vrot.lane.b32.xlu2 %v15735_v38, %s6351_s10  ;;  %v15736_v62 = vld [vmem:[#allocation6_spill] sm:$0xff]  ;;  %v12053_v52 = vpop.permute.xlu1 %6132  ;;  %v15738_v38 = vunpack.i.h.bf16 %v11489_v24  ;;  %v12071_v24 = vpop.permute.xlu2 %6137 }
 0x33a   :  { %v3517_v59 = vsel %vm1308_vm5, %v15732_v33, %v3516_v63  ;;  %v3634_v63 = vsel %vm1314_vm8, %v12013_v11, %v3633_v0  ;;  %v15737_v34 = vld [vmem:[#allocation10_spill] sm:$0xff]  ;;  %v6291_v0 = vld [vmem:[#allocation2 + $0x288] sm:$0xff] }
 0x33b   :  { %v3518_v36 = vsel %vm1310_vm6, %v15734_v9, %v3517_v59  ;;  %v3865_v2 = vsel %vm21_vm0, %v15737_v34, %v6040_v58  ;;  %v6231_v59 = vpack.i.bf16 0.0, %v3634_v63  ;;  %v2953_v54 = vperm.slane %v6291_v0, 1  ;;  %v15740_v58 = vld [vmem:[#allocation13_spill] sm:$0xff]  ;;  %v15795_v11 = vld [vmem:[#allocation92_spill] sm:$0xff] }
 0x33c   :  { %v3519_v33 = vsel %vm1312_vm7, %v15736_v62, %v3518_v36  ;;  %v3894_v25 = vsel %vm3877_vm10, %v3865_v2, %v15738_v38  ;;  %v15741_v62 = vrot.slane %v15740_v58, 2  ;;  %v15742_v37 = vrot.slane %v15740_v58, 4  ;;  %v15750_v38 = vld [vmem:[#allocation21_spill] sm:$0xff] }
 0x33d   :  { %v3520_v9 = vsel %vm1314_vm8, %v3324_v51, %v3519_v33  ;;  %v3923_v36 = vsel %vm3906_vm11, %v3894_v25, %v15739_v53  ;;  %v15743_v51 = vrot.slane %v15740_v58, 6  ;;  %6232 = vrot.lane.b32.xlu1 %v6231_v59, %s6352_s11  ;;  %v6292_v25 = vld [vmem:[#allocation2 + $0x290] sm:$0xff]  ;;  %v6114_v0 = vunpack.i.l.bf16 %v11933_v7  ;;  %v12094_v40 = vpop.permute.xlu0 %6142 }
 0x33e   :  { %3575 = vrot.lane.b32.xlu0 %v3520_v9, %s6350_s26  ;;  %v2954_v34 = vperm.slane %v15741_v62, 1  ;;  %v2955_v63 = vperm.slane %v15742_v37, 1  ;;  %4179 = vmatmul.f32.gmra.mxu0 %v3923_v36  ;;  %v2957_v9 = vperm.slane %v6292_v25, 1  ;;  %v15744_v53 = vld [vmem:[#allocation85_spill] sm:$0xff]  ;;  %v6119_v2 = vunpack.i.l.bf16 %v11961_v20 }
 0x33f   :  { %v2956_v33 = vperm.slane %v15743_v51, 1  ;;  %v15745_v58 = vrot.slane %v15744_v53, 2  ;;  %v15746_v59 = vrot.slane %v15744_v53, 4  ;;  %v15747_v25 = vrot.slane %v15744_v53, 6  ;;  %v15751_v53 = vld [vmem:[#allocation128_spill] sm:$0xff] }
 0x340   :  { %v3164_v51 = vsel %vm1302_vm2, %v2954_v34, %v2953_v54  ;;  %v15748_v37 = vunpack.i.h.bf16 %v11568_v28  ;;  %v6293_v54 = vld [vmem:[#allocation2 + $0x2e8] sm:$0xff]  ;;  %5825 = vmatmul.msk.f32.gmra.mxu2 %vm21_vm0, %v15750_v38  ;;  %v15753_v28 = vrot.slane %v15751_v53, 4  ;;  %v15755_v42 = vrot.slane %v15751_v53, 6 }
 0x341   :  { %v2958_v62 = vperm.slane %v15745_v58, 1  ;;  %v2959_v21 = vperm.slane %v15746_v59, 1  ;;  %v3165_v36 = vsel %vm1304_vm3, %v2955_v63, %v3164_v51  ;;  %v2960_v55 = vperm.slane %v15747_v25, 1 }
 0x342   :  { %v3166_v61 = vsel %vm1306_vm4, %v2956_v33, %v3165_v36  ;;  %v3866_v58 = vsel %vm21_vm0, %v15749_v44, %v15748_v37  ;;  %v2961_v34 = vperm.slane %v6293_v54, 1  ;;  %v15752_v33 = vrot.slane %v15751_v53, 2  ;;  %v15754_v44 = vld [vmem:[#allocation24_spill] sm:$0xff]  ;;  %v6294_v54 = vld [vmem:[#allocation2 + $0x2f0] sm:$0xff]  ;;  %v12125_v53 = vpop.permute.xlu1 %6147 }
 0x343   :  { %v3167_v59 = vsel %vm1308_vm5, %v2957_v9, %v3166_v61  ;;  %v3895_v63 = vsel %vm3877_vm10, %v3866_v58, %v6060_v10  ;;  %v2963_v36 = vperm.slane %v15753_v28, 1  ;;  %3801 = vrot.lane.b32.xlu2 %v15754_v44, %s6351_s10  ;;  %v6124_v37 = vunpack.i.l.bf16 %v11984_v47  ;;  %v12118_v28 = vpop.f32.mrf.mxu1 }
 0x344   :  { %v2962_v51 = vperm.slane %v15752_v33, 1  ;;  %v3168_v25 = vsel %vm1310_vm6, %v2958_v62, %v3167_v59  ;;  %v3924_v61 = vsel %vm3906_vm11, %v3895_v63, %v6065_v1  ;;  %v2964_v10 = vperm.slane %v15755_v42, 1  ;;  %15756 = vst [vmem:[#allocation73_spill] sm:$0xff] %v12118_v28  ;;  %v12130_v42 = vpop.f32.mrf.mxu2  ;;  %v15780_v28 = vld [vmem:[#allocation111_spill] sm:$0xff] }
 0x345   :  { %v3169_v38 = vsel %vm1312_vm7, %v2959_v21, %v3168_v25  ;;  %v6129_v58 = vunpack.i.l.bf16 %v12019_v29  ;;  %v2965_v33 = vperm.slane %v6294_v54, 1  ;;  %v15758_v59 = vrot.slane %v15757_v30, 2  ;;  %v12127_v21 = vpop.f32.mrf.mxu0 }
 0x346   :  { %v3170_v44 = vsel %vm1314_vm8, %v2960_v55, %v3169_v38  ;;  %v3171_v63 = vsel %vm1302_vm2, %v2962_v51, %v2961_v34  ;;  %v6134_v54 = vunpack.i.l.bf16 %v12053_v52  ;;  %4182 = vmatmul.f32.gmra.mxu0 %v3924_v61  ;;  %v15759_v55 = vrot.slane %v15757_v30, 4  ;;  %v12146_v61 = vld [vmem:[%s14196_s2] ss:$0 sm:$0xff] }
 0x347   :  { %v2966_v1 = vperm.slane %v15758_v59, 1  ;;  %v3948_v25 = vsel %vm21_vm0, %v3170_v44, %v6114_v0  ;;  %v3172_v62 = vsel %vm1304_vm3, %v2963_v36, %v3171_v63  ;;  %v15760_v51 = vrot.slane %v15757_v30, 6  ;;  %v12141_v0 = vpop.permute.xlu2 %6152  ;;  %v15761_v63 = vld [vmem:[#allocation102_spill] sm:$0xff] }
 0x348   :  { %v2967_v38 = vperm.slane %v15759_v55, 1  ;;  %v3976_v59 = vsel %vm3877_vm10, %v3948_v25, %v6119_v2  ;;  %v3173_v8 = vsel %vm1306_vm4, %v2964_v10, %v3172_v62  ;;  %v6139_v36 = vunpack.i.l.bf16 %v12071_v24  ;;  %v6295_v25 = vld [vmem:[#allocation2 + $0x318] sm:$0xff] }
 0x349   :  { %v2968_v9 = vperm.slane %v15760_v51, 1  ;;  %v4004_v44 = vsel %vm3906_vm11, %v3976_v59, %v6124_v37  ;;  %v3174_v2 = vsel %vm1308_vm5, %v2965_v33, %v3173_v8  ;;  %v3867_v30 = vsel %vm21_vm0, %v15761_v63, %v6070_v50  ;;  %v15762_v51 = vld [vmem:[#allocation64_spill] sm:$0xff]  ;;  %v15764_v34 = vld [vmem:[#allocation146_spill] sm:$0xff]  ;;  %v6296_v63 = vld [vmem:[#allocation2 + $0x320] sm:$0xff] }
 0x34a   :  { %4271 = vmatmul.f32.gmra.mxu1 %v4004_v44  ;;  %v3175_v10 = vsel %vm1310_vm6, %v2966_v1, %v3174_v2  ;;  %v3896_v62 = vsel %vm3877_vm10, %v3867_v30, %v6075_v41  ;;  %v2969_v55 = vperm.slane %v6295_v25, 1  ;;  %v15763_v37 = vrot.slane %v15762_v51, 2  ;;  %5826 = vmatmul.msk.f32.gmra.mxu2 %vm21_vm0, %v15764_v34  ;;  %v15768_v25 = vld [vmem:[#allocation136_spill] sm:$0xff]  ;;  %v15776_v44 = vld [vmem:[#allocation61_spill] sm:$0xff] }
 0x34b   :  { %v12165_v46 = vadd.f32 %v12146_v61, %v11912_v49  ;;  %v3176_v50 = vsel %vm1312_vm7, %v2967_v38, %v3175_v10  ;;  %v15765_v8 = vrot.slane %v15762_v51, 4  ;;  %v15766_v17 = vrot.slane %v15762_v51, 6  ;;  %v12177_v49 = vpop.permute.xlu0 %6157 }
 0x34c   :  { %v2970_v59 = vperm.slane %v15763_v37, 1  ;;  %v3177_v1 = vsel %vm1314_vm8, %v2968_v9, %v3176_v50  ;;  %v15767_v2 = vunpack.i.h.bf16 %v11729_v6  ;;  %v2973_v30 = vperm.slane %v6296_v63, 1 }
 0x34d   :  { %v2971_v33 = vperm.slane %v15765_v8, 1  ;;  %v2972_v41 = vperm.slane %v15766_v17, 1  ;;  %v3949_v38 = vsel %vm21_vm0, %v3177_v1, %v6129_v58  ;;  %v6144_v10 = vunpack.i.l.bf16 %v12094_v40 }
 0x34e   :  { %v3925_v34 = vsel %vm3906_vm11, %v3896_v62, %v15767_v2  ;;  %v15769_v37 = vrot.slane %v15768_v25, 2  ;;  %v3178_v8 = vsel %vm1302_vm2, %v2970_v59, %v2969_v55  ;;  %v3977_v9 = vsel %vm3877_vm10, %v3949_v38, %v6134_v54  ;;  %v12194_v55 = vpop.f32.mrf.mxu1  ;;  %v12197_v59 = vpop.permute.xlu1 %6162 }
 0x34f   :  { %v15770_v6 = vrot.slane %v15768_v25, 4  ;;  %v3179_v17 = vsel %vm1304_vm3, %v2971_v33, %v3178_v8  ;;  %v4005_v2 = vsel %vm3906_vm11, %v3977_v9, %v6139_v36  ;;  %4185 = vmatmul.f32.gmra.mxu0 %v3925_v34  ;;  %v15771_v58 = vrot.slane %v15768_v25, 6  ;;  %v12205_v8 = vpop.f32.mrf.mxu0  ;;  %v12218_v50 = vpop.permute.xlu2 %6167 }
 0x350   :  { %v2974_v51 = vperm.slane %v15769_v37, 1  ;;  %v3180_v63 = vsel %vm1306_vm4, %v2972_v41, %v3179_v17  ;;  %v3727_v37 = vperm.slane %v11931_v32, 1  ;;  %v15772_v38 = vrot.slane %v11931_v32, 2  ;;  %v12207_v41 = vpop.f32.mrf.mxu2 }
 0x351   :  { %v2975_v62 = vperm.slane %v15770_v6, 1  ;;  %v2976_v1 = vperm.slane %v15771_v58, 1  ;;  %v3181_v54 = vsel %vm1308_vm5, %v2973_v30, %v3180_v63  ;;  %v15773_v33 = vrot.slane %v11931_v32, 4 }
 0x352   :  { %v3728_v6 = vperm.slane %v15772_v38, 1  ;;  %v15774_v34 = vrot.slane %v11931_v32, 6  ;;  %v6149_v9 = vunpack.i.l.bf16 %v12125_v53  ;;  %v3182_v30 = vsel %vm1310_vm6, %v2974_v51, %v3181_v54  ;;  %4274 = vmatmul.f32.gmra.mxu1 %v4005_v2  ;;  %5827 = vmatmul.msk.f32.gmra.mxu2 %vm21_vm0, %v15776_v44 }
 0x353   :  { %v3729_v36 = vperm.slane %v15773_v33, 1  ;;  %v3731_v58 = vperm.slane %v11942_v43, 1  ;;  %v6154_v63 = vunpack.i.l.bf16 %v12141_v0  ;;  %v3183_v38 = vsel %vm1312_vm7, %v2975_v62, %v3182_v30 }
 0x354   :  { %v3730_v25 = vperm.slane %v15774_v34, 1  ;;  %v15775_v32 = vrot.slane %v11942_v43, 2  ;;  %v3742_v34 = vsel %vm1302_vm2, %v3728_v6, %v3727_v37  ;;  %v12224_v51 = vadd.f32 %v12146_v61, %v11986_v16 }
 0x355   :  { %v3184_v2 = vsel %vm1314_vm8, %v2976_v1, %v3183_v38  ;;  %v15777_v54 = vrot.slane %v11942_v43, 4  ;;  %v3743_v62 = vsel %vm1304_vm3, %v3729_v36, %v3742_v34  ;;  %v15778_v37 = vrot.slane %v11942_v43, 6  ;;  %v6297_v34 = vld [vmem:[#allocation2 + $0x348] sm:$0xff] }
 0x356   :  { %v3732_v33 = vperm.slane %v15775_v32, 1  ;;  %v3950_v30 = vsel %vm21_vm0, %v3184_v2, %v6144_v10  ;;  %v3744_v32 = vsel %vm1306_vm4, %v3730_v25, %v3743_v62  ;;  %v15779_v44 = vunpack.i.h.bf16 %v11763_v57  ;;  %v15783_v62 = vld [vmem:[#allocation143_spill] sm:$0xff] }
 0x357   :  { %v3733_v17 = vperm.slane %v15777_v54, 1  ;;  %v3734_v6 = vperm.slane %v15778_v37, 1  ;;  %v3978_v15 = vsel %vm3877_vm10, %v3950_v30, %v6149_v9  ;;  %v3745_v1 = vsel %vm1308_vm5, %v3731_v58, %v3744_v32  ;;  %v12250_v9 = vpop.permute.xlu0 %6172 }
 0x358   :  { %v3868_v16 = vsel %vm21_vm0, %v15780_v28, %v15779_v44  ;;  %v15781_v38 = vunpack.i.h.bf16 %v11792_v4  ;;  %v2977_v10 = vperm.slane %v6297_v34, 1  ;;  %v3746_v54 = vsel %vm1310_vm6, %v3732_v33, %v3745_v1 }
 0x359   :  { %v15782_v25 = vunpack.i.h.bf16 %v11810_v39  ;;  %v15784_v28 = vrot.slane %v15783_v62, 2  ;;  %v4006_v58 = vsel %vm3906_vm11, %v3978_v15, %v6154_v63  ;;  %v3747_v4 = vsel %vm1312_vm7, %v3733_v17, %v3746_v54  ;;  %v15787_v17 = vld [vmem:[#allocation145_spill] sm:$0xff] }
 0x35a   :  { %v3897_v36 = vsel %vm3877_vm10, %v3868_v16, %v15781_v38  ;;  %v15785_v30 = vrot.slane %v15783_v62, 4  ;;  %v15786_v44 = vrot.slane %v15783_v62, 6  ;;  %v6159_v39 = vunpack.i.l.bf16 %v12177_v49  ;;  %v6298_v38 = vld [vmem:[#allocation2 + $0x350] sm:$0xff]  ;;  %4277 = vmatmul.f32.gmra.mxu1 %v4006_v58 }
 0x35b   :  { %v3926_v57 = vsel %vm3906_vm11, %v3897_v36, %v15782_v25  ;;  %v2978_v37 = vperm.slane %v15784_v28, 1  ;;  %v3748_v1 = vsel %vm1314_vm8, %v3734_v6, %v3747_v4  ;;  %v2981_v36 = vperm.slane %v6298_v38, 1 }
 0x35c   :  { %4188 = vmatmul.f32.gmra.mxu0 %v3926_v57  ;;  %v2979_v32 = vperm.slane %v15785_v30, 1  ;;  %v2980_v33 = vperm.slane %v15786_v44, 1  ;;  %v6164_v34 = vunpack.i.l.bf16 %v12197_v59  ;;  %3803 = vrot.lane.b32.xlu2 %v3748_v1, %s6351_s10  ;;  %v15788_v63 = vrot.slane %v15787_v17, 2  ;;  %v12267_v57 = vpop.f32.mrf.mxu1  ;;  %v12277_v44 = vpop.permute.xlu1 %6177  ;;  %v15790_v1 = vld [vmem:[#allocation12_spill] sm:$0xff] }
 0x35d   :  { %v3185_v25 = vsel %vm1302_vm2, %v2978_v37, %v2977_v10  ;;  %v6169_v62 = vunpack.i.l.bf16 %v12218_v50  ;;  %v12272_v6 = vadd.f32 %v12146_v61, %v12055_v23  ;;  %v15789_v28 = vrot.slane %v15787_v17, 4  ;;  %5828 = vmatmul.msk.f32.gmra.mxu2 %vm21_vm0, %v15790_v1  ;;  %v12281_v10 = vpop.f32.mrf.mxu0  ;;  %v12283_v37 = vpop.f32.mrf.mxu2 }
 0x35e   :  { %v2982_v54 = vperm.slane %v15788_v63, 1  ;;  %v3186_v30 = vsel %vm1304_vm3, %v2979_v32, %v3185_v25  ;;  %v15791_v58 = vrot.slane %v15787_v17, 6  ;;  %v4237_v63 = vadd.f32 %v12194_v55, %v12165_v46  ;;  %v15793_v32 = vld [vmem:[#allocation124_spill] sm:$0xff]  ;;  %v12295_v1 = vpop.permute.xlu2 %6182  ;;  %v6299_v17 = vld [vmem:[#allocation2 + $0x378] sm:$0xff] }
 0x35f   :  { %v2983_v4 = vperm.slane %v15789_v28, 1  ;;  %v3187_v23 = vsel %vm1306_vm4, %v2980_v33, %v3186_v30  ;;  %v15792_v28 = vunpack.i.h.bf16 %v11844_v31  ;;  %v15794_v16 = vunpack.i.h.bf16 %v11873_v26 }
 0x360   :  { %v2984_v38 = vperm.slane %v15791_v58, 1  ;;  %v3188_v15 = vsel %vm1308_vm5, %v2981_v36, %v3187_v23  ;;  %v2985_v58 = vperm.slane %v6299_v17, 1  ;;  %v15796_v33 = vrot.slane %v15795_v11, 2 }
 0x361   :  { %v3869_v25 = vsel %vm21_vm0, %v15793_v32, %v15792_v28  ;;  %v3189_v46 = vsel %vm1310_vm6, %v2982_v54, %v3188_v15  ;;  %v4338_v31 = vadd.f32 %v12130_v42, %v4237_v63  ;;  %v15797_v55 = vunpack.i.h.bf16 %v11891_v12 }
 0x362   :  { %v3898_v2 = vsel %vm3877_vm10, %v3869_v25, %v15794_v16  ;;  %v2986_v30 = vperm.slane %v15796_v33, 1  ;;  %v15798_v36 = vrot.slane %v15795_v11, 4  ;;  %v3190_v26 = vsel %vm1312_vm7, %v2983_v4, %v3189_v46  ;;  %v15800_v33 = vld [vmem:[#allocation20_spill] sm:$0xff] }
 0x363   :  { %v3927_v28 = vsel %vm3906_vm11, %v3898_v2, %v15797_v55  ;;  %v6174_v32 = vunpack.i.l.bf16 %v12250_v9  ;;  %v15799_v25 = vrot.slane %v15795_v11, 6  ;;  %v3191_v15 = vsel %vm1314_vm8, %v2984_v38, %v3190_v26  ;;  %v6300_v2 = vld [vmem:[#allocation2 + $0x380] sm:$0xff]  ;;  %v12322_v11 = vpop.permute.xlu0 %6187 }
 0x364   :  { %v2987_v23 = vperm.slane %v15798_v36, 1  ;;  %v6179_v12 = vunpack.i.l.bf16 %v12277_v44  ;;  %4191 = vmatmul.f32.gmra.mxu0 %v3927_v28  ;;  %v2989_v54 = vperm.slane %v6300_v2, 1  ;;  %v3951_v63 = vsel %vm21_vm0, %v3191_v15, %v6159_v39 }
 0x365   :  { %v2988_v17 = vperm.slane %v15799_v25, 1  ;;  %v15801_v46 = vrot.slane %v15800_v33, 2  ;;  %v3192_v36 = vsel %vm1302_vm2, %v2986_v30, %v2985_v58  ;;  %v3979_v38 = vsel %vm3877_vm10, %v3951_v63, %v6164_v34  ;;  %v15804_v30 = vld [vmem:[#allocation125_spill] sm:$0xff]  ;;  %v12344_v63 = vpop.f32.mrf.mxu1 }
 0x366   :  { %v12325_v26 = vmax.f32 %v4338_v31, 0.0  ;;  %v15802_v25 = vrot.slane %v15800_v33, 4  ;;  %v3193_v2 = vsel %vm1304_vm3, %v2987_v23, %v3192_v36  ;;  %v4007_v39 = vsel %vm3906_vm11, %v3979_v38, %v6169_v62  ;;  %5829 = vmatmul.msk.f32.gmra.mxu2 %vm21_vm0, %v15804_v30  ;;  %v15806_v36 = vld [vmem:[#allocation66_spill] sm:$0xff]  ;;  %v12357_v30 = vpop.f32.mrf.mxu2 }
 0x367   :  { %v2990_v55 = vperm.slane %v15801_v46, 1  ;;  %v6184_v15 = vunpack.i.l.bf16 %v12295_v1  ;;  %v15803_v4 = vrot.slane %v15800_v33, 6  ;;  %v3194_v58 = vsel %vm1306_vm4, %v2988_v17, %v3193_v2  ;;  %4280 = vmatmul.f32.gmra.mxu1 %v4007_v39  ;;  %v12347_v33 = vpop.permute.xlu1 %6192  ;;  %v15807_v2 = vld [vmem:[#allocation106_spill] sm:$0xff] }
 0x368   :  { %v2991_v28 = vperm.slane %v15802_v25, 1  ;;  %v12339_v34 = vadd.f32 %v12146_v61, %v12127_v21  ;;  %v3195_v31 = vsel %vm1308_vm5, %v2989_v54, %v3194_v58  ;;  %v15805_v17 = vunpack.i.h.bf16 %v11933_v7  ;;  %v6301_v25 = vld [vmem:[#allocation2 + $0x3a8] sm:$0xff]  ;;  %v12355_v58 = vpop.f32.mrf.mxu0 }
 0x369   :  { %v2992_v46 = vperm.slane %v15803_v4, 1  ;;  %v3196_v4 = vsel %vm1310_vm6, %v2990_v55, %v3195_v31  ;;  %v2993_v21 = vperm.slane %v6301_v25, 1  ;;  %v15808_v39 = vrot.slane %v15807_v2, 2 }
 0x36a   :  { %v3870_v38 = vsel %vm21_vm0, %v15806_v36, %v15805_v17  ;;  %v4656_v23 = vperm.slane %v12325_v26, 1  ;;  %v3197_v55 = vsel %vm1312_vm7, %v2991_v28, %v3196_v4  ;;  %v15809_v31 = vunpack.i.h.bf16 %v11961_v20 }
 0x36b   :  { %v2994_v54 = vperm.slane %v15808_v39, 1  ;;  %v15810_v42 = vrot.slane %v15807_v2, 4  ;;  %v3198_v36 = vsel %vm1314_vm8, %v2992_v46, %v3197_v55  ;;  %v12368_v39 = vpop.permute.xlu2 %6197  ;;  %v15811_v16 = vunpack.i.h.bf16 %v11984_v47  ;;  %v6302_v46 = vld [vmem:[#allocation2 + $0x3b0] sm:$0xff]  ;;  %v15813_v47 = vld [vmem:[#allocation83_spill] sm:$0xff] }
 0x36c   :  { %v3899_v7 = vsel %vm3877_vm10, %v3870_v38, %v15809_v31  ;;  %v15812_v3 = vrot.slane %v15807_v2, 6  ;;  %v3952_v20 = vsel %vm21_vm0, %v3198_v36, %v6174_v32  ;;  %v6194_v4 = vunpack.i.l.bf16 %v12347_v33 }
 0x36d   :  { %v2995_v17 = vperm.slane %v15810_v42, 1  ;;  %v3928_v62 = vsel %vm3906_vm11, %v3899_v7, %v15811_v16  ;;  %v4240_v42 = vadd.f32 %v12267_v57, %v12224_v51  ;;  %v2997_v38 = vperm.slane %v6302_v46, 1  ;;  %v15817_v46 = vld [vmem:[#allocation104_spill] sm:$0xff] }
 0x36e   :  { %v2996_v28 = vperm.slane %v15812_v3, 1  ;;  %4194 = vmatmul.f32.gmra.mxu0 %v3928_v62  ;;  %v3980_v55 = vsel %vm3877_vm10, %v3952_v20, %v6179_v12  ;;  %v15814_v25 = vrot.slane %v15813_v47, 2  ;;  %v3199_v2 = vsel %vm1302_vm2, %v2994_v54, %v2993_v21  ;;  %5830 = vmatmul.msk.f32.gmra.mxu2 %vm21_vm0, %v15817_v46  ;;  %v5452_v21 = vld [vmem:[%s14197_s3 + $0x230] sm:$0xff] }
 0x36f   :  { %v4008_v3 = vsel %vm3906_vm11, %v3980_v55, %v6184_v15  ;;  %v6199_v32 = vunpack.i.l.bf16 %v12368_v39  ;;  %v15815_v7 = vrot.slane %v15813_v47, 4  ;;  %v3200_v51 = vsel %vm1304_vm3, %v2995_v17, %v3199_v2  ;;  %v5453_v15 = vld [vmem:[%s14197_s3 + $0x238] sm:$0xff] }
 0x370   :  { %v2998_v16 = vperm.slane %v15814_v25, 1  ;;  %v15816_v57 = vrot.slane %v15813_v47, 6  ;;  %v3201_v12 = vsel %vm1306_vm4, %v2996_v28, %v3200_v51  ;;  %v4516_v20 = vrot.slane %v12325_v26, 2  ;;  %4283 = vmatmul.f32.gmra.mxu1 %v4008_v3  ;;  %v12404_v28 = vpop.permute.xlu0 %6202  ;;  %5744 = vmatpush.msrb.mxu2 %v5453_v15  ;;  %v12414_v3 = vpop.f32.mrf.mxu1 }
 0x371   :  { %v2999_v36 = vperm.slane %v15815_v7, 1  ;;  %v4517_v25 = vrot.slane %v12325_v26, 4  ;;  %v4341_v54 = vadd.f32 %v12207_v41, %v4240_v42  ;;  %v3202_v17 = vsel %vm1308_vm5, %v2997_v38, %v3201_v12 }
 0x372   :  { %v3000_v62 = vperm.slane %v15816_v57, 1  ;;  %v4518_v55 = vrot.slane %v12325_v26, 6  ;;  %v4558_v47 = vperm.slane %v12325_v26, 0  ;;  %v3203_v2 = vsel %vm1310_vm6, %v2998_v16, %v3202_v17  ;;  %5745 = vmatpush.msrb.mxu2 %v5452_v21  ;;  %v5451_v26 = vld [vmem:[%s14197_s3 + $0x228] sm:$0xff] }
 0x373   :  { %v4559_v7 = vperm.slane %v4516_v20, 0  ;;  %v4560_v51 = vperm.slane %v4517_v25, 0  ;;  %v4657_v57 = vperm.slane %v4516_v20, 1  ;;  %v12411_v46 = vadd.f32 %v12146_v61, %v12205_v8  ;;  %v12422_v8 = vpop.f32.mrf.mxu0 }
 0x374   :  { %v3204_v41 = vsel %vm1312_vm7, %v2999_v36, %v3203_v2  ;;  %v4561_v42 = vperm.slane %v4518_v55, 0  ;;  %v4658_v38 = vperm.slane %v4517_v25, 1  ;;  %v4659_v20 = vperm.slane %v4518_v55, 1  ;;  %v5450_v36 = vld [vmem:[%s14197_s3 + $0x220] sm:$0xff]  ;;  %v12427_v25 = vpop.f32.mrf.mxu2  ;;  %5746 = vmatpush.msrb.mxu2 %v5451_v26  ;;  %v15821_v26 = vld [vmem:[#allocation93_spill] sm:$0xff] }
 0x375   :  { %v3205_v16 = vsel %vm1314_vm8, %v3000_v62, %v3204_v41  ;;  %v4614_v12 = vsel %vm1302_vm2, %v4559_v7, %v4558_v47  ;;  %v4712_v15 = vsel %vm1302_vm2, %v4657_v57, %v4656_v23  ;;  %v12429_v21 = vmax.f32 %v4341_v54, 0.0  ;;  %v12437_v47 = vpop.permute.xlu1 %6207 }
 0x376   :  { %v15819_v17 = vunpack.i.l.bf16 %v12322_v11  ;;  %v4615_v62 = vsel %vm1304_vm3, %v4560_v51, %v4614_v12  ;;  %v4713_v55 = vsel %vm1304_vm3, %v4658_v38, %v4712_v15  ;;  %v4243_v51 = vadd.f32 %v12344_v63, %v12272_v6  ;;  %5747 = vmatpush.msrb.mxu2 %v5450_v36  ;;  %v15823_v15 = vld [vmem:[#allocation155_spill] sm:$0xff]  ;;  %v15826_v63 = vld [vmem:[#allocation70_spill] sm:$0xff] }
 0x377   :  { %15818 = vst [vmem:[#allocation126_spill] sm:$0xff] %v12429_v21  ;;  %v4616_v7 = vsel %vm1306_vm4, %v4561_v42, %v4615_v62  ;;  %v4714_v57 = vsel %vm1306_vm4, %v4659_v20, %v4713_v55  ;;  %v15820_v38 = vunpack.i.h.bf16 %v12019_v29  ;;  %v15822_v42 = vunpack.i.h.bf16 %v12053_v52  ;;  %v6303_v20 = vld [vmem:[#allocation2 + $0x3d8] sm:$0xff]  ;;  %5831 = vmatmul.msk.f32.gmra.mxu2 %vm21_vm0, %v15826_v63 }
 0x378   :  { %v3953_v2 = vsel %vm21_vm0, %v3205_v16, %v15819_v17  ;;  %v4883_v41 = vrot.slane %v4714_v57, 7  ;;  %4929 = vrot.lane.b32.xlu2 %v4616_v7, %s6352_s11  ;;  %v12449_v16 = vpop.permute.xlu2 %6212  ;;  %v15824_v17 = vrot.slane %v15823_v15, 2  ;;  %v15825_v62 = vrot.slane %v15823_v15, 4  ;;  %v4248_v57 = vpop.f32.mrf.mxu1 }
 0x379   :  { %v3981_v23 = vsel %vm3877_vm10, %v3953_v2, %v6194_v4  ;;  %v3871_v4 = vsel %vm21_vm0, %v15821_v26, %v15820_v38  ;;  %v4344_v36 = vadd.f32 %v12283_v37, %v4243_v51  ;;  %v15828_v52 = vunpack.i.h.bf16 %v12071_v24  ;;  %v15830_v51 = vld [vmem:[#allocation63_spill] sm:$0xff] }
 0x37a   :  { %v4009_v54 = vsel %vm3906_vm11, %v3981_v23, %v6199_v32  ;;  %v3900_v12 = vsel %vm3877_vm10, %v3871_v4, %v15822_v42  ;;  %v3001_v32 = vperm.slane %v6303_v20, 1  ;;  %v3002_v2 = vperm.slane %v15824_v17, 1  ;;  %v12477_v20 = vpop.permute.xlu0 %6217  ;;  %v5448_v17 = vld [vmem:[%s14197_s3 + $0x210] sm:$0xff] }
 0x37b   :  { %v3003_v6 = vperm.slane %v15825_v62, 1  ;;  %4286 = vmatmul.f32.gmra.mxu1 %v4009_v54  ;;  %v12461_v29 = vsel %vm4866_vm12, 0.0, %v4883_v41  ;;  %v3929_v55 = vsel %vm3906_vm11, %v3900_v12, %v15828_v52  ;;  %v15829_v23 = vrot.slane %v15823_v15, 6  ;;  %v6304_v54 = vld [vmem:[#allocation2 + $0x3e0] sm:$0xff]  ;;  %v5449_v15 = vld [vmem:[%s14197_s3 + $0x218] sm:$0xff] }
 0x37c   :  { %15827 = vst [vmem:[#allocation95_spill] sm:$0xff] %v12461_v29  ;;  %v6204_v38 = vunpack.i.l.bf16 %v12404_v28  ;;  %v14799_v26 = vrot.slane %v12461_v29, 1  ;;  %4197 = vmatmul.f32.gmra.mxu0 %v3929_v55  ;;  %v3005_v4 = vperm.slane %v6304_v54, 1  ;;  %v6209_v41 = vunpack.i.l.bf16 %v12437_v47  ;;  %5748 = vmatpush.msrb.mxu2 %v5449_v15 }
 0x37d   :  { %v3004_v7 = vperm.slane %v15829_v23, 1  ;;  %v6214_v37 = vunpack.i.l.bf16 %v12449_v16  ;;  %v15831_v24 = vrot.slane %v15830_v51, 2  ;;  %v3206_v12 = vsel %vm1302_vm2, %v3002_v2, %v3001_v32 }
 0x37e   :  { %5466 = vst [vmem:[#allocation1 + $0x20] ss:$2 sm:$0xff] %v14799_v26  ;;  %v12489_v62 = vadd.f32 %v12146_v61, %v12281_v10  ;;  %v12491_v63 = vmax.f32 %v4344_v36, 0.0  ;;  %v15832_v32 = vrot.slane %v15830_v51, 4  ;;  %v3207_v52 = vsel %vm1304_vm3, %v3003_v6, %v3206_v12  ;;  %v5447_v10 = vld [vmem:[%s14197_s3 + $0x208] sm:$0xff]  ;;  %5749 = vmatpush.msrb.mxu2 %v5448_v17  ;;  %v12508_v12 = vpop.f32.mrf.mxu0 }
 0x37f   :  { %v3006_v42 = vperm.slane %v15831_v24, 1  ;;  %v15833_v55 = vrot.slane %v15830_v51, 6  ;;  %v3208_v54 = vsel %vm1306_vm4, %v3004_v7, %v3207_v52  ;;  %v14801_v26 = vrot.slane %v12429_v21, 2  ;;  %v12510_v7 = vpop.f32.mrf.mxu2  ;;  %v12521_v24 = vpop.permute.xlu1 %6222 }
 0x380   :  { %v3007_v2 = vperm.slane %v15832_v32, 1  ;;  %v3209_v36 = vsel %vm1308_vm5, %v3005_v4, %v3208_v54  ;;  %v14800_v6 = vrot.slane %v12429_v21, 4  ;;  %v14802_v51 = vrot.slane %v12429_v21, 6  ;;  %5750 = vmatpush.msrb.mxu2 %v5447_v10  ;;  %v6305_v10 = vld [vmem:[#allocation2 + $0x408] sm:$0xff] }
 0x381   :  { %v3008_v23 = vperm.slane %v15833_v55, 1  ;;  %v3210_v15 = vsel %vm1310_vm6, %v3006_v42, %v3209_v36  ;;  %v4758_v52 = vperm.slane %v12429_v21, 1  ;;  %v4759_v55 = vperm.slane %v14801_v26, 1 }
 0x382   :  { %v15834_v4 = vunpack.i.h.bf16 %v12094_v40  ;;  %v3211_v31 = vsel %vm1312_vm7, %v3007_v2, %v3210_v15  ;;  %v4760_v17 = vperm.slane %v14800_v6, 1  ;;  %v4246_v42 = vadd.f32 %v12414_v3, %v12339_v34  ;;  %v5446_v40 = vld [vmem:[%s14197_s3 + $0x200] sm:$0xff] }
 0x383   :  { %v15835_v36 = vunpack.i.h.bf16 %v12125_v53  ;;  %v4761_v2 = vperm.slane %v14802_v51, 1  ;;  %v4813_v15 = vsel %vm1304_vm3, %v4759_v55, %v4758_v52  ;;  %5751 = vmatpush.msrb.mxu2 %v5446_v40  ;;  %v6306_v40 = vld [vmem:[#allocation2 + $0x410] sm:$0xff] }
 0x384   :  { %v3872_v54 = vsel %vm21_vm0, %v11820_v27, %v15834_v4  ;;  %v3212_v27 = vsel %vm1314_vm8, %v3008_v23, %v3211_v31  ;;  %v15836_v4 = vunpack.i.h.bf16 %v12141_v0  ;;  %v4814_v3 = vsel %vm1306_vm4, %v4760_v17, %v4813_v15 }
 0x385   :  { %v3901_v32 = vsel %vm3877_vm10, %v3872_v54, %v15835_v36  ;;  %v3954_v53 = vsel %vm21_vm0, %v3212_v27, %v6204_v38  ;;  %v3009_v54 = vperm.slane %v6305_v10, 1  ;;  %v15837_v36 = vld [vmem:[#allocation29_spill] sm:$0xff]  ;;  %v6224_v23 = vunpack.i.l.bf16 %v12521_v24 }
 0x386   :  { %v3930_v34 = vsel %vm3906_vm11, %v3901_v32, %v15836_v4  ;;  %v15838_v6 = vrot.slane %v15837_v36, 2  ;;  %v3982_v31 = vsel %vm3877_vm10, %v3954_v53, %v6209_v41  ;;  %v4815_v52 = vsel %vm1308_vm5, %v4761_v2, %v4814_v3  ;;  %v15841_v4 = vld [vmem:[#allocation9_spill] sm:$0xff] }
 0x387   :  { %4200 = vmatmul.f32.gmra.mxu0 %v3930_v34  ;;  %v15839_v0 = vrot.slane %v15837_v36, 4  ;;  %v4660_v38 = vperm.slane %v12491_v63, 1  ;;  %v4010_v55 = vsel %vm3906_vm11, %v3982_v31, %v6214_v37  ;;  %v4868_v17 = vsel %vm4866_vm12, 0.0, %v4815_v52 }
 0x388   :  { %v3010_v26 = vperm.slane %v15838_v6, 1  ;;  %v15840_v27 = vrot.slane %v15837_v36, 6  ;;  %4289 = vmatmul.f32.gmra.mxu1 %v4010_v55  ;;  %5021 = vrot.lane.b32.xlu1 %v4868_v17, %s6352_s11  ;;  %v5174_v41 = vrot.slane %v4868_v17, 1  ;;  %v4347_v6 = vadd.f32 %v12357_v30, %v4246_v42  ;;  %v12569_v17 = vpop.f32.mrf.mxu1 }
 0x389   :  { %v3011_v32 = vperm.slane %v15839_v0, 1  ;;  %v3013_v2 = vperm.slane %v6306_v40, 1  ;;  %v15842_v34 = vrot.slane %v15841_v4, 2  ;;  %v4519_v37 = vrot.slane %v12491_v63, 2 }
 0x38a   :  { %v3012_v15 = vperm.slane %v15840_v27, 1  ;;  %v3213_v3 = vsel %vm1302_vm2, %v3010_v26, %v3009_v54  ;;  %v4520_v10 = vrot.slane %v12491_v63, 4  ;;  %v4521_v36 = vrot.slane %v12491_v63, 6  ;;  %5189 = vrot.lane.b32.xlu2 %v5174_v41, %s6352_s11  ;;  %v12575_v41 = vpop.f32.mrf.mxu2 }
 0x38b   :  { %v3014_v53 = vperm.slane %v15842_v34, 1  ;;  %v15843_v31 = vrot.slane %v15841_v4, 4  ;;  %v15844_v30 = vrot.slane %v15841_v4, 6  ;;  %v3214_v0 = vsel %vm1304_vm3, %v3011_v32, %v3213_v3  ;;  %v12573_v34 = vpop.f32.mrf.mxu0 }
 0x38c   :  { %v4562_v55 = vperm.slane %v12491_v63, 0  ;;  %v3215_v26 = vsel %vm1306_vm4, %v3012_v15, %v3214_v0  ;;  %v4563_v54 = vperm.slane %v4519_v37, 0  ;;  %v4564_v27 = vperm.slane %v4520_v10, 0  ;;  %v15846_v0 = vld [vmem:[#allocation72_spill] sm:$0xff] }
 0x38d   :  { %v3015_v52 = vperm.slane %v15843_v31, 1  ;;  %v3016_v42 = vperm.slane %v15844_v30, 1  ;;  %v4249_v40 = vadd.f32 %v4248_v57, %v12411_v46  ;;  %v3216_v31 = vsel %vm1308_vm5, %v3013_v2, %v3215_v26 }
 0x38e   :  { %v4565_v4 = vperm.slane %v4521_v36, 0  ;;  %v4661_v30 = vperm.slane %v4519_v37, 1  ;;  %v4662_v51 = vperm.slane %v4520_v10, 1  ;;  %v3217_v32 = vsel %vm1310_vm6, %v3014_v53, %v3216_v31  ;;  %v3790_v10 = vpop.permute.xlu2 %3789 }
 0x38f   :  { %v4617_v63 = vsel %vm1302_vm2, %v4563_v54, %v4562_v55  ;;  %v4663_v3 = vperm.slane %v4521_v36, 1  ;;  %v15845_v15 = vunpack.i.h.bf16 %v12177_v49  ;;  %v3218_v46 = vsel %vm1312_vm7, %v3015_v52, %v3217_v32 }
 0x390   :  { %v4618_v57 = vsel %vm1304_vm3, %v4564_v27, %v4617_v63  ;;  %v4715_v21 = vsel %vm1302_vm2, %v4661_v30, %v4660_v38  ;;  %v15847_v2 = vunpack.i.h.bf16 %v12197_v59  ;;  %v3219_v53 = vsel %vm1314_vm8, %v3016_v42, %v3218_v46  ;;  %v6307_v38 = vld [vmem:[#allocation2 + $0x438] sm:$0xff]  ;;  %v15856_v46 = vld [vmem:[#allocation39_spill] sm:$0xff] }
 0x391   :  { %v3873_v29 = vsel %vm21_vm0, %v15846_v0, %v15845_v15  ;;  %v4619_v36 = vsel %vm1306_vm4, %v4565_v4, %v4618_v57  ;;  %v4716_v49 = vsel %vm1304_vm3, %v4662_v51, %v4715_v21  ;;  %v4350_v55 = vadd.f32 %v12427_v25, %v4249_v40  ;;  %v15851_v25 = vld [vmem:[#allocation158_spill] sm:$0xff]  ;;  %v6308_v15 = vld [vmem:[#allocation2 + $0x440] sm:$0xff] }
 0x392   :  { %v3902_v37 = vsel %vm3877_vm10, %v3873_v29, %v15847_v2  ;;  %v15848_v26 = vunpack.i.l.bf16 %v12477_v20  ;;  %v4717_v54 = vsel %vm1306_vm4, %v4663_v3, %v4716_v49  ;;  %4931 = vrot.lane.b32.xlu0 %v4619_v36, %s6352_s11  ;;  %v15849_v59 = vunpack.i.h.bf16 %v12218_v50 }
 0x393   :  { %v3017_v42 = vperm.slane %v6307_v38, 1  ;;  %v12602_v27 = vmax.f32 %v4347_v6, 0.0  ;;  %v4884_v51 = vrot.slane %v4717_v54, 7  ;;  %v15852_v40 = vrot.slane %v15851_v25, 2  ;;  %v12634_v38 = vpop.f32.mrf.mxu0 }
 0x394   :  { %v3955_v52 = vsel %vm21_vm0, %v3219_v53, %v15848_v26  ;;  %v3931_v29 = vsel %vm3906_vm11, %v3902_v37, %v15849_v59  ;;  %v6225_v4 = vunpack.i.h.bf16 %v12521_v24  ;;  %v15853_v32 = vrot.slane %v15851_v25, 4  ;;  %v12626_v26 = vpop.permute.xlu1 %6227 }
 0x395   :  { %15850 = vst [vmem:[#allocation49_spill] sm:$0xff] %v12602_v27  ;;  %v3983_v21 = vsel %vm3877_vm10, %v3955_v52, %v6224_v23  ;;  %4203 = vmatmul.f32.gmra.mxu0 %v3931_v29  ;;  %v3018_v31 = vperm.slane %v15852_v40, 1  ;;  %v15854_v63 = vrot.slane %v15851_v25, 6  ;;  %v12614_v6 = vsel %vm4866_vm12, 0.0, %v4884_v51  ;;  %v12628_v52 = vpop.f32.mrf.mxu1  ;;  %v6309_v40 = vld [vmem:[#allocation2 + $0x468] sm:$0xff] }
 0x396   :  { %v4011_v30 = vsel %vm3906_vm11, %v3983_v21, %v3790_v10  ;;  %v3019_v50 = vperm.slane %v15853_v32, 1  ;;  %15855 = vst [vmem:[#allocation96_spill] sm:$0xff] %v12614_v6  ;;  %v12616_v23 = vmax.f32 %v4350_v55, 0.0  ;;  %v3021_v0 = vperm.slane %v6308_v15, 1  ;;  %v12636_v21 = vpop.f32.mrf.mxu2  ;;  %v15860_v15 = vld [vmem:[#allocation77_spill] sm:$0xff] }
 0x397   :  { %v3020_v3 = vperm.slane %v15854_v63, 1  ;;  %4292 = vmatmul.f32.gmra.mxu1 %v4011_v30  ;;  %v15857_v57 = vrot.slane %v15856_v46, 2  ;;  %v14808_v24 = vrot.slane %v12614_v6, 1  ;;  %v15858_v37 = vrot.slane %v15856_v46, 4  ;;  %v3792_v30 = vpop.permute.xlu0 %3791 }
 0x398   :  { %v15859_v53 = vrot.slane %v15856_v46, 6  ;;  %v3220_v49 = vsel %vm1302_vm2, %v3018_v31, %v3017_v42  ;;  %v14809_v59 = vrot.slane %v12602_v27, 2  ;;  %v14807_v29 = vrot.slane %v12602_v27, 4 }
 0x399   :  { %v3022_v2 = vperm.slane %v15857_v57, 1  ;;  %v3023_v10 = vperm.slane %v15858_v37, 1  ;;  %v3221_v55 = vsel %vm1304_vm3, %v3019_v50, %v3220_v49  ;;  %5468 = vst [vmem:[#allocation1 + $0x21] ss:$2 sm:$0xff] %v14808_v24  ;;  %v14812_v51 = vrot.slane %v12602_v27, 6  ;;  %v6310_v24 = vld [vmem:[#allocation2 + $0x470] sm:$0xff] }
 0x39a   :  { %v3024_v36 = vperm.slane %v15859_v53, 1  ;;  %v3222_v42 = vsel %vm1306_vm4, %v3020_v3, %v3221_v55  ;;  %v4762_v25 = vperm.slane %v12602_v27, 1  ;;  %v3025_v31 = vperm.slane %v6309_v40, 1 }
 0x39b   :  { %v3223_v32 = vsel %vm1308_vm5, %v3021_v0, %v3222_v42  ;;  %v4763_v50 = vperm.slane %v14809_v59, 1  ;;  %v4764_v63 = vperm.slane %v14807_v29, 1  ;;  %v15861_v46 = vrot.slane %v15860_v15, 2 }
 0x39c   :  { %v3224_v3 = vsel %vm1310_vm6, %v3022_v2, %v3223_v32  ;;  %v6229_v37 = vunpack.i.l.bf16 %v12626_v26  ;;  %v4765_v53 = vperm.slane %v14812_v51, 1  ;;  %v15862_v49 = vrot.slane %v15860_v15, 4  ;;  %v15864_v32 = vld [vmem:[#allocation76_spill] sm:$0xff] }
 0x39d   :  { %v3026_v57 = vperm.slane %v15861_v46, 1  ;;  %v3225_v0 = vsel %vm1312_vm7, %v3023_v10, %v3224_v3  ;;  %v4816_v42 = vsel %vm1304_vm3, %v4763_v50, %v4762_v25  ;;  %v15863_v40 = vrot.slane %v15860_v15, 6  ;;  %v3680_v15 = vpop.permute.xlu2 %3679 }
 0x39e   :  { %v3027_v55 = vperm.slane %v15862_v49, 1  ;;  %v3029_v59 = vperm.slane %v6310_v24, 1  ;;  %v3226_v46 = vsel %vm1314_vm8, %v3024_v36, %v3225_v0  ;;  %v4817_v2 = vsel %vm1306_vm4, %v4764_v63, %v4816_v42  ;;  %v15871_v0 = vld [vmem:[#allocation149_spill] sm:$0xff] }
 0x39f   :  { %v3028_v29 = vperm.slane %v15863_v40, 1  ;;  %v15865_v54 = vrot.slane %v15864_v32, 2  ;;  %v15866_v51 = vrot.slane %v15864_v32, 4  ;;  %v15867_v49 = vunpack.i.h.bf16 %v12477_v20 }
 0x3a0   :  { %v4818_v25 = vsel %vm1308_vm5, %v4765_v53, %v4817_v2  ;;  %v3227_v50 = vsel %vm1302_vm2, %v3026_v57, %v3025_v31  ;;  %v4252_v24 = vadd.f32 %v12569_v17, %v12489_v62  ;;  %v15869_v31 = vrot.slane %v15864_v32, 6 }
 0x3a1   :  { %v3030_v27 = vperm.slane %v15865_v54, 1  ;;  %v3031_v6 = vperm.slane %v15866_v51, 1  ;;  %v3956_v10 = vsel %vm21_vm0, %v3226_v46, %v15867_v49  ;;  %v4869_v63 = vsel %vm4866_vm12, 0.0, %v4818_v25  ;;  %v12692_v46 = vpop.f32.mrf.mxu1  ;;  %v12703_v25 = vpop.f32.mrf.mxu2 }
 0x3a2   :  { %v3984_v36 = vsel %vm3877_vm10, %v3956_v10, %v6225_v4  ;;  %v3228_v54 = vsel %vm1304_vm3, %v3027_v55, %v3227_v50  ;;  %v15868_v51 = vunpack.i.h.bf16 %v12250_v9  ;;  %v5175_v53 = vrot.slane %v4869_v63, 1  ;;  %5023 = vrot.lane.b32.xlu1 %v4869_v63, %s6352_s11  ;;  %v5477_v4 = vld.sshfl [vmem:[#allocation1 + $0x20] sm:$0xff pattern:$0x75316420]  ;;  %v12701_v10 = vpop.f32.mrf.mxu0 }
 0x3a3   :  { %v4012_v3 = vsel %vm3906_vm11, %v3984_v36, %v3792_v30  ;;  %v3032_v62 = vperm.slane %v15869_v31, 1  ;;  %v3229_v17 = vsel %vm1306_vm4, %v3028_v29, %v3228_v54  ;;  %v15870_v55 = vunpack.i.h.bf16 %v12277_v44  ;;  %5834 = vmatmul.msk.f32.vlgmr.msrb.gmra.mxu2 %vm3877_vm10, %v5477_v4 }
 0x3a4   :  { %v3874_v20 = vsel %vm21_vm0, %v11714_v22, %v15868_v51  ;;  %4295 = vmatmul.f32.gmra.mxu1 %v4012_v3  ;;  %v3230_v57 = vsel %vm1308_vm5, %v3029_v59, %v3229_v17  ;;  %v6311_v22 = vld [vmem:[#allocation2 + $0x498] sm:$0xff]  ;;  %v15872_v42 = vrot.slane %v15871_v0, 2  ;;  %v4353_v29 = vadd.f32 %v12510_v7, %v4252_v24  ;;  %v15876_v7 = vld [vmem:[#allocation151_spill] sm:$0xff] }
 0x3a5   :  { %v3903_v9 = vsel %vm3877_vm10, %v3874_v20, %v15870_v55  ;;  %v3033_v30 = vperm.slane %v6311_v22, 1  ;;  %v3231_v2 = vsel %vm1310_vm6, %v3030_v27, %v3230_v57  ;;  %v15873_v32 = vunpack.i.h.bf16 %v12295_v1  ;;  %v6312_v27 = vld [vmem:[#allocation2 + $0x4a0] sm:$0xff]  ;;  %v3794_v20 = vpop.permute.xlu0 %3793  ;;  %v3682_v57 = vpop.permute.xlu1 %3681 }
 0x3a6   :  { %v3034_v40 = vperm.slane %v15872_v42, 1  ;;  %v15874_v44 = vrot.slane %v15871_v0, 4  ;;  %v3232_v50 = vsel %vm1312_vm7, %v3031_v6, %v3231_v2  ;;  %v15875_v36 = vrot.slane %v15871_v0, 6 }
 0x3a7   :  { %v3932_v59 = vsel %vm3906_vm11, %v3903_v9, %v15873_v32  ;;  %v3037_v54 = vperm.slane %v6312_v27, 1  ;;  %v15877_v24 = vrot.slane %v15876_v7, 2  ;;  %v3233_v51 = vsel %vm1314_vm8, %v3032_v62, %v3232_v50 }
 0x3a8   :  { %v3035_v49 = vperm.slane %v15874_v44, 1  ;;  %4206 = vmatmul.f32.gmra.mxu0 %v3932_v59  ;;  %v3036_v63 = vperm.slane %v15875_v36, 1  ;;  %v15878_v3 = vrot.slane %v15876_v7, 4  ;;  %v15879_v17 = vrot.slane %v15876_v7, 6 }
 0x3a9   :  { %v3038_v1 = vperm.slane %v15877_v24, 1  ;;  %v3234_v6 = vsel %vm1302_vm2, %v3034_v40, %v3033_v30  ;;  %v3957_v55 = vsel %vm21_vm0, %v3233_v51, %v6229_v37  ;;  %v4522_v22 = vrot.slane %v12616_v23, 2 }
 0x3aa   :  { %v3039_v31 = vperm.slane %v15878_v3, 1  ;;  %v3040_v4 = vperm.slane %v15879_v17, 1  ;;  %v3235_v9 = vsel %vm1304_vm3, %v3035_v49, %v3234_v6  ;;  %v4523_v0 = vrot.slane %v12616_v23, 4  ;;  %5191 = vrot.lane.b32.xlu1 %v5175_v53, %s6352_s11  ;;  %v15884_v6 = vld [vmem:[#allocation140_spill] sm:$0xff] }
 0x3ab   :  { %v3985_v62 = vsel %vm3877_vm10, %v3957_v55, %v3680_v15  ;;  %v3236_v42 = vsel %vm1306_vm4, %v3036_v63, %v3235_v9  ;;  %v4524_v2 = vrot.slane %v12616_v23, 6  ;;  %v4566_v32 = vperm.slane %v12616_v23, 0 }
 0x3ac   :  { %v4013_v59 = vsel %vm3906_vm11, %v3985_v62, %v3794_v20  ;;  %v3237_v30 = vsel %vm1308_vm5, %v3037_v54, %v3236_v42  ;;  %v4567_v37 = vperm.slane %v4522_v22, 0  ;;  %v4568_v40 = vperm.slane %v4523_v0, 0 }
 0x3ad   :  { %v6210_v44 = vunpack.i.h.bf16 %v12437_v47  ;;  %v6215_v15 = vunpack.i.h.bf16 %v12449_v16  ;;  %v4154_v49 = vadd.f32 %v12146_v61, %v12355_v58  ;;  %v3238_v50 = vsel %vm1310_vm6, %v3038_v1, %v3237_v30  ;;  %4298 = vmatmul.f32.gmra.mxu1 %v4013_v59  ;;  %v3796_v47 = vpop.permute.xlu2 %3795 }
 0x3ae   :  { %v12736_v36 = vmax.f32 %v4353_v29, 0.0  ;;  %v3239_v63 = vsel %vm1312_vm7, %v3039_v31, %v3238_v50  ;;  %v4569_v27 = vperm.slane %v4524_v2, 0  ;;  %v4620_v54 = vsel %vm1302_vm2, %v4567_v37, %v4566_v32  ;;  %v6313_v31 = vld [vmem:[#allocation2 + $0x4c8] sm:$0xff]  ;;  %v3684_v37 = vpop.permute.xlu1 %3683 }
 0x3af   :  { %v3240_v16 = vsel %vm1314_vm8, %v3040_v4, %v3239_v63  ;;  %v4621_v7 = vsel %vm1304_vm3, %v4568_v40, %v4620_v54  ;;  %v4255_v58 = vadd.f32 %v12628_v52, %v4154_v49  ;;  %v15880_v24 = vunpack.i.h.bf16 %v12322_v11  ;;  %v12756_v4 = vpop.f32.mrf.mxu1  ;;  %v6314_v40 = vld [vmem:[#allocation2 + $0x4d0] sm:$0xff] }
 0x3b0   :  { %v15881_v29 = vunpack.i.h.bf16 %v12626_v26  ;;  %v4622_v51 = vsel %vm1306_vm4, %v4569_v27, %v4621_v7  ;;  %v15882_v20 = vunpack.i.h.bf16 %v12347_v33  ;;  %v3041_v17 = vperm.slane %v6313_v31, 1  ;;  %v12766_v33 = vpop.f32.mrf.mxu0  ;;  %v3570_v7 = vpop.permute.xlu0 %3569 }
 0x3b1   :  { %v3875_v53 = vsel %vm21_vm0, %v11805_v60, %v15880_v24  ;;  %4933 = vrot.lane.b32.xlu0 %v4622_v51, %s6352_s11  ;;  %v4356_v60 = vadd.f32 %v12575_v41, %v4255_v58  ;;  %v15883_v11 = vunpack.i.h.bf16 %v12368_v39  ;;  %v15885_v55 = vrot.slane %v15884_v6, 2  ;;  %v12775_v39 = vpop.f32.mrf.mxu2 }
 0x3b2   :  { %v3958_v1 = vsel %vm21_vm0, %v3240_v16, %v15881_v29  ;;  %v3904_v3 = vsel %vm3877_vm10, %v3875_v53, %v15882_v20  ;;  %v4157_v62 = vadd.f32 %v12146_v61, %v12422_v8  ;;  %v15887_v41 = vrot.slane %v15884_v6, 6 }
 0x3b3   :  { %v3986_v52 = vsel %vm3877_vm10, %v3958_v1, %v3682_v57  ;;  %v3933_v26 = vsel %vm3906_vm11, %v3904_v3, %v15883_v11  ;;  %v3042_v9 = vperm.slane %v15885_v55, 1  ;;  %v15886_v57 = vrot.slane %v15884_v6, 4 }
 0x3b4   :  { %4209 = vmatmul.f32.gmra.mxu0 %v3933_v26  ;;  %v4014_v42 = vsel %vm3906_vm11, %v3986_v52, %v3796_v47  ;;  %v3044_v59 = vperm.slane %v15887_v41, 1  ;;  %v12777_v30 = vmax.f32 %v4356_v60, 0.0  ;;  %v3045_v49 = vperm.slane %v6314_v40, 1 }
 0x3b5   :  { %v3043_v32 = vperm.slane %v15886_v57, 1  ;;  %v15888_v50 = vrot.slane %v11042_v5, 2  ;;  %v15889_v8 = vrot.slane %v11042_v5, 4  ;;  %v15890_v54 = vrot.slane %v11042_v5, 6  ;;  %4301 = vmatmul.f32.gmra.mxu1 %v4014_v42  ;;  %v3798_v6 = vpop.permute.xlu2 %3797 }
 0x3b6   :  { %v3241_v16 = vsel %vm1302_vm2, %v3042_v9, %v3041_v17  ;;  %v4469_v58 = vrot.slane %v12736_v36, 2  ;;  %v4470_v24 = vrot.slane %v12736_v36, 4  ;;  %v4471_v29 = vrot.slane %v12736_v36, 6 }
 0x3b7   :  { %v3046_v63 = vperm.slane %v15888_v50, 1  ;;  %v3047_v27 = vperm.slane %v15889_v8, 1  ;;  %v3048_v47 = vperm.slane %v15890_v54, 1  ;;  %v3242_v53 = vsel %vm1304_vm3, %v3043_v32, %v3241_v16 }
 0x3b8   :  { %v4766_v1 = vperm.slane %v12736_v36, 1  ;;  %v4258_v51 = vadd.f32 %v12692_v46, %v4157_v62  ;;  %v3243_v20 = vsel %vm1306_vm4, %v3044_v59, %v3242_v53  ;;  %v4767_v5 = vperm.slane %v4469_v58, 1  ;;  %v12825_v50 = vpop.f32.mrf.mxu0 }
 0x3b9   :  { %v4768_v3 = vperm.slane %v4470_v24, 1  ;;  %v15891_v31 = vunpack.i.h.bf16 %v12404_v28  ;;  %v3244_v52 = vsel %vm1308_vm5, %v3045_v49, %v3243_v20  ;;  %v4769_v60 = vperm.slane %v4471_v29, 1  ;;  %v15892_v20 = vld [vmem:[#allocation90_spill] sm:$0xff] }
 0x3ba   :  { %v3245_v11 = vsel %vm1310_vm6, %v3046_v63, %v3244_v52  ;;  %v4819_v26 = vsel %vm1304_vm3, %v4767_v5, %v4766_v1  ;;  %v4525_v9 = vrot.slane %v12777_v30, 2  ;;  %v4359_v62 = vadd.f32 %v12636_v21, %v4258_v51  ;;  %v6315_v1 = vld [vmem:[#allocation2 + $0x4f8] sm:$0xff] }
 0x3bb   :  { %v3876_v17 = vsel %vm21_vm0, %v11919_v56, %v15891_v31  ;;  %v3246_v28 = vsel %vm1312_vm7, %v3047_v27, %v3245_v11  ;;  %v4820_v56 = vsel %vm1306_vm4, %v4768_v3, %v4819_v26  ;;  %v4526_v42 = vrot.slane %v12777_v30, 4  ;;  %v12831_v27 = vpop.f32.mrf.mxu2  ;;  %v3572_v3 = vpop.permute.xlu0 %3571 }
 0x3bc   :  { %v3905_v46 = vsel %vm3877_vm10, %v3876_v17, %v6210_v44  ;;  %v3247_v57 = vsel %vm1314_vm8, %v3048_v47, %v3246_v28  ;;  %v4821_v44 = vsel %vm1308_vm5, %v4769_v60, %v4820_v56  ;;  %v4527_v32 = vrot.slane %v12777_v30, 6  ;;  %v3686_v47 = vpop.permute.xlu1 %3685 }
 0x3bd   :  { %v3934_v55 = vsel %vm3906_vm11, %v3905_v46, %v6215_v15  ;;  %v4570_v41 = vperm.slane %v12777_v30, 0  ;;  %v12817_v15 = vpop.f32.mrf.mxu1  ;;  %v3959_v59 = vsel %vm21_vm0, %v3247_v57, %v3570_v7  ;;  %v4870_v40 = vsel %vm4866_vm12, 0.0, %v4821_v44  ;;  %v6316_v46 = vld [vmem:[#allocation2 + $0x500] sm:$0xff] }
 0x3be   :  { %4212 = vmatmul.f32.gmra.mxu0 %v3934_v55  ;;  %v4571_v21 = vperm.slane %v4525_v9, 0  ;;  %v4572_v49 = vperm.slane %v4526_v42, 0  ;;  %5025 = vrot.lane.b32.xlu2 %v4870_v40, %s6352_s11  ;;  %v3987_v63 = vsel %vm3877_vm10, %v3959_v59, %v3684_v37  ;;  %v4160_v8 = vadd.f32 %v12146_v61, %v12508_v12 }
 0x3bf   :  { %v4015_v54 = vsel %vm3906_vm11, %v3987_v63, %v3798_v6  ;;  %v4573_v16 = vperm.slane %v4527_v32, 0  ;;  %v3049_v51 = vperm.slane %v6315_v1, 1  ;;  %v15893_v37 = vrot.slane %v15892_v20, 2 }
 0x3c0   :  { %v4623_v7 = vsel %vm1302_vm2, %v4571_v21, %v4570_v41  ;;  %4304 = vmatmul.f32.gmra.mxu1 %v4015_v54  ;;  %v15894_v61 = vrot.slane %v15892_v20, 4  ;;  %v12842_v31 = vmax.f32 %v4359_v62, 0.0  ;;  %v15895_v52 = vrot.slane %v15892_v20, 6  ;;  %v6317_v41 = vld [vmem:[#allocation2 + $0x528] sm:$0xff]  ;;  %v15898_v21 = vld [vmem:[#allocation46_spill] sm:$0xff] }
 0x3c1   :  { %v4624_v53 = vsel %vm1304_vm3, %v4572_v49, %v4623_v7  ;;  %v3050_v5 = vperm.slane %v15893_v37, 1  ;;  %v3053_v11 = vperm.slane %v6316_v46, 1  ;;  %v5176_v26 = vrot.slane %v4870_v40, 1  ;;  %v3800_v7 = vpop.permute.xlu2 %3799 }
 0x3c2   :  { %v3051_v12 = vperm.slane %v15894_v61, 1  ;;  %v4625_v17 = vsel %vm1306_vm4, %v4573_v16, %v4624_v53  ;;  %v3052_v60 = vperm.slane %v15895_v52, 1  ;;  %v15896_v6 = vrot.slane %v11202_v18, 2  ;;  %v15901_v53 = vld [vmem:[#allocation26_spill] sm:$0xff]  ;;  %v6319_v61 = vld [vmem:[#allocation2 + $0x530] sm:$0xff] }
 0x3c3   :  { %4935 = vrot.lane.b32.xlu0 %v4625_v17, %s6352_s11  ;;  %v15897_v28 = vrot.slane %v11202_v18, 4  ;;  %v3248_v57 = vsel %vm1302_vm2, %v3050_v5, %v3049_v51  ;;  %v4261_v44 = vadd.f32 %v12756_v4, %v4160_v8  ;;  %v3057_v59 = vperm.slane %v6317_v41, 1  ;;  %v12869_v8 = vld [vmem:[%s14196_s2] ss:$0 sm:$0xff]  ;;  %v12875_v17 = vpop.f32.mrf.mxu0 }
 0x3c4   :  { %v3054_v55 = vperm.slane %v15896_v6, 1  ;;  %v3249_v62 = vsel %vm1304_vm3, %v3051_v12, %v3248_v57  ;;  %v15899_v49 = vrot.slane %v15898_v21, 2  ;;  %v15900_v40 = vrot.slane %v11202_v18, 6 }
 0x3c5   :  { %v3055_v56 = vperm.slane %v15897_v28, 1  ;;  %v3250_v16 = vsel %vm1306_vm4, %v3052_v60, %v3249_v62  ;;  %v15902_v1 = vrot.slane %v15898_v21, 4  ;;  %v15903_v20 = vrot.slane %v15898_v21, 6  ;;  %v12884_v57 = vpop.f32.mrf.mxu1 }
 0x3c6   :  { %v3058_v63 = vperm.slane %v15899_v49, 1  ;;  %v3056_v54 = vperm.slane %v15900_v40, 1  ;;  %5806 = vmatmul.msk.f32.vlgmr.msrb.gmra.mxu0 %vm21_vm0, %v15901_v53  ;;  %v4163_v18 = vadd.f32 %v12869_v8, %v12573_v34  ;;  %v3251_v37 = vsel %vm1308_vm5, %v3053_v11, %v3250_v16  ;;  %5193 = vrot.lane.b32.xlu2 %v5176_v26, %s6352_s11 }
 0x3c7   :  { %v3059_v51 = vperm.slane %v15902_v1, 1  ;;  %v3060_v4 = vperm.slane %v15903_v20, 1  ;;  %v4362_v5 = vadd.f32 %v12703_v25, %v4261_v44  ;;  %v3061_v12 = vperm.slane %v6319_v61, 1  ;;  %v3574_v1 = vpop.permute.xlu0 %3573 }
 0x3c8   :  { %v3252_v52 = vsel %vm1310_vm6, %v3054_v55, %v3251_v37  ;;  %v15904_v60 = vrot.slane %v11337_v13, 2  ;;  %v15905_v6 = vrot.slane %v11337_v13, 4  ;;  %v3255_v34 = vsel %vm1302_vm2, %v3058_v63, %v3057_v59  ;;  %v12895_v59 = vpop.f32.mrf.mxu2 }
 0x3c9   :  { %v3253_v25 = vsel %vm1312_vm7, %v3055_v56, %v3252_v52  ;;  %v15906_v11 = vrot.slane %v11337_v13, 6  ;;  %v3256_v44 = vsel %vm1304_vm3, %v3059_v51, %v3255_v34  ;;  %v4472_v55 = vrot.slane %v12842_v31, 2  ;;  %v3688_v13 = vpop.permute.xlu1 %3687 }
 0x3ca   :  { %v3062_v46 = vperm.slane %v15904_v60, 1  ;;  %v3063_v28 = vperm.slane %v15905_v6, 1  ;;  %v3254_v26 = vsel %vm1314_vm8, %v3056_v54, %v3253_v25  ;;  %v3257_v41 = vsel %vm1306_vm4, %v3060_v4, %v3256_v44 }
 0x3cb   :  { %v3064_v62 = vperm.slane %v15906_v11, 1  ;;  %v4473_v21 = vrot.slane %v12842_v31, 4  ;;  %v4474_v49 = vrot.slane %v12842_v31, 6  ;;  %v3960_v63 = vsel %vm21_vm0, %v3254_v26, %v3572_v3  ;;  %v12924_v34 = vpop.f32.mrf.mxu0 }
 0x3cc   :  { %v12898_v56 = vmax.f32 %v4362_v5, 0.0  ;;  %v3258_v40 = vsel %vm1308_vm5, %v3061_v12, %v3257_v41  ;;  %v4770_v16 = vperm.slane %v12842_v31, 1  ;;  %v3988_v53 = vsel %vm3877_vm10, %v3960_v63, %v3686_v47 }
 0x3cd   :  { %v3259_v54 = vsel %vm1310_vm6, %v3062_v46, %v3258_v40  ;;  %v4771_v51 = vperm.slane %v4472_v55, 1  ;;  %v4772_v20 = vperm.slane %v4473_v21, 1  ;;  %v4016_v3 = vsel %vm3906_vm11, %v3988_v53, %v3800_v7  ;;  %v3802_v46 = vpop.permute.xlu2 %3801 }
 0x3ce   :  { %v3260_v4 = vsel %vm1312_vm7, %v3063_v28, %v3259_v54  ;;  %v4264_v37 = vadd.f32 %v12817_v15, %v4163_v18  ;;  %4307 = vmatmul.f32.gmra.mxu1 %v4016_v3  ;;  %v4773_v47 = vperm.slane %v4474_v49, 1  ;;  %v4528_v15 = vrot.slane %v12898_v56, 2  ;;  %v555_v28 = vld [vmem:[#allocation2 + $0x580] sm:$0x3] }
 0x3cf   :  { %v3261_v5 = vsel %vm1314_vm8, %v3064_v62, %v3260_v4  ;;  %v4822_v61 = vsel %vm1304_vm3, %v4771_v51, %v4770_v16  ;;  %v4166_v25 = vadd.f32 %v12869_v8, %v12634_v38  ;;  %v4529_v11 = vrot.slane %v12898_v56, 4  ;;  %v4269_v62 = vpop.f32.mrf.mxu1 }
 0x3d0   :  { %v3961_v12 = vsel %vm21_vm0, %v3261_v5, %v3574_v1  ;;  %v4823_v52 = vsel %vm1306_vm4, %v4772_v20, %v4822_v61  ;;  %v4365_v7 = vadd.f32 %v12775_v39, %v4264_v37  ;;  %v4530_v39 = vrot.slane %v12898_v56, 6  ;;  %v12945_v53 = vpop.f32.mrf.mxu2  ;;  %v6320_v20 = vld [vmem:[#allocation2 + $0x558] sm:$0xff] }
 0x3d1   :  { %v4824_v60 = vsel %vm1308_vm5, %v4773_v47, %v4823_v52  ;;  %v3989_v6 = vsel %vm3877_vm10, %v3961_v12, %v3688_v13  ;;  %v4574_v26 = vperm.slane %v12898_v56, 0  ;;  %v4575_v41 = vperm.slane %v4528_v15, 0  ;;  %v12947_v54 = vpop.permute.xlu1 %6232 }
 0x3d2   :  { %v12922_v18 = vsel %vm4866_vm12, 0.0, %v4824_v60  ;;  %v4017_v44 = vsel %vm3906_vm11, %v3989_v6, %v3802_v46  ;;  %v3842_v63 = vsel %vm1302_vm2, %v11978_v35, %v11974_v48  ;;  %v12939_v38 = vmax.f32 %v4365_v7, 0.0  ;;  %v15907_v35 = vld [vmem:[#allocation40_spill] sm:$0xff]  ;;  %v6321_v6 = vld [vmem:[#allocation2 + $0x560] sm:$0xff] }
 0x3d3   :  { %5027 = vrot.lane.b32.xlu1 %v12922_v18, %s6352_s11  ;;  %v4576_v13 = vperm.slane %v4529_v11, 0  ;;  %v4577_v40 = vperm.slane %v4530_v39, 0  ;;  %v3834_v16 = vperm.slane %v555_v28, 0  ;;  %v4626_v1 = vsel %vm1302_vm2, %v4575_v41, %v4574_v26  ;;  %v15912_v26 = vld [vmem:[#allocation25_spill] sm:$0xff] }
 0x3d4   :  { %v3843_v51 = vsel %vm1304_vm3, %v11982_v19, %v3842_v63  ;;  %v3065_v48 = vperm.slane %v6320_v20, 1  ;;  %v15908_v3 = vrot.slane %v15907_v35, 2  ;;  %v15909_v5 = vperm.slane %v11942_v43, 0 }
 0x3d5   :  { %v4627_v37 = vsel %vm1304_vm3, %v4576_v13, %v4626_v1  ;;  %v15910_v61 = vrot.slane %v15907_v35, 4  ;;  %v15911_v52 = vrot.slane %v15907_v35, 6  ;;  %v4169_v19 = vadd.f32 %v12869_v8, %v12701_v10  ;;  %v15914_v10 = vld [vmem:[#allocation94_spill] sm:$0xff]  ;;  %v12980_v35 = vpop.f32.mrf.mxu0 }
 0x3d6   :  { %v3066_v4 = vperm.slane %v15908_v3, 1  ;;  %4310 = vmatmul.f32.gmra.mxu1 %v4017_v44  ;;  %v3844_v47 = vsel %vm1306_vm4, %v15909_v5, %v3843_v51  ;;  %v4628_v7 = vsel %vm1306_vm4, %v4577_v40, %v4627_v37  ;;  %v3069_v28 = vperm.slane %v6321_v6, 1 }
 0x3d7   :  { %v3067_v12 = vperm.slane %v15910_v61, 1  ;;  %v3068_v60 = vperm.slane %v15911_v52, 1  ;;  %v3845_v46 = vsel %vm1308_vm5, %v11996_v45, %v3844_v47  ;;  %v6234_v43 = vunpack.i.l.bf16 %v12947_v54  ;;  %4937 = vrot.lane.b32.xlu0 %v4628_v7, %s6352_s11  ;;  %v3576_v61 = vpop.permute.xlu0 %3575  ;;  %v4272_v7 = vpop.f32.mrf.mxu1 }
 0x3d8   :  { %v3846_v44 = vsel %vm1310_vm6, %v12003_v14, %v3845_v46  ;;  %v15913_v41 = vrot.slane %v15912_v26, 2  ;;  %v3262_v13 = vsel %vm1302_vm2, %v3066_v4, %v3065_v48  ;;  %v15915_v1 = vrot.slane %v15912_v26, 4 }
 0x3d9   :  { %v3847_v40 = vsel %vm1312_vm7, %v15914_v10, %v3846_v44  ;;  %v3263_v51 = vsel %vm1304_vm3, %v3067_v12, %v3262_v13  ;;  %v4267_v20 = vadd.f32 %v12884_v57, %v4166_v25  ;;  %v15916_v14 = vrot.slane %v15912_v26, 6 }
 0x3da   :  { %v3070_v63 = vperm.slane %v15913_v41, 1  ;;  %v3071_v45 = vperm.slane %v15915_v1, 1  ;;  %v3848_v3 = vsel %vm1314_vm8, %v3834_v16, %v3847_v40  ;;  %v3264_v5 = vsel %vm1306_vm4, %v3068_v60, %v3263_v51 }
 0x3db   :  { %v3072_v37 = vperm.slane %v15916_v14, 1  ;;  %v4475_v48 = vrot.slane %v12939_v38, 2  ;;  %5833 = vmatmul.msk.f32.gmra.mxu3 %vm21_vm0, %v3848_v3  ;;  %v3265_v4 = vsel %vm1308_vm5, %v3069_v28, %v3264_v5  ;;  %v12990_v47 = vadd.f32 %v12831_v27, %v4267_v20  ;;  %v3804_v28 = vpop.permute.xlu2 %3803 }
 0x3dc   :  { %v4476_v57 = vrot.slane %v12939_v38, 4  ;;  %v4477_v25 = vrot.slane %v12939_v38, 6  ;;  %v3266_v16 = vsel %vm1310_vm6, %v3070_v63, %v3265_v4  ;;  %v4774_v12 = vperm.slane %v12939_v38, 1  ;;  %v4376_v63 = vpop.f32.mrf.mxu2 }
 0x3dd   :  { %v4775_v52 = vperm.slane %v4475_v48, 1  ;;  %v4270_v60 = vadd.f32 %v4269_v62, %v4169_v19  ;;  %v3267_v46 = vsel %vm1312_vm7, %v3071_v45, %v3266_v16  ;;  %v13020_v3 = vpop.f32.mrf.mxu0 }
 0x3de   :  { %v4776_v27 = vperm.slane %v4476_v57, 1  ;;  %v3268_v6 = vsel %vm1314_vm8, %v3072_v37, %v3267_v46  ;;  %v4777_v44 = vperm.slane %v4477_v25, 1 }
 0x3df   :  { %v4825_v26 = vsel %vm1304_vm3, %v4775_v52, %v4774_v12  ;;  %v4371_v41 = vadd.f32 %v12895_v59, %v4270_v60  ;;  %v3962_v13 = vsel %vm21_vm0, %v3268_v6, %v3576_v61  ;;  %v4275_v4 = vpop.f32.mrf.mxu1  ;;  %v4172_v61 = vadd.f32 %v12869_v8, %v12766_v33 }
 0x3e0   :  { %v4826_v62 = vsel %vm1306_vm4, %v4776_v27, %v4825_v26  ;;  %v3990_v19 = vsel %vm3877_vm10, %v3962_v13, %v6234_v43  ;;  %v4175_v43 = vadd.f32 %v12869_v8, %v12825_v50  ;;  %v4665_v33 = vperm.slane %v4522_v22, 1 }
 0x3e1   :  { %v4827_v10 = vsel %vm1308_vm5, %v4777_v44, %v4826_v62  ;;  %v13010_v40 = vmax.f32 %v4371_v41, 0.0  ;;  %v4018_v1 = vsel %vm3906_vm11, %v3990_v19, %v3804_v28  ;;  %v4273_v46 = vadd.f32 %v4272_v7, %v4172_v61 }
 0x3e2   :  { %v4872_v45 = vsel %vm4866_vm12, 0.0, %v4827_v10  ;;  %4313 = vmatmul.f32.gmra.mxu1 %v4018_v1  ;;  %v4276_v16 = vadd.f32 %v4275_v4, %v4175_v43  ;;  %v4666_v26 = vperm.slane %v4523_v0, 1  ;;  %v4178_v7 = vadd.f32 %v12869_v8, %v12875_v17 }
 0x3e3   :  { %5029 = vrot.lane.b32.xlu2 %v4872_v45, %s6352_s11  ;;  %v4478_v59 = vrot.slane %v13010_v40, 2  ;;  %v4479_v51 = vrot.slane %v13010_v40, 4  ;;  %v4480_v20 = vrot.slane %v13010_v40, 6  ;;  %v4778_v14 = vperm.slane %v13010_v40, 1 }
 0x3e4   :  { %v4377_v60 = vadd.f32 %v4376_v63, %v4276_v16  ;;  %v4379_v6 = vpop.f32.mrf.mxu2  ;;  %v4664_v62 = vperm.slane %v12616_v23, 1  ;;  %v4667_v22 = vperm.slane %v4524_v2, 1  ;;  %v5178_v19 = vrot.slane %v4872_v45, 1 }
 0x3e5   :  { %v4779_v37 = vperm.slane %v4478_v59, 1  ;;  %v4780_v5 = vperm.slane %v4479_v51, 1  ;;  %v4781_v12 = vperm.slane %v4480_v20, 1  ;;  %v4374_v0 = vadd.f32 %v12945_v53, %v4273_v46  ;;  %v13054_v43 = vpop.f32.mrf.mxu0 }
 0x3e6   :  { %v13037_v44 = vmax.f32 %v4377_v60, 0.0  ;;  %v4718_v23 = vsel %vm1302_vm2, %v4665_v33, %v4664_v62  ;;  %v5073_v2 = vperm.slane %v12736_v36, 0  ;;  %v5074_v53 = vperm.slane %v4469_v58, 0 }
 0x3e7   :  { %v4828_v50 = vsel %vm1304_vm3, %v4779_v37, %v4778_v14  ;;  %v4278_v10 = vpop.f32.mrf.mxu1  ;;  %v4719_v16 = vsel %vm1304_vm3, %v4666_v26, %v4718_v23  ;;  %v5075_v61 = vperm.slane %v4470_v24, 0  ;;  %v5076_v24 = vperm.slane %v4471_v29, 0 }
 0x3e8   :  { %v4829_v52 = vsel %vm1306_vm4, %v4780_v5, %v4828_v50  ;;  %v4481_v41 = vrot.slane %v13037_v44, 2  ;;  %v4482_v63 = vrot.slane %v13037_v44, 4  ;;  %v4483_v13 = vrot.slane %v13037_v44, 6 }
 0x3e9   :  { %v4830_v27 = vsel %vm1308_vm5, %v4781_v12, %v4829_v52  ;;  %v4279_v1 = vadd.f32 %v4278_v10, %v4178_v7  ;;  %v4782_v17 = vperm.slane %v13037_v44, 1  ;;  %v13071_v12 = vmax.f32 %v4374_v0, 0.0 }
 0x3ea   :  { %v13035_v28 = vsel %vm4866_vm12, 0.0, %v4830_v27  ;;  %v4783_v14 = vperm.slane %v4481_v41, 1  ;;  %v4784_v37 = vperm.slane %v4482_v63, 1  ;;  %v4785_v5 = vperm.slane %v4483_v13, 1 }
 0x3eb   :  { %5031 = vrot.lane.b32.xlu1 %v13035_v28, %s6352_s11  ;;  %v4380_v45 = vadd.f32 %v4379_v6, %v4279_v1  ;;  %v13075_v52 = vsel %vm1306_vm4, %v4667_v22, %v4719_v16  ;;  %v5126_v60 = vsel %vm1302_vm2, %v5074_v53, %v5073_v2  ;;  %v4181_v22 = vadd.f32 %v12869_v8, %v12924_v34 }
 0x3ec   :  { %v4831_v4 = vsel %vm1304_vm3, %v4783_v14, %v4782_v17  ;;  %v5127_v6 = vsel %vm1304_vm3, %v5075_v61, %v5126_v60  ;;  %v4382_v33 = vpop.f32.mrf.mxu2  ;;  %v4669_v17 = vperm.slane %v4525_v9, 1  ;;  %v4670_v34 = vperm.slane %v4526_v42, 1 }
 0x3ed   :  { %v4832_v50 = vsel %vm1306_vm4, %v4784_v37, %v4831_v4  ;;  %v13078_v46 = vmax.f32 %v4380_v45, 0.0  ;;  %v13097_v36 = vsel %vm1306_vm4, %v5076_v24, %v5127_v6  ;;  %v13108_v37 = vpop.f32.mrf.mxu0  ;;  %v4535_v2 = vrot.slane %v13071_v12, 4 }
 0x3ee   :  { %v4833_v58 = vsel %vm1308_vm5, %v4785_v5, %v4832_v50  ;;  %v4668_v4 = vperm.slane %v12777_v30, 1  ;;  %v5077_v16 = vperm.slane %v12842_v31, 0  ;;  %v5078_v61 = vperm.slane %v4472_v55, 0 }
 0x3ef   :  { %v13083_v27 = vsel %vm4866_vm12, 0.0, %v4833_v58  ;;  %v4537_v26 = vrot.slane %v13078_v46, 2  ;;  %v4538_v7 = vrot.slane %v13078_v46, 4  ;;  %v4539_v62 = vrot.slane %v13078_v46, 6  ;;  %v4281_v29 = vpop.f32.mrf.mxu1 }
 0x3f0   :  { %5033 = vrot.lane.b32.xlu2 %v13083_v27, %s6352_s11  ;;  %v4586_v0 = vperm.slane %v13078_v46, 0  ;;  %v4282_v14 = vadd.f32 %v4281_v29, %v4181_v22  ;;  %v5079_v50 = vperm.slane %v4473_v21, 0  ;;  %v4671_v60 = vperm.slane %v4527_v32, 1 }
 0x3f1   :  { %v4587_v10 = vperm.slane %v4537_v26, 0  ;;  %v4588_v1 = vperm.slane %v4538_v7, 0  ;;  %v4589_v5 = vperm.slane %v4539_v62, 0  ;;  %v4184_v58 = vadd.f32 %v12869_v8, %v12980_v35 }
 0x3f2   :  { %v13114_v53 = vadd.f32 %v4382_v33, %v4282_v14  ;;  %v4582_v24 = vperm.slane %v13071_v12, 0  ;;  %v4721_v6 = vsel %vm1302_vm2, %v4669_v17, %v4668_v4  ;;  %v4584_v33 = vperm.slane %v4535_v2, 0 }
 0x3f3   :  { %5197 = vrot.lane.b32.xlu1 %v5178_v19, %s6352_s11  ;;  %v4534_v19 = vrot.slane %v13071_v12, 2  ;;  %v4635_v23 = vsel %vm1302_vm2, %v4587_v10, %v4586_v0  ;;  %v4722_v55 = vsel %vm1304_vm3, %v4670_v34, %v4721_v6  ;;  %v5080_v21 = vperm.slane %v4474_v49, 0 }
 0x3f4   :  { %v4636_v45 = vsel %vm1304_vm3, %v4588_v1, %v4635_v23  ;;  %v5129_v30 = vsel %vm1302_vm2, %v5078_v61, %v5077_v16  ;;  %v4536_v32 = vrot.slane %v13071_v12, 6  ;;  %v13142_v22 = vsel %vm1306_vm4, %v4671_v60, %v4722_v55  ;;  %v4385_v10 = vpop.f32.mrf.mxu2 }
 0x3f5   :  { %v4583_v9 = vperm.slane %v4534_v19, 0  ;;  %v4637_v42 = vsel %vm1306_vm4, %v4589_v5, %v4636_v45  ;;  %v5130_v29 = vsel %vm1304_vm3, %v5079_v50, %v5129_v30  ;;  %v4673_v0 = vperm.slane %v4528_v15, 1  ;;  %v13160_v45 = vpop.f32.mrf.mxu0  ;;  %v15917_v50 = vld [vmem:[#allocation126_spill] sm:$0xff] }
 0x3f6   :  { %v13148_v17 = vsel %vm1306_vm4, %v5080_v21, %v5130_v29  ;;  %v4674_v31 = vperm.slane %v4529_v11, 1  ;;  %v4672_v14 = vperm.slane %v12898_v56, 1  ;;  %v4585_v23 = vperm.slane %v4536_v32, 0 }
 0x3f7   :  { %v4632_v35 = vsel %vm1302_vm2, %v4583_v9, %v4582_v24  ;;  %v4284_v1 = vpop.f32.mrf.mxu1  ;;  %v4675_v15 = vperm.slane %v4530_v39, 1  ;;  %v4187_v61 = vadd.f32 %v12869_v8, %v13020_v3  ;;  %v15918_v56 = vrot.slane %v15917_v50, 2  ;;  %v15919_v24 = vld [vmem:[#allocation95_spill] sm:$0xff] }
 0x3f8   :  { %4941 = vrot.lane.b32.xlu2 %v4637_v42, %s6352_s11  ;;  %v4285_v49 = vadd.f32 %v4284_v1, %v4184_v58  ;;  %v4633_v34 = vsel %vm1304_vm3, %v4584_v33, %v4632_v35  ;;  %v4724_v9 = vsel %vm1302_vm2, %v4673_v0, %v4672_v14  ;;  %v4930_v42 = vpop.permute.xlu2 %4929  ;;  %v13174_v58 = vmax.f32 %v12990_v47, 0.0 }
 0x3f9   :  { %v4634_v4 = vsel %vm1306_vm4, %v4585_v23, %v4633_v34  ;;  %v4725_v11 = vsel %vm1304_vm3, %v4674_v31, %v4724_v9  ;;  %v5066_v39 = vperm.slane %v15918_v56, 0  ;;  %v13178_v6 = vsel %vm3877_vm10, %v15919_v24, %v4930_v42 }
 0x3fa   :  { %v13154_v5 = vadd.f32 %v4385_v10, %v4285_v49  ;;  %v13167_v16 = vsel %vm1306_vm4, %v4675_v15, %v4725_v11  ;;  %v5065_v33 = vperm.slane %v15917_v50, 0  ;;  %v5022_v21 = vpop.permute.xlu1 %5021  ;;  %v15920_v35 = vrot.slane %v15919_v24, 1 }
 0x3fb   :  { %v5081_v29 = vperm.slane %v12939_v38, 0  ;;  %v5082_v47 = vperm.slane %v4475_v48, 0  ;;  %v15921_v0 = vrot.slane %v15917_v50, 4  ;;  %v5083_v49 = vperm.slane %v4476_v57, 0 }
 0x3fc   :  { %v4388_v30 = vpop.f32.mrf.mxu2  ;;  %v5253_v3 = vsel %vm3877_vm10, %v15920_v35, %v5022_v21  ;;  %v5120_v14 = vsel %vm1302_vm2, %v5066_v39, %v5065_v33  ;;  %v5180_v34 = vrot.slane %v13083_v27, 1  ;;  %v5084_v23 = vperm.slane %v4477_v25, 0  ;;  %v15923_v33 = vld [vmem:[#allocation96_spill] sm:$0xff] }
 0x3fd   :  { %v5067_v10 = vperm.slane %v15921_v0, 0  ;;  %v5327_v31 = vrot.slane %v5253_v3, 4  ;;  %v5132_v15 = vsel %vm1302_vm2, %v5082_v47, %v5081_v29  ;;  %v15922_v38 = vrot.slane %v15917_v50, 6 }
 0x3fe   :  { %v5133_v9 = vsel %vm1304_vm3, %v5083_v49, %v5132_v15  ;;  %v4531_v11 = vrot.slane %v13174_v58, 2  ;;  %v4532_v42 = vrot.slane %v13174_v58, 4  ;;  %v4533_v39 = vrot.slane %v13174_v58, 6 }
 0x3ff   :  { %v4287_v60 = vpop.f32.mrf.mxu1  ;;  %v5356_v48 = vsel %vm5353_vm13, %v13178_v6, %v5327_v31  ;;  %v13205_v57 = vsel %vm1306_vm4, %v5084_v23, %v5133_v9  ;;  %v5121_v27 = vsel %vm1304_vm3, %v5067_v10, %v5120_v14  ;;  %v5068_v25 = vperm.slane %v15922_v38, 0 }
 0x400   :  { %5229 = vrot.lane.b32.xlu2 %v4634_v4, %s6352_s11  ;;  %v4288_v55 = vadd.f32 %v4287_v60, %v4187_v61  ;;  %5460 = vst [vmem:[#allocation1 + $0x1] ss:$2 sm:$0xff] %v5356_v48  ;;  %v13201_v4 = vpop.f32.mrf.mxu0  ;;  %v5190_v61 = vpop.permute.xlu2 %5189  ;;  %v4676_v60 = vperm.slane %v13174_v58, 1  ;;  %v4190_v21 = vadd.f32 %v12869_v8, %v13054_v43  ;;  %v4678_v35 = vperm.slane %v4532_v42, 1 }
 0x401   :  { %v5122_v24 = vsel %vm1306_vm4, %v5068_v25, %v5121_v27  ;;  %v4679_v10 = vperm.slane %v4533_v39, 1  ;;  %v5085_v48 = vperm.slane %v13010_v40, 0  ;;  %v5086_v9 = vperm.slane %v4478_v59, 0 }
 0x402   :  { %v13189_v1 = vadd.f32 %v4388_v30, %v4288_v55  ;;  %v4677_v30 = vperm.slane %v4531_v11, 1  ;;  %v5267_v3 = vsel %vm3877_vm10, %v5122_v24, %v5190_v61  ;;  %v5087_v61 = vperm.slane %v4479_v51, 0 }
 0x404   :  { %v4932_v56 = vpop.permute.xlu0 %4931  ;;  %v4727_v31 = vsel %vm1302_vm2, %v4677_v30, %v4676_v60  ;;  %v4391_v49 = vpop.f32.mrf.mxu2  ;;  %v4885_v30 = vrot.slane %v13075_v52, 7  ;;  %v4681_v52 = vperm.slane %v4534_v19, 1 }
 0x405   :  { %v5241_v55 = vsel %vm3877_vm10, %v15923_v33, %v4932_v56  ;;  %v4728_v43 = vsel %vm1304_vm3, %v4678_v35, %v4727_v31  ;;  %v5135_v56 = vsel %vm1302_vm2, %v5086_v9, %v5085_v48 }
 0x406   :  { %v5328_v50 = vrot.slane %v5241_v55, 4 }
 0x407   :  { %v4290_v29 = vpop.f32.mrf.mxu1 }
 0x408   :  { %5201 = vrot.lane.b32.xlu2 %v5180_v34, %s6352_s11  ;;  %v4291_v47 = vadd.f32 %v4290_v29, %v4190_v21  ;;  %v5357_v0 = vsel %vm5353_vm13, %v5267_v3, %v5328_v50  ;;  %v13230_v34 = vsel %vm1306_vm4, %v4679_v10, %v4728_v43  ;;  %v13232_v23 = vpop.f32.mrf.mxu0  ;;  %v4193_v50 = vadd.f32 %v12869_v8, %v13108_v37  ;;  %v15924_v3 = vld [vmem:[#allocation49_spill] sm:$0xff] }
 0x409   :  { %5464 = vst [vmem:[#allocation1 + $0x11] ss:$2 sm:$0xff] %v5357_v0  ;;  %v15925_v29 = vrot.slane %v15924_v3, 2  ;;  %v15926_v10 = vrot.slane %v15923_v33, 1  ;;  %v5136_v37 = vsel %vm1304_vm3, %v5087_v61, %v5135_v56  ;;  %v5069_v9 = vperm.slane %v15924_v3, 0 }
 0x40a   :  { %v4392_v14 = vadd.f32 %v4391_v49, %v4291_v47  ;;  %v5088_v47 = vperm.slane %v4480_v20, 0  ;;  %v4682_v20 = vperm.slane %v4535_v2, 1  ;;  %v13277_v61 = vsel %vm4866_vm12, 0.0, %v4885_v30 }
 0x40b   :  { %v5070_v51 = vperm.slane %v15925_v29, 0  ;;  %v4680_v2 = vperm.slane %v13071_v12, 1  ;;  %v14815_v29 = vrot.slane %v13277_v61, 1 }
 0x40c   :  { %v13234_v15 = vmax.f32 %v4392_v14, 0.0 }
 0x40d   :  { %v4730_v30 = vsel %vm1302_vm2, %v4681_v52, %v4680_v2  ;;  %v13322_v2 = vpop.f32.mrf.mxu2 }
 0x40e   :  { %v4543_v27 = vrot.slane %v13234_v15, 2  ;;  %v4544_v38 = vrot.slane %v13234_v15, 4  ;;  %v4545_v25 = vrot.slane %v13234_v15, 6  ;;  %v4594_v24 = vperm.slane %v13234_v15, 0 }
 0x410   :  { %v4595_v21 = vperm.slane %v4543_v27, 0  ;;  %v4596_v59 = vperm.slane %v4544_v38, 0  ;;  %v4597_v49 = vperm.slane %v4545_v25, 0 }
 0x412   :  { %v4641_v43 = vsel %vm1302_vm2, %v4595_v21, %v4594_v24  ;;  %v13281_v56 = vpop.f32.mrf.mxu0  ;;  %v15927_v24 = vrot.slane %v15924_v3, 4 }
 0x413   :  { %v4642_v40 = vsel %vm1304_vm3, %v4596_v59, %v4641_v43  ;;  %v5123_v59 = vsel %vm1302_vm2, %v5070_v51, %v5069_v9  ;;  %v4196_v43 = vadd.f32 %v12869_v8, %v13160_v45 }
 0x414   :  { %v5024_v35 = vpop.permute.xlu1 %5023  ;;  %v4293_v0 = vpop.f32.mrf.mxu1  ;;  %v4643_v33 = vsel %vm1306_vm4, %v4597_v49, %v4642_v40  ;;  %v5071_v21 = vperm.slane %v15927_v24, 0  ;;  %v5089_v40 = vperm.slane %v13037_v44, 0  ;;  %v4686_v44 = vperm.slane %v4538_v7, 1 }
 0x415   :  { %v5254_v31 = vsel %vm3877_vm10, %v15926_v10, %v5024_v35  ;;  %v13266_v14 = vadd.f32 %v4293_v0, %v4193_v50  ;;  %v13274_v35 = vsel %vm1306_vm4, %v5088_v47, %v5136_v37  ;;  %4945 = vrot.lane.b32.xlu2 %v4643_v33, %s6352_s11  ;;  %v4683_v50 = vperm.slane %v4536_v32, 1 }
 0x416   :  { %v5329_v48 = vrot.slane %v5254_v31, 4  ;;  %v4731_v47 = vsel %vm1304_vm3, %v4682_v20, %v4730_v30  ;;  %v5124_v10 = vsel %vm1304_vm3, %v5071_v21, %v5123_v59  ;;  %v15928_v32 = vrot.slane %v15924_v3, 6 }
 0x417   :  { %v13296_v31 = vsel %vm1306_vm4, %v4683_v50, %v4731_v47  ;;  %v5090_v20 = vperm.slane %v4481_v41, 0  ;;  %v5092_v21 = vperm.slane %v4483_v13, 0  ;;  %v4685_v30 = vperm.slane %v4537_v26, 1 }
 0x418   :  { %v5026_v60 = vpop.permute.xlu2 %5025  ;;  %v5358_v19 = vsel %vm5353_vm13, %v5241_v55, %v5329_v48  ;;  %v5072_v51 = vperm.slane %v15928_v32, 0  ;;  %v13337_v47 = vmax.f32 %v13114_v53, 0.0  ;;  %v4886_v32 = vrot.slane %v13142_v22, 7 }
 0x419   :  { %5470 = vst [vmem:[#allocation1 + $0x30] ss:$2 sm:$0xff] %v5358_v19  ;;  %v5255_v12 = vsel %vm3877_vm10, %v14815_v29, %v5026_v60  ;;  %v5091_v60 = vperm.slane %v4482_v63, 0  ;;  %v5138_v41 = vsel %vm1302_vm2, %v5090_v20, %v5089_v40  ;;  %v13365_v20 = vmax.f32 %v13154_v5, 0.0 }
 0x41a   :  { %v5125_v37 = vsel %vm1306_vm4, %v5072_v51, %v5124_v10  ;;  %v5331_v52 = vrot.slane %v5255_v12, 4  ;;  %v4687_v10 = vperm.slane %v4539_v62, 1  ;;  %v4484_v7 = vrot.slane %v13337_v47, 2 }
 0x41b   :  { %v5139_v63 = vsel %vm1304_vm3, %v5091_v60, %v5138_v41  ;;  %v4485_v53 = vrot.slane %v13337_v47, 4  ;;  %v4887_v5 = vrot.slane %v13167_v16, 7 }
 0x41c   :  { %v5192_v49 = vpop.permute.xlu1 %5191  ;;  %v13329_v50 = vsel %vm1306_vm4, %v5092_v21, %v5139_v63  ;;  %v5094_v40 = vperm.slane %v4484_v7, 0  ;;  %v14817_v63 = vrot.slane %v13365_v20, 2 }
 0x41d   :  { %v5268_v45 = vsel %vm3877_vm10, %v5125_v37, %v5192_v49  ;;  %v14818_v37 = vrot.slane %v13337_v47, 6  ;;  %v5095_v60 = vperm.slane %v4485_v53, 0 }
 0x420   :  { %v5194_v55 = vpop.permute.xlu2 %5193 }
 0x421   :  { %v5269_v0 = vsel %vm3877_vm10, %v13097_v36, %v5194_v55  ;;  %v4296_v36 = vpop.f32.mrf.mxu1  ;;  %v4684_v55 = vperm.slane %v13078_v46, 1  ;;  %v13354_v46 = vsel %vm4866_vm12, 0.0, %v4886_v32 }
 0x422   :  { %v13311_v33 = vadd.f32 %v4296_v36, %v4196_v43  ;;  %v13350_v43 = vpop.f32.mrf.mxu2 }
 0x423   :  { %v4934_v48 = vpop.permute.xlu0 %4933  ;;  %v4733_v12 = vsel %vm1302_vm2, %v4685_v30, %v4684_v55  ;;  %v14816_v30 = vrot.slane %v13365_v20, 4  ;;  %v4688_v55 = vperm.slane %v13365_v20, 1 }
 0x424   :  { %v5242_v3 = vsel %vm3877_vm10, %v13277_v61, %v4934_v48  ;;  %v4734_v51 = vsel %vm1304_vm3, %v4686_v44, %v4733_v12  ;;  %v5093_v48 = vperm.slane %v13337_v47, 0  ;;  %v14819_v44 = vrot.slane %v13365_v20, 6 }
 0x425   :  { %v5330_v9 = vrot.slane %v5242_v3, 4  ;;  %v5360_v19 = vsel %vm5353_vm13, %v5242_v3, %v5331_v52  ;;  %v13317_v24 = vpop.f32.mrf.mxu0  ;;  %v13347_v26 = vsel %vm1306_vm4, %v4687_v10, %v4734_v51  ;;  %v4579_v10 = vperm.slane %v4531_v11, 0  ;;  %v15930_v51 = vld [vmem:[#allocation131_spill] sm:$0xff] }
 0x426   :  { %5472 = vst [vmem:[#allocation1 + $0x31] ss:$2 sm:$0xff] %v5360_v19  ;;  %v4689_v12 = vperm.slane %v14817_v63, 1  ;;  %v4690_v32 = vperm.slane %v14816_v30, 1  ;;  %v4133_v16 = vadd.f32 %v12869_v8, %v15930_v51  ;;  %v4578_v11 = vperm.slane %v13174_v58, 0 }
 0x427   :  { %v13326_v59 = vsel %vm5353_vm13, %v5268_v45, %v5330_v9  ;;  %v5096_v45 = vperm.slane %v14818_v37, 0  ;;  %v5141_v9 = vsel %vm1302_vm2, %v5094_v40, %v5093_v48  ;;  %v6235_v48 = vunpack.i.h.bf16 %v12947_v54 }
 0x428   :  { %v5142_v21 = vsel %vm1304_vm3, %v5095_v60, %v5141_v9  ;;  %v13397_v40 = vsel %vm4866_vm12, 0.0, %v4887_v5  ;;  %v4736_v9 = vsel %vm1302_vm2, %v4689_v12, %v4688_v55  ;;  %v14821_v51 = vrot.slane %v13354_v46, 1 }
 0x429   :  { %v13379_v41 = vsel %vm1306_vm4, %v5096_v45, %v5142_v21  ;;  %v4691_v45 = vperm.slane %v14819_v44, 1  ;;  %v15932_v21 = vld [vmem:[#allocation73_spill] sm:$0xff]  ;;  %v4737_v54 = vsel %vm1304_vm3, %v4690_v32, %v4736_v9  ;;  %v13411_v5 = vmax.f32 %v13189_v1, 0.0 }
 0x42a   :  { %v4299_v13 = vpop.f32.mrf.mxu1  ;;  %15929 = vst [vmem:[#allocation67_spill] sm:$0xff] %v13379_v41  ;;  %v4234_v29 = vadd.f32 %v15932_v21, %v4133_v16  ;;  %v4199_v30 = vadd.f32 %v12869_v8, %v13201_v4  ;;  %v4629_v44 = vsel %vm1302_vm2, %v4579_v10, %v4578_v11  ;;  %v5177_v1 = vrot.slane %v12922_v18, 1 }
 0x42b   :  { %v13417_v55 = vsel %vm1306_vm4, %v4691_v45, %v4737_v54 }
 0x42c   :  { %v4300_v4 = vadd.f32 %v4299_v13, %v4199_v30  ;;  %v4581_v13 = vperm.slane %v4533_v39, 0  ;;  %v4487_v30 = vrot.slane %v13411_v5, 2 }
 0x431   :  { %v13344_v49 = vpop.f32.mrf.mxu0 }
 0x432   :  { %v13357_v22 = vpop.f32.mrf.mxu1 }
 0x435   :  { %v4936_v62 = vpop.permute.xlu0 %4935 }
 0x436   :  { %v5243_v52 = vsel %vm3877_vm10, %v13354_v46, %v4936_v62  ;;  %v15931_v62 = vmov 0.0  }
 0x437   :  { %v5332_v36 = vrot.slane %v5243_v52, 4 }
 0x439   :  { %v13370_v3 = vsel %vm5353_vm13, %v5269_v0, %v5332_v36  ;;  %v4400_v0 = vpop.f32.mrf.mxu2  ;;  %v4882_v36 = vrot.slane %v15931_v62, 7  ;;  %v4580_v62 = vperm.slane %v4532_v42, 0  ;;  %v14820_v42 = vrot.slane %v13397_v40, 1 }
 0x43b   :  { %v13375_v19 = vpop.f32.mrf.mxu0  ;;  %v13420_v12 = vsel %vm4866_vm12, 0.0, %v4882_v36 }
 0x43c   :  { %v13426_v9 = vsel %vm3877_vm10, %v13420_v12, %v6235_v48  ;;  %v13440_v48 = vadd.f32 %v12869_v8, %v13232_v23  ;;  %v4401_v23 = vadd.f32 %v4400_v0, %v4300_v4  ;;  %v4205_v0 = vadd.f32 %v12869_v8, %v13281_v56 }
 0x43d   :  { %v13399_v60 = vpop.f32.mrf.mxu1  ;;  %v5030_v63 = vpop.permute.xlu2 %5029  ;;  %v4398_v56 = vadd.f32 %v13350_v43, %v13311_v33 }
 0x43e   :  { %v5257_v36 = vsel %vm3877_vm10, %v14820_v42, %v5030_v63  ;;  %v14825_v42 = vrot.slane %v13420_v12, 1  ;;  %v4306_v33 = vadd.f32 %v13399_v60, %v4205_v0  ;;  %v4788_v0 = vperm.slane %v4485_v53, 1  ;;  %v4412_v53 = vpop.f32.mrf.mxu3 }
 0x441   :  { %v13445_v21 = vpop.f32.mrf.mxu2 }
 0x443   :  { %v4334_v37 = vpop.f32.mrf.mxu0 }
 0x444   :  { %v4335_v32 = vadd.f32 %v4334_v37, %v4234_v29  ;;  %v4630_v29 = vsel %vm1304_vm3, %v4580_v62, %v4629_v44  ;;  %v5179_v37 = vrot.slane %v13035_v28, 1  ;;  %v4693_v62 = vperm.slane %v4543_v27, 1 }
 0x445   :  { %v5028_v16 = vpop.permute.xlu1 %5027  ;;  %v13454_v58 = vsel %vm1306_vm4, %v4581_v13, %v4630_v29  ;;  %v4395_v27 = vadd.f32 %v13322_v2, %v13266_v14  ;;  %v14826_v29 = vrot.slane %v13411_v5, 4  ;;  %v4791_v14 = vperm.slane %v4487_v30, 1 }
 0x446   :  { %v5256_v10 = vsel %vm3877_vm10, %v14821_v51, %v5028_v16  ;;  %v13434_v45 = vmax.f32 %v4335_v32, 0.0  ;;  %v5335_v32 = vrot.slane %v5257_v36, 4  ;;  %v13482_v2 = vmax.f32 %v4401_v23, 0.0 }
 0x447   :  { %v5333_v11 = vrot.slane %v5256_v10, 4  ;;  %v5097_v28 = vperm.slane %v13411_v5, 0 }
 0x448   :  { %v14823_v54 = vrot.slane %v13434_v45, 2  ;;  %v14822_v16 = vrot.slane %v13434_v45, 4  ;;  %v14824_v44 = vrot.slane %v13434_v45, 6  ;;  %v4754_v10 = vperm.slane %v13434_v45, 1 }
 0x449   :  { %v5362_v63 = vsel %vm5353_vm13, %v5243_v52, %v5333_v11  ;;  %v4938_v39 = vpop.permute.xlu0 %4937 }
 0x44a   :  { %5484 = vst [vmem:[#allocation1 + $0x20] ss:$2 sm:$0xff] %v5362_v63  ;;  %v4755_v52 = vperm.slane %v14823_v54, 1  ;;  %v4756_v11 = vperm.slane %v14822_v16, 1  ;;  %v13470_v36 = vsel %vm3877_vm10, %v13397_v40, %v4938_v39  ;;  %v4757_v63 = vperm.slane %v14824_v44, 1  ;;  %v5034_v16 = vpop.permute.xlu2 %5033 }
 0x44b   :  { %v13466_v4 = vpop.f32.mrf.mxu1  ;;  %v5364_v13 = vsel %vm5353_vm13, %v13470_v36, %v5335_v32  ;;  %v4889_v54 = vrot.slane %v13296_v31, 7  ;;  %v4787_v44 = vperm.slane %v4484_v7, 1  ;;  %v4694_v7 = vperm.slane %v4544_v38, 1 }
 0x44c   :  { %v4810_v51 = vsel %vm1304_vm3, %v4755_v52, %v4754_v10  ;;  %5485 = vst [vmem:[#allocation1 + $0x21] ss:$2 sm:$0xff] %v5364_v13  ;;  %v5259_v10 = vsel %vm3877_vm10, %v14825_v42, %v5034_v16  ;;  %v4790_v52 = vperm.slane %v13411_v5, 1  ;;  %v4786_v13 = vperm.slane %v13337_v47, 1 }
 0x44d   :  { %v4811_v39 = vsel %vm1306_vm4, %v4756_v11, %v4810_v51  ;;  %v5339_v23 = vrot.slane %v5259_v10, 4  ;;  %v4792_v51 = vperm.slane %v14826_v29, 1  ;;  %v14827_v11 = vrot.slane %v13411_v5, 6 }
 0x44e   :  { %v4812_v32 = vsel %vm1308_vm5, %v4757_v63, %v4811_v39  ;;  %v4837_v16 = vsel %vm1304_vm3, %v4791_v14, %v4790_v52  ;;  %v4692_v63 = vperm.slane %v13234_v15, 1  ;;  %v4406_v39 = vpop.f32.mrf.mxu2  ;;  %v4211_v14 = vadd.f32 %v12869_v8, %v13344_v49 }
 0x44f   :  { %v4867_v43 = vsel %vm4866_vm12, 0.0, %v4812_v32  ;;  %v13505_v60 = vsel %vm5353_vm13, %v13426_v9, %v5339_v23  ;;  %v4695_v32 = vperm.slane %v4545_v25, 1  ;;  %v4834_v38 = vsel %vm1304_vm3, %v4787_v44, %v4786_v13 }
 0x450   :  { %5019 = vrot.lane.b32.xlu0 %v4867_v43, %s6352_s11  ;;  %v5173_v31 = vrot.slane %v4867_v43, 1  ;;  %v4493_v10 = vrot.slane %v13482_v2, 2  ;;  %v13517_v52 = vmax.f32 %v4398_v56, 0.0  ;;  %v4407_v43 = vadd.f32 %v4406_v39, %v4306_v33 }
 0x451   :  { %v4838_v42 = vsel %vm1306_vm4, %v4792_v51, %v4837_v16  ;;  %v4739_v29 = vsel %vm1302_vm2, %v4693_v62, %v4692_v63  ;;  %v13521_v15 = vmax.f32 %v4395_v27, 0.0  ;;  %v4793_v49 = vperm.slane %v14827_v11, 1 }
 0x452   :  { %5187 = vrot.lane.b32.xlu1 %v5173_v31, %s6352_s11  ;;  %v13526_v31 = vsel %vm4866_vm12, 0.0, %v4889_v54  ;;  %v4208_v44 = vadd.f32 %v12869_v8, %v13317_v24  ;;  %v4942_v56 = vpop.permute.xlu2 %4941  ;;  %v4835_v33 = vsel %vm1306_vm4, %v4788_v0, %v4834_v38  ;;  %v4494_v13 = vrot.slane %v13482_v2, 4 }
 0x453   :  { %v4311_v23 = vpop.f32.mrf.mxu1  ;;  %v4740_v51 = vsel %vm1304_vm3, %v4694_v7, %v4739_v29  ;;  %v4839_v27 = vsel %vm1308_vm5, %v4793_v49, %v4838_v42  ;;  %v15933_v16 = vrot.slane %v13337_v47, 6  ;;  %v4799_v54 = vperm.slane %v4493_v10, 1 }
 0x454   :  { %v4312_v25 = vadd.f32 %v4311_v23, %v4211_v14  ;;  %v4303_v8 = vadd.f32 %v13357_v22, %v13440_v48  ;;  %v13541_v24 = vmax.f32 %v4407_v43, 0.0  ;;  %v4890_v0 = vrot.slane %v13347_v26, 7 }
 0x455   :  { %v4789_v63 = vperm.slane %v15933_v16, 1  ;;  %v4798_v42 = vperm.slane %v13482_v2, 1  ;;  %v15934_v29 = vrot.slane %v13365_v20, 2  ;;  %v4309_v38 = vadd.f32 %v13466_v4, %v4208_v44 }
 0x456   :  { %v4413_v62 = vadd.f32 %v4412_v53, %v4312_v25  ;;  %v13554_v22 = vsel %vm4866_vm12, 0.0, %v4839_v27  ;;  %v4800_v26 = vperm.slane %v4494_v13, 1  ;;  %v13559_v48 = vsel %vm1306_vm4, %v4695_v32, %v4740_v51  ;;  %v4409_v44 = vpop.f32.mrf.mxu2 }
 0x457   :  { %v4836_v47 = vsel %vm1308_vm5, %v4789_v63, %v4835_v33  ;;  %v4591_v7 = vperm.slane %v15934_v29, 0  ;;  %15935 = vst [vmem:[#allocation35_spill] sm:$0xff] %v13559_v48  ;;  %v4843_v4 = vsel %vm1304_vm3, %v4799_v54, %v4798_v42  ;;  %v4404_v53 = vadd.f32 %v13445_v21, %v4303_v8 }
 0x458   :  { %v13544_v14 = vmax.f32 %v4413_v62, 0.0  ;;  %4939 = vrot.lane.b32.xlu0 %v13454_v58, %s6352_s11  ;;  %v14833_v25 = vrot.slane %v13482_v2, 6  ;;  %v4590_v49 = vperm.slane %v13365_v20, 0  ;;  %v14832_v32 = vrot.slane %v13541_v24, 2 }
 0x459   :  { %v15936_v27 = vrot.slane %v13365_v20, 4  ;;  %v4410_v63 = vadd.f32 %v4409_v44, %v4309_v38  ;;  %v4875_v21 = vsel %vm4866_vm12, 0.0, %v4836_v47  ;;  %v4844_v8 = vsel %vm1306_vm4, %v4800_v26, %v4843_v4 }
 0x45a   :  { %5037 = vrot.lane.b32.xlu1 %v13554_v22, %s6352_s11  ;;  %v14828_v58 = vrot.slane %v13544_v14, 2  ;;  %v14829_v43 = vrot.slane %v13544_v14, 4  ;;  %v14830_v23 = vrot.slane %v13544_v14, 6  ;;  %v4806_v33 = vperm.slane %v13544_v14, 1  ;;  %v5230_v54 = vpop.permute.xlu2 %5229 }
 0x45b   :  { %v4592_v16 = vperm.slane %v15936_v27, 0  ;;  %v4638_v42 = vsel %vm1302_vm2, %v4591_v7, %v4590_v49  ;;  %v13589_v27 = vmax.f32 %v4404_v53, 0.0  ;;  %v4801_v38 = vperm.slane %v14833_v25, 1 }
 0x45c   :  { %v4807_v51 = vperm.slane %v14828_v58, 1  ;;  %v4808_v62 = vperm.slane %v14829_v43, 1  ;;  %v4809_v29 = vperm.slane %v14830_v23, 1  ;;  %v13586_v58 = vsel %vm3877_vm10, %v13526_v31, %v5230_v54 }
 0x45d   :  { %v14831_v43 = vrot.slane %v13541_v24, 4  ;;  %v4803_v7 = vperm.slane %v14832_v32, 1  ;;  %v13598_v4 = vsel %vm4866_vm12, 0.0, %v4890_v0  ;;  %v5181_v49 = vrot.slane %v4875_v21, 1 }
 0x45e   :  { %v4849_v11 = vsel %vm1304_vm3, %v4807_v51, %v4806_v33  ;;  %v4639_v53 = vsel %vm1304_vm3, %v4592_v16, %v4638_v42  ;;  %v4845_v44 = vsel %vm1308_vm5, %v4801_v38, %v4844_v8  ;;  %v15937_v33 = vrot.slane %v13365_v20, 6 }
 0x45f   :  { %v4850_v47 = vsel %vm1306_vm4, %v4808_v62, %v4849_v11  ;;  %v4802_v62 = vperm.slane %v13541_v24, 1  ;;  %v13611_v54 = vmax.f32 %v4410_v63, 0.0  ;;  %v13617_v18 = vsel %vm3877_vm10, %v13598_v4, %v4942_v56 }
 0x460   :  { %v4851_v26 = vsel %vm1308_vm5, %v4809_v29, %v4850_v47  ;;  %5195 = vrot.lane.b32.xlu0 %v5177_v1, %s6352_s11  ;;  %v4593_v51 = vperm.slane %v15937_v33, 0  ;;  %15938 = vst [vmem:[#allocation33_spill] sm:$0xff] %v13617_v18  ;;  %v4804_v1 = vperm.slane %v14831_v43, 1  ;;  %v4490_v20 = vrot.slane %v13521_v15, 2 }
 0x461   :  { %v13605_v11 = vsel %vm4866_vm12, 0.0, %v4851_v26  ;;  %v14834_v63 = vrot.slane %v13541_v24, 6  ;;  %v4846_v8 = vsel %vm1304_vm3, %v4803_v7, %v4802_v62  ;;  %v13630_v56 = vsel %vm4866_vm12, 0.0, %v4845_v44  ;;  %v13641_v33 = vld.sshfl [vmem:[#allocation1 + $0x20] sm:$0xff pattern:$0x75316420] }
 0x462   :  { %5045 = vrot.lane.b32.xlu2 %v13605_v11, %s6352_s11  ;;  %5199 = vrot.lane.b32.xlu1 %v5179_v37, %s6352_s11  ;;  %v4640_v16 = vsel %vm1306_vm4, %v4593_v51, %v4639_v53  ;;  %v14835_v42 = vrot.slane %v13517_v52, 2  ;;  %v5098_v37 = vperm.slane %v4487_v30, 0  ;;  %v5340_v29 = vrot.slane %v13617_v18, 4  ;;  %v5202_v47 = vpop.permute.xlu2 %5201  ;;  %15940 = vst [vmem:[#allocation31_spill] sm:$0xff] %v13641_v33 }
 0x463   :  { %v4491_v38 = vrot.slane %v13521_v15, 4  ;;  %v14836_v26 = vrot.slane %v13517_v52, 4  ;;  %v15939_v53 = vrot.slane %v13411_v5, 4  ;;  %v5273_v44 = vsel %vm3877_vm10, %v13329_v50, %v5202_v47  ;;  %v13648_v43 = vld.sshfl [vmem:[#allocation1 + $0x28] sm:$0xff pattern:$0x75316420] }
 0x464   :  { %v4847_v51 = vsel %vm1306_vm4, %v4804_v1, %v4846_v8  ;;  %v4795_v62 = vperm.slane %v4490_v20, 1  ;;  %v4552_v30 = vrot.slane %v13611_v54, 2  ;;  %v5184_v23 = vrot.slane %v13630_v56, 1  ;;  %15941 = vst [vmem:[#allocation75_spill] sm:$0xff] %v13648_v43 }
 0x465   :  { %v5099_v7 = vperm.slane %v15939_v53, 0  ;;  %v5369_v32 = vsel %vm5353_vm13, %v5273_v44, %v5340_v29  ;;  %v4805_v0 = vperm.slane %v14834_v63, 1  ;;  %v14837_v53 = vrot.slane %v13517_v52, 6 }
 0x466   :  { %5500 = vst [vmem:[#allocation1 + $0x21] ss:$2 sm:$0xff] %v5369_v32  ;;  %v4492_v50 = vrot.slane %v13521_v15, 6  ;;  %v4794_v1 = vperm.slane %v13521_v15, 1  ;;  %v4697_v8 = vperm.slane %v14835_v42, 1  ;;  %v14839_v47 = vrot.slane %v13589_v27, 2 }
 0x467   :  { %v4848_v25 = vsel %vm1308_vm5, %v4805_v0, %v4847_v51  ;;  %v4796_v29 = vperm.slane %v4491_v38, 1  ;;  %v4698_v44 = vperm.slane %v14836_v26, 1  ;;  %v5101_v63 = vperm.slane %v13521_v15, 0 }
 0x468   :  { %5035 = vrot.lane.b32.xlu0 %v4875_v21, %s6352_s11  ;;  %v4840_v32 = vsel %vm1304_vm3, %v4795_v62, %v4794_v1  ;;  %v4553_v21 = vrot.slane %v13611_v54, 4  ;;  %v4607_v42 = vperm.slane %v4552_v30, 0  ;;  %v4699_v0 = vperm.slane %v14837_v53, 1 }
 0x469   :  { %v5105_v51 = vperm.slane %v13482_v2, 0  ;;  %v5106_v15 = vperm.slane %v4493_v10, 0  ;;  %v4701_v62 = vperm.slane %v14839_v47, 1  ;;  %v15942_v1 = vperm.slane %v13517_v52, 1 }
 0x46a   :  { %5203 = vrot.lane.b32.xlu2 %v5181_v49, %s6352_s11  ;;  %5041 = vrot.lane.b32.xlu1 %v13630_v56, %s6352_s11  ;;  %v5107_v49 = vperm.slane %v4494_v13, 0  ;;  %v5102_v39 = vperm.slane %v4490_v20, 0  ;;  %v15943_v53 = vrot.slane %v13482_v2, 6  ;;  %v5103_v33 = vperm.slane %v4491_v38, 0 }
 0x46b   :  { %v4742_v26 = vsel %vm1302_vm2, %v4697_v8, %v15942_v1  ;;  %v5150_v41 = vsel %vm1302_vm2, %v5106_v15, %v5105_v51  ;;  %v15944_v13 = vrot.slane %v13589_v27, 4  ;;  %v5104_v2 = vperm.slane %v4492_v50, 0 }
 0x46c   :  { %v5108_v43 = vperm.slane %v15943_v53, 0  ;;  %v4743_v10 = vsel %vm1304_vm3, %v4698_v44, %v4742_v26  ;;  %v5151_v56 = vsel %vm1304_vm3, %v5107_v49, %v5150_v41  ;;  %v5147_v48 = vsel %vm1302_vm2, %v5102_v39, %v5101_v63 }
 0x46d   :  { %v4702_v18 = vperm.slane %v15944_v13, 1  ;;  %v13691_v47 = vsel %vm1306_vm4, %v4699_v0, %v4743_v10  ;;  %v5148_v53 = vsel %vm1304_vm3, %v5103_v33, %v5147_v48  ;;  %v5144_v8 = vsel %vm1302_vm2, %v5098_v37, %v5097_v28 }
 0x46e   :  { %v13695_v20 = vsel %vm1306_vm4, %v5108_v43, %v5151_v56  ;;  %v13701_v38 = vsel %vm4866_vm12, 0.0, %v4848_v25  ;;  %v4797_v26 = vperm.slane %v4492_v50, 1  ;;  %v4841_v41 = vsel %vm1306_vm4, %v4796_v29, %v4840_v32 }
 0x46f   :  { %v4606_v44 = vperm.slane %v13611_v54, 0  ;;  %v4608_v0 = vperm.slane %v4553_v21, 0  ;;  %v15945_v39 = vperm.slane %v13589_v27, 1  ;;  %v13709_v63 = vsel %vm1306_vm4, %v5104_v2, %v5148_v53 }
 0x470   :  { %4943 = vrot.lane.b32.xlu0 %v4640_v16, %s6352_s11  ;;  %v5145_v48 = vsel %vm1304_vm3, %v5099_v7, %v5144_v8  ;;  %v4554_v25 = vrot.slane %v13611_v54, 6  ;;  %v15946_v28 = vrot.slane %v13589_v27, 6  ;;  %v15947_v33 = vrot.slane %v13411_v5, 6 }
 0x471   :  { %v4745_v43 = vsel %vm1302_vm2, %v4701_v62, %v15945_v39  ;;  %v4650_v16 = vsel %vm1302_vm2, %v4607_v42, %v4606_v44  ;;  %v4842_v29 = vsel %vm1308_vm5, %v4797_v26, %v4841_v41  ;;  %v4705_v7 = vperm.slane %v4552_v30, 1  ;;  %v5397_v41 = vld [vmem:[%s14197_s3 + $0x78] sm:$0xff]  ;;  %v5396_v44 = vld [vmem:[%s14197_s3 + $0x70] sm:$0xff] }
 0x472   :  { %5209 = vrot.lane.b32.xlu2 %v5184_v23, %s6352_s11  ;;  %5043 = vrot.lane.b32.xlu1 %v13701_v38, %s6352_s11  ;;  %v4703_v37 = vperm.slane %v15946_v28, 1  ;;  %v5100_v50 = vperm.slane %v15947_v33, 0  ;;  %v4746_v32 = vsel %vm1304_vm3, %v4702_v18, %v4745_v43  ;;  %v4651_v15 = vsel %vm1304_vm3, %v4608_v0, %v4650_v16  ;;  %v4314_v28 = vpop.f32.mrf.mxu1 }
 0x473   :  { %v4706_v42 = vperm.slane %v4553_v21, 1  ;;  %v15948_v49 = vrot.slane %v13517_v52, 2  ;;  %v4704_v5 = vperm.slane %v13611_v54, 1  ;;  %v5186_v62 = vrot.slane %v13605_v11, 1  ;;  %5584 = vmatpush.msrb.mxu3 %v5397_v41 }
 0x474   :  { %v13724_v23 = vsel %vm1306_vm4, %v4703_v37, %v4746_v32  ;;  %v13727_v51 = vsel %vm1306_vm4, %v5100_v50, %v5145_v48  ;;  %v4877_v1 = vsel %vm4866_vm12, 0.0, %v4842_v29  ;;  %v4609_v18 = vperm.slane %v4554_v25, 0  ;;  %v5395_v37 = vld [vmem:[%s14197_s3 + $0x68] sm:$0xff] }
 0x475   :  { %v4599_v56 = vperm.slane %v15948_v49, 0  ;;  %v4598_v30 = vperm.slane %v13517_v52, 0  ;;  %v5109_v10 = vperm.slane %v13541_v24, 0  ;;  %v15949_v13 = vrot.slane %v13541_v24, 2  ;;  %5585 = vmatpush.msrb.mxu3 %v5396_v44 }
 0x476   :  { %v15950_v53 = vrot.slane %v13541_v24, 4  ;;  %v4652_v8 = vsel %vm1306_vm4, %v4609_v18, %v4651_v15  ;;  %v4707_v54 = vperm.slane %v4554_v25, 1  ;;  %v15951_v11 = vrot.slane %v13517_v52, 4 }
 0x477   :  { %v5110_v2 = vperm.slane %v15949_v13, 0  ;;  %v4748_v0 = vsel %vm1302_vm2, %v4705_v7, %v4704_v5  ;;  %v4644_v39 = vsel %vm1302_vm2, %v4599_v56, %v4598_v30  ;;  %v15952_v48 = vrot.slane %v13541_v24, 6  ;;  %v6322_v24 = vld [vmem:[%s14196_s2] ss:$0 sm:$0xff]  ;;  %5586 = vmatpush.msrb.mxu3 %v5395_v37  ;;  %v4415_v13 = vpop.f32.mrf.mxu3 }
 0x478   :  { %v5111_v21 = vperm.slane %v15950_v53, 0  ;;  %5039 = vrot.lane.b32.xlu0 %v4877_v1, %s6352_s11  ;;  %v4600_v26 = vperm.slane %v15951_v11, 0  ;;  %v4749_v43 = vsel %vm1304_vm3, %v4706_v42, %v4748_v0  ;;  %v4214_v29 = vadd.f32 %v6322_v24, %v13375_v19 }
 0x479   :  { %v5112_v25 = vperm.slane %v15952_v48, 0  ;;  %v5153_v16 = vsel %vm1302_vm2, %v5110_v2, %v5109_v10  ;;  %v13763_v33 = vsel %vm1306_vm4, %v4707_v54, %v4749_v43  ;;  %v5061_v15 = vperm.slane %v13434_v45, 0 }
 0x47a   :  { %5213 = vrot.lane.b32.xlu2 %v5186_v62, %s6352_s11  ;;  %4951 = vrot.lane.b32.xlu1 %v4652_v8, %s6352_s11  ;;  %v5154_v50 = vsel %vm1304_vm3, %v5111_v21, %v5153_v16  ;;  %v4645_v7 = vsel %vm1304_vm3, %v4600_v26, %v4644_v39  ;;  %v15953_v42 = vrot.slane %v13434_v45, 2  ;;  %v15954_v56 = vrot.slane %v13434_v45, 4 }
 0x47b   :  { %v13771_v32 = vsel %vm1306_vm4, %v5112_v25, %v5154_v50  ;;  %v4315_v62 = vadd.f32 %v4314_v28, %v4214_v29  ;;  %v15955_v18 = vrot.slane %v13517_v52, 6  ;;  %v15956_v19 = vrot.slane %v13589_v27, 2 }
 0x47c   :  { %v5062_v49 = vperm.slane %v15953_v42, 0  ;;  %v5063_v5 = vperm.slane %v15954_v56, 0  ;;  %v15957_v2 = vrot.slane %v13434_v45, 6  ;;  %v4602_v54 = vperm.slane %v13589_v27, 0 }
 0x47d   :  { %v4601_v30 = vperm.slane %v15955_v18, 0  ;;  %v4603_v10 = vperm.slane %v15956_v19, 0  ;;  %v5183_v26 = vrot.slane %v4877_v1, 1  ;;  %v15958_v52 = vrot.slane %v13589_v27, 4 }
 0x47e   :  { %v5064_v53 = vperm.slane %v15957_v2, 0  ;;  %v5117_v21 = vsel %vm1302_vm2, %v5062_v49, %v5061_v15  ;;  %v4416_v0 = vadd.f32 %v4415_v13, %v4315_v62  ;;  %v15959_v48 = vrot.slane %v13589_v27, 6 }
 0x47f   :  { %v4646_v8 = vsel %vm1306_vm4, %v4601_v30, %v4645_v7  ;;  %v5118_v11 = vsel %vm1304_vm3, %v5063_v5, %v5117_v21  ;;  %v4604_v41 = vperm.slane %v15958_v52, 0  ;;  %v4647_v45 = vsel %vm1302_vm2, %v4603_v10, %v4602_v54  ;;  %v5394_v52 = vld [vmem:[%s14197_s3 + $0x60] sm:$0xff] }
 0x480   :  { %4947 = vrot.lane.b32.xlu0 %v4646_v8, %s6352_s11  ;;  %v13793_v44 = vsel %vm1306_vm4, %v5064_v53, %v5118_v11  ;;  %v4445_v43 = vmax.f32 %v4416_v0, 0.0  ;;  %v4605_v25 = vperm.slane %v15959_v48, 0  ;;  %v5113_v16 = vperm.slane %v13544_v14, 0  ;;  %5587 = vmatpush.msrb.mxu3 %v5394_v52  ;;  %v5392_v0 = vld [vmem:[%s14197_s3 + $0x50] sm:$0xff] }
 0x481   :  { %v4648_v39 = vsel %vm1304_vm3, %v4604_v41, %v4647_v45  ;;  %v15960_v28 = vrot.slane %v13544_v14, 2  ;;  %v15961_v50 = vrot.slane %v13544_v14, 4  ;;  %v5185_v29 = vrot.slane %v13701_v38, 1  ;;  %v5393_v41 = vld [vmem:[%s14197_s3 + $0x58] sm:$0xff]  ;;  %v5391_v45 = vld [vmem:[%s14197_s3 + $0x48] sm:$0xff]  ;;  %v5388_v48 = vld [vmem:[%s14197_s3 + $0x30] sm:$0xff] }
 0x482   :  { %5207 = vrot.lane.b32.xlu1 %v5183_v26, %s6352_s11  ;;  %v4649_v1 = vsel %vm1306_vm4, %v4605_v25, %v4648_v39  ;;  %v4555_v7 = vrot.slane %v4445_v43, 2  ;;  %v15962_v15 = vrot.slane %v13544_v14, 6  ;;  %v4556_v5 = vrot.slane %v4445_v43, 4  ;;  %5588 = vmatpush.msrb.mxu3 %v5393_v41  ;;  %v5390_v39 = vld [vmem:[%s14197_s3 + $0x40] sm:$0xff]  ;;  %v5032_v25 = vpop.permute.xlu1 %5031 }
 0x483   :  { %v5114_v37 = vperm.slane %v15960_v28, 0  ;;  %v5115_v24 = vperm.slane %v15961_v50, 0  ;;  %v5182_v18 = vrot.slane %v13554_v22, 1  ;;  %v4610_v38 = vperm.slane %v4445_v43, 0  ;;  %v5385_v28 = vld [vmem:[%s14197_s3 + $0x18] sm:$0xff]  ;;  %v5384_v50 = vld [vmem:[%s14197_s3 + $0x10] sm:$0xff] }
 0x484   :  { %v5116_v42 = vperm.slane %v15962_v15, 0  ;;  %v4611_v62 = vperm.slane %v4555_v7, 0  ;;  %v4612_v30 = vperm.slane %v4556_v5, 0  ;;  %v4557_v19 = vrot.slane %v4445_v43, 6  ;;  %5589 = vmatpush.msrb.mxu3 %v5392_v0 }
 0x485   :  { %v5156_v27 = vsel %vm1302_vm2, %v5114_v37, %v5113_v16  ;;  %v4709_v2 = vperm.slane %v4555_v7, 1  ;;  %v4710_v21 = vperm.slane %v4556_v5, 1  ;;  %v4708_v8 = vperm.slane %v4445_v43, 1  ;;  %v5389_v43 = vld [vmem:[%s14197_s3 + $0x38] sm:$0xff]  ;;  %v5386_v16 = vld [vmem:[%s14197_s3 + $0x20] sm:$0xff] }
 0x486   :  { %v5157_v49 = vsel %vm1304_vm3, %v5115_v24, %v5156_v27  ;;  %v4653_v14 = vsel %vm1302_vm2, %v4611_v62, %v4610_v38  ;;  %v4613_v13 = vperm.slane %v4557_v19, 0  ;;  %v4711_v54 = vperm.slane %v4557_v19, 1  ;;  %5590 = vmatpush.msrb.mxu3 %v5391_v45  ;;  %v5383_v24 = vld [vmem:[%s14197_s3 + $0x8] sm:$0xff]  ;;  %v5478_v0 = vld.sshfl [vmem:[#allocation1 + $0x30] sm:$0xff pattern:$0x75316420] }
 0x487   :  { %v13814_v56 = vsel %vm1306_vm4, %v5116_v42, %v5157_v49  ;;  %v4654_v10 = vsel %vm1304_vm3, %v4612_v30, %v4653_v14  ;;  %v4751_v22 = vsel %vm1302_vm2, %v4709_v2, %v4708_v8  ;;  %v15963_v15 = vrot.slane %v13420_v12, 1  ;;  %v5413_v12 = vld [vmem:[%s14197_s3 + $0xf8] sm:$0xff]  ;;  %v5410_v2 = vld [vmem:[%s14197_s3 + $0xe0] sm:$0xff] }
 0x488   :  { %4949 = vrot.lane.b32.xlu0 %v4649_v1, %s6352_s11  ;;  %v4655_v53 = vsel %vm1306_vm4, %v4613_v13, %v4654_v10  ;;  %v4752_v11 = vsel %vm1304_vm3, %v4710_v21, %v4751_v22  ;;  %5591 = vmatpush.msrb.mxu3 %v5390_v39  ;;  %v5387_v1 = vld [vmem:[%s14197_s3 + $0x28] sm:$0xff]  ;;  %v5326_v27 = vrot.slane %v13178_v6, 4  ;;  %v5412_v6 = vld [vmem:[%s14197_s3 + $0xf0] sm:$0xff]  ;;  %v5409_v22 = vld [vmem:[%s14197_s3 + $0xd8] sm:$0xff]  ;;  %v15964_v41 = vrot.slane %v13277_v61, 1 }
 0x489   :  { %v13825_v26 = vsel %vm1306_vm4, %v4711_v54, %v4752_v11  ;;  %v13903_v11 = vpop.permute.xlu2 %4945  ;;  %v5334_v45 = vrot.slane %v13470_v36, 4  ;;  %v15965_v39 = vrot.slane %v13354_v46, 1 }
 0x48a   :  { %5211 = vrot.lane.b32.xlu1 %v5185_v29, %s6352_s11  ;;  %5592 = vmatpush.msrb.mxu3 %v5389_v43  ;;  %v5198_v37 = vpop.permute.xlu1 %5197  ;;  %v5382_v29 = vld [vmem:[%s14197_s3] sm:$0xff]  ;;  %v13916_v43 = vld.sshfl [vmem:[#allocation1 + $0x38] sm:$0xff pattern:$0x75316420] }
 0x48b   :  { %v5271_v13 = vsel %vm3877_vm10, %v13205_v57, %v5198_v37 }
 0x48c   :  { %5593 = vmatpush.msrb.mxu3 %v5388_v48 }
 0x48e   :  { %5594 = vmatpush.msrb.mxu3 %v5387_v1  ;;  %v5407_v1 = vld [vmem:[%s14197_s3 + $0xc8] sm:$0xff] }
 0x490   :  { %5205 = vrot.lane.b32.xlu0 %v5182_v18, %s6352_s11  ;;  %5595 = vmatpush.msrb.mxu3 %v5386_v16  ;;  %v4888_v18 = vrot.slane %v13230_v34, 7  ;;  %v5411_v34 = vld [vmem:[%s14197_s3 + $0xe8] sm:$0xff]  ;;  %v5338_v16 = vrot.slane %v13586_v58, 4  ;;  %v5405_v58 = vld [vmem:[%s14197_s3 + $0xb8] sm:$0xff] }
 0x492   :  { %5596 = vmatpush.msrb.mxu3 %v5385_v28 }
 0x494   :  { %5597 = vmatpush.msrb.mxu3 %v5384_v50 }
 0x496   :  { %5598 = vmatpush.msrb.mxu3 %v5383_v24 }
 0x498   :  { %5231 = vrot.lane.b32.xlu0 %v4655_v53, %s6352_s11  ;;  %5599 = vmatpush.msrb.mxu3 %v5382_v29 }
 0x49a   :  { %5622 = vmatpush.msra.mxu3 %v5413_v12  ;;  %v15967_v12 = vld [vmem:[#allocation35_spill] sm:$0xff] }
 0x49c   :  { %5623 = vmatpush.msra.mxu3 %v5412_v6  ;;  %v4892_v6 = vrot.slane %v15967_v12, 7 }
 0x49e   :  { %5624 = vmatpush.msra.mxu3 %v5411_v34 }
 0x4a0   :  { %5625 = vmatpush.msra.mxu3 %v5410_v2  ;;  %v4922_v2 = vsel %vm4866_vm12, 0.0, %v4892_v6  ;;  %v5398_v6 = vld [vmem:[%s14197_s3 + $0x80] sm:$0xff] }
 0x4a2   :  { %5626 = vmatpush.msra.mxu3 %v5409_v22 }
 0x4c2   :  { %v5020_v7 = vpop.permute.xlu0 %5019 }
 0x4c3   :  { %v5252_v42 = vsel %vm3877_vm10, %v15963_v15, %v5020_v7  ;;  %v5046_v7 = vpop.permute.xlu2 %5045  ;;  %v15966_v15 = vrot.slane %v13397_v40, 1 }
 0x4c4   :  { %v5325_v49 = vrot.slane %v5252_v42, 4  ;;  %v5188_v5 = vpop.permute.xlu1 %5187 }
 0x4c5   :  { %v5266_v62 = vsel %vm3877_vm10, %v13793_v44, %v5188_v5  ;;  %v4918_v44 = vsel %vm4866_vm12, 0.0, %v4888_v18 }
 0x4c6   :  { %v5354_v38 = vsel %vm5353_vm13, %v13426_v9, %v5325_v49  ;;  %v5355_v30 = vsel %vm5353_vm13, %v5266_v62, %v5326_v27  ;;  %v4985_v57 = vrot.slane %v4918_v44, 1  ;;  %v5404_v27 = vld [vmem:[%s14197_s3 + $0xb0] sm:$0xff]  ;;  %v5403_v62 = vld [vmem:[%s14197_s3 + $0xa8] sm:$0xff] }
 0x4c7   :  { %5458 = vst [vmem:[#allocation1] ss:$2 sm:$0xff] %v5354_v38 }
 0x4c8   :  { %5462 = vst [vmem:[#allocation1 + $0x10] ss:$2 sm:$0xff] %v5355_v30 }
 0x4ca   :  { %v4940_v19 = vpop.permute.xlu0 %4939 }
 0x4cb   :  { %v5245_v9 = vsel %vm3877_vm10, %v4918_v44, %v4940_v19 }
 0x4cc   :  { %v5336_v14 = vrot.slane %v5245_v9, 4  ;;  %v13887_v10 = vpop.permute.xlu1 %5037 }
 0x4ce   :  { %v5473_v53 = vld.sshfl [vmem:[#allocation1] sm:$0xff pattern:$0x75316420]  ;;  %v13894_v21 = vld.sshfl [vmem:[#allocation1 + $0x8] sm:$0xff pattern:$0x75316420]  ;;  %v5365_v8 = vsel %vm5353_vm13, %v5271_v13, %v5336_v14 }
 0x4cf   :  { %5480 = vst [vmem:[#allocation1] ss:$2 sm:$0xff] %v13326_v59  ;;  %v13898_v54 = vld.sshfl [vmem:[#allocation1 + $0x10] sm:$0xff pattern:$0x75316420]  ;;  %5600 = vmatmul.f32.vlgmr.msrb.gmra.mxu3 %v5473_v53  ;;  %v4895_v14 = vrot.slane %v13763_v33, 7  ;;  %v5204_v53 = vpop.permute.xlu2 %5203 }
 0x4d0   :  { %5481 = vst [vmem:[#allocation1 + $0x1] ss:$2 sm:$0xff] %v13370_v3  ;;  %v13906_v52 = vld.sshfl [vmem:[#allocation1 + $0x18] sm:$0xff pattern:$0x75316420]  ;;  %v5408_v59 = vld [vmem:[%s14197_s3 + $0xd0] sm:$0xff]  ;;  %v5258_v3 = vsel %vm3877_vm10, %v4985_v57, %v5032_v25 }
 0x4d1   :  { %5482 = vst [vmem:[#allocation1 + $0x10] ss:$2 sm:$0xff] %v15964_v41  ;;  %5627 = vmatpush.msra.mxu3 %v5408_v59  ;;  %v5406_v25 = vld [vmem:[%s14197_s3 + $0xc0] sm:$0xff]  ;;  %v5337_v37 = vrot.slane %v5258_v3, 4  ;;  %v13970_v41 = vsel %vm4866_vm12, 0.0, %v4895_v14  ;;  %v15970_v33 = vld [vmem:[#allocation67_spill] sm:$0xff] }
 0x4d2   :  { %5483 = vst [vmem:[#allocation1 + $0x11] ss:$2 sm:$0xff] %v15965_v39  ;;  %v5196_v48 = vpop.permute.xlu0 %5195  ;;  %v5274_v39 = vsel %vm3877_vm10, %v15970_v33, %v5204_v53 }
 0x4d3   :  { %5487 = vst [vmem:[#allocation1 + $0x31] ss:$2 sm:$0xff] %v5365_v8  ;;  %v5270_v61 = vsel %vm3877_vm10, %v13148_v17, %v5196_v48  ;;  %v4891_v17 = vrot.slane %v13417_v55, 7  ;;  %5628 = vmatpush.msra.mxu3 %v5407_v1  ;;  %v5366_v55 = vsel %vm5353_vm13, %v5245_v9, %v5337_v37  ;;  %v15969_v9 = vld [vmem:[#allocation31_spill] sm:$0xff]  ;;  %v4893_v48 = vrot.slane %v13691_v47, 7  ;;  %v5401_v47 = vld [vmem:[%s14197_s3 + $0x98] sm:$0xff] }
 0x4d4   :  { %v5363_v36 = vsel %vm5353_vm13, %v5270_v61, %v5334_v45  ;;  %v5200_v46 = vpop.permute.xlu1 %5199 }
 0x4d5   :  { %5486 = vst [vmem:[#allocation1 + $0x30] ss:$2 sm:$0xff] %v5363_v36  ;;  %v5272_v28 = vsel %vm3877_vm10, %v13274_v35, %v5200_v46  ;;  %v4986_v35 = vrot.slane %v13598_v4, 1  ;;  %5629 = vmatpush.msra.mxu3 %v5406_v25  ;;  %v4921_v49 = vsel %vm4866_vm12, 0.0, %v4891_v17  ;;  %v5237_v4 = vrot.slane %v13526_v31, 1  ;;  %v15968_v31 = vld [vmem:[#allocation33_spill] sm:$0xff] }
 0x4d6   :  { %v5367_v50 = vsel %vm5353_vm13, %v5272_v28, %v5338_v16  ;;  %v4987_v44 = vrot.slane %v4921_v49, 1  ;;  %v4991_v36 = vrot.slane %v13970_v41, 1  ;;  %v5402_v46 = vld [vmem:[%s14197_s3 + $0xa0] sm:$0xff]  ;;  %v13996_v17 = vsel %vm4866_vm12, 0.0, %v4893_v48  ;;  %v5425_v48 = vld [vmem:[%s14197_s3 + $0x158] sm:$0xff] }
 0x4d7   :  { %v13936_v24 = vld.sshfl [vmem:[#allocation1] sm:$0xff pattern:$0x75316420]  ;;  %v13938_v29 = vld.sshfl [vmem:[#allocation1 + $0x8] sm:$0xff pattern:$0x75316420]  ;;  %5603 = vmatmul.f32.gmra.mxu3 %v5478_v0 }
 0x4d8   :  { %5495 = vst [vmem:[#allocation1] ss:$2 sm:$0xff] %v15966_v15  ;;  %5630 = vmatpush.msra.mxu3 %v5405_v58  ;;  %v5265_v25 = vsel %vm3877_vm10, %v4991_v36, %v5046_v7  ;;  %v4989_v7 = vrot.slane %v13996_v17, 1 }
 0x4d9   :  { %5496 = vst [vmem:[#allocation1 + $0x1] ss:$2 sm:$0xff] %v4985_v57  ;;  %v5490_v42 = vld.sshfl [vmem:[#allocation1 + $0x10] sm:$0xff pattern:$0x75316420] }
 0x4da   :  { %5497 = vst [vmem:[#allocation1 + $0x10] ss:$2 sm:$0xff] %v5366_v55  ;;  %5835 = vmatmul.msk.f32.gmra.mxu2 %vm3877_vm10, %v5490_v42  ;;  %v5036_v5 = vpop.permute.xlu0 %5035  ;;  %5631 = vmatpush.msra.mxu3 %v5404_v27  ;;  %v14002_v42 = vsel %vm3877_vm10, %v4922_v2, %v13903_v11 }
 0x4db   :  { %5498 = vst [vmem:[#allocation1 + $0x11] ss:$2 sm:$0xff] %v13505_v60  ;;  %v5260_v40 = vsel %vm3877_vm10, %v4986_v35, %v5036_v5  ;;  %v5261_v60 = vsel %vm3877_vm10, %v4987_v44, %v13887_v10  ;;  %v4988_v10 = vrot.slane %v4922_v2, 1 }
 0x4dc   :  { %v13955_v18 = vld.sshfl [vmem:[#allocation1 + $0x30] sm:$0xff pattern:$0x75316420]  ;;  %v13957_v38 = vld.sshfl [vmem:[#allocation1 + $0x38] sm:$0xff pattern:$0x75316420]  ;;  %v5042_v30 = vpop.permute.xlu1 %5041  ;;  %5632 = vmatpush.msra.mxu3 %v5403_v62 }
 0x4dd   :  { %5501 = vst [vmem:[#allocation1 + $0x30] ss:$2 sm:$0xff] %v5237_v4  ;;  %v5341_v19 = vrot.slane %v5260_v40, 4  ;;  %v5343_v8 = vrot.slane %v5261_v60, 4  ;;  %v5400_v62 = vld [vmem:[%s14197_s3 + $0x90] sm:$0xff]  ;;  %v5263_v11 = vsel %vm3877_vm10, %v4989_v7, %v5042_v30  ;;  %v5429_v60 = vld [vmem:[%s14197_s3 + $0x178] sm:$0xff] }
 0x4de   :  { %5502 = vst [vmem:[#allocation1 + $0x31] ss:$2 sm:$0xff] %v4986_v35  ;;  %5633 = vmatpush.msra.mxu3 %v5402_v46  ;;  %v5351_v35 = vrot.slane %v5265_v25, 4 }
 0x4df   :  { %5499 = vst [vmem:[#allocation1 + $0x20] ss:$2 sm:$0xff] %v5367_v50  ;;  %v5370_v34 = vsel %vm5353_vm13, %v15968_v31, %v5341_v19  ;;  %5606 = vmatmul.f32.gmra.mxu3 %v15969_v9 }
 0x4e0   :  { %v5503_v13 = vld.sshfl [vmem:[#allocation1] sm:$0xff pattern:$0x75316420]  ;;  %5634 = vmatpush.msra.mxu3 %v5401_v47 }
 0x4e1   :  { %5509 = vst [vmem:[#allocation1] ss:$2 sm:$0xff] %v5370_v34 }
 0x4e2   :  { %5836 = vmatmul.msk.f32.gmra.mxu2 %vm3877_vm10, %v5503_v13  ;;  %v4944_v22 = vpop.permute.xlu0 %4943  ;;  %v5504_v3 = vld.sshfl [vmem:[#allocation1 + $0x10] sm:$0xff pattern:$0x75316420]  ;;  %v13990_v28 = vld.sshfl [vmem:[#allocation1 + $0x18] sm:$0xff pattern:$0x75316420]  ;;  %5635 = vmatpush.msra.mxu3 %v5400_v62 }
 0x4e3   :  { %v5247_v57 = vsel %vm3877_vm10, %v4921_v49, %v4944_v22  ;;  %v4894_v49 = vrot.slane %v13724_v23, 7  ;;  %v5399_v23 = vld [vmem:[%s14197_s3 + $0x88] sm:$0xff]  ;;  %v5428_v13 = vld [vmem:[%s14197_s3 + $0x170] sm:$0xff] }
 0x4e4   :  { %v5342_v0 = vrot.slane %v5247_v57, 4  ;;  %v5372_v59 = vsel %vm5353_vm13, %v5247_v57, %v5343_v8  ;;  %v13973_v45 = vpop.permute.xlu1 %5043  ;;  %5636 = vmatpush.msra.mxu3 %v5399_v23  ;;  %v5427_v57 = vld [vmem:[%s14197_s3 + $0x168] sm:$0xff] }
 0x4e5   :  { %5510 = vst [vmem:[#allocation1 + $0x1] ss:$2 sm:$0xff] %v5372_v59  ;;  %v5508_v37 = vld.sshfl [vmem:[#allocation1 + $0x30] sm:$0xff pattern:$0x75316420]  ;;  %v14024_v19 = vsel %vm4866_vm12, 0.0, %v4894_v49 }
 0x4e6   :  { %v13978_v61 = vld.sshfl [vmem:[#allocation1 + $0x20] sm:$0xff pattern:$0x75316420]  ;;  %v13980_v1 = vld.sshfl [vmem:[#allocation1 + $0x28] sm:$0xff pattern:$0x75316420]  ;;  %v5371_v16 = vsel %vm5353_vm13, %v5274_v39, %v5342_v0  ;;  %5637 = vmatpush.msra.mxu3 %v5398_v6  ;;  %v5210_v0 = vpop.permute.xlu2 %5209 }
 0x4e7   :  { %5513 = vst [vmem:[#allocation1 + $0x20] ss:$2 sm:$0xff] %v4987_v44  ;;  %5609 = vmatmul.f32.gmra.mxu3 %v5504_v3  ;;  %v5347_v44 = vrot.slane %v5263_v11, 4  ;;  %v4990_v2 = vrot.slane %v14024_v19, 1  ;;  %v5277_v25 = vsel %vm3877_vm10, %v13695_v20, %v5210_v0  ;;  %v5423_v20 = vld [vmem:[%s14197_s3 + $0x148] sm:$0xff]  ;;  %v5437_v0 = vld [vmem:[%s14197_s3 + $0x1b8] sm:$0xff] }
 0x4e8   :  { %5514 = vst [vmem:[#allocation1 + $0x21] ss:$2 sm:$0xff] %v4988_v10  ;;  %5660 = vmatpush.msrb.mxu3 %v5429_v60 }
 0x4e9   :  { %5511 = vst [vmem:[#allocation1 + $0x10] ss:$2 sm:$0xff] %v5371_v16 }
 0x4ea   :  { %5837 = vmatmul.msk.f32.gmra.mxu2 %vm3877_vm10, %v5508_v37  ;;  %v5040_v50 = vpop.permute.xlu0 %5039  ;;  %5661 = vmatpush.msrb.mxu3 %v5428_v13  ;;  %v5445_v13 = vld [vmem:[%s14197_s3 + $0x1f8] sm:$0xff] }
 0x4eb   :  { %v5262_v58 = vsel %vm3877_vm10, %v4988_v10, %v5040_v50  ;;  %v5264_v10 = vsel %vm3877_vm10, %v4990_v2, %v13973_v45 }
 0x4ec   :  { %v5345_v15 = vrot.slane %v5262_v58, 4  ;;  %v4952_v55 = vpop.permute.xlu1 %4951  ;;  %v5517_v40 = vld.sshfl [vmem:[#allocation1] sm:$0xff pattern:$0x75316420]  ;;  %5662 = vmatpush.msrb.mxu3 %v5427_v57  ;;  %v5349_v59 = vrot.slane %v5264_v10, 4  ;;  %v5440_v57 = vld [vmem:[%s14197_s3 + $0x1d0] sm:$0xff] }
 0x4ed   :  { %v5251_v27 = vsel %vm3877_vm10, %v13970_v41, %v4952_v55  ;;  %v14039_v8 = vld.sshfl [vmem:[#allocation1 + $0x8] sm:$0xff pattern:$0x75316420]  ;;  %v5420_v41 = vld [vmem:[%s14197_s3 + $0x130] sm:$0xff] }
 0x4ee   :  { %v5374_v5 = vsel %vm5353_vm13, %v14002_v42, %v5345_v15  ;;  %v5380_v4 = vsel %vm5353_vm13, %v5251_v27, %v5351_v35  ;;  %v5350_v3 = vrot.slane %v5251_v27, 4  ;;  %v4896_v35 = vrot.slane %v13825_v26, 7  ;;  %v5424_v15 = vld [vmem:[%s14197_s3 + $0x150] sm:$0xff] }
 0x4ef   :  { %5515 = vst [vmem:[#allocation1 + $0x30] ss:$2 sm:$0xff] %v5374_v5  ;;  %5612 = vmatmul.f32.gmra.mxu3 %v5517_v40  ;;  %v5521_v12 = vld.sshfl [vmem:[#allocation1 + $0x20] sm:$0xff pattern:$0x75316420] }
 0x4f0   :  { %5529 = vst [vmem:[#allocation1 + $0x21] ss:$2 sm:$0xff] %v5380_v4  ;;  %v4926_v27 = vsel %vm4866_vm12, 0.0, %v4896_v35  ;;  %v5422_v40 = vld [vmem:[%s14197_s3 + $0x140] sm:$0xff] }
 0x4f1   :  { %v5238_v4 = vrot.slane %v4926_v27, 1 }
 0x4f2   :  { %5838 = vmatmul.msk.f32.gmra.mxu2 %vm3877_vm10, %v5521_v12  ;;  %v4948_v30 = vpop.permute.xlu0 %4947  ;;  %v5214_v12 = vpop.permute.xlu2 %5213 }
 0x4f3   :  { %v5249_v31 = vsel %vm3877_vm10, %v13996_v17, %v4948_v30  ;;  %v5279_v60 = vsel %vm3877_vm10, %v13814_v56, %v5214_v12  ;;  %v5417_v56 = vld [vmem:[%s14197_s3 + $0x118] sm:$0xff] }
 0x4f4   :  { %v5346_v34 = vrot.slane %v5249_v31, 4  ;;  %v5376_v9 = vsel %vm5353_vm13, %v5249_v31, %v5347_v44  ;;  %v5208_v14 = vpop.permute.xlu1 %5207 }
 0x4f5   :  { %5516 = vst [vmem:[#allocation1 + $0x31] ss:$2 sm:$0xff] %v5376_v9  ;;  %v5276_v53 = vsel %vm3877_vm10, %v13709_v63, %v5208_v14  ;;  %v5426_v63 = vld [vmem:[%s14197_s3 + $0x160] sm:$0xff] }
 0x4f6   :  { %v5375_v22 = vsel %vm5353_vm13, %v5276_v53, %v5346_v34  ;;  %5663 = vmatpush.msrb.mxu3 %v5426_v63  ;;  %v15971_v34 = vld [vmem:[#allocation75_spill] sm:$0xff]  ;;  %v5414_v14 = vld [vmem:[%s14197_s3 + $0x100] sm:$0xff] }
 0x4f7   :  { %5524 = vst [vmem:[#allocation1] ss:$2 sm:$0xff] %v5375_v22  ;;  %v5443_v53 = vld [vmem:[%s14197_s3 + $0x1e8] sm:$0xff]  ;;  %v5441_v22 = vld [vmem:[%s14197_s3 + $0x1d8] sm:$0xff]  ;;  %v5438_v63 = vld [vmem:[%s14197_s3 + $0x1c0] sm:$0xff] }
 0x4f8   :  { %5664 = vmatpush.msrb.mxu3 %v5425_v48 }
 0x4fa   :  { %v4950_v33 = vpop.permute.xlu0 %4949  ;;  %5665 = vmatpush.msrb.mxu3 %v5424_v15 }
 0x4fb   :  { %v5250_v39 = vsel %vm3877_vm10, %v14024_v19, %v4950_v33  ;;  %v5416_v19 = vld [vmem:[%s14197_s3 + $0x110] sm:$0xff]  ;;  %v5435_v33 = vld [vmem:[%s14197_s3 + $0x1a8] sm:$0xff] }
 0x4fc   :  { %v5348_v45 = vrot.slane %v5250_v39, 4  ;;  %v5378_v16 = vsel %vm5353_vm13, %v5250_v39, %v5349_v59  ;;  %v5212_v46 = vpop.permute.xlu1 %5211  ;;  %v5522_v47 = vld.sshfl [vmem:[#allocation1 + $0x30] sm:$0xff pattern:$0x75316420]  ;;  %5666 = vmatpush.msrb.mxu3 %v5423_v20  ;;  %v5434_v39 = vld [vmem:[%s14197_s3 + $0x1a0] sm:$0xff] }
 0x4fd   :  { %5528 = vst [vmem:[#allocation1 + $0x20] ss:$2 sm:$0xff] %v5378_v16  ;;  %v5278_v37 = vsel %vm3877_vm10, %v13771_v32, %v5212_v46  ;;  %5615 = vmatmul.f32.gmra.mxu3 %v5522_v47  ;;  %v5344_v32 = vrot.slane %v14002_v42, 4  ;;  %v5421_v42 = vld [vmem:[%s14197_s3 + $0x138] sm:$0xff]  ;;  %v5436_v59 = vld [vmem:[%s14197_s3 + $0x1b0] sm:$0xff] }
 0x4fe   :  { %v5377_v50 = vsel %vm5353_vm13, %v5277_v25, %v5348_v45  ;;  %v5379_v58 = vsel %vm5353_vm13, %v5278_v37, %v5350_v3  ;;  %5667 = vmatpush.msrb.mxu3 %v5422_v40  ;;  %v5523_v17 = vld.sshfl [vmem:[#allocation1 + $0x38] sm:$0xff pattern:$0x75316420]  ;;  %v5432_v3 = vld [vmem:[%s14197_s3 + $0x190] sm:$0xff]  ;;  %v5430_v45 = vld [vmem:[%s14197_s3 + $0x180] sm:$0xff] }
 0x4ff   :  { %5525 = vst [vmem:[#allocation1 + $0x1] ss:$2 sm:$0xff] %v5377_v50 }
 0x500   :  { %5668 = vmatpush.msrb.mxu3 %v5421_v42  ;;  %5530 = vst [vmem:[#allocation1 + $0x30] ss:$2 sm:$0xff] %v5379_v58 }
 0x502   :  { %v5206_v55 = vpop.permute.xlu0 %5205  ;;  %5669 = vmatpush.msrb.mxu3 %v5420_v41 }
 0x503   :  { %v5275_v26 = vsel %vm3877_vm10, %v13727_v51, %v5206_v55 }
 0x504   :  { %v5373_v49 = vsel %vm5353_vm13, %v5275_v26, %v5344_v32  ;;  %v5535_v5 = vld.sshfl [vmem:[#allocation1 + $0x20] sm:$0xff pattern:$0x75316420]  ;;  %v5536_v10 = vld.sshfl [vmem:[#allocation1 + $0x28] sm:$0xff pattern:$0x75316420] }
 0x505   :  { %5512 = vst [vmem:[#allocation1 + $0x11] ss:$2 sm:$0xff] %v5373_v49  ;;  %5618 = vmatmul.f32.gmra.mxu3 %v5535_v5 }
 0x506   :  { %v14082_v62 = vld.sshfl [vmem:[#allocation1] sm:$0xff pattern:$0x75316420]  ;;  %v14084_v11 = vld.sshfl [vmem:[#allocation1 + $0x8] sm:$0xff pattern:$0x75316420] }
 0x507   :  { %5539 = vst [vmem:[#allocation1] ss:$2 sm:$0xff] %v4991_v36  ;;  %v5419_v36 = vld [vmem:[%s14197_s3 + $0x128] sm:$0xff] }
 0x508   :  { %5540 = vst [vmem:[#allocation1 + $0x1] ss:$2 sm:$0xff] %v5238_v4  ;;  %5670 = vmatpush.msrb.mxu3 %v5419_v36 }
 0x50a   :  { %v5232_v51 = vpop.permute.xlu0 %5231 }
 0x50b   :  { %v5281_v23 = vsel %vm3877_vm10, %v4926_v27, %v5232_v51 }
 0x50c   :  { %v14089_v6 = vld.sshfl [vmem:[#allocation1 + $0x10] sm:$0xff pattern:$0x75316420]  ;;  %v14091_v44 = vld.sshfl [vmem:[#allocation1 + $0x18] sm:$0xff pattern:$0x75316420] }
 0x50d   :  { %5526 = vst [vmem:[#allocation1 + $0x10] ss:$2 sm:$0xff] %v4989_v7  ;;  %v5352_v30 = vrot.slane %v5281_v23, 4  ;;  %5638 = vmatmul.f32.vlgmr.msra.gmra.mxu3 %v13894_v21  ;;  %v5418_v21 = vld [vmem:[%s14197_s3 + $0x120] sm:$0xff]  ;;  %v5753_v23 = vpop.f32.mrf.mxu2 }
 0x50e   :  { %5527 = vst [vmem:[#allocation1 + $0x11] ss:$2 sm:$0xff] %v4990_v2  ;;  %5671 = vmatpush.msrb.mxu3 %v5418_v21  ;;  %v5444_v2 = vld [vmem:[%s14197_s3 + $0x1f0] sm:$0xff] }
 0x50f   :  { %v5381_v7 = vsel %vm5353_vm13, %v5279_v60, %v5352_v30  ;;  %v5541_v9 = vld.sshfl [vmem:[#allocation1] sm:$0xff pattern:$0x75316420] }
 0x510   :  { %5531 = vst [vmem:[#allocation1 + $0x31] ss:$2 sm:$0xff] %v5381_v7  ;;  %5672 = vmatpush.msrb.mxu3 %v5417_v56 }
 0x512   :  { %5673 = vmatpush.msrb.mxu3 %v5416_v19 }
 0x515   :  { %5641 = vmatmul.f32.gmra.mxu3 %v13916_v43  ;;  %v5534_v31 = vld.sshfl [vmem:[#allocation1 + $0x10] sm:$0xff pattern:$0x75316420]  ;;  %v5415_v43 = vld [vmem:[%s14197_s3 + $0x108] sm:$0xff] }
 0x516   :  { %5839 = vmatmul.msk.f32.gmra.mxu2 %vm3877_vm10, %v5534_v31  ;;  %5674 = vmatpush.msrb.mxu3 %v5415_v43 }
 0x517   :  { %v5537_v47 = vld.sshfl [vmem:[#allocation1 + $0x30] sm:$0xff pattern:$0x75316420]  ;;  %v5538_v20 = vld.sshfl [vmem:[#allocation1 + $0x38] sm:$0xff pattern:$0x75316420] }
 0x518   :  { %5675 = vmatpush.msrb.mxu3 %v5414_v14 }
 0x51a   :  { %5698 = vmatpush.msra.mxu3 %v5445_v13 }
 0x51c   :  { %5699 = vmatpush.msra.mxu3 %v5444_v2 }
 0x51d   :  { %5644 = vmatmul.f32.gmra.mxu3 %v15971_v34 }
 0x51e   :  { %5840 = vmatmul.msk.f32.gmra.mxu2 %vm3877_vm10, %v5541_v9  ;;  %5700 = vmatpush.msra.mxu3 %v5443_v53 }
 0x525   :  { %5647 = vmatmul.f32.gmra.mxu3 %v13990_v28  ;;  %v5442_v28 = vld [vmem:[%s14197_s3 + $0x1e0] sm:$0xff] }
 0x526   :  { %5701 = vmatpush.msra.mxu3 %v5442_v28 }
 0x528   :  { %5702 = vmatpush.msra.mxu3 %v5441_v22 }
 0x52a   :  { %5703 = vmatpush.msra.mxu3 %v5440_v57 }
 0x52d   :  { %5650 = vmatmul.f32.gmra.mxu3 %v14039_v8  ;;  %v5439_v8 = vld [vmem:[%s14197_s3 + $0x1c8] sm:$0xff] }
 0x52e   :  { %5704 = vmatpush.msra.mxu3 %v5439_v8 }
 0x530   :  { %5705 = vmatpush.msra.mxu3 %v5438_v63 }
 0x532   :  { %5706 = vmatpush.msra.mxu3 %v5437_v0 }
 0x534   :  { %5707 = vmatpush.msra.mxu3 %v5436_v59 }
 0x535   :  { %5653 = vmatmul.f32.gmra.mxu3 %v5523_v17 }
 0x536   :  { %5708 = vmatpush.msra.mxu3 %v5435_v33 }
 0x538   :  { %5709 = vmatpush.msra.mxu3 %v5434_v39 }
 0x53d   :  { %5656 = vmatmul.f32.gmra.mxu3 %v5536_v10 }
 0x545   :  { %5676 = vmatmul.f32.vlgmr.msrb.gmra.mxu3 %v13898_v54  ;;  %v5433_v54 = vld [vmem:[%s14197_s3 + $0x198] sm:$0xff] }
 0x546   :  { %5710 = vmatpush.msra.mxu3 %v5433_v54 }
 0x548   :  { %5711 = vmatpush.msra.mxu3 %v5432_v3 }
 0x54d   :  { %5679 = vmatmul.f32.gmra.mxu3 %v13936_v24  ;;  %v5431_v24 = vld [vmem:[%s14197_s3 + $0x188] sm:$0xff] }
 0x54e   :  { %5712 = vmatpush.msra.mxu3 %v5431_v24 }
 0x550   :  { %5713 = vmatpush.msra.mxu3 %v5430_v45 }
 0x552   :  { %v5601_v48 = vpop.f32.mrf.mxu3 }
 0x555   :  { %5682 = vmatmul.f32.gmra.mxu3 %v13955_v18 }
 0x55a   :  { %v5604_v16 = vpop.f32.mrf.mxu3 }
 0x55d   :  { %5685 = vmatmul.f32.gmra.mxu3 %v13978_v61  ;;  %v5756_v60 = vpop.f32.mrf.mxu2 }
 0x562   :  { %v5607_v46 = vpop.f32.mrf.mxu3 }
 0x565   :  { %5688 = vmatmul.f32.gmra.mxu3 %v14089_v6  ;;  %v5759_v14 = vpop.f32.mrf.mxu2 }
 0x56a   :  { %v5610_v18 = vpop.f32.mrf.mxu3 }
 0x56d   :  { %5691 = vmatmul.f32.gmra.mxu3 %v14082_v62  ;;  %v5762_v0 = vpop.f32.mrf.mxu2 }
 0x572   :  { %v5613_v25 = vpop.f32.mrf.mxu3 }
 0x575   :  { %5694 = vmatmul.f32.gmra.mxu3 %v5537_v47  ;;  %v5765_v24 = vpop.f32.mrf.mxu2 }
 0x57d   :  { %5714 = vmatmul.f32.vlgmr.msra.gmra.mxu3 %v13906_v52  ;;  %v6237_v52 = vld [vmem:[%s14198_s4] ss:$0 sm:$0xff]  ;;  %s6353_s4 = smov [#allocation3]  }
 0x57e   :  { %v5602_v6 = vadd.f32 %v6237_v52, %v5601_v48  ;;  %v5605_v17 = vadd.f32 %v6237_v52, %v5604_v16  ;;  %v5608_v9 = vadd.f32 %v6237_v52, %v5607_v46  ;;  %v5611_v57 = vadd.f32 %v6237_v52, %v5610_v18  ;;  %s5792_s7 = sshll.u32 %s6353_s4, 4  ;;  %s5793_s7 = int_to_ptr.vmem [resolvable:$true] %s5792_s7 }
 0x580   :  { %v5616_v37 = vpop.f32.mrf.mxu3 }
 0x585   :  { %5717 = vmatmul.f32.gmra.mxu3 %v13938_v29  ;;  %v5614_v29 = vadd.f32 %v6237_v52, %v5613_v25 }
 0x588   :  { %v5619_v50 = vpop.f32.mrf.mxu3 }
 0x58d   :  { %5720 = vmatmul.f32.gmra.mxu3 %v13957_v38  ;;  %v5617_v38 = vadd.f32 %v6237_v52, %v5616_v37 }
 0x590   :  { %v5639_v58 = vpop.f32.mrf.mxu3 }
 0x595   :  { %5723 = vmatmul.f32.gmra.mxu3 %v13980_v1  ;;  %v5620_v1 = vadd.f32 %v6237_v52, %v5619_v50 }
 0x598   :  { %v5642_v61 = vpop.f32.mrf.mxu3 }
 0x599   :  { %v5643_v21 = vadd.f32 %v5642_v61, %v5605_v17  ;;  %v5768_v18 = vpop.f32.mrf.mxu2 }
 0x59d   :  { %5726 = vmatmul.f32.gmra.mxu3 %v14091_v44  ;;  %v5640_v44 = vadd.f32 %v5639_v58, %v5602_v6 }
 0x5a0   :  { %v5645_v35 = vpop.f32.mrf.mxu3 }
 0x5a1   :  { %v5646_v13 = vadd.f32 %v5645_v35, %v5608_v9  ;;  %v5771_v52 = vpop.f32.mrf.mxu2 }
 0x5a5   :  { %5729 = vmatmul.f32.gmra.mxu3 %v14084_v11 }
 0x5a8   :  { %v5648_v15 = vpop.f32.mrf.mxu3 }
 0x5a9   :  { %v5649_v10 = vadd.f32 %v5648_v15, %v5611_v57 }
 0x5ad   :  { %5732 = vmatmul.f32.gmra.mxu3 %v5538_v20 }
 0x5b0   :  { %v5651_v32 = vpop.f32.mrf.mxu3 }
 0x5b1   :  { %v5652_v55 = vadd.f32 %v5651_v32, %v5614_v29 }
 0x5b8   :  { %v5654_v27 = vpop.f32.mrf.mxu3 }
 0x5b9   :  { %v5655_v26 = vadd.f32 %v5654_v27, %v5617_v38 }
 0x5c0   :  { %v5657_v49 = vpop.f32.mrf.mxu3 }
 0x5c1   :  { %v5658_v5 = vadd.f32 %v5657_v49, %v5620_v1 }
 0x5c8   :  { %v5677_v4 = vpop.f32.mrf.mxu3 }
 0x5c9   :  { %v5678_v30 = vadd.f32 %v5677_v4, %v5640_v44 }
 0x5d0   :  { %v5680_v40 = vpop.f32.mrf.mxu3 }
 0x5d1   :  { %v5681_v56 = vadd.f32 %v5680_v40, %v5643_v21 }
 0x5d8   :  { %v5683_v42 = vpop.f32.mrf.mxu3 }
 0x5d9   :  { %v5684_v53 = vadd.f32 %v5683_v42, %v5646_v13 }
 0x5e0   :  { %v5686_v62 = vpop.f32.mrf.mxu3 }
 0x5e1   :  { %v5687_v59 = vadd.f32 %v5686_v62, %v5649_v10 }
 0x5e8   :  { %v5689_v11 = vpop.f32.mrf.mxu3 }
 0x5e9   :  { %v5690_v3 = vadd.f32 %v5689_v11, %v5652_v55 }
 0x5f0   :  { %v5692_v51 = vpop.f32.mrf.mxu3 }
 0x5f1   :  { %v5693_v25 = vadd.f32 %v5692_v51, %v5655_v26 }
 0x5f8   :  { %v5695_v12 = vpop.f32.mrf.mxu3 }
 0x5f9   :  { %v5696_v35 = vadd.f32 %v5695_v12, %v5658_v5 }
 0x600   :  { %v5715_v41 = vpop.f32.mrf.mxu3 }
 0x601   :  { %v5716_v36 = vadd.f32 %v5715_v41, %v5678_v30 }
 0x603   :  { %v5754_v7 = vadd.f32 %v5753_v23, %v5716_v36 }
 0x605   :  { %v5774_v31 = vmax.f32 %v5754_v7, 0.0 }
 0x607   :  { %5781 = vst [vmem:[#allocation3] sm:$0xff] %v5774_v31 }
 0x608   :  { %v5718_v19 = vpop.f32.mrf.mxu3 }
 0x609   :  { %v5719_v34 = vadd.f32 %v5718_v19, %v5681_v56 }
 0x60b   :  { %v5757_v43 = vadd.f32 %v5756_v60, %v5719_v34 }
 0x60d   :  { %v5775_v2 = vmax.f32 %v5757_v43, 0.0 }
 0x60f   :  { %5782 = vst [vmem:[#allocation3 + $0x8] sm:$0xff] %v5775_v2 }
 0x610   :  { %v5721_v28 = vpop.f32.mrf.mxu3 }
 0x611   :  { %v5722_v22 = vadd.f32 %v5721_v28, %v5684_v53 }
 0x613   :  { %v5760_v8 = vadd.f32 %v5759_v14, %v5722_v22 }
 0x615   :  { %v5776_v63 = vmax.f32 %v5760_v8, 0.0 }
 0x617   :  { %5783 = vst [vmem:[#allocation3 + $0x10] sm:$0xff] %v5776_v63 }
 0x618   :  { %v5724_v33 = vpop.f32.mrf.mxu3 }
 0x619   :  { %v5725_v39 = vadd.f32 %v5724_v33, %v5687_v59 }
 0x61b   :  { %v5763_v54 = vadd.f32 %v5762_v0, %v5725_v39 }
 0x61d   :  { %v5777_v48 = vmax.f32 %v5763_v54, 0.0 }
 0x61f   :  { %5784 = vst [vmem:[#allocation3 + $0x18] sm:$0xff] %v5777_v48 }
 0x620   :  { %v5727_v45 = vpop.f32.mrf.mxu3 }
 0x621   :  { %v5728_v16 = vadd.f32 %v5727_v45, %v5690_v3 }
 0x623   :  { %v5766_v46 = vadd.f32 %v5765_v24, %v5728_v16 }
 0x625   :  { %v5778_v47 = vmax.f32 %v5766_v46, 0.0 }
 0x627   :  { %5785 = vst [vmem:[#allocation3 + $0x20] sm:$0xff] %v5778_v47 }
 0x628   :  { %v5730_v37 = vpop.f32.mrf.mxu3 }
 0x629   :  { %v5731_v50 = vadd.f32 %v5730_v37, %v5693_v25 }
 0x62b   :  { %v5769_v58 = vadd.f32 %v5768_v18, %v5731_v50 }
 0x62d   :  { %v5779_v61 = vmax.f32 %v5769_v58, 0.0 }
 0x62f   :  { %5786 = vst [vmem:[#allocation3 + $0x28] sm:$0xff] %v5779_v61 }
 0x630   :  { %v5733_v15 = vpop.f32.mrf.mxu3 }
 0x631   :  { %v5734_v20 = vadd.f32 %v5733_v15, %v5696_v35 }
 0x633   :  { %v5772_v29 = vadd.f32 %v5771_v52, %v5734_v20 }
 0x635   :  { %v5780_v32 = vmax.f32 %v5772_v29, 0.0 }
 0x637   :  { %5787 = vst [vmem:[#allocation3 + $0x30] sm:$0xff] %v5780_v32 }
 0x638   :  { %5800 = dma.vmem_to_hbm [thread:$0]  %s5793_s7, 896, %s5795_s12, [#allocation4], %s6354_s13, %s6354_s13, %s6355_s14  }
 0x639   :  { %6347 = dma.done.wait [#allocation4], 896  }
 0x63a   :  { %6348 = vsyncadd [#allocation4], 4294966400 }
 0x63b   :  { %5805 = vsyncpa [#allocation4], 1 }

</bundles_post_ra>
